<compile_context>
chip_gen: v6e
topology: v6e:2x2x1
jax: 0.10.0
libtpu: 0.0.40
codegen_flags: <defaults>
</compile_context>

<pallas_src>
import functools

import jax
import jax.numpy as jnp
import numpy as np
from jax.experimental import pallas as pl
from jax.experimental.pallas import tpu as pltpu


# ----------------------------------------------------------------------------
# Single fused kernel: Embedding FF -> residual blocks -> Decoding FF
# ----------------------------------------------------------------------------
def _encoder_kernel(*refs, n_emb, n_dec, rates, use_lns, ksize, seg_len, eps):
    """refs = [x, (w,b)*n_emb, win,bin,gamma,beta,wa,ba,wout,bout, (w,b)*n_dec, out]."""
    x_ref = refs[0]
    o_ref = refs[-1]
    idx = 1
    emb = [(refs[idx + 2 * i], refs[idx + 2 * i + 1]) for i in range(n_emb)]
    idx += 2 * n_emb
    (win_ref, bin_ref, g_ref, bt_ref,
     wa_ref, ba_ref, wout_ref, bout_ref) = refs[idx:idx + 8]
    idx += 8
    dec = [(refs[idx + 2 * i], refs[idx + 2 * i + 1]) for i in range(n_dec)]

    f32, bf16 = jnp.float32, jnp.bfloat16

    def mm(a, w):
        # bf16 x bf16 operands, f32 accumulation: single-pass MXU.
        return jnp.dot(a.astype(bf16), w, preferred_element_type=f32)

    # ---- Embedding FeedForward (pointwise over rows) ----
    h = x_ref[0].astype(f32)                               # (R, d_in)
    for li, (w_ref, b_ref) in enumerate(emb):
        h = mm(h, w_ref[...]) + b_ref[...]
        if li < n_emb - 1:
            h = jnp.maximum(h, 0.0)
    R = h.shape[0]                                         # static rows

    # Hoisted loop-invariant: position of each row inside its length-`seg_len`
    # batch segment (R == seg_len when the batch is NOT folded into rows).
    pos = jax.lax.broadcasted_iota(jnp.int32, (R, 1), 0)
    if R != seg_len:
        if (seg_len & (seg_len - 1)) == 0:                 # power of two
            pos = pos & (seg_len - 1)
        else:
            pos = pos % seg_len

    half = ksize // 2

    # ---- Residual blocks (static unroll; rates / use_ln are Python constants)
    for i in range(len(rates)):
        rate = int(rates[i])

        # conv_in (kernel_size=1) + ReLU
        a = jnp.maximum(mm(h, win_ref[i]) + bin_ref[i], 0.0)   # (R, Ch) f32
        ch = a.shape[1]

        # LayerNorm over channels (PyTorch applies it after transpose(1,2)).
        if use_lns[i]:
            # Single pass: independent sum / sum-of-squares reductions
            # (dual-issue on the XLUs), var = E[a^2] - mu^2, gamma folded in.
            s1 = jnp.sum(a, axis=-1, keepdims=True)
            s2 = jnp.sum(a * a, axis=-1, keepdims=True)
            mu = s1 * (1.0 / ch)
            var = s2 * (1.0 / ch) - mu * mu
            a = (a - mu) * (jax.lax.rsqrt(var + eps) * g_ref[i]) + bt_ref[i]

        # Dilated conv (kernel=ksize, dilation=rate, "same" padding):
        # tap k reads a[t + (k - half)*rate]; realized as an XLU roll plus a
        # per-row validity mask — no zero-pad copy, no lane concat, and peak
        # live registers stay small (per-tap accumulated matmuls).
        acc = mm(a, wa_ref[i, half])                       # center tap (d = 0)
        for k in range(ksize):
            if k == half:
                continue
            d = (k - half) * rate                          # static offset
            tap = pltpu.roll(a, (-d) % R, axis=0)          # tap[t] = a[t+d] (cyclic)
            mask = (pos >= -d) if d < 0 else (pos < seg_len - d)
            acc = acc + mm(jnp.where(mask, tap, 0.0), wa_ref[i, k])
        y = jnp.maximum(acc + ba_ref[i], 0.0)              # (R, Ch)

        # conv_out (kernel_size=1) + residual
        h = mm(y, wout_ref[i]) + bout_ref[i] + h

    # ---- Decoding FeedForward ----
    for li, (w_ref, b_ref) in enumerate(dec):
        h = mm(h, w_ref[...]) + b_ref[...]
        if li < n_dec - 1:
            h = jnp.maximum(h, 0.0)

    # TODO(synk): last dim d_in=10 lowers to masked vst partial stores; pad the
    # output lane dim to 128 in the wrapper if the surrounding model allows.
    o_ref[0] = h.astype(o_ref.dtype)


def _const_spec(arr):
    """Full-array block, same block every grid step (stays resident in VMEM).

    The block index never changes, so Pallas reuses the already-DMA'd copy
    across grid steps.  Single-buffering (pipeline_mode=pl.Buffered(1)) would
    also drop the unused second buffer, but at <0.5 MiB of bf16 weights today
    it is not worth the compatibility risk; revisit when n_encoder/d_att grow
    (especially on v7x's 64 MiB VMEM): move the block index onto an
    'arbitrary' grid axis with h carried in a VMEM scratch accumulator and
    tile T with a 2*max_rate halo.
    """
    nd = arr.ndim
    return pl.BlockSpec(tuple(arr.shape), lambda *_g, _n=nd: (0,) * _n)


def _default_fold_batch():
    # Single-TC chips (v5e/v6e): fold B into the row dim -> one grid step,
    # full MXU rows.  v7x has 2 TensorCores, so keep grid=(B,) there and let
    # dimension_semantics=("parallel",) spread the batch across cores.
    try:
        kind = jax.devices()[0].device_kind.lower()
    except Exception:
        return True
    return not ("v7" in kind or "7x" in kind)


def encoder_forward(x, params, fold_batch=None):
    """x: (B, T, d_in) channels-last -> (B, T, d_in)."""
    B, T, d_in = x.shape
    if fold_batch is None:
        fold_batch = _default_fold_batch()

    emb, dec, blk = params["emb"], params["dec"], params["blocks"]

    # Weights go to the kernel as bf16 (half VMEM/DMA); biases / LN params f32.
    bf = lambda w: w.astype(jnp.bfloat16)
    flat = []
    for w, b in emb:
        flat += [bf(w), b]
    flat += [bf(blk["win"]), blk["bin"], blk["gamma"], blk["beta"],
             bf(blk["wa"]), blk["ba"], bf(blk["wout"]), blk["bout"]]
    for w, b in dec:
        flat += [bf(w), b]

    if fold_batch:
        ng, rows = 1, B * T
    else:
        ng, rows = B, T
    x_in = x.reshape(ng, rows, d_in)

    kernel = functools.partial(
        _encoder_kernel,
        n_emb=len(emb), n_dec=len(dec),
        rates=tuple(int(r) for r in params["rates"]),
        use_lns=tuple(bool(u) for u in params["use_lns"]),
        ksize=int(params["ksize"]), seg_len=T, eps=1e-5)

    in_specs = [pl.BlockSpec((1, rows, d_in), lambda g: (g, 0, 0))]
    in_specs += [_const_spec(w) for w in flat]

    out = pl.pallas_call(
        kernel,
        out_shape=jax.ShapeDtypeStruct((ng, rows, d_in), x.dtype),
        grid=(ng,),
        in_specs=in_specs,
        out_specs=pl.BlockSpec((1, rows, d_in), lambda g: (g, 0, 0)),
        compiler_params=pltpu.CompilerParams(
            dimension_semantics=("parallel",),
            vmem_limit_bytes=32 * 1024 * 1024),
    )(x_in, *flat)
    return out.reshape(B, T, d_in)


# ----------------------------------------------------------------------------
# Parameter construction (deterministic, synthetic)
# ----------------------------------------------------------------------------
def build_encoder_params(key, n_encoder, d_in, d_att, widths, ksize=5, scale=0.1):
    ch = d_att // 2
    rates_cycle = (1, 2, 4, 8, 16)
    rates, use_lns = [], []
    for _ in range(n_encoder):
        for j, r in enumerate(rates_cycle):
            rates.append(r)
            use_lns.append(j != 0)     # is_first=True only for the rate=1 block
    nb = len(rates)

    def ff(k, dims):
        layers = []
        for i in range(len(dims) - 1):
            k, k1, k2 = jax.random.split(k, 3)
            w = scale * jax.random.normal(k1, (dims[i], dims[i + 1]), jnp.float32)
            b = scale * jax.random.normal(k2, (1, dims[i + 1]), jnp.float32)
            layers.append((w, b))
        return layers

    key, ke, kd, kb = jax.random.split(key, 4)
    ks = jax.random.split(kb, 6)
    blocks = {
        "win": scale * jax.random.normal(ks[0], (nb, d_att, ch), jnp.float32),
        "bin": scale * jax.random.normal(ks[1], (nb, 1, ch), jnp.float32),
        "gamma": jnp.ones((nb, 1, ch), jnp.float32),
        "beta": jnp.zeros((nb, 1, ch), jnp.float32),
        # wa[i, k] = pytorch_conv_weight[:, :, k].T, shape (Ch, Ch).
        "wa": scale * jax.random.normal(ks[2], (nb, ksize, ch, ch), jnp.float32),
        "ba": scale * jax.random.normal(ks[3], (nb, 1, ch), jnp.float32),
        "wout": scale * jax.random.normal(ks[4], (nb, ch, d_att), jnp.float32),
        "bout": scale * jax.random.normal(ks[5], (nb, 1, d_att), jnp.float32),
    }
    return {
        "emb": ff(ke, [d_in] + list(widths) + [d_att]),
        "dec": ff(kd, [d_att] + list(widths) + [d_in]),
        "blocks": blocks,
        "rates": tuple(rates),
        "use_lns": tuple(use_lns),
        "ksize": ksize,
    }


# ----------------------------------------------------------------------------
# Pure-JAX f32 reference (for correctness check)
# ----------------------------------------------------------------------------
def encoder_reference(x, params):
    h = x.astype(jnp.float32)
    emb, dec, blk = params["emb"], params["dec"], params["blocks"]
    K = params["ksize"]
    T = x.shape[1]
    for i, (w, b) in enumerate(emb):
        h = h @ w + b
        if i < len(emb) - 1:
            h = jax.nn.relu(h)
    for i, (rate, use_ln) in enumerate(zip(params["rates"], params["use_lns"])):
        a = jax.nn.relu(jnp.einsum("btc,cd->btd", h, blk["win"][i]) + blk["bin"][i])
        if use_ln:
            mu = a.mean(-1, keepdims=True)
            var = jnp.square(a - mu).mean(-1, keepdims=True)
            a = (a - mu) / jnp.sqrt(var + 1e-5) * blk["gamma"][i] + blk["beta"][i]
        pad = jnp.pad(a, ((0, 0), (2 * rate, 2 * rate), (0, 0)))
        acc = jnp.zeros_like(a) + blk["ba"][i]
        for k in range(K):
            acc = acc + jnp.einsum("btc,cd->btd",
                                   pad[:, k * rate:k * rate + T, :], blk["wa"][i, k])
        y = jax.nn.relu(acc)
        h = jnp.einsum("btc,cd->btd", y, blk["wout"][i]) + blk["bout"][i] + h
    for i, (w, b) in enumerate(dec):
        h = h @ w + b
        if i < len(dec) - 1:
            h = jax.nn.relu(h)
    return h


if __name__ == "__main__":
    B, T = 2, 64
    d_in, d_att = 10, 128            # module defaults: d_in=10, d_att=128
    widths = [32]                    # WidthsEmbedding default
    n_encoder = 1                    # 5 residual blocks, rates 1, 2, 4, 8, 16

    key = jax.random.PRNGKey(0)
    key, kx, kp = jax.random.split(key, 3)
    x = jax.random.normal(kx, (B, T, d_in), jnp.float32)
    params = build_encoder_params(kp, n_encoder, d_in, d_att, widths, ksize=5)

    out = encoder_forward(x, params)
    out = jax.block_until_ready(out)
    assert out.shape == (B, T, d_in)

    ref = jax.block_until_ready(encoder_reference(x, params))
    # bf16 matmul operands in the kernel vs. pure-f32 reference -> looser tol.
    np.testing.assert_allclose(np.asarray(out), np.asarray(ref),
                               rtol=3e-2, atol=3e-2)
    print("KERNEL_OK")
</pallas_src>

<mosaic_0001>
module attributes {stable_mosaic.version = 11 : i64} {
  func.func @_encoder_kernel(%arg0: i32, %arg1: memref<1x128x10xf32, #tpu.memory_space<vmem>>, %arg2: memref<10x32xbf16, #tpu.memory_space<vmem>>, %arg3: memref<1x32xf32, #tpu.memory_space<vmem>>, %arg4: memref<32x128xbf16, #tpu.memory_space<vmem>>, %arg5: memref<1x128xf32, #tpu.memory_space<vmem>>, %arg6: memref<5x128x64xbf16, #tpu.memory_space<vmem>>, %arg7: memref<5x1x64xf32, #tpu.memory_space<vmem>>, %arg8: memref<5x1x64xf32, #tpu.memory_space<vmem>>, %arg9: memref<5x1x64xf32, #tpu.memory_space<vmem>>, %arg10: memref<5x5x64x64xbf16, #tpu.memory_space<vmem>>, %arg11: memref<5x1x64xf32, #tpu.memory_space<vmem>>, %arg12: memref<5x64x128xbf16, #tpu.memory_space<vmem>>, %arg13: memref<5x1x128xf32, #tpu.memory_space<vmem>>, %arg14: memref<128x32xbf16, #tpu.memory_space<vmem>>, %arg15: memref<1x32xf32, #tpu.memory_space<vmem>>, %arg16: memref<32x10xbf16, #tpu.memory_space<vmem>>, %arg17: memref<1x10xf32, #tpu.memory_space<vmem>>, %arg18: memref<1x128x10xf32, #tpu.memory_space<vmem>>) attributes {dimension_semantics = [#tpu.dimension_semantics<parallel>], iteration_bounds = array<i64: 1>, scalar_prefetch = 0 : i64, scratch_operands = 0 : i64, tpu.core_type = #tpu.core_type<tc>, window_params = [{transform_indices = @transform_0, window_bounds = array<i64: 1, 128, 10>}, {pipeline_mode = #tpu.pipeline_mode<synchronous>, transform_indices = @transform_1, window_bounds = array<i64: 10, 32>}, {pipeline_mode = #tpu.pipeline_mode<synchronous>, transform_indices = @transform_2, window_bounds = array<i64: 1, 32>}, {pipeline_mode = #tpu.pipeline_mode<synchronous>, transform_indices = @transform_3, window_bounds = array<i64: 32, 128>}, {pipeline_mode = #tpu.pipeline_mode<synchronous>, transform_indices = @transform_4, window_bounds = array<i64: 1, 128>}, {pipeline_mode = #tpu.pipeline_mode<synchronous>, transform_indices = @transform_5, window_bounds = array<i64: 5, 128, 64>}, {pipeline_mode = #tpu.pipeline_mode<synchronous>, transform_indices = @transform_6, window_bounds = array<i64: 5, 1, 64>}, {pipeline_mode = #tpu.pipeline_mode<synchronous>, transform_indices = @transform_7, window_bounds = array<i64: 5, 1, 64>}, {pipeline_mode = #tpu.pipeline_mode<synchronous>, transform_indices = @transform_8, window_bounds = array<i64: 5, 1, 64>}, {pipeline_mode = #tpu.pipeline_mode<synchronous>, transform_indices = @transform_9, window_bounds = array<i64: 5, 5, 64, 64>}, {pipeline_mode = #tpu.pipeline_mode<synchronous>, transform_indices = @transform_10, window_bounds = array<i64: 5, 1, 64>}, {pipeline_mode = #tpu.pipeline_mode<synchronous>, transform_indices = @transform_11, window_bounds = array<i64: 5, 64, 128>}, {pipeline_mode = #tpu.pipeline_mode<synchronous>, transform_indices = @transform_12, window_bounds = array<i64: 5, 1, 128>}, {pipeline_mode = #tpu.pipeline_mode<synchronous>, transform_indices = @transform_13, window_bounds = array<i64: 128, 32>}, {pipeline_mode = #tpu.pipeline_mode<synchronous>, transform_indices = @transform_14, window_bounds = array<i64: 1, 32>}, {pipeline_mode = #tpu.pipeline_mode<synchronous>, transform_indices = @transform_15, window_bounds = array<i64: 32, 10>}, {pipeline_mode = #tpu.pipeline_mode<synchronous>, transform_indices = @transform_16, window_bounds = array<i64: 1, 10>}, {transform_indices = @transform_17, window_bounds = array<i64: 1, 128, 10>}]} {
    %c0 = arith.constant 0 : index
    %c0_0 = arith.constant 0 : index
    %c0_1 = arith.constant 0 : index
    %0 = vector.load %arg1[%c0, %c0_0, %c0_1] : memref<1x128x10xf32, #tpu.memory_space<vmem>>, vector<1x128x10xf32>
    %1 = vector.shape_cast %0 : vector<1x128x10xf32> to vector<128x10xf32>
    %c0_2 = arith.constant 0 : index
    %c0_3 = arith.constant 0 : index
    %2 = vector.load %arg2[%c0_2, %c0_3] : memref<10x32xbf16, #tpu.memory_space<vmem>>, vector<10x32xbf16>
    %3 = arith.truncf %1 : vector<128x10xf32> to vector<128x10xbf16>
    %cst = arith.constant dense<0.000000e+00> : vector<128x32xf32>
    %4 = tpu.matmul %3, %2, %cst {dimension_numbers = #tpu.dot_dimension_numbers<[1], [0], [0], [1], [0, 0, 1, 1], [], []>} : vector<128x10xbf16>, vector<10x32xbf16>, vector<128x32xf32> -> vector<128x32xf32>
    %c0_4 = arith.constant 0 : index
    %c0_5 = arith.constant 0 : index
    %5 = vector.load %arg3[%c0_4, %c0_5] : memref<1x32xf32, #tpu.memory_space<vmem>>, vector<1x32xf32>
    %6 = vector.broadcast %5 : vector<1x32xf32> to vector<128x32xf32>
    %7 = arith.addf %4, %6 : vector<128x32xf32>
    %cst_6 = arith.constant 0.000000e+00 : f32
    %8 = vector.broadcast %cst_6 : f32 to vector<128x32xf32>
    %9 = arith.maximumf %7, %8 : vector<128x32xf32>
    %c0_7 = arith.constant 0 : index
    %c0_8 = arith.constant 0 : index
    %10 = vector.load %arg4[%c0_7, %c0_8] : memref<32x128xbf16, #tpu.memory_space<vmem>>, vector<32x128xbf16>
    %11 = arith.truncf %9 : vector<128x32xf32> to vector<128x32xbf16>
    %cst_9 = arith.constant dense<0.000000e+00> : vector<128x128xf32>
    %12 = tpu.matmul %11, %10, %cst_9 {dimension_numbers = #tpu.dot_dimension_numbers<[1], [0], [0], [1], [0, 0, 1, 1], [], []>} : vector<128x32xbf16>, vector<32x128xbf16>, vector<128x128xf32> -> vector<128x128xf32>
    %c0_10 = arith.constant 0 : index
    %c0_11 = arith.constant 0 : index
    %13 = vector.load %arg5[%c0_10, %c0_11] : memref<1x128xf32, #tpu.memory_space<vmem>>, vector<1x128xf32>
    %14 = vector.broadcast %13 : vector<1x128xf32> to vector<128x128xf32>
    %15 = arith.addf %12, %14 : vector<128x128xf32>
    %16 = tpu.iota {dimensions = array<i32: 0>} : vector<128x1xi32>
    %c63_i32 = arith.constant 63 : i32
    %17 = vector.broadcast %c63_i32 : i32 to vector<128x1xi32>
    %18 = arith.andi %16, %17 : vector<128x1xi32>
    %c0_12 = arith.constant 0 : index
    %c0_13 = arith.constant 0 : index
    %c0_14 = arith.constant 0 : index
    %19 = vector.load %arg6[%c0_12, %c0_13, %c0_14] : memref<5x128x64xbf16, #tpu.memory_space<vmem>>, vector<1x128x64xbf16>
    %20 = vector.shape_cast %19 : vector<1x128x64xbf16> to vector<128x64xbf16>
    %21 = arith.truncf %15 : vector<128x128xf32> to vector<128x128xbf16>
    %cst_15 = arith.constant dense<0.000000e+00> : vector<128x64xf32>
    %22 = tpu.matmul %21, %20, %cst_15 {dimension_numbers = #tpu.dot_dimension_numbers<[1], [0], [0], [1], [0, 0, 1, 1], [], []>} : vector<128x128xbf16>, vector<128x64xbf16>, vector<128x64xf32> -> vector<128x64xf32>
    %c0_16 = arith.constant 0 : index
    %c0_17 = arith.constant 0 : index
    %c0_18 = arith.constant 0 : index
    %23 = vector.load %arg7[%c0_16, %c0_17, %c0_18] : memref<5x1x64xf32, #tpu.memory_space<vmem>>, vector<1x1x64xf32>
    %24 = vector.shape_cast %23 : vector<1x1x64xf32> to vector<1x64xf32>
    %25 = vector.broadcast %24 : vector<1x64xf32> to vector<128x64xf32>
    %26 = arith.addf %22, %25 : vector<128x64xf32>
    %cst_19 = arith.constant 0.000000e+00 : f32
    %27 = vector.broadcast %cst_19 : f32 to vector<128x64xf32>
    %28 = arith.maximumf %26, %27 : vector<128x64xf32>
    %c0_20 = arith.constant 0 : index
    %c2 = arith.constant 2 : index
    %c0_21 = arith.constant 0 : index
    %c0_22 = arith.constant 0 : index
    %29 = vector.load %arg10[%c0_20, %c2, %c0_21, %c0_22] : memref<5x5x64x64xbf16, #tpu.memory_space<vmem>>, vector<1x1x64x64xbf16>
    %30 = vector.shape_cast %29 : vector<1x1x64x64xbf16> to vector<64x64xbf16>
    %31 = arith.truncf %28 : vector<128x64xf32> to vector<128x64xbf16>
    %cst_23 = arith.constant dense<0.000000e+00> : vector<128x64xf32>
    %32 = tpu.matmul %31, %30, %cst_23 {dimension_numbers = #tpu.dot_dimension_numbers<[1], [0], [0], [1], [0, 0, 1, 1], [], []>} : vector<128x64xbf16>, vector<64x64xbf16>, vector<128x64xf32> -> vector<128x64xf32>
    %c2_i32 = arith.constant 2 : i32
    %33 = tpu.dynamic_rotate %28 by %c2_i32 dim 0 : vector<128x64xf32>, i32 -> vector<128x64xf32>
    %c2_i32_24 = arith.constant 2 : i32
    %34 = vector.broadcast %c2_i32_24 : i32 to vector<128x1xi32>
    %35 = arith.cmpi sge, %18, %34 : vector<128x1xi32>
    %cst_25 = arith.constant 0.000000e+00 : f32
    %36 = vector.shape_cast %35 : vector<128x1xi1> to vector<128x1xi1>
    %37 = vector.broadcast %36 : vector<128x1xi1> to vector<128x64xi1>
    %38 = vector.broadcast %cst_25 : f32 to vector<128x64xf32>
    %39 = arith.select %37, %33, %38 : vector<128x64xi1>, vector<128x64xf32>
    %c0_26 = arith.constant 0 : index
    %c0_27 = arith.constant 0 : index
    %c0_28 = arith.constant 0 : index
    %c0_29 = arith.constant 0 : index
    %40 = vector.load %arg10[%c0_26, %c0_27, %c0_28, %c0_29] : memref<5x5x64x64xbf16, #tpu.memory_space<vmem>>, vector<1x1x64x64xbf16>
    %41 = vector.shape_cast %40 : vector<1x1x64x64xbf16> to vector<64x64xbf16>
    %42 = arith.truncf %39 : vector<128x64xf32> to vector<128x64xbf16>
    %cst_30 = arith.constant dense<0.000000e+00> : vector<128x64xf32>
    %43 = tpu.matmul %42, %41, %cst_30 {dimension_numbers = #tpu.dot_dimension_numbers<[1], [0], [0], [1], [0, 0, 1, 1], [], []>} : vector<128x64xbf16>, vector<64x64xbf16>, vector<128x64xf32> -> vector<128x64xf32>
    %44 = arith.addf %32, %43 : vector<128x64xf32>
    %c1_i32 = arith.constant 1 : i32
    %45 = tpu.dynamic_rotate %28 by %c1_i32 dim 0 : vector<128x64xf32>, i32 -> vector<128x64xf32>
    %c1_i32_31 = arith.constant 1 : i32
    %46 = vector.broadcast %c1_i32_31 : i32 to vector<128x1xi32>
    %47 = arith.cmpi sge, %18, %46 : vector<128x1xi32>
    %cst_32 = arith.constant 0.000000e+00 : f32
    %48 = vector.shape_cast %47 : vector<128x1xi1> to vector<128x1xi1>
    %49 = vector.broadcast %48 : vector<128x1xi1> to vector<128x64xi1>
    %50 = vector.broadcast %cst_32 : f32 to vector<128x64xf32>
    %51 = arith.select %49, %45, %50 : vector<128x64xi1>, vector<128x64xf32>
    %c0_33 = arith.constant 0 : index
    %c1 = arith.constant 1 : index
    %c0_34 = arith.constant 0 : index
    %c0_35 = arith.constant 0 : index
    %52 = vector.load %arg10[%c0_33, %c1, %c0_34, %c0_35] : memref<5x5x64x64xbf16, #tpu.memory_space<vmem>>, vector<1x1x64x64xbf16>
    %53 = vector.shape_cast %52 : vector<1x1x64x64xbf16> to vector<64x64xbf16>
    %54 = arith.truncf %51 : vector<128x64xf32> to vector<128x64xbf16>
    %cst_36 = arith.constant dense<0.000000e+00> : vector<128x64xf32>
    %55 = tpu.matmul %54, %53, %cst_36 {dimension_numbers = #tpu.dot_dimension_numbers<[1], [0], [0], [1], [0, 0, 1, 1], [], []>} : vector<128x64xbf16>, vector<64x64xbf16>, vector<128x64xf32> -> vector<128x64xf32>
    %56 = arith.addf %44, %55 : vector<128x64xf32>
    %c127_i32 = arith.constant 127 : i32
    %57 = tpu.dynamic_rotate %28 by %c127_i32 dim 0 : vector<128x64xf32>, i32 -> vector<128x64xf32>
    %c63_i32_37 = arith.constant 63 : i32
    %58 = vector.broadcast %c63_i32_37 : i32 to vector<128x1xi32>
    %59 = arith.cmpi slt, %18, %58 : vector<128x1xi32>
    %cst_38 = arith.constant 0.000000e+00 : f32
    %60 = vector.shape_cast %59 : vector<128x1xi1> to vector<128x1xi1>
    %61 = vector.broadcast %60 : vector<128x1xi1> to vector<128x64xi1>
    %62 = vector.broadcast %cst_38 : f32 to vector<128x64xf32>
    %63 = arith.select %61, %57, %62 : vector<128x64xi1>, vector<128x64xf32>
    %c0_39 = arith.constant 0 : index
    %c3 = arith.constant 3 : index
    %c0_40 = arith.constant 0 : index
    %c0_41 = arith.constant 0 : index
    %64 = vector.load %arg10[%c0_39, %c3, %c0_40, %c0_41] : memref<5x5x64x64xbf16, #tpu.memory_space<vmem>>, vector<1x1x64x64xbf16>
    %65 = vector.shape_cast %64 : vector<1x1x64x64xbf16> to vector<64x64xbf16>
    %66 = arith.truncf %63 : vector<128x64xf32> to vector<128x64xbf16>
    %cst_42 = arith.constant dense<0.000000e+00> : vector<128x64xf32>
    %67 = tpu.matmul %66, %65, %cst_42 {dimension_numbers = #tpu.dot_dimension_numbers<[1], [0], [0], [1], [0, 0, 1, 1], [], []>} : vector<128x64xbf16>, vector<64x64xbf16>, vector<128x64xf32> -> vector<128x64xf32>
    %68 = arith.addf %56, %67 : vector<128x64xf32>
    %c126_i32 = arith.constant 126 : i32
    %69 = tpu.dynamic_rotate %28 by %c126_i32 dim 0 : vector<128x64xf32>, i32 -> vector<128x64xf32>
    %c62_i32 = arith.constant 62 : i32
    %70 = vector.broadcast %c62_i32 : i32 to vector<128x1xi32>
    %71 = arith.cmpi slt, %18, %70 : vector<128x1xi32>
    %cst_43 = arith.constant 0.000000e+00 : f32
    %72 = vector.shape_cast %71 : vector<128x1xi1> to vector<128x1xi1>
    %73 = vector.broadcast %72 : vector<128x1xi1> to vector<128x64xi1>
    %74 = vector.broadcast %cst_43 : f32 to vector<128x64xf32>
    %75 = arith.select %73, %69, %74 : vector<128x64xi1>, vector<128x64xf32>
    %c0_44 = arith.constant 0 : index
    %c4 = arith.constant 4 : index
    %c0_45 = arith.constant 0 : index
    %c0_46 = arith.constant 0 : index
    %76 = vector.load %arg10[%c0_44, %c4, %c0_45, %c0_46] : memref<5x5x64x64xbf16, #tpu.memory_space<vmem>>, vector<1x1x64x64xbf16>
    %77 = vector.shape_cast %76 : vector<1x1x64x64xbf16> to vector<64x64xbf16>
    %78 = arith.truncf %75 : vector<128x64xf32> to vector<128x64xbf16>
    %cst_47 = arith.constant dense<0.000000e+00> : vector<128x64xf32>
    %79 = tpu.matmul %78, %77, %cst_47 {dimension_numbers = #tpu.dot_dimension_numbers<[1], [0], [0], [1], [0, 0, 1, 1], [], []>} : vector<128x64xbf16>, vector<64x64xbf16>, vector<128x64xf32> -> vector<128x64xf32>
    %80 = arith.addf %68, %79 : vector<128x64xf32>
    %c0_48 = arith.constant 0 : index
    %c0_49 = arith.constant 0 : index
    %c0_50 = arith.constant 0 : index
    %81 = vector.load %arg11[%c0_48, %c0_49, %c0_50] : memref<5x1x64xf32, #tpu.memory_space<vmem>>, vector<1x1x64xf32>
    %82 = vector.shape_cast %81 : vector<1x1x64xf32> to vector<1x64xf32>
    %83 = vector.broadcast %82 : vector<1x64xf32> to vector<128x64xf32>
    %84 = arith.addf %80, %83 : vector<128x64xf32>
    %cst_51 = arith.constant 0.000000e+00 : f32
    %85 = vector.broadcast %cst_51 : f32 to vector<128x64xf32>
    %86 = arith.maximumf %84, %85 : vector<128x64xf32>
    %c0_52 = arith.constant 0 : index
    %c0_53 = arith.constant 0 : index
    %c0_54 = arith.constant 0 : index
    %87 = vector.load %arg12[%c0_52, %c0_53, %c0_54] : memref<5x64x128xbf16, #tpu.memory_space<vmem>>, vector<1x64x128xbf16>
    %88 = vector.shape_cast %87 : vector<1x64x128xbf16> to vector<64x128xbf16>
    %89 = arith.truncf %86 : vector<128x64xf32> to vector<128x64xbf16>
    %cst_55 = arith.constant dense<0.000000e+00> : vector<128x128xf32>
    %90 = tpu.matmul %89, %88, %cst_55 {dimension_numbers = #tpu.dot_dimension_numbers<[1], [0], [0], [1], [0, 0, 1, 1], [], []>} : vector<128x64xbf16>, vector<64x128xbf16>, vector<128x128xf32> -> vector<128x128xf32>
    %c0_56 = arith.constant 0 : index
    %c0_57 = arith.constant 0 : index
    %c0_58 = arith.constant 0 : index
    %91 = vector.load %arg13[%c0_56, %c0_57, %c0_58] : memref<5x1x128xf32, #tpu.memory_space<vmem>>, vector<1x1x128xf32>
    %92 = vector.shape_cast %91 : vector<1x1x128xf32> to vector<1x128xf32>
    %93 = vector.broadcast %92 : vector<1x128xf32> to vector<128x128xf32>
    %94 = arith.addf %90, %93 : vector<128x128xf32>
    %95 = arith.addf %94, %15 : vector<128x128xf32>
    %c1_59 = arith.constant 1 : index
    %c0_60 = arith.constant 0 : index
    %c0_61 = arith.constant 0 : index
    %96 = vector.load %arg6[%c1_59, %c0_60, %c0_61] : memref<5x128x64xbf16, #tpu.memory_space<vmem>>, vector<1x128x64xbf16>
    %97 = vector.shape_cast %96 : vector<1x128x64xbf16> to vector<128x64xbf16>
    %98 = arith.truncf %95 : vector<128x128xf32> to vector<128x128xbf16>
    %cst_62 = arith.constant dense<0.000000e+00> : vector<128x64xf32>
    %99 = tpu.matmul %98, %97, %cst_62 {dimension_numbers = #tpu.dot_dimension_numbers<[1], [0], [0], [1], [0, 0, 1, 1], [], []>} : vector<128x128xbf16>, vector<128x64xbf16>, vector<128x64xf32> -> vector<128x64xf32>
    %c1_63 = arith.constant 1 : index
    %c0_64 = arith.constant 0 : index
    %c0_65 = arith.constant 0 : index
    %100 = vector.load %arg7[%c1_63, %c0_64, %c0_65] : memref<5x1x64xf32, #tpu.memory_space<vmem>>, vector<1x1x64xf32>
    %101 = vector.shape_cast %100 : vector<1x1x64xf32> to vector<1x64xf32>
    %102 = vector.broadcast %101 : vector<1x64xf32> to vector<128x64xf32>
    %103 = arith.addf %99, %102 : vector<128x64xf32>
    %cst_66 = arith.constant 0.000000e+00 : f32
    %104 = vector.broadcast %cst_66 : f32 to vector<128x64xf32>
    %105 = arith.maximumf %103, %104 : vector<128x64xf32>
    %cst_67 = arith.constant dense<0.000000e+00> : vector<128xf32>
    %106 = vector.multi_reduction <add>, %105, %cst_67 [1] : vector<128x64xf32> to vector<128xf32>
    %107 = vector.shape_cast %106 : vector<128xf32> to vector<128x1xf32>
    %108 = arith.mulf %105, %105 : vector<128x64xf32>
    %cst_68 = arith.constant dense<0.000000e+00> : vector<128xf32>
    %109 = vector.multi_reduction <add>, %108, %cst_68 [1] : vector<128x64xf32> to vector<128xf32>
    %110 = vector.shape_cast %109 : vector<128xf32> to vector<128x1xf32>
    %cst_69 = arith.constant 1.562500e-02 : f32
    %111 = vector.broadcast %cst_69 : f32 to vector<128x1xf32>
    %112 = arith.mulf %107, %111 : vector<128x1xf32>
    %cst_70 = arith.constant 1.562500e-02 : f32
    %113 = vector.broadcast %cst_70 : f32 to vector<128x1xf32>
    %114 = arith.mulf %110, %113 : vector<128x1xf32>
    %115 = arith.mulf %112, %112 : vector<128x1xf32>
    %116 = arith.subf %114, %115 : vector<128x1xf32>
    %117 = vector.broadcast %112 : vector<128x1xf32> to vector<128x64xf32>
    %118 = arith.subf %105, %117 : vector<128x64xf32>
    %cst_71 = arith.constant 9.99999974E-6 : f32
    %119 = vector.broadcast %cst_71 : f32 to vector<128x1xf32>
    %120 = arith.addf %116, %119 : vector<128x1xf32>
    %121 = math.rsqrt %120 : vector<128x1xf32>
    %c1_72 = arith.constant 1 : index
    %c0_73 = arith.constant 0 : index
    %c0_74 = arith.constant 0 : index
    %122 = vector.load %arg8[%c1_72, %c0_73, %c0_74] : memref<5x1x64xf32, #tpu.memory_space<vmem>>, vector<1x1x64xf32>
    %123 = vector.shape_cast %122 : vector<1x1x64xf32> to vector<1x64xf32>
    %124 = vector.broadcast %121 : vector<128x1xf32> to vector<128x64xf32>
    %125 = vector.broadcast %123 : vector<1x64xf32> to vector<128x64xf32>
    %126 = arith.mulf %124, %125 : vector<128x64xf32>
    %127 = arith.mulf %118, %126 : vector<128x64xf32>
    %c1_75 = arith.constant 1 : index
    %c0_76 = arith.constant 0 : index
    %c0_77 = arith.constant 0 : index
    %128 = vector.load %arg9[%c1_75, %c0_76, %c0_77] : memref<5x1x64xf32, #tpu.memory_space<vmem>>, vector<1x1x64xf32>
    %129 = vector.shape_cast %128 : vector<1x1x64xf32> to vector<1x64xf32>
    %130 = vector.broadcast %129 : vector<1x64xf32> to vector<128x64xf32>
    %131 = arith.addf %127, %130 : vector<128x64xf32>
    %c1_78 = arith.constant 1 : index
    %c2_79 = arith.constant 2 : index
    %c0_80 = arith.constant 0 : index
    %c0_81 = arith.constant 0 : index
    %132 = vector.load %arg10[%c1_78, %c2_79, %c0_80, %c0_81] : memref<5x5x64x64xbf16, #tpu.memory_space<vmem>>, vector<1x1x64x64xbf16>
    %133 = vector.shape_cast %132 : vector<1x1x64x64xbf16> to vector<64x64xbf16>
    %134 = arith.truncf %131 : vector<128x64xf32> to vector<128x64xbf16>
    %cst_82 = arith.constant dense<0.000000e+00> : vector<128x64xf32>
    %135 = tpu.matmul %134, %133, %cst_82 {dimension_numbers = #tpu.dot_dimension_numbers<[1], [0], [0], [1], [0, 0, 1, 1], [], []>} : vector<128x64xbf16>, vector<64x64xbf16>, vector<128x64xf32> -> vector<128x64xf32>
    %c4_i32 = arith.constant 4 : i32
    %136 = tpu.dynamic_rotate %131 by %c4_i32 dim 0 : vector<128x64xf32>, i32 -> vector<128x64xf32>
    %c4_i32_83 = arith.constant 4 : i32
    %137 = vector.broadcast %c4_i32_83 : i32 to vector<128x1xi32>
    %138 = arith.cmpi sge, %18, %137 : vector<128x1xi32>
    %cst_84 = arith.constant 0.000000e+00 : f32
    %139 = vector.shape_cast %138 : vector<128x1xi1> to vector<128x1xi1>
    %140 = vector.broadcast %139 : vector<128x1xi1> to vector<128x64xi1>
    %141 = vector.broadcast %cst_84 : f32 to vector<128x64xf32>
    %142 = arith.select %140, %136, %141 : vector<128x64xi1>, vector<128x64xf32>
    %c1_85 = arith.constant 1 : index
    %c0_86 = arith.constant 0 : index
    %c0_87 = arith.constant 0 : index
    %c0_88 = arith.constant 0 : index
    %143 = vector.load %arg10[%c1_85, %c0_86, %c0_87, %c0_88] : memref<5x5x64x64xbf16, #tpu.memory_space<vmem>>, vector<1x1x64x64xbf16>
    %144 = vector.shape_cast %143 : vector<1x1x64x64xbf16> to vector<64x64xbf16>
    %145 = arith.truncf %142 : vector<128x64xf32> to vector<128x64xbf16>
    %cst_89 = arith.constant dense<0.000000e+00> : vector<128x64xf32>
    %146 = tpu.matmul %145, %144, %cst_89 {dimension_numbers = #tpu.dot_dimension_numbers<[1], [0], [0], [1], [0, 0, 1, 1], [], []>} : vector<128x64xbf16>, vector<64x64xbf16>, vector<128x64xf32> -> vector<128x64xf32>
    %147 = arith.addf %135, %146 : vector<128x64xf32>
    %c2_i32_90 = arith.constant 2 : i32
    %148 = tpu.dynamic_rotate %131 by %c2_i32_90 dim 0 : vector<128x64xf32>, i32 -> vector<128x64xf32>
    %c2_i32_91 = arith.constant 2 : i32
    %149 = vector.broadcast %c2_i32_91 : i32 to vector<128x1xi32>
    %150 = arith.cmpi sge, %18, %149 : vector<128x1xi32>
    %cst_92 = arith.constant 0.000000e+00 : f32
    %151 = vector.shape_cast %150 : vector<128x1xi1> to vector<128x1xi1>
    %152 = vector.broadcast %151 : vector<128x1xi1> to vector<128x64xi1>
    %153 = vector.broadcast %cst_92 : f32 to vector<128x64xf32>
    %154 = arith.select %152, %148, %153 : vector<128x64xi1>, vector<128x64xf32>
    %c1_93 = arith.constant 1 : index
    %c1_94 = arith.constant 1 : index
    %c0_95 = arith.constant 0 : index
    %c0_96 = arith.constant 0 : index
    %155 = vector.load %arg10[%c1_93, %c1_94, %c0_95, %c0_96] : memref<5x5x64x64xbf16, #tpu.memory_space<vmem>>, vector<1x1x64x64xbf16>
    %156 = vector.shape_cast %155 : vector<1x1x64x64xbf16> to vector<64x64xbf16>
    %157 = arith.truncf %154 : vector<128x64xf32> to vector<128x64xbf16>
    %cst_97 = arith.constant dense<0.000000e+00> : vector<128x64xf32>
    %158 = tpu.matmul %157, %156, %cst_97 {dimension_numbers = #tpu.dot_dimension_numbers<[1], [0], [0], [1], [0, 0, 1, 1], [], []>} : vector<128x64xbf16>, vector<64x64xbf16>, vector<128x64xf32> -> vector<128x64xf32>
    %159 = arith.addf %147, %158 : vector<128x64xf32>
    %c126_i32_98 = arith.constant 126 : i32
    %160 = tpu.dynamic_rotate %131 by %c126_i32_98 dim 0 : vector<128x64xf32>, i32 -> vector<128x64xf32>
    %c62_i32_99 = arith.constant 62 : i32
    %161 = vector.broadcast %c62_i32_99 : i32 to vector<128x1xi32>
    %162 = arith.cmpi slt, %18, %161 : vector<128x1xi32>
    %cst_100 = arith.constant 0.000000e+00 : f32
    %163 = vector.shape_cast %162 : vector<128x1xi1> to vector<128x1xi1>
    %164 = vector.broadcast %163 : vector<128x1xi1> to vector<128x64xi1>
    %165 = vector.broadcast %cst_100 : f32 to vector<128x64xf32>
    %166 = arith.select %164, %160, %165 : vector<128x64xi1>, vector<128x64xf32>
    %c1_101 = arith.constant 1 : index
    %c3_102 = arith.constant 3 : index
    %c0_103 = arith.constant 0 : index
    %c0_104 = arith.constant 0 : index
    %167 = vector.load %arg10[%c1_101, %c3_102, %c0_103, %c0_104] : memref<5x5x64x64xbf16, #tpu.memory_space<vmem>>, vector<1x1x64x64xbf16>
    %168 = vector.shape_cast %167 : vector<1x1x64x64xbf16> to vector<64x64xbf16>
    %169 = arith.truncf %166 : vector<128x64xf32> to vector<128x64xbf16>
    %cst_105 = arith.constant dense<0.000000e+00> : vector<128x64xf32>
    %170 = tpu.matmul %169, %168, %cst_105 {dimension_numbers = #tpu.dot_dimension_numbers<[1], [0], [0], [1], [0, 0, 1, 1], [], []>} : vector<128x64xbf16>, vector<64x64xbf16>, vector<128x64xf32> -> vector<128x64xf32>
    %171 = arith.addf %159, %170 : vector<128x64xf32>
    %c124_i32 = arith.constant 124 : i32
    %172 = tpu.dynamic_rotate %131 by %c124_i32 dim 0 : vector<128x64xf32>, i32 -> vector<128x64xf32>
    %c60_i32 = arith.constant 60 : i32
    %173 = vector.broadcast %c60_i32 : i32 to vector<128x1xi32>
    %174 = arith.cmpi slt, %18, %173 : vector<128x1xi32>
    %cst_106 = arith.constant 0.000000e+00 : f32
    %175 = vector.shape_cast %174 : vector<128x1xi1> to vector<128x1xi1>
    %176 = vector.broadcast %175 : vector<128x1xi1> to vector<128x64xi1>
    %177 = vector.broadcast %cst_106 : f32 to vector<128x64xf32>
    %178 = arith.select %176, %172, %177 : vector<128x64xi1>, vector<128x64xf32>
    %c1_107 = arith.constant 1 : index
    %c4_108 = arith.constant 4 : index
    %c0_109 = arith.constant 0 : index
    %c0_110 = arith.constant 0 : index
    %179 = vector.load %arg10[%c1_107, %c4_108, %c0_109, %c0_110] : memref<5x5x64x64xbf16, #tpu.memory_space<vmem>>, vector<1x1x64x64xbf16>
    %180 = vector.shape_cast %179 : vector<1x1x64x64xbf16> to vector<64x64xbf16>
    %181 = arith.truncf %178 : vector<128x64xf32> to vector<128x64xbf16>
    %cst_111 = arith.constant dense<0.000000e+00> : vector<128x64xf32>
    %182 = tpu.matmul %181, %180, %cst_111 {dimension_numbers = #tpu.dot_dimension_numbers<[1], [0], [0], [1], [0, 0, 1, 1], [], []>} : vector<128x64xbf16>, vector<64x64xbf16>, vector<128x64xf32> -> vector<128x64xf32>
    %183 = arith.addf %171, %182 : vector<128x64xf32>
    %c1_112 = arith.constant 1 : index
    %c0_113 = arith.constant 0 : index
    %c0_114 = arith.constant 0 : index
    %184 = vector.load %arg11[%c1_112, %c0_113, %c0_114] : memref<5x1x64xf32, #tpu.memory_space<vmem>>, vector<1x1x64xf32>
    %185 = vector.shape_cast %184 : vector<1x1x64xf32> to vector<1x64xf32>
    %186 = vector.broadcast %185 : vector<1x64xf32> to vector<128x64xf32>
    %187 = arith.addf %183, %186 : vector<128x64xf32>
    %cst_115 = arith.constant 0.000000e+00 : f32
    %188 = vector.broadcast %cst_115 : f32 to vector<128x64xf32>
    %189 = arith.maximumf %187, %188 : vector<128x64xf32>
    %c1_116 = arith.constant 1 : index
    %c0_117 = arith.constant 0 : index
    %c0_118 = arith.constant 0 : index
    %190 = vector.load %arg12[%c1_116, %c0_117, %c0_118] : memref<5x64x128xbf16, #tpu.memory_space<vmem>>, vector<1x64x128xbf16>
    %191 = vector.shape_cast %190 : vector<1x64x128xbf16> to vector<64x128xbf16>
    %192 = arith.truncf %189 : vector<128x64xf32> to vector<128x64xbf16>
    %cst_119 = arith.constant dense<0.000000e+00> : vector<128x128xf32>
    %193 = tpu.matmul %192, %191, %cst_119 {dimension_numbers = #tpu.dot_dimension_numbers<[1], [0], [0], [1], [0, 0, 1, 1], [], []>} : vector<128x64xbf16>, vector<64x128xbf16>, vector<128x128xf32> -> vector<128x128xf32>
    %c1_120 = arith.constant 1 : index
    %c0_121 = arith.constant 0 : index
    %c0_122 = arith.constant 0 : index
    %194 = vector.load %arg13[%c1_120, %c0_121, %c0_122] : memref<5x1x128xf32, #tpu.memory_space<vmem>>, vector<1x1x128xf32>
    %195 = vector.shape_cast %194 : vector<1x1x128xf32> to vector<1x128xf32>
    %196 = vector.broadcast %195 : vector<1x128xf32> to vector<128x128xf32>
    %197 = arith.addf %193, %196 : vector<128x128xf32>
    %198 = arith.addf %197, %95 : vector<128x128xf32>
    %c2_123 = arith.constant 2 : index
    %c0_124 = arith.constant 0 : index
    %c0_125 = arith.constant 0 : index
    %199 = vector.load %arg6[%c2_123, %c0_124, %c0_125] : memref<5x128x64xbf16, #tpu.memory_space<vmem>>, vector<1x128x64xbf16>
    %200 = vector.shape_cast %199 : vector<1x128x64xbf16> to vector<128x64xbf16>
    %201 = arith.truncf %198 : vector<128x128xf32> to vector<128x128xbf16>
    %cst_126 = arith.constant dense<0.000000e+00> : vector<128x64xf32>
    %202 = tpu.matmul %201, %200, %cst_126 {dimension_numbers = #tpu.dot_dimension_numbers<[1], [0], [0], [1], [0, 0, 1, 1], [], []>} : vector<128x128xbf16>, vector<128x64xbf16>, vector<128x64xf32> -> vector<128x64xf32>
    %c2_127 = arith.constant 2 : index
    %c0_128 = arith.constant 0 : index
    %c0_129 = arith.constant 0 : index
    %203 = vector.load %arg7[%c2_127, %c0_128, %c0_129] : memref<5x1x64xf32, #tpu.memory_space<vmem>>, vector<1x1x64xf32>
    %204 = vector.shape_cast %203 : vector<1x1x64xf32> to vector<1x64xf32>
    %205 = vector.broadcast %204 : vector<1x64xf32> to vector<128x64xf32>
    %206 = arith.addf %202, %205 : vector<128x64xf32>
    %cst_130 = arith.constant 0.000000e+00 : f32
    %207 = vector.broadcast %cst_130 : f32 to vector<128x64xf32>
    %208 = arith.maximumf %206, %207 : vector<128x64xf32>
    %cst_131 = arith.constant dense<0.000000e+00> : vector<128xf32>
    %209 = vector.multi_reduction <add>, %208, %cst_131 [1] : vector<128x64xf32> to vector<128xf32>
    %210 = vector.shape_cast %209 : vector<128xf32> to vector<128x1xf32>
    %211 = arith.mulf %208, %208 : vector<128x64xf32>
    %cst_132 = arith.constant dense<0.000000e+00> : vector<128xf32>
    %212 = vector.multi_reduction <add>, %211, %cst_132 [1] : vector<128x64xf32> to vector<128xf32>
    %213 = vector.shape_cast %212 : vector<128xf32> to vector<128x1xf32>
    %cst_133 = arith.constant 1.562500e-02 : f32
    %214 = vector.broadcast %cst_133 : f32 to vector<128x1xf32>
    %215 = arith.mulf %210, %214 : vector<128x1xf32>
    %cst_134 = arith.constant 1.562500e-02 : f32
    %216 = vector.broadcast %cst_134 : f32 to vector<128x1xf32>
    %217 = arith.mulf %213, %216 : vector<128x1xf32>
    %218 = arith.mulf %215, %215 : vector<128x1xf32>
    %219 = arith.subf %217, %218 : vector<128x1xf32>
    %220 = vector.broadcast %215 : vector<128x1xf32> to vector<128x64xf32>
    %221 = arith.subf %208, %220 : vector<128x64xf32>
    %cst_135 = arith.constant 9.99999974E-6 : f32
    %222 = vector.broadcast %cst_135 : f32 to vector<128x1xf32>
    %223 = arith.addf %219, %222 : vector<128x1xf32>
    %224 = math.rsqrt %223 : vector<128x1xf32>
    %c2_136 = arith.constant 2 : index
    %c0_137 = arith.constant 0 : index
    %c0_138 = arith.constant 0 : index
    %225 = vector.load %arg8[%c2_136, %c0_137, %c0_138] : memref<5x1x64xf32, #tpu.memory_space<vmem>>, vector<1x1x64xf32>
    %226 = vector.shape_cast %225 : vector<1x1x64xf32> to vector<1x64xf32>
    %227 = vector.broadcast %224 : vector<128x1xf32> to vector<128x64xf32>
    %228 = vector.broadcast %226 : vector<1x64xf32> to vector<128x64xf32>
    %229 = arith.mulf %227, %228 : vector<128x64xf32>
    %230 = arith.mulf %221, %229 : vector<128x64xf32>
    %c2_139 = arith.constant 2 : index
    %c0_140 = arith.constant 0 : index
    %c0_141 = arith.constant 0 : index
    %231 = vector.load %arg9[%c2_139, %c0_140, %c0_141] : memref<5x1x64xf32, #tpu.memory_space<vmem>>, vector<1x1x64xf32>
    %232 = vector.shape_cast %231 : vector<1x1x64xf32> to vector<1x64xf32>
    %233 = vector.broadcast %232 : vector<1x64xf32> to vector<128x64xf32>
    %234 = arith.addf %230, %233 : vector<128x64xf32>
    %c2_142 = arith.constant 2 : index
    %c2_143 = arith.constant 2 : index
    %c0_144 = arith.constant 0 : index
    %c0_145 = arith.constant 0 : index
    %235 = vector.load %arg10[%c2_142, %c2_143, %c0_144, %c0_145] : memref<5x5x64x64xbf16, #tpu.memory_space<vmem>>, vector<1x1x64x64xbf16>
    %236 = vector.shape_cast %235 : vector<1x1x64x64xbf16> to vector<64x64xbf16>
    %237 = arith.truncf %234 : vector<128x64xf32> to vector<128x64xbf16>
    %cst_146 = arith.constant dense<0.000000e+00> : vector<128x64xf32>
    %238 = tpu.matmul %237, %236, %cst_146 {dimension_numbers = #tpu.dot_dimension_numbers<[1], [0], [0], [1], [0, 0, 1, 1], [], []>} : vector<128x64xbf16>, vector<64x64xbf16>, vector<128x64xf32> -> vector<128x64xf32>
    %c8_i32 = arith.constant 8 : i32
    %239 = tpu.dynamic_rotate %234 by %c8_i32 dim 0 : vector<128x64xf32>, i32 -> vector<128x64xf32>
    %c8_i32_147 = arith.constant 8 : i32
    %240 = vector.broadcast %c8_i32_147 : i32 to vector<128x1xi32>
    %241 = arith.cmpi sge, %18, %240 : vector<128x1xi32>
    %cst_148 = arith.constant 0.000000e+00 : f32
    %242 = vector.shape_cast %241 : vector<128x1xi1> to vector<128x1xi1>
    %243 = vector.broadcast %242 : vector<128x1xi1> to vector<128x64xi1>
    %244 = vector.broadcast %cst_148 : f32 to vector<128x64xf32>
    %245 = arith.select %243, %239, %244 : vector<128x64xi1>, vector<128x64xf32>
    %c2_149 = arith.constant 2 : index
    %c0_150 = arith.constant 0 : index
    %c0_151 = arith.constant 0 : index
    %c0_152 = arith.constant 0 : index
    %246 = vector.load %arg10[%c2_149, %c0_150, %c0_151, %c0_152] : memref<5x5x64x64xbf16, #tpu.memory_space<vmem>>, vector<1x1x64x64xbf16>
    %247 = vector.shape_cast %246 : vector<1x1x64x64xbf16> to vector<64x64xbf16>
    %248 = arith.truncf %245 : vector<128x64xf32> to vector<128x64xbf16>
    %cst_153 = arith.constant dense<0.000000e+00> : vector<128x64xf32>
    %249 = tpu.matmul %248, %247, %cst_153 {dimension_numbers = #tpu.dot_dimension_numbers<[1], [0], [0], [1], [0, 0, 1, 1], [], []>} : vector<128x64xbf16>, vector<64x64xbf16>, vector<128x64xf32> -> vector<128x64xf32>
    %250 = arith.addf %238, %249 : vector<128x64xf32>
    %c4_i32_154 = arith.constant 4 : i32
    %251 = tpu.dynamic_rotate %234 by %c4_i32_154 dim 0 : vector<128x64xf32>, i32 -> vector<128x64xf32>
    %c4_i32_155 = arith.constant 4 : i32
    %252 = vector.broadcast %c4_i32_155 : i32 to vector<128x1xi32>
    %253 = arith.cmpi sge, %18, %252 : vector<128x1xi32>
    %cst_156 = arith.constant 0.000000e+00 : f32
    %254 = vector.shape_cast %253 : vector<128x1xi1> to vector<128x1xi1>
    %255 = vector.broadcast %254 : vector<128x1xi1> to vector<128x64xi1>
    %256 = vector.broadcast %cst_156 : f32 to vector<128x64xf32>
    %257 = arith.select %255, %251, %256 : vector<128x64xi1>, vector<128x64xf32>
    %c2_157 = arith.constant 2 : index
    %c1_158 = arith.constant 1 : index
    %c0_159 = arith.constant 0 : index
    %c0_160 = arith.constant 0 : index
    %258 = vector.load %arg10[%c2_157, %c1_158, %c0_159, %c0_160] : memref<5x5x64x64xbf16, #tpu.memory_space<vmem>>, vector<1x1x64x64xbf16>
    %259 = vector.shape_cast %258 : vector<1x1x64x64xbf16> to vector<64x64xbf16>
    %260 = arith.truncf %257 : vector<128x64xf32> to vector<128x64xbf16>
    %cst_161 = arith.constant dense<0.000000e+00> : vector<128x64xf32>
    %261 = tpu.matmul %260, %259, %cst_161 {dimension_numbers = #tpu.dot_dimension_numbers<[1], [0], [0], [1], [0, 0, 1, 1], [], []>} : vector<128x64xbf16>, vector<64x64xbf16>, vector<128x64xf32> -> vector<128x64xf32>
    %262 = arith.addf %250, %261 : vector<128x64xf32>
    %c124_i32_162 = arith.constant 124 : i32
    %263 = tpu.dynamic_rotate %234 by %c124_i32_162 dim 0 : vector<128x64xf32>, i32 -> vector<128x64xf32>
    %c60_i32_163 = arith.constant 60 : i32
    %264 = vector.broadcast %c60_i32_163 : i32 to vector<128x1xi32>
    %265 = arith.cmpi slt, %18, %264 : vector<128x1xi32>
    %cst_164 = arith.constant 0.000000e+00 : f32
    %266 = vector.shape_cast %265 : vector<128x1xi1> to vector<128x1xi1>
    %267 = vector.broadcast %266 : vector<128x1xi1> to vector<128x64xi1>
    %268 = vector.broadcast %cst_164 : f32 to vector<128x64xf32>
    %269 = arith.select %267, %263, %268 : vector<128x64xi1>, vector<128x64xf32>
    %c2_165 = arith.constant 2 : index
    %c3_166 = arith.constant 3 : index
    %c0_167 = arith.constant 0 : index
    %c0_168 = arith.constant 0 : index
    %270 = vector.load %arg10[%c2_165, %c3_166, %c0_167, %c0_168] : memref<5x5x64x64xbf16, #tpu.memory_space<vmem>>, vector<1x1x64x64xbf16>
    %271 = vector.shape_cast %270 : vector<1x1x64x64xbf16> to vector<64x64xbf16>
    %272 = arith.truncf %269 : vector<128x64xf32> to vector<128x64xbf16>
    %cst_169 = arith.constant dense<0.000000e+00> : vector<128x64xf32>
    %273 = tpu.matmul %272, %271, %cst_169 {dimension_numbers = #tpu.dot_dimension_numbers<[1], [0], [0], [1], [0, 0, 1, 1], [], []>} : vector<128x64xbf16>, vector<64x64xbf16>, vector<128x64xf32> -> vector<128x64xf32>
    %274 = arith.addf %262, %273 : vector<128x64xf32>
    %c120_i32 = arith.constant 120 : i32
    %275 = tpu.dynamic_rotate %234 by %c120_i32 dim 0 : vector<128x64xf32>, i32 -> vector<128x64xf32>
    %c56_i32 = arith.constant 56 : i32
    %276 = vector.broadcast %c56_i32 : i32 to vector<128x1xi32>
    %277 = arith.cmpi slt, %18, %276 : vector<128x1xi32>
    %cst_170 = arith.constant 0.000000e+00 : f32
    %278 = vector.shape_cast %277 : vector<128x1xi1> to vector<128x1xi1>
    %279 = vector.broadcast %278 : vector<128x1xi1> to vector<128x64xi1>
    %280 = vector.broadcast %cst_170 : f32 to vector<128x64xf32>
    %281 = arith.select %279, %275, %280 : vector<128x64xi1>, vector<128x64xf32>
    %c2_171 = arith.constant 2 : index
    %c4_172 = arith.constant 4 : index
    %c0_173 = arith.constant 0 : index
    %c0_174 = arith.constant 0 : index
    %282 = vector.load %arg10[%c2_171, %c4_172, %c0_173, %c0_174] : memref<5x5x64x64xbf16, #tpu.memory_space<vmem>>, vector<1x1x64x64xbf16>
    %283 = vector.shape_cast %282 : vector<1x1x64x64xbf16> to vector<64x64xbf16>
    %284 = arith.truncf %281 : vector<128x64xf32> to vector<128x64xbf16>
    %cst_175 = arith.constant dense<0.000000e+00> : vector<128x64xf32>
    %285 = tpu.matmul %284, %283, %cst_175 {dimension_numbers = #tpu.dot_dimension_numbers<[1], [0], [0], [1], [0, 0, 1, 1], [], []>} : vector<128x64xbf16>, vector<64x64xbf16>, vector<128x64xf32> -> vector<128x64xf32>
    %286 = arith.addf %274, %285 : vector<128x64xf32>
    %c2_176 = arith.constant 2 : index
    %c0_177 = arith.constant 0 : index
    %c0_178 = arith.constant 0 : index
    %287 = vector.load %arg11[%c2_176, %c0_177, %c0_178] : memref<5x1x64xf32, #tpu.memory_space<vmem>>, vector<1x1x64xf32>
    %288 = vector.shape_cast %287 : vector<1x1x64xf32> to vector<1x64xf32>
    %289 = vector.broadcast %288 : vector<1x64xf32> to vector<128x64xf32>
    %290 = arith.addf %286, %289 : vector<128x64xf32>
    %cst_179 = arith.constant 0.000000e+00 : f32
    %291 = vector.broadcast %cst_179 : f32 to vector<128x64xf32>
    %292 = arith.maximumf %290, %291 : vector<128x64xf32>
    %c2_180 = arith.constant 2 : index
    %c0_181 = arith.constant 0 : index
    %c0_182 = arith.constant 0 : index
    %293 = vector.load %arg12[%c2_180, %c0_181, %c0_182] : memref<5x64x128xbf16, #tpu.memory_space<vmem>>, vector<1x64x128xbf16>
    %294 = vector.shape_cast %293 : vector<1x64x128xbf16> to vector<64x128xbf16>
    %295 = arith.truncf %292 : vector<128x64xf32> to vector<128x64xbf16>
    %cst_183 = arith.constant dense<0.000000e+00> : vector<128x128xf32>
    %296 = tpu.matmul %295, %294, %cst_183 {dimension_numbers = #tpu.dot_dimension_numbers<[1], [0], [0], [1], [0, 0, 1, 1], [], []>} : vector<128x64xbf16>, vector<64x128xbf16>, vector<128x128xf32> -> vector<128x128xf32>
    %c2_184 = arith.constant 2 : index
    %c0_185 = arith.constant 0 : index
    %c0_186 = arith.constant 0 : index
    %297 = vector.load %arg13[%c2_184, %c0_185, %c0_186] : memref<5x1x128xf32, #tpu.memory_space<vmem>>, vector<1x1x128xf32>
    %298 = vector.shape_cast %297 : vector<1x1x128xf32> to vector<1x128xf32>
    %299 = vector.broadcast %298 : vector<1x128xf32> to vector<128x128xf32>
    %300 = arith.addf %296, %299 : vector<128x128xf32>
    %301 = arith.addf %300, %198 : vector<128x128xf32>
    %c3_187 = arith.constant 3 : index
    %c0_188 = arith.constant 0 : index
    %c0_189 = arith.constant 0 : index
    %302 = vector.load %arg6[%c3_187, %c0_188, %c0_189] : memref<5x128x64xbf16, #tpu.memory_space<vmem>>, vector<1x128x64xbf16>
    %303 = vector.shape_cast %302 : vector<1x128x64xbf16> to vector<128x64xbf16>
    %304 = arith.truncf %301 : vector<128x128xf32> to vector<128x128xbf16>
    %cst_190 = arith.constant dense<0.000000e+00> : vector<128x64xf32>
    %305 = tpu.matmul %304, %303, %cst_190 {dimension_numbers = #tpu.dot_dimension_numbers<[1], [0], [0], [1], [0, 0, 1, 1], [], []>} : vector<128x128xbf16>, vector<128x64xbf16>, vector<128x64xf32> -> vector<128x64xf32>
    %c3_191 = arith.constant 3 : index
    %c0_192 = arith.constant 0 : index
    %c0_193 = arith.constant 0 : index
    %306 = vector.load %arg7[%c3_191, %c0_192, %c0_193] : memref<5x1x64xf32, #tpu.memory_space<vmem>>, vector<1x1x64xf32>
    %307 = vector.shape_cast %306 : vector<1x1x64xf32> to vector<1x64xf32>
    %308 = vector.broadcast %307 : vector<1x64xf32> to vector<128x64xf32>
    %309 = arith.addf %305, %308 : vector<128x64xf32>
    %cst_194 = arith.constant 0.000000e+00 : f32
    %310 = vector.broadcast %cst_194 : f32 to vector<128x64xf32>
    %311 = arith.maximumf %309, %310 : vector<128x64xf32>
    %cst_195 = arith.constant dense<0.000000e+00> : vector<128xf32>
    %312 = vector.multi_reduction <add>, %311, %cst_195 [1] : vector<128x64xf32> to vector<128xf32>
    %313 = vector.shape_cast %312 : vector<128xf32> to vector<128x1xf32>
    %314 = arith.mulf %311, %311 : vector<128x64xf32>
    %cst_196 = arith.constant dense<0.000000e+00> : vector<128xf32>
    %315 = vector.multi_reduction <add>, %314, %cst_196 [1] : vector<128x64xf32> to vector<128xf32>
    %316 = vector.shape_cast %315 : vector<128xf32> to vector<128x1xf32>
    %cst_197 = arith.constant 1.562500e-02 : f32
    %317 = vector.broadcast %cst_197 : f32 to vector<128x1xf32>
    %318 = arith.mulf %313, %317 : vector<128x1xf32>
    %cst_198 = arith.constant 1.562500e-02 : f32
    %319 = vector.broadcast %cst_198 : f32 to vector<128x1xf32>
    %320 = arith.mulf %316, %319 : vector<128x1xf32>
    %321 = arith.mulf %318, %318 : vector<128x1xf32>
    %322 = arith.subf %320, %321 : vector<128x1xf32>
    %323 = vector.broadcast %318 : vector<128x1xf32> to vector<128x64xf32>
    %324 = arith.subf %311, %323 : vector<128x64xf32>
    %cst_199 = arith.constant 9.99999974E-6 : f32
    %325 = vector.broadcast %cst_199 : f32 to vector<128x1xf32>
    %326 = arith.addf %322, %325 : vector<128x1xf32>
    %327 = math.rsqrt %326 : vector<128x1xf32>
    %c3_200 = arith.constant 3 : index
    %c0_201 = arith.constant 0 : index
    %c0_202 = arith.constant 0 : index
    %328 = vector.load %arg8[%c3_200, %c0_201, %c0_202] : memref<5x1x64xf32, #tpu.memory_space<vmem>>, vector<1x1x64xf32>
    %329 = vector.shape_cast %328 : vector<1x1x64xf32> to vector<1x64xf32>
    %330 = vector.broadcast %327 : vector<128x1xf32> to vector<128x64xf32>
    %331 = vector.broadcast %329 : vector<1x64xf32> to vector<128x64xf32>
    %332 = arith.mulf %330, %331 : vector<128x64xf32>
    %333 = arith.mulf %324, %332 : vector<128x64xf32>
    %c3_203 = arith.constant 3 : index
    %c0_204 = arith.constant 0 : index
    %c0_205 = arith.constant 0 : index
    %334 = vector.load %arg9[%c3_203, %c0_204, %c0_205] : memref<5x1x64xf32, #tpu.memory_space<vmem>>, vector<1x1x64xf32>
    %335 = vector.shape_cast %334 : vector<1x1x64xf32> to vector<1x64xf32>
    %336 = vector.broadcast %335 : vector<1x64xf32> to vector<128x64xf32>
    %337 = arith.addf %333, %336 : vector<128x64xf32>
    %c3_206 = arith.constant 3 : index
    %c2_207 = arith.constant 2 : index
    %c0_208 = arith.constant 0 : index
    %c0_209 = arith.constant 0 : index
    %338 = vector.load %arg10[%c3_206, %c2_207, %c0_208, %c0_209] : memref<5x5x64x64xbf16, #tpu.memory_space<vmem>>, vector<1x1x64x64xbf16>
    %339 = vector.shape_cast %338 : vector<1x1x64x64xbf16> to vector<64x64xbf16>
    %340 = arith.truncf %337 : vector<128x64xf32> to vector<128x64xbf16>
    %cst_210 = arith.constant dense<0.000000e+00> : vector<128x64xf32>
    %341 = tpu.matmul %340, %339, %cst_210 {dimension_numbers = #tpu.dot_dimension_numbers<[1], [0], [0], [1], [0, 0, 1, 1], [], []>} : vector<128x64xbf16>, vector<64x64xbf16>, vector<128x64xf32> -> vector<128x64xf32>
    %c16_i32 = arith.constant 16 : i32
    %342 = tpu.dynamic_rotate %337 by %c16_i32 dim 0 : vector<128x64xf32>, i32 -> vector<128x64xf32>
    %c16_i32_211 = arith.constant 16 : i32
    %343 = vector.broadcast %c16_i32_211 : i32 to vector<128x1xi32>
    %344 = arith.cmpi sge, %18, %343 : vector<128x1xi32>
    %cst_212 = arith.constant 0.000000e+00 : f32
    %345 = vector.shape_cast %344 : vector<128x1xi1> to vector<128x1xi1>
    %346 = vector.broadcast %345 : vector<128x1xi1> to vector<128x64xi1>
    %347 = vector.broadcast %cst_212 : f32 to vector<128x64xf32>
    %348 = arith.select %346, %342, %347 : vector<128x64xi1>, vector<128x64xf32>
    %c3_213 = arith.constant 3 : index
    %c0_214 = arith.constant 0 : index
    %c0_215 = arith.constant 0 : index
    %c0_216 = arith.constant 0 : index
    %349 = vector.load %arg10[%c3_213, %c0_214, %c0_215, %c0_216] : memref<5x5x64x64xbf16, #tpu.memory_space<vmem>>, vector<1x1x64x64xbf16>
    %350 = vector.shape_cast %349 : vector<1x1x64x64xbf16> to vector<64x64xbf16>
    %351 = arith.truncf %348 : vector<128x64xf32> to vector<128x64xbf16>
    %cst_217 = arith.constant dense<0.000000e+00> : vector<128x64xf32>
    %352 = tpu.matmul %351, %350, %cst_217 {dimension_numbers = #tpu.dot_dimension_numbers<[1], [0], [0], [1], [0, 0, 1, 1], [], []>} : vector<128x64xbf16>, vector<64x64xbf16>, vector<128x64xf32> -> vector<128x64xf32>
    %353 = arith.addf %341, %352 : vector<128x64xf32>
    %c8_i32_218 = arith.constant 8 : i32
    %354 = tpu.dynamic_rotate %337 by %c8_i32_218 dim 0 : vector<128x64xf32>, i32 -> vector<128x64xf32>
    %c8_i32_219 = arith.constant 8 : i32
    %355 = vector.broadcast %c8_i32_219 : i32 to vector<128x1xi32>
    %356 = arith.cmpi sge, %18, %355 : vector<128x1xi32>
    %cst_220 = arith.constant 0.000000e+00 : f32
    %357 = vector.shape_cast %356 : vector<128x1xi1> to vector<128x1xi1>
    %358 = vector.broadcast %357 : vector<128x1xi1> to vector<128x64xi1>
    %359 = vector.broadcast %cst_220 : f32 to vector<128x64xf32>
    %360 = arith.select %358, %354, %359 : vector<128x64xi1>, vector<128x64xf32>
    %c3_221 = arith.constant 3 : index
    %c1_222 = arith.constant 1 : index
    %c0_223 = arith.constant 0 : index
    %c0_224 = arith.constant 0 : index
    %361 = vector.load %arg10[%c3_221, %c1_222, %c0_223, %c0_224] : memref<5x5x64x64xbf16, #tpu.memory_space<vmem>>, vector<1x1x64x64xbf16>
    %362 = vector.shape_cast %361 : vector<1x1x64x64xbf16> to vector<64x64xbf16>
    %363 = arith.truncf %360 : vector<128x64xf32> to vector<128x64xbf16>
    %cst_225 = arith.constant dense<0.000000e+00> : vector<128x64xf32>
    %364 = tpu.matmul %363, %362, %cst_225 {dimension_numbers = #tpu.dot_dimension_numbers<[1], [0], [0], [1], [0, 0, 1, 1], [], []>} : vector<128x64xbf16>, vector<64x64xbf16>, vector<128x64xf32> -> vector<128x64xf32>
    %365 = arith.addf %353, %364 : vector<128x64xf32>
    %c120_i32_226 = arith.constant 120 : i32
    %366 = tpu.dynamic_rotate %337 by %c120_i32_226 dim 0 : vector<128x64xf32>, i32 -> vector<128x64xf32>
    %c56_i32_227 = arith.constant 56 : i32
    %367 = vector.broadcast %c56_i32_227 : i32 to vector<128x1xi32>
    %368 = arith.cmpi slt, %18, %367 : vector<128x1xi32>
    %cst_228 = arith.constant 0.000000e+00 : f32
    %369 = vector.shape_cast %368 : vector<128x1xi1> to vector<128x1xi1>
    %370 = vector.broadcast %369 : vector<128x1xi1> to vector<128x64xi1>
    %371 = vector.broadcast %cst_228 : f32 to vector<128x64xf32>
    %372 = arith.select %370, %366, %371 : vector<128x64xi1>, vector<128x64xf32>
    %c3_229 = arith.constant 3 : index
    %c3_230 = arith.constant 3 : index
    %c0_231 = arith.constant 0 : index
    %c0_232 = arith.constant 0 : index
    %373 = vector.load %arg10[%c3_229, %c3_230, %c0_231, %c0_232] : memref<5x5x64x64xbf16, #tpu.memory_space<vmem>>, vector<1x1x64x64xbf16>
    %374 = vector.shape_cast %373 : vector<1x1x64x64xbf16> to vector<64x64xbf16>
    %375 = arith.truncf %372 : vector<128x64xf32> to vector<128x64xbf16>
    %cst_233 = arith.constant dense<0.000000e+00> : vector<128x64xf32>
    %376 = tpu.matmul %375, %374, %cst_233 {dimension_numbers = #tpu.dot_dimension_numbers<[1], [0], [0], [1], [0, 0, 1, 1], [], []>} : vector<128x64xbf16>, vector<64x64xbf16>, vector<128x64xf32> -> vector<128x64xf32>
    %377 = arith.addf %365, %376 : vector<128x64xf32>
    %c112_i32 = arith.constant 112 : i32
    %378 = tpu.dynamic_rotate %337 by %c112_i32 dim 0 : vector<128x64xf32>, i32 -> vector<128x64xf32>
    %c48_i32 = arith.constant 48 : i32
    %379 = vector.broadcast %c48_i32 : i32 to vector<128x1xi32>
    %380 = arith.cmpi slt, %18, %379 : vector<128x1xi32>
    %cst_234 = arith.constant 0.000000e+00 : f32
    %381 = vector.shape_cast %380 : vector<128x1xi1> to vector<128x1xi1>
    %382 = vector.broadcast %381 : vector<128x1xi1> to vector<128x64xi1>
    %383 = vector.broadcast %cst_234 : f32 to vector<128x64xf32>
    %384 = arith.select %382, %378, %383 : vector<128x64xi1>, vector<128x64xf32>
    %c3_235 = arith.constant 3 : index
    %c4_236 = arith.constant 4 : index
    %c0_237 = arith.constant 0 : index
    %c0_238 = arith.constant 0 : index
    %385 = vector.load %arg10[%c3_235, %c4_236, %c0_237, %c0_238] : memref<5x5x64x64xbf16, #tpu.memory_space<vmem>>, vector<1x1x64x64xbf16>
    %386 = vector.shape_cast %385 : vector<1x1x64x64xbf16> to vector<64x64xbf16>
    %387 = arith.truncf %384 : vector<128x64xf32> to vector<128x64xbf16>
    %cst_239 = arith.constant dense<0.000000e+00> : vector<128x64xf32>
    %388 = tpu.matmul %387, %386, %cst_239 {dimension_numbers = #tpu.dot_dimension_numbers<[1], [0], [0], [1], [0, 0, 1, 1], [], []>} : vector<128x64xbf16>, vector<64x64xbf16>, vector<128x64xf32> -> vector<128x64xf32>
    %389 = arith.addf %377, %388 : vector<128x64xf32>
    %c3_240 = arith.constant 3 : index
    %c0_241 = arith.constant 0 : index
    %c0_242 = arith.constant 0 : index
    %390 = vector.load %arg11[%c3_240, %c0_241, %c0_242] : memref<5x1x64xf32, #tpu.memory_space<vmem>>, vector<1x1x64xf32>
    %391 = vector.shape_cast %390 : vector<1x1x64xf32> to vector<1x64xf32>
    %392 = vector.broadcast %391 : vector<1x64xf32> to vector<128x64xf32>
    %393 = arith.addf %389, %392 : vector<128x64xf32>
    %cst_243 = arith.constant 0.000000e+00 : f32
    %394 = vector.broadcast %cst_243 : f32 to vector<128x64xf32>
    %395 = arith.maximumf %393, %394 : vector<128x64xf32>
    %c3_244 = arith.constant 3 : index
    %c0_245 = arith.constant 0 : index
    %c0_246 = arith.constant 0 : index
    %396 = vector.load %arg12[%c3_244, %c0_245, %c0_246] : memref<5x64x128xbf16, #tpu.memory_space<vmem>>, vector<1x64x128xbf16>
    %397 = vector.shape_cast %396 : vector<1x64x128xbf16> to vector<64x128xbf16>
    %398 = arith.truncf %395 : vector<128x64xf32> to vector<128x64xbf16>
    %cst_247 = arith.constant dense<0.000000e+00> : vector<128x128xf32>
    %399 = tpu.matmul %398, %397, %cst_247 {dimension_numbers = #tpu.dot_dimension_numbers<[1], [0], [0], [1], [0, 0, 1, 1], [], []>} : vector<128x64xbf16>, vector<64x128xbf16>, vector<128x128xf32> -> vector<128x128xf32>
    %c3_248 = arith.constant 3 : index
    %c0_249 = arith.constant 0 : index
    %c0_250 = arith.constant 0 : index
    %400 = vector.load %arg13[%c3_248, %c0_249, %c0_250] : memref<5x1x128xf32, #tpu.memory_space<vmem>>, vector<1x1x128xf32>
    %401 = vector.shape_cast %400 : vector<1x1x128xf32> to vector<1x128xf32>
    %402 = vector.broadcast %401 : vector<1x128xf32> to vector<128x128xf32>
    %403 = arith.addf %399, %402 : vector<128x128xf32>
    %404 = arith.addf %403, %301 : vector<128x128xf32>
    %c4_251 = arith.constant 4 : index
    %c0_252 = arith.constant 0 : index
    %c0_253 = arith.constant 0 : index
    %405 = vector.load %arg6[%c4_251, %c0_252, %c0_253] : memref<5x128x64xbf16, #tpu.memory_space<vmem>>, vector<1x128x64xbf16>
    %406 = vector.shape_cast %405 : vector<1x128x64xbf16> to vector<128x64xbf16>
    %407 = arith.truncf %404 : vector<128x128xf32> to vector<128x128xbf16>
    %cst_254 = arith.constant dense<0.000000e+00> : vector<128x64xf32>
    %408 = tpu.matmul %407, %406, %cst_254 {dimension_numbers = #tpu.dot_dimension_numbers<[1], [0], [0], [1], [0, 0, 1, 1], [], []>} : vector<128x128xbf16>, vector<128x64xbf16>, vector<128x64xf32> -> vector<128x64xf32>
    %c4_255 = arith.constant 4 : index
    %c0_256 = arith.constant 0 : index
    %c0_257 = arith.constant 0 : index
    %409 = vector.load %arg7[%c4_255, %c0_256, %c0_257] : memref<5x1x64xf32, #tpu.memory_space<vmem>>, vector<1x1x64xf32>
    %410 = vector.shape_cast %409 : vector<1x1x64xf32> to vector<1x64xf32>
    %411 = vector.broadcast %410 : vector<1x64xf32> to vector<128x64xf32>
    %412 = arith.addf %408, %411 : vector<128x64xf32>
    %cst_258 = arith.constant 0.000000e+00 : f32
    %413 = vector.broadcast %cst_258 : f32 to vector<128x64xf32>
    %414 = arith.maximumf %412, %413 : vector<128x64xf32>
    %cst_259 = arith.constant dense<0.000000e+00> : vector<128xf32>
    %415 = vector.multi_reduction <add>, %414, %cst_259 [1] : vector<128x64xf32> to vector<128xf32>
    %416 = vector.shape_cast %415 : vector<128xf32> to vector<128x1xf32>
    %417 = arith.mulf %414, %414 : vector<128x64xf32>
    %cst_260 = arith.constant dense<0.000000e+00> : vector<128xf32>
    %418 = vector.multi_reduction <add>, %417, %cst_260 [1] : vector<128x64xf32> to vector<128xf32>
    %419 = vector.shape_cast %418 : vector<128xf32> to vector<128x1xf32>
    %cst_261 = arith.constant 1.562500e-02 : f32
    %420 = vector.broadcast %cst_261 : f32 to vector<128x1xf32>
    %421 = arith.mulf %416, %420 : vector<128x1xf32>
    %cst_262 = arith.constant 1.562500e-02 : f32
    %422 = vector.broadcast %cst_262 : f32 to vector<128x1xf32>
    %423 = arith.mulf %419, %422 : vector<128x1xf32>
    %424 = arith.mulf %421, %421 : vector<128x1xf32>
    %425 = arith.subf %423, %424 : vector<128x1xf32>
    %426 = vector.broadcast %421 : vector<128x1xf32> to vector<128x64xf32>
    %427 = arith.subf %414, %426 : vector<128x64xf32>
    %cst_263 = arith.constant 9.99999974E-6 : f32
    %428 = vector.broadcast %cst_263 : f32 to vector<128x1xf32>
    %429 = arith.addf %425, %428 : vector<128x1xf32>
    %430 = math.rsqrt %429 : vector<128x1xf32>
    %c4_264 = arith.constant 4 : index
    %c0_265 = arith.constant 0 : index
    %c0_266 = arith.constant 0 : index
    %431 = vector.load %arg8[%c4_264, %c0_265, %c0_266] : memref<5x1x64xf32, #tpu.memory_space<vmem>>, vector<1x1x64xf32>
    %432 = vector.shape_cast %431 : vector<1x1x64xf32> to vector<1x64xf32>
    %433 = vector.broadcast %430 : vector<128x1xf32> to vector<128x64xf32>
    %434 = vector.broadcast %432 : vector<1x64xf32> to vector<128x64xf32>
    %435 = arith.mulf %433, %434 : vector<128x64xf32>
    %436 = arith.mulf %427, %435 : vector<128x64xf32>
    %c4_267 = arith.constant 4 : index
    %c0_268 = arith.constant 0 : index
    %c0_269 = arith.constant 0 : index
    %437 = vector.load %arg9[%c4_267, %c0_268, %c0_269] : memref<5x1x64xf32, #tpu.memory_space<vmem>>, vector<1x1x64xf32>
    %438 = vector.shape_cast %437 : vector<1x1x64xf32> to vector<1x64xf32>
    %439 = vector.broadcast %438 : vector<1x64xf32> to vector<128x64xf32>
    %440 = arith.addf %436, %439 : vector<128x64xf32>
    %c4_270 = arith.constant 4 : index
    %c2_271 = arith.constant 2 : index
    %c0_272 = arith.constant 0 : index
    %c0_273 = arith.constant 0 : index
    %441 = vector.load %arg10[%c4_270, %c2_271, %c0_272, %c0_273] : memref<5x5x64x64xbf16, #tpu.memory_space<vmem>>, vector<1x1x64x64xbf16>
    %442 = vector.shape_cast %441 : vector<1x1x64x64xbf16> to vector<64x64xbf16>
    %443 = arith.truncf %440 : vector<128x64xf32> to vector<128x64xbf16>
    %cst_274 = arith.constant dense<0.000000e+00> : vector<128x64xf32>
    %444 = tpu.matmul %443, %442, %cst_274 {dimension_numbers = #tpu.dot_dimension_numbers<[1], [0], [0], [1], [0, 0, 1, 1], [], []>} : vector<128x64xbf16>, vector<64x64xbf16>, vector<128x64xf32> -> vector<128x64xf32>
    %c32_i32 = arith.constant 32 : i32
    %445 = tpu.dynamic_rotate %440 by %c32_i32 dim 0 : vector<128x64xf32>, i32 -> vector<128x64xf32>
    %c32_i32_275 = arith.constant 32 : i32
    %446 = vector.broadcast %c32_i32_275 : i32 to vector<128x1xi32>
    %447 = arith.cmpi sge, %18, %446 : vector<128x1xi32>
    %cst_276 = arith.constant 0.000000e+00 : f32
    %448 = vector.shape_cast %447 : vector<128x1xi1> to vector<128x1xi1>
    %449 = vector.broadcast %448 : vector<128x1xi1> to vector<128x64xi1>
    %450 = vector.broadcast %cst_276 : f32 to vector<128x64xf32>
    %451 = arith.select %449, %445, %450 : vector<128x64xi1>, vector<128x64xf32>
    %c4_277 = arith.constant 4 : index
    %c0_278 = arith.constant 0 : index
    %c0_279 = arith.constant 0 : index
    %c0_280 = arith.constant 0 : index
    %452 = vector.load %arg10[%c4_277, %c0_278, %c0_279, %c0_280] : memref<5x5x64x64xbf16, #tpu.memory_space<vmem>>, vector<1x1x64x64xbf16>
    %453 = vector.shape_cast %452 : vector<1x1x64x64xbf16> to vector<64x64xbf16>
    %454 = arith.truncf %451 : vector<128x64xf32> to vector<128x64xbf16>
    %cst_281 = arith.constant dense<0.000000e+00> : vector<128x64xf32>
    %455 = tpu.matmul %454, %453, %cst_281 {dimension_numbers = #tpu.dot_dimension_numbers<[1], [0], [0], [1], [0, 0, 1, 1], [], []>} : vector<128x64xbf16>, vector<64x64xbf16>, vector<128x64xf32> -> vector<128x64xf32>
    %456 = arith.addf %444, %455 : vector<128x64xf32>
    %c16_i32_282 = arith.constant 16 : i32
    %457 = tpu.dynamic_rotate %440 by %c16_i32_282 dim 0 : vector<128x64xf32>, i32 -> vector<128x64xf32>
    %c16_i32_283 = arith.constant 16 : i32
    %458 = vector.broadcast %c16_i32_283 : i32 to vector<128x1xi32>
    %459 = arith.cmpi sge, %18, %458 : vector<128x1xi32>
    %cst_284 = arith.constant 0.000000e+00 : f32
    %460 = vector.shape_cast %459 : vector<128x1xi1> to vector<128x1xi1>
    %461 = vector.broadcast %460 : vector<128x1xi1> to vector<128x64xi1>
    %462 = vector.broadcast %cst_284 : f32 to vector<128x64xf32>
    %463 = arith.select %461, %457, %462 : vector<128x64xi1>, vector<128x64xf32>
    %c4_285 = arith.constant 4 : index
    %c1_286 = arith.constant 1 : index
    %c0_287 = arith.constant 0 : index
    %c0_288 = arith.constant 0 : index
    %464 = vector.load %arg10[%c4_285, %c1_286, %c0_287, %c0_288] : memref<5x5x64x64xbf16, #tpu.memory_space<vmem>>, vector<1x1x64x64xbf16>
    %465 = vector.shape_cast %464 : vector<1x1x64x64xbf16> to vector<64x64xbf16>
    %466 = arith.truncf %463 : vector<128x64xf32> to vector<128x64xbf16>
    %cst_289 = arith.constant dense<0.000000e+00> : vector<128x64xf32>
    %467 = tpu.matmul %466, %465, %cst_289 {dimension_numbers = #tpu.dot_dimension_numbers<[1], [0], [0], [1], [0, 0, 1, 1], [], []>} : vector<128x64xbf16>, vector<64x64xbf16>, vector<128x64xf32> -> vector<128x64xf32>
    %468 = arith.addf %456, %467 : vector<128x64xf32>
    %c112_i32_290 = arith.constant 112 : i32
    %469 = tpu.dynamic_rotate %440 by %c112_i32_290 dim 0 : vector<128x64xf32>, i32 -> vector<128x64xf32>
    %c48_i32_291 = arith.constant 48 : i32
    %470 = vector.broadcast %c48_i32_291 : i32 to vector<128x1xi32>
    %471 = arith.cmpi slt, %18, %470 : vector<128x1xi32>
    %cst_292 = arith.constant 0.000000e+00 : f32
    %472 = vector.shape_cast %471 : vector<128x1xi1> to vector<128x1xi1>
    %473 = vector.broadcast %472 : vector<128x1xi1> to vector<128x64xi1>
    %474 = vector.broadcast %cst_292 : f32 to vector<128x64xf32>
    %475 = arith.select %473, %469, %474 : vector<128x64xi1>, vector<128x64xf32>
    %c4_293 = arith.constant 4 : index
    %c3_294 = arith.constant 3 : index
    %c0_295 = arith.constant 0 : index
    %c0_296 = arith.constant 0 : index
    %476 = vector.load %arg10[%c4_293, %c3_294, %c0_295, %c0_296] : memref<5x5x64x64xbf16, #tpu.memory_space<vmem>>, vector<1x1x64x64xbf16>
    %477 = vector.shape_cast %476 : vector<1x1x64x64xbf16> to vector<64x64xbf16>
    %478 = arith.truncf %475 : vector<128x64xf32> to vector<128x64xbf16>
    %cst_297 = arith.constant dense<0.000000e+00> : vector<128x64xf32>
    %479 = tpu.matmul %478, %477, %cst_297 {dimension_numbers = #tpu.dot_dimension_numbers<[1], [0], [0], [1], [0, 0, 1, 1], [], []>} : vector<128x64xbf16>, vector<64x64xbf16>, vector<128x64xf32> -> vector<128x64xf32>
    %480 = arith.addf %468, %479 : vector<128x64xf32>
    %c96_i32 = arith.constant 96 : i32
    %481 = tpu.dynamic_rotate %440 by %c96_i32 dim 0 : vector<128x64xf32>, i32 -> vector<128x64xf32>
    %c32_i32_298 = arith.constant 32 : i32
    %482 = vector.broadcast %c32_i32_298 : i32 to vector<128x1xi32>
    %483 = arith.cmpi slt, %18, %482 : vector<128x1xi32>
    %cst_299 = arith.constant 0.000000e+00 : f32
    %484 = vector.shape_cast %483 : vector<128x1xi1> to vector<128x1xi1>
    %485 = vector.broadcast %484 : vector<128x1xi1> to vector<128x64xi1>
    %486 = vector.broadcast %cst_299 : f32 to vector<128x64xf32>
    %487 = arith.select %485, %481, %486 : vector<128x64xi1>, vector<128x64xf32>
    %c4_300 = arith.constant 4 : index
    %c4_301 = arith.constant 4 : index
    %c0_302 = arith.constant 0 : index
    %c0_303 = arith.constant 0 : index
    %488 = vector.load %arg10[%c4_300, %c4_301, %c0_302, %c0_303] : memref<5x5x64x64xbf16, #tpu.memory_space<vmem>>, vector<1x1x64x64xbf16>
    %489 = vector.shape_cast %488 : vector<1x1x64x64xbf16> to vector<64x64xbf16>
    %490 = arith.truncf %487 : vector<128x64xf32> to vector<128x64xbf16>
    %cst_304 = arith.constant dense<0.000000e+00> : vector<128x64xf32>
    %491 = tpu.matmul %490, %489, %cst_304 {dimension_numbers = #tpu.dot_dimension_numbers<[1], [0], [0], [1], [0, 0, 1, 1], [], []>} : vector<128x64xbf16>, vector<64x64xbf16>, vector<128x64xf32> -> vector<128x64xf32>
    %492 = arith.addf %480, %491 : vector<128x64xf32>
    %c4_305 = arith.constant 4 : index
    %c0_306 = arith.constant 0 : index
    %c0_307 = arith.constant 0 : index
    %493 = vector.load %arg11[%c4_305, %c0_306, %c0_307] : memref<5x1x64xf32, #tpu.memory_space<vmem>>, vector<1x1x64xf32>
    %494 = vector.shape_cast %493 : vector<1x1x64xf32> to vector<1x64xf32>
    %495 = vector.broadcast %494 : vector<1x64xf32> to vector<128x64xf32>
    %496 = arith.addf %492, %495 : vector<128x64xf32>
    %cst_308 = arith.constant 0.000000e+00 : f32
    %497 = vector.broadcast %cst_308 : f32 to vector<128x64xf32>
    %498 = arith.maximumf %496, %497 : vector<128x64xf32>
    %c4_309 = arith.constant 4 : index
    %c0_310 = arith.constant 0 : index
    %c0_311 = arith.constant 0 : index
    %499 = vector.load %arg12[%c4_309, %c0_310, %c0_311] : memref<5x64x128xbf16, #tpu.memory_space<vmem>>, vector<1x64x128xbf16>
    %500 = vector.shape_cast %499 : vector<1x64x128xbf16> to vector<64x128xbf16>
    %501 = arith.truncf %498 : vector<128x64xf32> to vector<128x64xbf16>
    %cst_312 = arith.constant dense<0.000000e+00> : vector<128x128xf32>
    %502 = tpu.matmul %501, %500, %cst_312 {dimension_numbers = #tpu.dot_dimension_numbers<[1], [0], [0], [1], [0, 0, 1, 1], [], []>} : vector<128x64xbf16>, vector<64x128xbf16>, vector<128x128xf32> -> vector<128x128xf32>
    %c4_313 = arith.constant 4 : index
    %c0_314 = arith.constant 0 : index
    %c0_315 = arith.constant 0 : index
    %503 = vector.load %arg13[%c4_313, %c0_314, %c0_315] : memref<5x1x128xf32, #tpu.memory_space<vmem>>, vector<1x1x128xf32>
    %504 = vector.shape_cast %503 : vector<1x1x128xf32> to vector<1x128xf32>
    %505 = vector.broadcast %504 : vector<1x128xf32> to vector<128x128xf32>
    %506 = arith.addf %502, %505 : vector<128x128xf32>
    %507 = arith.addf %506, %404 : vector<128x128xf32>
    %c0_316 = arith.constant 0 : index
    %c0_317 = arith.constant 0 : index
    %508 = vector.load %arg14[%c0_316, %c0_317] : memref<128x32xbf16, #tpu.memory_space<vmem>>, vector<128x32xbf16>
    %509 = arith.truncf %507 : vector<128x128xf32> to vector<128x128xbf16>
    %cst_318 = arith.constant dense<0.000000e+00> : vector<128x32xf32>
    %510 = tpu.matmul %509, %508, %cst_318 {dimension_numbers = #tpu.dot_dimension_numbers<[1], [0], [0], [1], [0, 0, 1, 1], [], []>} : vector<128x128xbf16>, vector<128x32xbf16>, vector<128x32xf32> -> vector<128x32xf32>
    %c0_319 = arith.constant 0 : index
    %c0_320 = arith.constant 0 : index
    %511 = vector.load %arg15[%c0_319, %c0_320] : memref<1x32xf32, #tpu.memory_space<vmem>>, vector<1x32xf32>
    %512 = vector.broadcast %511 : vector<1x32xf32> to vector<128x32xf32>
    %513 = arith.addf %510, %512 : vector<128x32xf32>
    %cst_321 = arith.constant 0.000000e+00 : f32
    %514 = vector.broadcast %cst_321 : f32 to vector<128x32xf32>
    %515 = arith.maximumf %513, %514 : vector<128x32xf32>
    %c0_322 = arith.constant 0 : index
    %c0_323 = arith.constant 0 : index
    %516 = vector.load %arg16[%c0_322, %c0_323] : memref<32x10xbf16, #tpu.memory_space<vmem>>, vector<32x10xbf16>
    %517 = arith.truncf %515 : vector<128x32xf32> to vector<128x32xbf16>
    %cst_324 = arith.constant dense<0.000000e+00> : vector<128x10xf32>
    %518 = tpu.matmul %517, %516, %cst_324 {dimension_numbers = #tpu.dot_dimension_numbers<[1], [0], [0], [1], [0, 0, 1, 1], [], []>} : vector<128x32xbf16>, vector<32x10xbf16>, vector<128x10xf32> -> vector<128x10xf32>
    %c0_325 = arith.constant 0 : index
    %c0_326 = arith.constant 0 : index
    %519 = vector.load %arg17[%c0_325, %c0_326] : memref<1x10xf32, #tpu.memory_space<vmem>>, vector<1x10xf32>
    %520 = vector.broadcast %519 : vector<1x10xf32> to vector<128x10xf32>
    %521 = arith.addf %518, %520 : vector<128x10xf32>
    %c0_327 = arith.constant 0 : index
    %c0_328 = arith.constant 0 : index
    %c0_329 = arith.constant 0 : index
    %522 = vector.load %arg18[%c0_327, %c0_328, %c0_329] : memref<1x128x10xf32, #tpu.memory_space<vmem>>, vector<1x128x10xf32>
    %523 = vector.shape_cast %522 : vector<1x128x10xf32> to vector<128x10xf32>
    %524 = vector.shape_cast %521 : vector<128x10xf32> to vector<1x128x10xf32>
    tpu.vector_store %arg18[%c0_327, %c0_328, %c0_329], %524 {strides = array<i32>} : memref<1x128x10xf32, #tpu.memory_space<vmem>>, vector<1x128x10xf32>,
    return
  }
  func.func @transform_0(%arg0: i32) -> (i32, i32, i32) {
    %c0_i32 = arith.constant 0 : i32
    %c0_i32_0 = arith.constant 0 : i32
    %c0_i32_1 = arith.constant 0 : i32
    return %arg0, %c0_i32, %c0_i32_0 : i32, i32, i32
  }
  func.func @transform_1(%arg0: i32) -> (i32, i32) {
    %c0_i32 = arith.constant 0 : i32
    %c0_i32_0 = arith.constant 0 : i32
    %c0_i32_1 = arith.constant 0 : i32
    return %c0_i32, %c0_i32_0 : i32, i32
  }
  func.func @transform_2(%arg0: i32) -> (i32, i32) {
    %c0_i32 = arith.constant 0 : i32
    %c0_i32_0 = arith.constant 0 : i32
    %c0_i32_1 = arith.constant 0 : i32
    return %c0_i32, %c0_i32_0 : i32, i32
  }
  func.func @transform_3(%arg0: i32) -> (i32, i32) {
    %c0_i32 = arith.constant 0 : i32
    %c0_i32_0 = arith.constant 0 : i32
    %c0_i32_1 = arith.constant 0 : i32
    return %c0_i32, %c0_i32_0 : i32, i32
  }
  func.func @transform_4(%arg0: i32) -> (i32, i32) {
    %c0_i32 = arith.constant 0 : i32
    %c0_i32_0 = arith.constant 0 : i32
    %c0_i32_1 = arith.constant 0 : i32
    return %c0_i32, %c0_i32_0 : i32, i32
  }
  func.func @transform_5(%arg0: i32) -> (i32, i32, i32) {
    %c0_i32 = arith.constant 0 : i32
    %c0_i32_0 = arith.constant 0 : i32
    %c0_i32_1 = arith.constant 0 : i32
    %c0_i32_2 = arith.constant 0 : i32
    return %c0_i32, %c0_i32_0, %c0_i32_1 : i32, i32, i32
  }
  func.func @transform_6(%arg0: i32) -> (i32, i32, i32) {
    %c0_i32 = arith.constant 0 : i32
    %c0_i32_0 = arith.constant 0 : i32
    %c0_i32_1 = arith.constant 0 : i32
    %c0_i32_2 = arith.constant 0 : i32
    return %c0_i32, %c0_i32_0, %c0_i32_1 : i32, i32, i32
  }
  func.func @transform_7(%arg0: i32) -> (i32, i32, i32) {
    %c0_i32 = arith.constant 0 : i32
    %c0_i32_0 = arith.constant 0 : i32
    %c0_i32_1 = arith.constant 0 : i32
    %c0_i32_2 = arith.constant 0 : i32
    return %c0_i32, %c0_i32_0, %c0_i32_1 : i32, i32, i32
  }
  func.func @transform_8(%arg0: i32) -> (i32, i32, i32) {
    %c0_i32 = arith.constant 0 : i32
    %c0_i32_0 = arith.constant 0 : i32
    %c0_i32_1 = arith.constant 0 : i32
    %c0_i32_2 = arith.constant 0 : i32
    return %c0_i32, %c0_i32_0, %c0_i32_1 : i32, i32, i32
  }
  func.func @transform_9(%arg0: i32) -> (i32, i32, i32, i32) {
    %c0_i32 = arith.constant 0 : i32
    %c0_i32_0 = arith.constant 0 : i32
    %c0_i32_1 = arith.constant 0 : i32
    %c0_i32_2 = arith.constant 0 : i32
    %c0_i32_3 = arith.constant 0 : i32
    return %c0_i32, %c0_i32_0, %c0_i32_1, %c0_i32_2 : i32, i32, i32, i32
  }
  func.func @transform_10(%arg0: i32) -> (i32, i32, i32) {
    %c0_i32 = arith.constant 0 : i32
    %c0_i32_0 = arith.constant 0 : i32
    %c0_i32_1 = arith.constant 0 : i32
    %c0_i32_2 = arith.constant 0 : i32
    return %c0_i32, %c0_i32_0, %c0_i32_1 : i32, i32, i32
  }
  func.func @transform_11(%arg0: i32) -> (i32, i32, i32) {
    %c0_i32 = arith.constant 0 : i32
    %c0_i32_0 = arith.constant 0 : i32
    %c0_i32_1 = arith.constant 0 : i32
    %c0_i32_2 = arith.constant 0 : i32
    return %c0_i32, %c0_i32_0, %c0_i32_1 : i32, i32, i32
  }
  func.func @transform_12(%arg0: i32) -> (i32, i32, i32) {
    %c0_i32 = arith.constant 0 : i32
    %c0_i32_0 = arith.constant 0 : i32
    %c0_i32_1 = arith.constant 0 : i32
    %c0_i32_2 = arith.constant 0 : i32
    return %c0_i32, %c0_i32_0, %c0_i32_1 : i32, i32, i32
  }
  func.func @transform_13(%arg0: i32) -> (i32, i32) {
    %c0_i32 = arith.constant 0 : i32
    %c0_i32_0 = arith.constant 0 : i32
    %c0_i32_1 = arith.constant 0 : i32
    return %c0_i32, %c0_i32_0 : i32, i32
  }
  func.func @transform_14(%arg0: i32) -> (i32, i32) {
    %c0_i32 = arith.constant 0 : i32
    %c0_i32_0 = arith.constant 0 : i32
    %c0_i32_1 = arith.constant 0 : i32
    return %c0_i32, %c0_i32_0 : i32, i32
  }
  func.func @transform_15(%arg0: i32) -> (i32, i32) {
    %c0_i32 = arith.constant 0 : i32
    %c0_i32_0 = arith.constant 0 : i32
    %c0_i32_1 = arith.constant 0 : i32
    return %c0_i32, %c0_i32_0 : i32, i32
  }
  func.func @transform_16(%arg0: i32) -> (i32, i32) {
    %c0_i32 = arith.constant 0 : i32
    %c0_i32_0 = arith.constant 0 : i32
    %c0_i32_1 = arith.constant 0 : i32
    return %c0_i32, %c0_i32_0 : i32, i32
  }
  func.func @transform_17(%arg0: i32) -> (i32, i32, i32) {
    %c0_i32 = arith.constant 0 : i32
    %c0_i32_0 = arith.constant 0 : i32
    %c0_i32_1 = arith.constant 0 : i32
    return %arg0, %c0_i32, %c0_i32_0 : i32, i32, i32
  }
}

</mosaic_0001>

<bundles_post_ra>
// kernel: tpu_custom_call.1
= control target key start
LH: loop header
LB: loop body
LE: loop exit
PB: predicated region body
PF: predicated region fallthrough
CT: control target
= control target key end

     0   :  { %s15573_s0 = inlined_call_operand.vmem [shape: f32[1,128,10], index: 0, kind: input, shape index: {}]   ;;  %s15574_s1 = inlined_call_operand.vmem [shape: bf16[10,32], index: 1, kind: input, shape index: {}]   ;;  %s15575_s2 = inlined_call_operand.vmem [shape: f32[1,32], index: 2, kind: input, shape index: {}]   ;;  %s15576_s3 = inlined_call_operand.vmem [shape: bf16[32,128], index: 3, kind: input, shape index: {}]   ;;  %s15577_s4 = inlined_call_operand.vmem [shape: f32[1,128], index: 4, kind: input, shape index: {}]   ;;  %s15578_s5 = inlined_call_operand.vmem [shape: bf16[5,128,64], index: 5, kind: input, shape index: {}]   ;;  %s15579_s6 = inlined_call_operand.vmem [shape: f32[5,1,64], index: 6, kind: input, shape index: {}]   ;;  %s15580_s7 = inlined_call_operand.vmem [shape: f32[5,1,64], index: 7, kind: input, shape index: {}]   ;;  %s15581_s8 = inlined_call_operand.vmem [shape: f32[5,1,64], index: 8, kind: input, shape index: {}]   ;;  %s15582_s9 = inlined_call_operand.hbm [shape: bf16[5,5,64,64], index: 9, kind: input, shape index: {}]   ;;  %s15583_s10 = inlined_call_operand.vmem [shape: f32[5,1,64], index: 10, kind: input, shape index: {}]   ;;  %s15584_s11 = inlined_call_operand.vmem [shape: bf16[5,64,128], index: 11, kind: input, shape index: {}]   ;;  %s15585_s12 = inlined_call_operand.vmem [shape: f32[5,1,128], index: 12, kind: input, shape index: {}]   ;;  %s15586_s13 = inlined_call_operand.vmem [shape: bf16[128,32], index: 13, kind: input, shape index: {}]   ;;  %s15587_s14 = inlined_call_operand.vmem [shape: f32[1,32], index: 14, kind: input, shape index: {}]   ;;  %s15588_s15 = inlined_call_operand.vmem [shape: bf16[32,10], index: 15, kind: input, shape index: {}]   ;;  %s15589_s16 = inlined_call_operand.vmem [shape: f32[1,10], index: 16, kind: input, shape index: {}]   ;;  %s15590_s17 = inlined_call_operand.vmem [shape: f32[1,128,10], index: 17, kind: output, shape index: {}]  }
   0x1   :  { %15702 = sst [smem:[#allocation31_spill]] %s15573_s0 }
   0x2   :  { %15703 = sst [smem:[#allocation32_spill]] %s15574_s1 }
   0x3   :  { %22 = vsyncpa [#allocation3], 0  ;;  %s11860_s24 = smov [#allocation2]  }
   0x4   :  { %s46_s25 = sshll.u32 %s11860_s24, 4  ;;  %s47_s25 = int_to_ptr.vmem [resolvable:$true] %s46_s25 }
   0x5   :  { %s11846_s26 = scalar_lea.vmem %s47_s25, 12800  ;;  %p11851_p1 = scmp.lt.s32.totalorder %s47_s25, %s47_s25 }
   0x6   :  { %p11847_p0 = scmp.ne.s32.totalorder %s47_s25, %s11846_s26  ;;  %p11852_p2 = scmp.lt.s32.totalorder %s11846_s26, %s11846_s26 }
   0x8   :  { %p11853_p3 = por %p11852_p2, %p11851_p1 }
   0xa   :  { %p11854_p4 = pnand %p11853_p3, %p11847_p0 }
   0xc   :  { %11857 = shalt.err (!%p11854_p4)
}
   0xd   :  { %s11861_s27 = smov 64   ;;  %s11862_s28 = smov 4  }
   0xe   :  { %52 = dma.hbm_to_vmem [thread:$0]  %s15582_s9, 12800, %s47_s25, [#allocation3], %s11861_s27, %s11861_s27, %s11862_s28  }
   0xf   :  { %11858 = dma.done.wait [#allocation3], 12800  }
  0x10   :  { %11859 = vsyncadd [#allocation3], 4294954496  ;;  %vm134_vm0 = vcmask 1044480   ;;  %s15704_s19 = sld [smem:[#allocation32_spill]]  ;;  %vm109_vm1 = vcmask 80896   ;;  %v11538_v26 = vld [vmem:[%s15576_s3 + $0x8] sm:$0xff]  }
  0x11   :  { %s15705_s21 = sld [smem:[#allocation31_spill]]  ;;  %10563 = vmatprep.subr.bf16.mxu1 %v11538_v26  ;;  %v11539_v27 = vld [vmem:[%s15576_s3] sm:$0xff]   ;;  %v11540_v28 = vld [vmem:[%s15578_s5 + $0x38] sm:$0xff]   ;;  %v11541_v29 = vld [vmem:[%s15578_s5 + $0x30] sm:$0xff]   ;;  %vm282_vm2 = vcmask 261120   ;;  %vm783_vm3 = vcmask 523264  }
  0x12   :  { %10564 = vmatpush3.bf16.msra.mxu1 %v11538_v26  ;;  %v11542_v30 = vld [vmem:[%s15578_s5 + $0x28] sm:$0xff]   ;;  %v12035_v31 = vld [vmem:[%s15578_s5 + $0x20] sm:$0xff]   ;;  %v12040_v32 = vld [vmem:[%s15578_s5 + $0x18] sm:$0xff]  }
  0x13   :  { %10565 = vmatprep.subr.bf16.mxu1 %v11539_v27  ;;  %v12049_v35 = vld [vmem:[%s15575_s2] ss:$0 sm:$0xff]  ;;  %v11545_v26 = vld [vmem:[%s15578_s5 + $0x10] sm:$0xff]  }
  0x16   :  { %v11537_v0 = vld [vmem:[%s15704_s19] sm:$0x1f]   ;;  %10566 = vmatpush3.bf16.msra.mxu1 %v11539_v27  ;;  %v11546_v27 = vld [vmem:[%s15578_s5 + $0x8] sm:$0xff]  }
  0x17   :  { %v71_v1 = vld [vmem:[%s15705_s21] sm:$0xff]  ;;  %v72_v2 = vld [vmem:[%s15705_s21 + $0x8] sm:$0xff]  ;;  %v73_v3 = vld [vmem:[%s15705_s21 + $0x10] sm:$0xff]  ;;  %11531 = vmatprep.subr.msk.bf16.mxu0 %vm134_vm0, %v11537_v0  ;;  %v136_v4 = vsel %vm134_vm0, %v11537_v0, 0  ;;  %11515 = vmatprep.subr.bf16.mxu1 %v11540_v28 }
  0x18   :  { %v89_v5 = vpack.c.bf16 %v72_v2, %v71_v1  ;;  %v74_v6 = vld [vmem:[%s15705_s21 + $0x18] sm:$0xff]  ;;  %v75_v7 = vld [vmem:[%s15705_s21 + $0x20] sm:$0xff]  ;;  %v76_v8 = vld [vmem:[%s15705_s21 + $0x28] sm:$0xff]  ;;  %10546 = vmatpush3.bf16.msra.mxu0 %v136_v4 }
  0x19   :  { %v90_v9 = vpack.c.bf16 %v74_v6, %v73_v3  ;;  %v91_v10 = vpack.c.bf16 %v76_v8, %v75_v7  ;;  %v77_v11 = vld [vmem:[%s15705_s21 + $0x30] sm:$0xff]  ;;  %v78_v12 = vld [vmem:[%s15705_s21 + $0x38] sm:$0xff]  ;;  %v79_v13 = vld [vmem:[%s15705_s21 + $0x40] sm:$0xff]  ;;  %10583 = vmatprep.subr.bf16.mxu0 %v11540_v28 }
  0x1a   :  { %10547 = vmatprep.mubr.msk.bf16.mxu0 %vm109_vm1, %v89_v5  ;;  %v80_v14 = vld [vmem:[%s15705_s21 + $0x48] sm:$0xff]  ;;  %v92_v15 = vpack.c.bf16 %v78_v12, %v77_v11  ;;  %v81_v17 = vld [vmem:[%s15705_s21 + $0x50] sm:$0xff]  ;;  %v82_v18 = vld [vmem:[%s15705_s21 + $0x58] sm:$0xff] }
  0x1b   :  { %10548 = vmatmul.mubr.msk.bf16.vlgmr.msra.gmra.mxu0 %vm109_vm1, %v90_v9  ;;  %v93_v16 = vpack.c.bf16 %v80_v14, %v79_v13  ;;  %v83_v19 = vld [vmem:[%s15705_s21 + $0x60] sm:$0xff]  ;;  %v84_v20 = vld [vmem:[%s15705_s21 + $0x68] sm:$0xff]  ;;  %v94_v21 = vpack.c.bf16 %v82_v18, %v81_v17  ;;  %v85_v23 = vld [vmem:[%s15705_s21 + $0x70] sm:$0xff] }
  0x1c   :  { %10551 = vmatprep.mubr.msk.bf16.mxu0 %vm109_vm1, %v91_v10  ;;  %v95_v22 = vpack.c.bf16 %v84_v20, %v83_v19  ;;  %v86_v24 = vld [vmem:[%s15705_s21 + $0x78] sm:$0xff]  ;;  %10584 = vmatpush3.bf16.msra.mxu0 %v11540_v28 }
  0x1d   :  { %v96_v25 = vpack.c.bf16 %v86_v24, %v85_v23  ;;  %10585 = vmatprep.subr.bf16.mxu0 %v11541_v29 }
  0x20   :  { %10586 = vmatpush3.bf16.msra.mxu0 %v11541_v29 }
  0x21   :  { %10587 = vmatprep.subr.bf16.mxu0 %v11542_v30 }
  0x23   :  { %10552 = vmatmul.mubr.msk.bf16.gmra.mxu0 %vm109_vm1, %v92_v15 }
  0x24   :  { %10555 = vmatprep.mubr.msk.bf16.mxu0 %vm109_vm1, %v93_v16  ;;  %10588 = vmatpush3.bf16.msra.mxu0 %v11542_v30 }
  0x25   :  { %10589 = vmatprep.subr.bf16.mxu0 %v12035_v31 }
  0x28   :  { %10590 = vmatpush3.bf16.msra.mxu0 %v12035_v31 }
  0x29   :  { %10591 = vmatprep.subr.bf16.mxu0 %v12040_v32 }
  0x2b   :  { %10556 = vmatmul.mubr.msk.bf16.gmra.mxu0 %vm109_vm1, %v94_v21 }
  0x2c   :  { %10559 = vmatprep.mubr.msk.bf16.mxu0 %vm109_vm1, %v95_v22  ;;  %10592 = vmatpush3.bf16.msra.mxu0 %v12040_v32 }
  0x2d   :  { %10593 = vmatprep.subr.bf16.mxu0 %v11545_v26 }
  0x30   :  { %10594 = vmatpush3.bf16.msra.mxu0 %v11545_v26 }
  0x31   :  { %10595 = vmatprep.subr.bf16.mxu0 %v11546_v27 }
  0x33   :  { %10560 = vmatmul.mubr.msk.bf16.gmra.mxu0 %vm109_vm1, %v96_v25 }
  0x34   :  { %10596 = vmatpush3.bf16.msra.mxu0 %v11546_v27 }
  0xdb   :  { %v10549_v33 = vpop.f32.mrf.mxu0 }
  0xdc   :  { %v181_v39 = vadd.f32 %v10549_v33, %v12049_v35  ;;  %v9506_v33 = vld [vmem:[%s15577_s4] ss:$0 sm:$0xff] }
  0xdd   :  { %v172_v34 = vpop.f32.mrf.mxu0 }
  0xde   :  { %v173_v37 = vadd.f32 %v12049_v35, %v172_v34  ;;  %v237_v46 = vmax.f32 %v181_v39, 0.0 }
  0xdf   :  { %v10550_v36 = vpop.f32.mrf.mxu0 }
  0xe0   :  { %v184_v38 = vadd.f32 %v10550_v36, %v12049_v35  ;;  %v235_v44 = vmax.f32 %v173_v37, 0.0 }
  0xe1   :  { %v175_v40 = vpop.f32.mrf.mxu0 }
  0xe2   :  { %v176_v41 = vadd.f32 %v12049_v35, %v175_v40  ;;  %v238_v42 = vmax.f32 %v184_v38, 0.0 }
  0xe3   :  { %v10553_v43 = vpop.f32.mrf.mxu0 }
  0xe4   :  { %v236_v45 = vmax.f32 %v176_v41, 0.0  ;;  %v256_v49 = vpack.c.bf16 %v238_v42, %v237_v46  ;;  %v197_v53 = vadd.f32 %v10553_v43, %v12049_v35 }
  0xe5   :  { %v188_v47 = vpop.f32.mrf.mxu0 }
  0xe6   :  { %v255_v48 = vpack.c.bf16 %v236_v45, %v235_v44  ;;  %v189_v51 = vadd.f32 %v12049_v35, %v188_v47  ;;  %v241_v60 = vmax.f32 %v197_v53, 0.0 }
  0xe7   :  { %v10554_v50 = vpop.f32.mrf.mxu0 }
  0xe8   :  { %v200_v52 = vadd.f32 %v10554_v50, %v12049_v35  ;;  %10567 = vmatprep.mubr.msk.bf16.mxu1 %vm282_vm2, %v255_v48  ;;  %v239_v58 = vmax.f32 %v189_v51, 0.0 }
  0xe9   :  { %v191_v54 = vpop.f32.mrf.mxu0  ;;  %10568 = vmatmul.mubr.msk.bf16.vlgmr.msra.gmra.mxu1 %vm282_vm2, %v256_v49 }
  0xea   :  { %v192_v55 = vadd.f32 %v12049_v35, %v191_v54  ;;  %11523 = vmatpush3.bf16.msra.mxu1 %v11540_v28  ;;  %v242_v56 = vmax.f32 %v200_v52, 0.0  ;;  %v11547_v28 = vld [vmem:[%s15578_s5] sm:$0xff]  }
  0xeb   :  { %v10557_v57 = vpop.f32.mrf.mxu0  ;;  %11516 = vmatprep.subr.bf16.mxu1 %v11541_v29  ;;  %10597 = vmatprep.subr.bf16.mxu0 %v11547_v28 }
  0xec   :  { %v240_v59 = vmax.f32 %v192_v55, 0.0  ;;  %v258_v63 = vpack.c.bf16 %v242_v56, %v241_v60  ;;  %v213_v3 = vadd.f32 %v10557_v57, %v12049_v35  ;;  %10598 = vmatpush3.bf16.msra.mxu0 %v11547_v28 }
  0xed   :  { %v204_v61 = vpop.f32.mrf.mxu0 }
  0xee   :  { %v257_v62 = vpack.c.bf16 %v240_v59, %v239_v58  ;;  %11524 = vmatpush3.bf16.msra.mxu1 %v11541_v29  ;;  %v205_v1 = vadd.f32 %v12049_v35, %v204_v61  ;;  %v245_v10 = vmax.f32 %v213_v3, 0.0  ;;  %v11548_v29 = vld [vmem:[#allocation2 + $0x58] sm:$0xff]  }
  0xef   :  { %v10558_v0 = vpop.f32.mrf.mxu0  ;;  %11517 = vmatprep.subr.bf16.mxu1 %v11542_v30  ;;  %10639 = vmatprep.subr.bf16.mxu0 %v11548_v29 }
  0xf0   :  { %v216_v2 = vadd.f32 %v10558_v0, %v12049_v35  ;;  %10571 = vmatprep.mubr.msk.bf16.mxu1 %vm282_vm2, %v257_v62  ;;  %v243_v8 = vmax.f32 %v205_v1, 0.0 }
  0xf1   :  { %v207_v4 = vpop.f32.mrf.mxu0  ;;  %10572 = vmatmul.mubr.msk.bf16.gmra.mxu1 %vm282_vm2, %v258_v63 }
  0xf2   :  { %v208_v5 = vadd.f32 %v12049_v35, %v207_v4  ;;  %11525 = vmatpush3.bf16.msra.mxu1 %v11542_v30  ;;  %v246_v6 = vmax.f32 %v216_v2, 0.0 }
  0xf3   :  { %v10561_v7 = vpop.f32.mrf.mxu0  ;;  %11518 = vmatprep.subr.bf16.mxu1 %v12035_v31 }
  0xf4   :  { %v244_v9 = vmax.f32 %v208_v5, 0.0  ;;  %v260_v13 = vpack.c.bf16 %v246_v6, %v245_v10  ;;  %v229_v17 = vadd.f32 %v10561_v7, %v12049_v35  ;;  %v11549_v7 = vld [vmem:[#allocation2 + $0x50] sm:$0xff]   ;;  %v11552_v10 = vld [vmem:[#allocation2 + $0x18] sm:$0xff]  }
  0xf5   :  { %v220_v11 = vpop.f32.mrf.mxu0 }
  0xf6   :  { %v259_v12 = vpack.c.bf16 %v244_v9, %v243_v8  ;;  %11526 = vmatpush3.bf16.msra.mxu1 %v12035_v31  ;;  %v221_v15 = vadd.f32 %v12049_v35, %v220_v11  ;;  %v249_v23 = vmax.f32 %v229_v17, 0.0  ;;  %v11550_v8 = vld [vmem:[#allocation2 + $0x48] sm:$0xff]   ;;  %v11551_v9 = vld [vmem:[#allocation2 + $0x40] sm:$0xff]   ;;  %v11553_v11 = vld [vmem:[#allocation2 + $0x10] sm:$0xff]  }
  0xf7   :  { %v10562_v14 = vpop.f32.mrf.mxu0  ;;  %11519 = vmatprep.subr.bf16.mxu1 %v12040_v32 }
  0xf8   :  { %v232_v16 = vadd.f32 %v10562_v14, %v12049_v35  ;;  %10575 = vmatprep.mubr.msk.bf16.mxu1 %vm282_vm2, %v259_v12  ;;  %v247_v21 = vmax.f32 %v221_v15, 0.0  ;;  %v11554_v12 = vld [vmem:[#allocation2 + $0x78] sm:$0xff]   ;;  %v11557_v14 = vld [vmem:[#allocation2] sm:$0xff]  }
  0xf9   :  { %v223_v18 = vpop.f32.mrf.mxu0  ;;  %10576 = vmatmul.mubr.msk.bf16.gmra.mxu1 %vm282_vm2, %v260_v13  ;;  %v11555_v13 = vld [vmem:[#allocation2 + $0x8] sm:$0xff]   ;;  %v12139_v15 = vld [vmem:[#allocation2 + $0x38] sm:$0xff]  }
  0xfa   :  { %v224_v19 = vadd.f32 %v12049_v35, %v223_v18  ;;  %11527 = vmatpush3.bf16.msra.mxu1 %v12040_v32  ;;  %v250_v20 = vmax.f32 %v232_v16, 0.0  ;;  %v12145_v18 = vld [vmem:[%s15579_s6] ss:$0 sm:$0xff] }
  0xfb   :  { %11520 = vmatprep.subr.bf16.mxu1 %v11545_v26 }
  0xfc   :  { %v248_v22 = vmax.f32 %v224_v19, 0.0  ;;  %v262_v25 = vpack.c.bf16 %v250_v20, %v249_v23 }
  0xfe   :  { %v261_v24 = vpack.c.bf16 %v248_v22, %v247_v21  ;;  %11528 = vmatpush3.bf16.msra.mxu1 %v11545_v26 }
  0xff   :  { %11521 = vmatprep.subr.bf16.mxu1 %v11546_v27 }
 0x100   :  { %10579 = vmatprep.mubr.msk.bf16.mxu1 %vm282_vm2, %v261_v24 }
 0x101   :  { %10580 = vmatmul.mubr.msk.bf16.gmra.mxu1 %vm282_vm2, %v262_v25  ;;  %v404_v25 = vlaneseq }
 0x102   :  { %11529 = vmatpush3.bf16.msra.mxu1 %v11546_v27 }
 0x103   :  { %11522 = vmatprep.subr.bf16.mxu1 %v11547_v28 }
 0x106   :  { %11530 = vmatpush3.bf16.msra.mxu1 %v11547_v28 }
 0x107   :  { %10615 = vmatprep.subr.bf16.mxu1 %v11552_v10 }
 0x1a9   :  { %v10569_v30 = vpop.f32.mrf.mxu1 }
 0x1aa   :  { %v12097_v38 = vadd.f32 %v10569_v30, %v9506_v33 }
 0x1ab   :  { %v341_v31 = vpop.f32.mrf.mxu1 }
 0x1ac   :  { %v12093_v36 = vadd.f32 %v9506_v33, %v341_v31  ;;  %15709 = vst [vmem:[#allocation8_spill] sm:$0xff] %v12097_v38 }
 0x1ad   :  { %v10570_v32 = vpop.f32.mrf.mxu1 }
 0x1ae   :  { %v12091_v34 = vadd.f32 %v10570_v32, %v9506_v33  ;;  %15707 = vst [vmem:[#allocation6_spill] sm:$0xff] %v12093_v36 }
 0x1af   :  { %v344_v35 = vpop.f32.mrf.mxu1 }
 0x1b0   :  { %15706 = vst [vmem:[#allocation5_spill] sm:$0xff] %v12091_v34  ;;  %v12095_v37 = vadd.f32 %v9506_v33, %v344_v35  ;;  %v454_v41 = vpack.c.bf16 %v12091_v34, %v12097_v38 }
 0x1b1   :  { %v10573_v39 = vpop.f32.mrf.mxu1 }
 0x1b2   :  { %15708 = vst [vmem:[#allocation7_spill] sm:$0xff] %v12095_v37  ;;  %v453_v40 = vpack.c.bf16 %v12095_v37, %v12093_v36  ;;  %v12109_v48 = vadd.f32 %v10573_v39, %v9506_v33 }
 0x1b3   :  { %v357_v42 = vpop.f32.mrf.mxu1 }
 0x1b4   :  { %10599 = vmatprep.mubr.bf16.mxu0 %v453_v40  ;;  %v12105_v46 = vadd.f32 %v9506_v33, %v357_v42  ;;  %15713 = vst [vmem:[#allocation12_spill] sm:$0xff] %v12109_v48 }
 0x1b5   :  { %v10574_v43 = vpop.f32.mrf.mxu1  ;;  %10600 = vmatmul.mubr.bf16.vlgmr.msra.gmra.mxu0 %v454_v41 }
 0x1b6   :  { %10640 = vmatpush3.bf16.msra.mxu0 %v11548_v29  ;;  %v12103_v44 = vadd.f32 %v10574_v43, %v9506_v33  ;;  %15711 = vst [vmem:[#allocation10_spill] sm:$0xff] %v12105_v46  ;;  %v11556_v43 = vld [vmem:[#allocation2 + $0x70] sm:$0xff]  }
 0x1b7   :  { %v360_v45 = vpop.f32.mrf.mxu1  ;;  %10641 = vmatprep.subr.bf16.mxu0 %v11549_v7 }
 0x1b8   :  { %15710 = vst [vmem:[#allocation9_spill] sm:$0xff] %v12103_v44  ;;  %v12107_v47 = vadd.f32 %v9506_v33, %v360_v45  ;;  %v456_v51 = vpack.c.bf16 %v12103_v44, %v12109_v48 }
 0x1b9   :  { %v10577_v49 = vpop.f32.mrf.mxu1 }
 0x1ba   :  { %15712 = vst [vmem:[#allocation11_spill] sm:$0xff] %v12107_v47  ;;  %v455_v50 = vpack.c.bf16 %v12107_v47, %v12105_v46  ;;  %v12121_v58 = vadd.f32 %v10577_v49, %v9506_v33  ;;  %10642 = vmatpush3.bf16.msra.mxu0 %v11549_v7 }
 0x1bb   :  { %v373_v52 = vpop.f32.mrf.mxu1  ;;  %10643 = vmatprep.subr.bf16.mxu0 %v11550_v8 }
 0x1bc   :  { %10603 = vmatprep.mubr.bf16.mxu0 %v455_v50  ;;  %v12117_v56 = vadd.f32 %v9506_v33, %v373_v52  ;;  %15717 = vst [vmem:[#allocation16_spill] sm:$0xff] %v12121_v58 }
 0x1bd   :  { %v10578_v53 = vpop.f32.mrf.mxu1  ;;  %10604 = vmatmul.mubr.bf16.gmra.mxu0 %v456_v51 }
 0x1be   :  { %v12115_v54 = vadd.f32 %v10578_v53, %v9506_v33  ;;  %15715 = vst [vmem:[#allocation14_spill] sm:$0xff] %v12117_v56  ;;  %10644 = vmatpush3.bf16.msra.mxu0 %v11550_v8 }
 0x1bf   :  { %v376_v55 = vpop.f32.mrf.mxu1  ;;  %10645 = vmatprep.subr.bf16.mxu0 %v11551_v9 }
 0x1c0   :  { %15714 = vst [vmem:[#allocation13_spill] sm:$0xff] %v12115_v54  ;;  %v12119_v57 = vadd.f32 %v9506_v33, %v376_v55  ;;  %v458_v61 = vpack.c.bf16 %v12115_v54, %v12121_v58 }
 0x1c1   :  { %v10581_v59 = vpop.f32.mrf.mxu1 }
 0x1c2   :  { %15716 = vst [vmem:[#allocation15_spill] sm:$0xff] %v12119_v57  ;;  %v457_v60 = vpack.c.bf16 %v12119_v57, %v12117_v56  ;;  %v12133_v4 = vadd.f32 %v10581_v59, %v9506_v33  ;;  %10646 = vmatpush3.bf16.msra.mxu0 %v11551_v9  ;;  %v11560_v9 = vld [vmem:[#allocation2 + $0x60] sm:$0xff]  }
 0x1c3   :  { %v389_v62 = vpop.f32.mrf.mxu1  ;;  %10687 = vmatprep.subr.bf16.mxu0 %v11554_v12 }
 0x1c4   :  { %10607 = vmatprep.mubr.bf16.mxu1 %v457_v60  ;;  %v12129_v2 = vadd.f32 %v9506_v33, %v389_v62  ;;  %15721 = vst [vmem:[#allocation20_spill] sm:$0xff] %v12133_v4 }
 0x1c5   :  { %v10582_v63 = vpop.f32.mrf.mxu1  ;;  %10608 = vmatmul.mubr.bf16.vlgmr.msra.gmra.mxu1 %v458_v61  ;;  %v11558_v61 = vld [vmem:[#allocation2 + $0x68] sm:$0xff]  }
 0x1c6   :  { %v12127_v0 = vadd.f32 %v10582_v63, %v9506_v33  ;;  %15719 = vst [vmem:[#allocation18_spill] sm:$0xff] %v12129_v2  ;;  %10616 = vmatpush3.bf16.msra.mxu1 %v11552_v10 }
 0x1c7   :  { %v392_v1 = vpop.f32.mrf.mxu1  ;;  %10617 = vmatprep.subr.bf16.mxu1 %v11553_v11 }
 0x1c8   :  { %15718 = vst [vmem:[#allocation17_spill] sm:$0xff] %v12127_v0  ;;  %v12131_v3 = vadd.f32 %v9506_v33, %v392_v1  ;;  %v460_v6 = vpack.c.bf16 %v12127_v0, %v12133_v4  ;;  %v12160_v33 = vshrl.u32 %v404_v25, 7 }
 0x1ca   :  { %15720 = vst [vmem:[#allocation19_spill] sm:$0xff] %v12131_v3  ;;  %v459_v5 = vpack.c.bf16 %v12131_v3, %v12129_v2  ;;  %10618 = vmatpush3.bf16.msra.mxu1 %v11553_v11  ;;  %15722 = vst [vmem:[#allocation21_spill] sm:$0xff] %v12160_v33  ;;  %vm1616_vm4 = vcmp.lt.s32.totalorder %v12160_v33, 6  ;;  %v12198_v11 = vand.u32 63, %v12160_v33  ;;  %vm662_vm5 = vcmp.lt.s32.totalorder %v12160_v33, 2 }
 0x1cb   :  { %10619 = vmatprep.subr.bf16.mxu1 %v11555_v13  ;;  %vm1341_vm6 = vcmp.lt.s32.totalorder %v12160_v33, 7  ;;  %vm1066_vm12 = vcmp.lt.s32.totalorder %v12160_v33, 1 }
 0x1cc   :  { %10611 = vmatprep.mubr.bf16.mxu1 %v459_v5  ;;  %15723 = vst [vmem:[#allocation22_spill] sm:$0xff] %v12198_v11  ;;  %vm679_vm7 = vcmp.ge.s32.totalorder %v12198_v11, 2  ;;  %vm1083_vm13 = vcmp.ge.s32.totalorder %v12198_v11, 1 }
 0x1cd   :  { %10612 = vmatmul.mubr.bf16.gmra.mxu1 %v460_v6 }
 0x1ce   :  { %10620 = vmatpush3.bf16.msra.mxu1 %v11555_v13  ;;  %v412_v13 = vadd.s32 56, %v12160_v33 }
 0x1cf   :  { %10621 = vmatprep.subr.bf16.mxu1 %v11557_v14 }
 0x1d0   :  { %v12217_v25 = vand.u32 63, %v412_v13 }
 0x1d2   :  { %10622 = vmatpush3.bf16.msra.mxu1 %v11557_v14  ;;  %15725 = vst [vmem:[#allocation24_spill] sm:$0xff] %v12217_v25  ;;  %vm1365_vm8 = vcmp.lt.s32.totalorder %v12217_v25, 63  ;;  %vm1640_vm10 = vcmp.lt.s32.totalorder %v12217_v25, 62 }
 0x1d3   :  { %10663 = vmatprep.subr.bf16.mxu1 %v12139_v15 }
 0x275   :  { %v10601_v16 = vpop.f32.mrf.mxu0 }
 0x276   :  { %v559_v23 = vadd.f32 %v10601_v16, %v12145_v18 }
 0x277   :  { %v550_v17 = vpop.f32.mrf.mxu0 }
 0x278   :  { %v551_v21 = vadd.f32 %v12145_v18, %v550_v17  ;;  %v12157_v31 = vmax.f32 %v559_v23, 0.0  ;;  %v420_v17 = vadd.s32 120, %v12160_v33 }
 0x279   :  { %v10602_v19 = vpop.f32.mrf.mxu0 }
 0x27a   :  { %v562_v20 = vadd.f32 %v10602_v19, %v12145_v18  ;;  %v12153_v28 = vmax.f32 %v551_v21, 0.0 }
 0x27b   :  { %v553_v22 = vpop.f32.mrf.mxu0 }
 0x27c   :  { %v554_v24 = vadd.f32 %v12145_v18, %v553_v22  ;;  %v12151_v27 = vmax.f32 %v562_v20, 0.0 }
 0x27d   :  { %v10605_v26 = vpop.f32.mrf.mxu0 }
 0x27e   :  { %v12155_v29 = vmax.f32 %v554_v24, 0.0  ;;  %v639_v40 = vpack.c.bf16 %v12151_v27, %v12157_v31  ;;  %v15595_v49 = vrot.slane %v12151_v27, 2  ;;  %v575_v50 = vadd.f32 %v10605_v26, %v12145_v18 }
 0x27f   :  { %v566_v30 = vpop.f32.mrf.mxu0  ;;  %v648_v26 = vrot.slane %v12157_v31, 6 }
 0x280   :  { %v567_v32 = vadd.f32 %v12145_v18, %v566_v30  ;;  %v638_v39 = vpack.c.bf16 %v12155_v29, %v12153_v28  ;;  %v12188_v63 = vmax.f32 %v575_v50, 0.0  ;;  %v15737_v54 = vrot.slane %v12155_v29, 7 }
 0x281   :  { %v10606_v35 = vpop.f32.mrf.mxu0 }
 0x282   :  { %v12166_v41 = vmax.f32 %v567_v32, 0.0  ;;  %v578_v42 = vadd.f32 %v10606_v35, %v12145_v18  ;;  %10647 = vmatprep.mubr.msk.bf16.mxu0 %vm783_vm3, %v638_v39  ;;  %v12224_v35 = vand.u32 63, %v420_v17 }
 0x283   :  { %v569_v45 = vpop.f32.mrf.mxu0  ;;  %10648 = vmatmul.mubr.msk.bf16.vlgmr.msra.gmra.mxu0 %vm783_vm3, %v639_v40  ;;  %v647_v40 = vrot.slane %v12155_v29, 6 }
 0x284   :  { %v15593_v51 = vrot.slane %v12166_v41, 2  ;;  %v570_v52 = vadd.f32 %v12145_v18, %v569_v45  ;;  %10688 = vmatpush3.bf16.msra.mxu0 %v11554_v12  ;;  %v12184_v59 = vmax.f32 %v578_v42, 0.0  ;;  %v413_v12 = vadd.s32 64, %v12160_v33  ;;  %15726 = vst [vmem:[#allocation25_spill] sm:$0xff] %v12224_v35 }
 0x285   :  { %v10609_v53 = vpop.f32.mrf.mxu1  ;;  %10689 = vmatprep.subr.bf16.mxu0 %v11556_v43  ;;  %v1326_v42 = vrot.slane %v12155_v29, 1  ;;  %v676_v13 = vsel %vm662_vm5, %v647_v40, %v648_v26  ;;  %vm1648_vm11 = vcmp.lt.s32.totalorder %v12224_v35, 62  ;;  %vm1373_vm14 = vcmp.lt.s32.totalorder %v12224_v35, 63 }
 0x286   :  { %v12182_v55 = vsel %vm1616_vm4, %v15595_v49, %v15593_v51  ;;  %v12186_v60 = vmax.f32 %v570_v52, 0.0  ;;  %v641_v8 = vpack.c.bf16 %v12184_v59, %v12188_v63  ;;  %v591_v14 = vadd.f32 %v10609_v53, %v12145_v18 }
 0x287   :  { %v582_v62 = vpop.f32.mrf.mxu1  ;;  %v12215_v24 = vand.u32 63, %v413_v12 }
 0x288   :  { %v640_v1 = vpack.c.bf16 %v12186_v60, %v12166_v41  ;;  %10690 = vmatpush3.bf16.msra.mxu0 %v11556_v43  ;;  %v583_v6 = vadd.f32 %v12145_v18, %v582_v62  ;;  %v12220_v30 = vmax.f32 %v591_v14, 0.0  ;;  %v1327_v43 = vrot.slane %v12157_v31, 1 }
 0x289   :  { %v10610_v5 = vpop.f32.mrf.mxu1  ;;  %10691 = vmatprep.subr.bf16.mxu0 %v11558_v61  ;;  %15724 = vst [vmem:[#allocation23_spill] sm:$0xff] %v12215_v24  ;;  %v649_v62 = vrot.slane %v12151_v27, 6  ;;  %v651_v17 = vrot.slane %v12186_v60, 6  ;;  %vm687_vm9 = vcmp.ge.s32.totalorder %v12215_v24, 2  ;;  %vm1091_vm15 = vcmp.ge.s32.totalorder %v12215_v24, 1 }
 0x28a   :  { %v594_v7 = vadd.f32 %v10610_v5, %v12145_v18  ;;  %10651 = vmatprep.mubr.msk.bf16.mxu0 %vm783_vm3, %v640_v1  ;;  %v12207_v20 = vmax.f32 %v583_v6, 0.0  ;;  %v1328_v1 = vrot.slane %v12151_v27, 1  ;;  %v15592_v6 = vrot.slane %v12153_v28, 1 }
 0x28b   :  { %v585_v10 = vpop.f32.mrf.mxu1  ;;  %10652 = vmatmul.mubr.msk.bf16.gmra.mxu0 %vm783_vm3, %v641_v8  ;;  %v1355_v14 = vsel %vm1341_vm6, %v1326_v42, %v1327_v43  ;;  %v15735_v0 = vrot.slane %v12220_v30, 1 }
 0x28c   :  { %v586_v16 = vadd.f32 %v12145_v18, %v585_v10  ;;  %10692 = vmatpush3.bf16.msra.mxu0 %v11558_v61  ;;  %v12209_v21 = vmax.f32 %v594_v7, 0.0  ;;  %v646_v61 = vrot.slane %v12153_v28, 6 }
 0x28d   :  { %v10613_v19 = vpop.f32.mrf.mxu1  ;;  %10693 = vmatprep.subr.bf16.mxu0 %v11560_v9 }
 0x28e   :  { %v12211_v22 = vmax.f32 %v586_v16, 0.0  ;;  %v643_v53 = vpack.c.bf16 %v12209_v21, %v12220_v30  ;;  %v607_v8 = vadd.f32 %v10613_v19, %v12145_v18  ;;  %v1356_v16 = vsel %vm1341_vm6, %v15592_v6, %v1326_v42 }
 0x28f   :  { %v598_v23 = vpop.f32.mrf.mxu1  ;;  %v12268_v42 = vsel %vm1341_vm6, %v1327_v43, %v1328_v1 }
 0x290   :  { %v642_v32 = vpack.c.bf16 %v12211_v22, %v12207_v20  ;;  %10694 = vmatpush3.bf16.msra.mxu0 %v11560_v9  ;;  %v599_v50 = vadd.f32 %v12145_v18, %v598_v23 }
 0x291   :  { %v10614_v39 = vpop.f32.mrf.mxu1 }
 0x292   :  { %v610_v52 = vadd.f32 %v10614_v39, %v12145_v18  ;;  %10655 = vmatprep.mubr.msk.bf16.mxu0 %vm783_vm3, %v642_v32  ;;  %v12257_v19 = vmax.f32 %v599_v50, 0.0  ;;  %v675_v39 = vsel %vm662_vm5, %v648_v26, %v649_v62  ;;  %v12272_v50 = vmax.f32 %v607_v8, 0.0 }
 0x293   :  { %v601_v5 = vpop.f32.mrf.mxu1  ;;  %10656 = vmatmul.mubr.msk.bf16.gmra.mxu0 %vm783_vm3, %v643_v53  ;;  %v650_v53 = vrot.slane %v12166_v41, 6  ;;  %v752_v6 = vpack.c.bf16 %v675_v39, %v676_v13  ;;  %v1331_v13 = vrot.slane %v12188_v63, 1  ;;  %v654_v39 = vrot.slane %v12207_v20, 6 }
 0x294   :  { %v12241_v9 = vmax.f32 %v610_v52, 0.0  ;;  %v602_v10 = vadd.f32 %v12145_v18, %v601_v5  ;;  %v1329_v18 = vrot.slane %v12166_v41, 1  ;;  %v677_v52 = vsel %vm662_vm5, %v646_v61, %v647_v40 }
 0x295   :  { %v1333_v40 = vrot.slane %v12207_v20, 1  ;;  %v673_v7 = vsel %vm662_vm5, %v650_v53, %v651_v17 }
 0x296   :  { %v15594_v23 = vrot.slane %v12241_v9, 6  ;;  %v12260_v32 = vmax.f32 %v602_v10, 0.0  ;;  %v1431_v10 = vpack.c.bf16 %v1355_v14, %v1356_v16  ;;  %v1353_v8 = vsel %vm1341_vm6, %v1328_v1, %v1329_v18  ;;  %v11561_v16 = vld [vmem:[#allocation2 + $0x30] sm:$0xff]  }
 0x297   :  { %v645_v51 = vpack.c.bf16 %v12241_v9, %v12272_v50  ;;  %v674_v14 = vsel %vm662_vm5, %v649_v62, %v650_v53  ;;  %v1432_v62 = vpack.c.bf16 %v1353_v8, %v12268_v42  ;;  %v1601_v42 = vrot.slane %v12155_v29, 2 }
 0x298   :  { %v644_v5 = vpack.c.bf16 %v12260_v32, %v12257_v19  ;;  %v678_v26 = vsel %vm662_vm5, %v15594_v23, %v646_v61  ;;  %v1330_v61 = vrot.slane %v12186_v60, 1  ;;  %v753_v1 = vpack.c.bf16 %v673_v7, %v674_v14  ;;  %v11562_v14 = vld [vmem:[#allocation2 + $0x28] sm:$0xff]  }
 0x299   :  { %v727_v43 = vsel %vm679_vm7, %v678_v26, 0.0  ;;  %v1332_v26 = vrot.slane %v12184_v59, 1  ;;  %v1340_v25 = vrot.slane %v12241_v9, 1  ;;  %v15736_v57 = vrot.slane %v12241_v9, 6 }
 0x29a   :  { %10659 = vmatprep.mubr.msk.bf16.mxu0 %vm783_vm3, %v644_v5  ;;  %v751_v12 = vpack.c.bf16 %v677_v52, %v727_v43  ;;  %v652_v5 = vrot.slane %v12188_v63, 6  ;;  %v653_v52 = vrot.slane %v12184_v59, 6  ;;  %v655_v43 = vrot.slane %v12211_v22, 6 }
 0x29b   :  { %10660 = vmatmul.mubr.msk.bf16.gmra.mxu0 %vm783_vm3, %v645_v51  ;;  %v1349_v53 = vsel %vm1341_vm6, %v1332_v26, %v1333_v40  ;;  %v1334_v51 = vrot.slane %v12211_v22, 1  ;;  %v1351_v7 = vsel %vm1341_vm6, %v1330_v61, %v1331_v13 }
 0x29c   :  { %10623 = vmatprep.mubr.msk.bf16.mxu1 %vm783_vm3, %v751_v12  ;;  %10695 = vmatprep.mubr.msk.bf16.mxu0 %vm783_vm3, %v1431_v10  ;;  %v1352_v10 = vsel %vm1341_vm6, %v1329_v18, %v1330_v61  ;;  %v670_v8 = vsel %vm662_vm5, %v653_v52, %v654_v39  ;;  %v657_v12 = vrot.slane %v12209_v21, 6  ;;  %v1608_v18 = vrot.slane %v12207_v20, 2 }
 0x29d   :  { %10624 = vmatmul.mubr.msk.bf16.vlgmr.msra.gmra.mxu1 %vm783_vm3, %v752_v6  ;;  %v672_v6 = vsel %vm662_vm5, %v651_v17, %v652_v5  ;;  %v671_v17 = vsel %vm662_vm5, %v652_v5, %v653_v52  ;;  %v669_v61 = vsel %vm662_vm5, %v654_v39, %v655_v43  ;;  %v1413_v23 = vsel %vm1365_vm8, %v1349_v53, 0.0 }
 0x29e   :  { %10664 = vmatpush3.bf16.msra.mxu1 %v12139_v15  ;;  %10627 = vmatprep.mubr.msk.bf16.mxu1 %vm783_vm3, %v753_v1  ;;  %v15597_v15 = vrot.slane %v12220_v30, 1  ;;  %v656_v1 = vrot.slane %v12220_v30, 6  ;;  %v12338_v49 = vsel %vm1341_vm6, %v1333_v40, %v1334_v51  ;;  %v658_v5 = vrot.slane %v12257_v19, 6 }
 0x29f   :  { %10665 = vmatprep.subr.bf16.mxu1 %v11561_v16  ;;  %v1433_v39 = vpack.c.bf16 %v1351_v7, %v1352_v10  ;;  %v735_v52 = vsel %vm687_vm9, %v670_v8, 0.0  ;;  %v1350_v53 = vsel %vm1341_vm6, %v1331_v13, %v1332_v26  ;;  %v754_v3 = vpack.c.bf16 %v671_v17, %v672_v6 }
 0x2a0   :  { %v12334_v45 = vsel %vm1341_vm6, %v1334_v51, %v15597_v15  ;;  %v12342_v4 = vsel %vm662_vm5, %v655_v43, %v656_v1  ;;  %v15600_v15 = vrot.slane %v12260_v32, 6  ;;  %v755_v2 = vpack.c.bf16 %v669_v61, %v735_v52  ;;  %v11563_v51 = vld [vmem:[#allocation2 + $0x20] sm:$0xff]  }
 0x2a1   :  { %v1434_v40 = vpack.c.bf16 %v1413_v23, %v1350_v53  ;;  %v667_v43 = vsel %vm662_vm5, %v656_v1, %v657_v12  ;;  %v1337_v10 = vrot.slane %v12257_v19, 1  ;;  %v15727_v13 = vrot.slane %v12151_v27, 2 }
 0x2a2   :  { %10666 = vmatpush3.bf16.msra.mxu1 %v11561_v16  ;;  %v1435_v16 = vpack.c.bf16 %v12334_v45, %v12338_v49  ;;  %v756_v7 = vpack.c.bf16 %v667_v43, %v12342_v4  ;;  %v15728_v26 = vrot.slane %v12157_v31, 2  ;;  %v666_v4 = vsel %vm662_vm5, %v657_v12, %v658_v5 }
 0x2a3   :  { %10667 = vmatprep.subr.bf16.mxu1 %v11562_v14  ;;  %10696 = vmatmul.mubr.msk.bf16.vlgmr.msra.gmra.mxu0 %vm783_vm3, %v1432_v62  ;;  %v15601_v62 = vrot.slane %v12241_v9, 7  ;;  %v1338_v49 = vrot.slane %v12260_v32, 1  ;;  %v1605_v45 = vrot.slane %v12186_v60, 2  ;;  %v665_v6 = vsel %vm662_vm5, %v658_v5, %v15600_v15 }
 0x2a4   :  { %v12363_v23 = vsel %vm1616_vm4, %v15728_v26, %v15727_v13  ;;  %10699 = vmatprep.mubr.msk.bf16.mxu0 %vm783_vm3, %v1433_v39  ;;  %v15729_v8 = vmov %v15728_v26  ;;  %v15730_v12 = vrot.slane %v12153_v28, 2  ;;  %v15731_v5 = vrot.slane %v12166_v41, 2 }
 0x2a5   :  { %10628 = vmatmul.mubr.msk.bf16.gmra.mxu1 %vm783_vm3, %v754_v3  ;;  %v12384_v3 = vsel %vm1616_vm4, %v1601_v42, %v15729_v8  ;;  %v1609_v53 = vrot.slane %v12211_v22, 2  ;;  %v1610_v43 = vrot.slane %v12220_v30, 2  ;;  %v1611_v13 = vrot.slane %v12209_v21, 2 }
 0x2a6   :  { %10631 = vmatprep.mubr.msk.bf16.mxu1 %vm783_vm3, %v755_v2  ;;  %10668 = vmatpush3.bf16.msra.mxu1 %v11562_v14  ;;  %v12390_v1 = vsel %vm1616_vm4, %v15730_v12, %v1601_v42  ;;  %v1606_v2 = vrot.slane %v12188_v63, 2  ;;  %v12393_v14 = vld [vmem:[#allocation2 + $0x98] sm:$0xff]   ;;  %v12403_v39 = vsel %vm1616_vm4, %v15731_v5, %v1605_v45  ;;  %v1607_v42 = vrot.slane %v12184_v59, 2 }
 0x2a7   :  { %10669 = vmatprep.subr.bf16.mxu1 %v11563_v51  ;;  %v1612_v5 = vrot.slane %v12257_v19, 2  ;;  %v12428_v61 = vsel %vm1616_vm4, %v1609_v53, %v1610_v43  ;;  %v12432_v26 = vsel %vm1616_vm4, %v1608_v18, %v1609_v53  ;;  %v12436_v17 = vsel %vm1616_vm4, %v1610_v43, %v1611_v13 }
 0x2a8   :  { %v12408_v52 = vsel %vm1616_vm4, %v1605_v45, %v1606_v2  ;;  %v1624_v8 = vsel %vm1616_vm4, %v1607_v42, %v1608_v18  ;;  %v12419_v12 = vsel %vm1616_vm4, %v1606_v2, %v1607_v42  ;;  %v757_v18 = vpack.c.bf16 %v665_v6, %v666_v4 }
 0x2a9   :  { %v12424_v45 = vsel %vm1640_vm10, %v1624_v8, 0.0  ;;  %v12445_v42 = vsel %vm1616_vm4, %v1611_v13, %v1612_v5  ;;  %v1613_v8 = vrot.slane %v12260_v32, 2  ;;  %v1614_v43 = vrot.slane %v12272_v50, 2 }
 0x2aa   :  { %10670 = vmatpush3.bf16.msra.mxu1 %v11563_v51  ;;  %v1615_v15 = vrot.slane %v12241_v9, 2  ;;  %v1336_v2 = vrot.slane %v12209_v21, 1  ;;  %v1339_v13 = vrot.slane %v12272_v50, 1  ;;  %v660_v51 = vrot.slane %v12272_v50, 6 }
 0x2ab   :  { %10711 = vmatprep.subr.bf16.mxu1 %v12393_v14  ;;  %10700 = vmatmul.mubr.msk.bf16.gmra.mxu0 %vm783_vm3, %v1434_v40  ;;  %v12460_v40 = vsel %vm1616_vm4, %v1612_v5, %v1613_v8  ;;  %v15732_v4 = vrot.slane %v12153_v28, 7  ;;  %v15733_v5 = vrot.slane %v12153_v28, 2 }
 0x2ac   :  { %10703 = vmatprep.mubr.msk.bf16.mxu0 %vm783_vm3, %v1435_v16  ;;  %v12475_v6 = vsel %vm1616_vm4, %v1614_v43, %v1615_v15  ;;  %v1345_v53 = vsel %vm1341_vm6, %v1336_v2, %v1337_v10  ;;  %v663_v56 = vsel %vm662_vm5, %v660_v51, %v15736_v57  ;;  %v1052_v57 = vrot.slane %v12157_v31, 7 }
 0x2ad   :  { %10632 = vmatmul.mubr.msk.bf16.gmra.mxu1 %vm783_vm3, %v756_v7  ;;  %v1082_v16 = vsel %vm1066_vm12, %v15601_v62, %v15732_v4  ;;  %v12471_v7 = vsel %vm1616_vm4, %v1613_v8, %v1614_v43  ;;  %v15734_v4 = vrot.slane %v12260_v32, 6  ;;  %v1346_v62 = vsel %vm1341_vm6, %v15735_v0, %v1336_v2 }
 0x2ae   :  { %10635 = vmatprep.mubr.msk.bf16.mxu1 %vm783_vm3, %v757_v18  ;;  %v1632_v18 = vsel %vm1616_vm4, %v1615_v15, %v15733_v5  ;;  %v1343_v15 = vsel %vm1341_vm6, %v1338_v49, %v1339_v13  ;;  %v1344_v5 = vsel %vm1341_vm6, %v1337_v10, %v1338_v49  ;;  %v1436_v58 = vpack.c.bf16 %v1345_v53, %v1346_v62 }
 0x2af   :  { %v664_v8 = vsel %vm662_vm5, %v15734_v4, %v660_v51  ;;  %v12493_v43 = vsel %vm1648_vm11, %v1632_v18, 0.0  ;;  %v1131_v18 = vsel %vm1083_vm13, %v1082_v16, 0.0  ;;  %v1437_v10 = vpack.c.bf16 %v1343_v15, %v1344_v5 }
 0x2b0   :  { %v758_v49 = vpack.c.bf16 %v663_v56, %v664_v8  ;;  %v15738_v4 = vrot.slane %v12153_v28, 7  ;;  %v15739_v2 = vrot.slane %v12153_v28, 1  ;;  %v1055_v56 = vrot.slane %v12186_v60, 7 }
 0x2b1   :  { %v1054_v28 = vrot.slane %v12166_v41, 7  ;;  %v15740_v51 = vrot.slane %v12155_v29, 7  ;;  %v1058_v29 = vrot.slane %v12207_v20, 7  ;;  %v1056_v15 = vrot.slane %v12188_v63, 7 }
 0x2b2   :  { %v1081_v48 = vsel %vm1066_vm12, %v15738_v4, %v15737_v54  ;;  %v1357_v62 = vsel %vm1341_vm6, %v1340_v25, %v15739_v2  ;;  %v1053_v54 = vrot.slane %v12151_v27, 7  ;;  %v1057_v5 = vrot.slane %v12184_v59, 7  ;;  %v11566_v4 = vld [vmem:[#allocation2 + $0x88] sm:$0xff]   ;;  %v11567_v59 = vld [vmem:[#allocation2 + $0x80] sm:$0xff]  }
 0x2b3   :  { %10704 = vmatmul.mubr.msk.bf16.gmra.mxu0 %vm783_vm3, %v1436_v58  ;;  %v1156_v0 = vpack.c.bf16 %v1081_v48, %v1131_v18  ;;  %v1342_v48 = vsel %vm1341_vm6, %v1339_v13, %v1340_v25  ;;  %v1421_v58 = vsel %vm1373_vm14, %v1357_v62, 0.0  ;;  %v1080_v53 = vsel %vm1066_vm12, %v15740_v51, %v1052_v57  ;;  %v11565_v25 = vld [vmem:[#allocation2 + $0x90] sm:$0xff]  }
 0x2b4   :  { %10707 = vmatprep.mubr.msk.bf16.mxu0 %vm783_vm3, %v1437_v10  ;;  %v1077_v60 = vsel %vm1066_vm12, %v1054_v28, %v1055_v56  ;;  %v1079_v31 = vsel %vm1066_vm12, %v1052_v57, %v1053_v54  ;;  %v1438_v27 = vpack.c.bf16 %v1421_v58, %v1342_v48  ;;  %v1078_v8 = vsel %vm1066_vm12, %v1053_v54, %v1054_v28 }
 0x2b5   :  { %10636 = vmatmul.mubr.msk.bf16.gmra.mxu1 %vm783_vm3, %v758_v49  ;;  %v1157_v16 = vpack.c.bf16 %v1079_v31, %v1080_v53  ;;  %v1158_v41 = vpack.c.bf16 %v1077_v60, %v1078_v8  ;;  %v1059_v13 = vrot.slane %v12211_v22, 7  ;;  %v1076_v18 = vsel %vm1066_vm12, %v1055_v56, %v1056_v15  ;;  %v11576_v8 = vld [vmem:[%s15578_s5 + $0x58] sm:$0xff]  }
 0x2b6   :  { %10671 = vmatprep.mubr.msk.bf16.mxu1 %vm783_vm3, %v1156_v0  ;;  %v1074_v20 = vsel %vm1066_vm12, %v1057_v5, %v1058_v29  ;;  %v1063_v0 = vrot.slane %v12260_v32, 7  ;;  %v1060_v2 = vrot.slane %v12220_v30, 7  ;;  %v1061_v62 = vrot.slane %v12209_v21, 7 }
 0x2b7   :  { %v1073_v22 = vsel %vm1066_vm12, %v1058_v29, %v1059_v13  ;;  %v1139_v10 = vsel %vm1091_vm15, %v1074_v20, 0.0  ;;  %v1062_v56 = vrot.slane %v12257_v19, 7  ;;  %v1064_v21 = vrot.slane %v12272_v50, 7 }
 0x2b8   :  { %v1160_v49 = vpack.c.bf16 %v1073_v22, %v1139_v10  ;;  %v1072_v57 = vsel %vm1066_vm12, %v1059_v13, %v1060_v2  ;;  %v1071_v48 = vsel %vm1066_vm12, %v1060_v2, %v1061_v62  ;;  %v15741_v28 = vrot.slane %v12241_v9, 7 }
 0x2b9   :  { %v1069_v54 = vsel %vm1066_vm12, %v1062_v56, %v1063_v0  ;;  %v1161_v32 = vpack.c.bf16 %v1071_v48, %v1072_v57  ;;  %v1070_v30 = vsel %vm1066_vm12, %v1061_v62, %v1062_v56  ;;  %v1068_v19 = vsel %vm1066_vm12, %v1063_v0, %v1064_v21 }
 0x2ba   :  { %v1162_v58 = vpack.c.bf16 %v1069_v54, %v1070_v30  ;;  %v1067_v51 = vsel %vm1066_vm12, %v1064_v21, %v15741_v28  ;;  %v15742_v60 = vpack.c.bf16 %v12384_v3, %v12390_v1  ;;  %v15743_v31 = vpack.c.bf16 %v12182_v55, %v12363_v23 }
 0x2bb   :  { %10708 = vmatmul.mubr.msk.bf16.gmra.mxu0 %vm783_vm3, %v1438_v27  ;;  %v1163_v53 = vpack.c.bf16 %v1067_v51, %v1068_v19  ;;  %v15744_v50 = vpack.c.bf16 %v12408_v52, %v12403_v39  ;;  %v15745_v9 = vpack.c.bf16 %v12424_v45, %v12419_v12  ;;  %v15746_v3 = vpack.c.bf16 %v12428_v61, %v12432_v26  ;;  %v11568_v61 = vld [vmem:[%s15584_s11 + $0x18] sm:$0xff]   ;;  %v11570_v39 = vld [vmem:[%s15584_s11 + $0x8] sm:$0xff]   ;;  %v11571_v52 = vld [vmem:[%s15584_s11] sm:$0xff]  }
 0x2bc   :  { %v15747_v55 = vpack.c.bf16 %v12445_v42, %v12436_v17  ;;  %v15748_v23 = vpack.c.bf16 %v12471_v7, %v12460_v40  ;;  %v15749_v1 = vpack.c.bf16 %v12493_v43, %v12475_v6  ;;  %10735 = vmatprep.subr.bf16.mxu0 %v11568_v61  ;;  %v11569_v17 = vld [vmem:[%s15584_s11 + $0x10] sm:$0xff]   ;;  %v11572_v12 = vld [vmem:[%s15578_s5 + $0x78] sm:$0xff]   ;;  %v11574_v7 = vld [vmem:[%s15578_s5 + $0x68] sm:$0xff]  }
 0x2bd   :  { %10672 = vmatmul.mubr.msk.bf16.vlgmr.msra.gmra.mxu1 %vm783_vm3, %v1157_v16  ;;  %10736 = vmatpush3.bf16.msra.mxu0 %v11568_v61  ;;  %v11573_v45 = vld [vmem:[%s15578_s5 + $0x70] sm:$0xff]   ;;  %v11575_v27 = vld [vmem:[%s15578_s5 + $0x60] sm:$0xff]  }
 0x2be   :  { %10712 = vmatpush3.bf16.msra.mxu1 %v12393_v14  ;;  %10675 = vmatprep.mubr.msk.bf16.mxu1 %vm783_vm3, %v1158_v41  ;;  %v1075_v14 = vsel %vm1066_vm12, %v1056_v15, %v1057_v5 }
 0x2bf   :  { %10713 = vmatprep.subr.bf16.mxu1 %v11565_v25  ;;  %v1159_v63 = vpack.c.bf16 %v1075_v14, %v1076_v18  ;;  %10737 = vmatprep.subr.bf16.mxu0 %v11569_v17 }
 0x2c1   :  { %10738 = vmatpush3.bf16.msra.mxu0 %v11569_v17 }
 0x2c2   :  { %10714 = vmatpush3.bf16.msra.mxu1 %v11565_v25  ;;  %10739 = vmatprep.subr.bf16.mxu0 %v11570_v39 }
 0x2c3   :  { %10715 = vmatprep.subr.bf16.mxu1 %v11566_v4 }
 0x2c5   :  { %10676 = vmatmul.mubr.msk.bf16.gmra.mxu1 %vm783_vm3, %v1159_v63  ;;  %10740 = vmatpush3.bf16.msra.mxu0 %v11570_v39 }
 0x2c6   :  { %10679 = vmatprep.mubr.msk.bf16.mxu1 %vm783_vm3, %v1160_v49  ;;  %10716 = vmatpush3.bf16.msra.mxu1 %v11566_v4 }
 0x2c7   :  { %10717 = vmatprep.subr.bf16.mxu1 %v11567_v59  ;;  %10741 = vmatprep.subr.bf16.mxu0 %v11571_v52 }
 0x2c9   :  { %10742 = vmatpush3.bf16.msra.mxu0 %v11571_v52 }
 0x2ca   :  { %10718 = vmatpush3.bf16.msra.mxu1 %v11567_v59 }
 0x2cb   :  { %10759 = vmatprep.subr.bf16.mxu1 %v11572_v12 }
 0x2cd   :  { %10680 = vmatmul.mubr.msk.bf16.gmra.mxu1 %vm783_vm3, %v1161_v32 }
 0x2ce   :  { %10683 = vmatprep.mubr.msk.bf16.mxu1 %vm783_vm3, %v1162_v58 }
 0x2d5   :  { %10684 = vmatmul.mubr.msk.bf16.gmra.mxu1 %vm783_vm3, %v1163_v53 }
 0x2d6   :  { %10719 = vmatprep.mubr.msk.bf16.mxu1 %vm783_vm3, %v15742_v60 }
 0x2dd   :  { %10720 = vmatmul.mubr.msk.bf16.vlgmr.msra.gmra.mxu1 %vm783_vm3, %v15743_v31 }
 0x2de   :  { %10723 = vmatprep.mubr.msk.bf16.mxu1 %vm783_vm3, %v15744_v50  ;;  %10760 = vmatpush3.bf16.msra.mxu1 %v11572_v12 }
 0x2df   :  { %10761 = vmatprep.subr.bf16.mxu1 %v11573_v45 }
 0x2e2   :  { %10762 = vmatpush3.bf16.msra.mxu1 %v11573_v45 }
 0x2e3   :  { %10763 = vmatprep.subr.bf16.mxu1 %v11574_v7 }
 0x2e5   :  { %10724 = vmatmul.mubr.msk.bf16.gmra.mxu1 %vm783_vm3, %v15745_v9 }
 0x2e6   :  { %10727 = vmatprep.mubr.msk.bf16.mxu1 %vm783_vm3, %v15746_v3  ;;  %10764 = vmatpush3.bf16.msra.mxu1 %v11574_v7 }
 0x2e7   :  { %10765 = vmatprep.subr.bf16.mxu1 %v11575_v27 }
 0x2ea   :  { %10766 = vmatpush3.bf16.msra.mxu1 %v11575_v27 }
 0x2eb   :  { %10767 = vmatprep.subr.bf16.mxu1 %v11576_v8 }
 0x2ed   :  { %10728 = vmatmul.mubr.msk.bf16.gmra.mxu1 %vm783_vm3, %v15747_v55 }
 0x2ee   :  { %10731 = vmatprep.mubr.msk.bf16.mxu1 %vm783_vm3, %v15748_v23  ;;  %10768 = vmatpush3.bf16.msra.mxu1 %v11576_v8 }
 0x2f5   :  { %10732 = vmatmul.mubr.msk.bf16.gmra.mxu1 %vm783_vm3, %v15749_v1 }
 0x343   :  { %v12630_v26 = vpop.f32.mrf.mxu0 }
 0x345   :  { %v12638_v42 = vpop.f32.mrf.mxu0 }
 0x347   :  { %v12640_v40 = vpop.f32.mrf.mxu0 }
 0x349   :  { %v12645_v6 = vpop.f32.mrf.mxu0 }
 0x34b   :  { %v12647_v43 = vpop.f32.mrf.mxu0 }
 0x34d   :  { %v12652_v16 = vpop.f32.mrf.mxu0 }
 0x34f   :  { %v12657_v25 = vpop.f32.mrf.mxu0 }
 0x351   :  { %v12659_v41 = vpop.f32.mrf.mxu0 }
 0x353   :  { %v12661_v29 = vpop.f32.mrf.mxu0 }
 0x355   :  { %v12663_v5 = vpop.f32.mrf.mxu0 }
 0x357   :  { %v12665_v20 = vpop.f32.mrf.mxu0 }
 0x359   :  { %v12667_v63 = vpop.f32.mrf.mxu0 }
 0x35b   :  { %v12669_v49 = vpop.f32.mrf.mxu0 }
 0x35d   :  { %v10625_v13 = vpop.f32.mrf.mxu1  ;;  %v12675_v62 = vpop.f32.mrf.mxu0 }
 0x35e   :  { %v996_v24 = vadd.f32 %v12630_v26, %v10625_v13 }
 0x35f   :  { %v842_v15 = vpop.f32.mrf.mxu1  ;;  %v12681_v54 = vpop.f32.mrf.mxu0 }
 0x360   :  { %v988_v35 = vadd.f32 %v12638_v42, %v842_v15 }
 0x361   :  { %v10626_v4 = vpop.f32.mrf.mxu1  ;;  %v12687_v30 = vpop.f32.mrf.mxu0 }
 0x362   :  { %15750 = vst [vmem:[#allocation26_spill] sm:$0xff] %v12687_v30  ;;  %v999_v47 = vadd.f32 %v12640_v40, %v10626_v4 }
 0x363   :  { %v845_v18 = vpop.f32.mrf.mxu1  ;;  %v10697_v19 = vpop.f32.mrf.mxu0 }
 0x364   :  { %v991_v37 = vadd.f32 %v12645_v6, %v845_v18 }
 0x365   :  { %v10629_v22 = vpop.f32.mrf.mxu1  ;;  %v1521_v53 = vpop.f32.mrf.mxu0 }
 0x366   :  { %v1012_v40 = vadd.f32 %v12647_v43, %v10629_v22 }
 0x367   :  { %v858_v14 = vpop.f32.mrf.mxu1  ;;  %v10698_v50 = vpop.f32.mrf.mxu0 }
 0x368   :  { %v1004_v26 = vadd.f32 %v12652_v16, %v858_v14 }
 0x369   :  { %v10630_v10 = vpop.f32.mrf.mxu1  ;;  %v1524_v55 = vpop.f32.mrf.mxu0 }
 0x36b   :  { %v861_v59 = vpop.f32.mrf.mxu1  ;;  %v10701_v61 = vpop.f32.mrf.mxu0 }
 0x36d   :  { %v12671_v0 = vpop.f32.mrf.mxu1  ;;  %v1537_v52 = vpop.f32.mrf.mxu0 }
 0x36f   :  { %v12673_v2 = vpop.f32.mrf.mxu1  ;;  %v10702_v7 = vpop.f32.mrf.mxu0 }
 0x371   :  { %v12677_v56 = vpop.f32.mrf.mxu1  ;;  %v1540_v11 = vpop.f32.mrf.mxu0 }
 0x373   :  { %v12679_v57 = vpop.f32.mrf.mxu1  ;;  %v12711_v34 = vpop.f32.mrf.mxu0 }
 0x375   :  { %v12683_v48 = vpop.f32.mrf.mxu1 }
 0x377   :  { %v12685_v32 = vpop.f32.mrf.mxu1 }
 0x379   :  { %v12689_v58 = vpop.f32.mrf.mxu1 }
 0x37b   :  { %v12691_v21 = vpop.f32.mrf.mxu1 }
 0x37c   :  { %15751 = vst [vmem:[#allocation27_spill] sm:$0xff] %v12691_v21 }
 0x37d   :  { %v10673_v28 = vpop.f32.mrf.mxu1 }
 0x37e   :  { %v1311_v44 = vadd.f32 %v10673_v28, %v996_v24  ;;  %v1015_v28 = vadd.f32 %v12657_v25, %v10630_v10 }
 0x37f   :  { %v1246_v51 = vpop.f32.mrf.mxu1 }
 0x380   :  { %v1309_v46 = vadd.f32 %v1246_v51, %v988_v35  ;;  %v1586_v42 = vadd.f32 %v10697_v19, %v1311_v44  ;;  %v1553_v35 = vpop.f32.mrf.mxu0 }
 0x381   :  { %v10674_v60 = vpop.f32.mrf.mxu1 }
 0x382   :  { %v1312_v36 = vadd.f32 %v10674_v60, %v999_v47  ;;  %v1584_v21 = vadd.f32 %v1521_v53, %v1309_v46  ;;  %v12719_v47 = vld [vmem:[%s15583_s10] ss:$0 sm:$0xff]  ;;  %v1007_v46 = vadd.f32 %v12659_v41, %v861_v59 }
 0x383   :  { %v1249_v31 = vpop.f32.mrf.mxu1 }
 0x384   :  { %v1310_v30 = vadd.f32 %v1249_v31, %v991_v37 }
 0x385   :  { %v10677_v9 = vpop.f32.mrf.mxu1 }
 0x386   :  { %v1585_v44 = vadd.f32 %v1524_v55, %v1310_v30  ;;  %v1315_v16 = vadd.f32 %v10677_v9, %v1012_v40  ;;  %v1031_v55 = vadd.f32 %v12665_v20, %v12677_v56 }
 0x387   :  { %v1262_v3 = vpop.f32.mrf.mxu1 }
 0x388   :  { %v1313_v6 = vadd.f32 %v1262_v3, %v1004_v26  ;;  %v1590_v59 = vadd.f32 %v10701_v61, %v1315_v16  ;;  %v1028_v3 = vadd.f32 %v12661_v29, %v12671_v0  ;;  %v1023_v61 = vadd.f32 %v12667_v63, %v12679_v57 }
 0x389   :  { %v10678_v23 = vpop.f32.mrf.mxu1  ;;  %v1044_v16 = vadd.f32 %v12669_v49, %v12683_v48 }
 0x38a   :  { %v1588_v53 = vadd.f32 %v1537_v52, %v1313_v6 }
 0x38b   :  { %v1265_v1 = vpop.f32.mrf.mxu1 }
 0x38c   :  { %v1314_v19 = vadd.f32 %v1265_v1, %v1007_v46 }
 0x38d   :  { %v12693_v17 = vpop.f32.mrf.mxu1 }
 0x38e   :  { %v1319_v26 = vadd.f32 %v12693_v17, %v1028_v3 }
 0x38f   :  { %v1278_v39 = vpop.f32.mrf.mxu1 }
 0x391   :  { %v12695_v12 = vpop.f32.mrf.mxu1 }
 0x392   :  { %v1320_v29 = vadd.f32 %v12695_v12, %v1031_v55  ;;  %v1036_v12 = vadd.f32 %v12675_v62, %v12685_v32 }
 0x393   :  { %v12697_v45 = vpop.f32.mrf.mxu1 }
 0x394   :  { %v1318_v63 = vadd.f32 %v12697_v45, %v1023_v61  ;;  %v1047_v45 = vadd.f32 %v12681_v54, %v12689_v58 }
 0x395   :  { %v12699_v27 = vpop.f32.mrf.mxu1 }
 0x396   :  { %15752 = vst [vmem:[#allocation28_spill] sm:$0xff] %v12699_v27 }
 0x397   :  { %v12701_v8 = vpop.f32.mrf.mxu1 }
 0x398   :  { %v1321_v62 = vadd.f32 %v12701_v8, %v1036_v12  ;;  %v11577_v12 = vld [vmem:[%s15578_s5 + $0x50] sm:$0xff]  }
 0x399   :  { %v12705_v33 = vpop.f32.mrf.mxu1  ;;  %10769 = vmatprep.subr.bf16.mxu1 %v11577_v12 }
 0x39a   :  { %15753 = vst [vmem:[#allocation29_spill] sm:$0xff] %v12705_v33  ;;  %v1587_v33 = vadd.f32 %v10698_v50, %v1312_v36  ;;  %v1316_v36 = vadd.f32 %v10678_v23, %v1015_v28  ;;  %10770 = vmatpush3.bf16.msra.mxu1 %v11577_v12 }
 0x39b   :  { %v12708_v38 = vpop.f32.mrf.mxu1 }
 0x39c   :  { %v1591_v9 = vadd.f32 %v10702_v7, %v1316_v36 }
 0x39d   :  { %v10721_v27 = vpop.f32.mrf.mxu1 }
 0x39e   :  { %v1861_v24 = vadd.f32 %v10721_v27, %v1586_v42 }
 0x39f   :  { %v1796_v15 = vpop.f32.mrf.mxu1 }
 0x3a0   :  { %v1859_v13 = vadd.f32 %v1796_v15, %v1584_v21  ;;  %v10706_v21 = vpop.f32.mrf.mxu0  ;;  %v1884_v25 = vadd.f32 %v12719_v47, %v1861_v24 }
 0x3a1   :  { %v10722_v4 = vpop.f32.mrf.mxu1  ;;  %v1595_v46 = vadd.f32 %v10706_v21, %v1320_v29  ;;  %v15757_v49 = vld [vmem:[#allocation29_spill] sm:$0xff] }
 0x3a2   :  { %v1862_v37 = vadd.f32 %v10722_v4, %v1587_v33  ;;  %v1882_v43 = vadd.f32 %v12719_v47, %v1859_v13  ;;  %v1020_v33 = vadd.f32 %v12663_v5, %v12673_v2  ;;  %v1556_v23 = vpop.f32.mrf.mxu0  ;;  %v1900_v1 = vmax.f32 %v1884_v25, 0.0  ;;  %v15755_v25 = vld [vmem:[#allocation26_spill] sm:$0xff] }
 0x3a3   :  { %v1799_v18 = vpop.f32.mrf.mxu1  ;;  %v1589_v2 = vadd.f32 %v1540_v11, %v1314_v19  ;;  %v1594_v4 = vadd.f32 %v12711_v34, %v1319_v26  ;;  %v1593_v34 = vadd.f32 %v1556_v23, %v1318_v63  ;;  %v15756_v19 = vld [vmem:[#allocation28_spill] sm:$0xff]  ;;  %v1324_v48 = vadd.f32 %v15757_v49, %v1047_v45 }
 0x3a4   :  { %v1885_v22 = vadd.f32 %v12719_v47, %v1862_v37  ;;  %v1860_v14 = vadd.f32 %v1799_v18, %v1585_v44  ;;  %v1898_v60 = vmax.f32 %v1882_v43, 0.0  ;;  %v1317_v42 = vadd.f32 %v1278_v39, %v1020_v33  ;;  %v10709_v39 = vpop.f32.mrf.mxu0 }
 0x3a5   :  { %v10725_v10 = vpop.f32.mrf.mxu1  ;;  %v1323_v21 = vadd.f32 %v15756_v19, %v1044_v16 }
 0x3a6   :  { %v1883_v51 = vadd.f32 %v12719_v47, %v1860_v14  ;;  %v1901_v41 = vmax.f32 %v1885_v22, 0.0  ;;  %v1865_v27 = vadd.f32 %v10725_v10, %v1590_v59  ;;  %v1592_v17 = vadd.f32 %v1553_v35, %v1317_v42  ;;  %v1569_v18 = vpop.f32.mrf.mxu0  ;;  %v15754_v14 = vld [vmem:[#allocation27_spill] sm:$0xff] }
 0x3a7   :  { %v1812_v30 = vpop.f32.mrf.mxu1  ;;  %v1039_v10 = vadd.f32 %v15755_v25, %v15754_v14  ;;  %v15764_v14 = vld [vmem:[#allocation8_spill] sm:$0xff] }
 0x3a8   :  { %v1899_v31 = vmax.f32 %v1883_v51, 0.0  ;;  %v1863_v50 = vadd.f32 %v1812_v30, %v1588_v53  ;;  %v1923_v7 = vpack.c.bf16 %v1901_v41, %v1900_v1  ;;  %v1888_v40 = vadd.f32 %v12719_v47, %v1865_v27  ;;  %v10710_v8 = vpop.f32.mrf.mxu0 }
 0x3a9   :  { %v10726_v52 = vpop.f32.mrf.mxu1  ;;  %v1322_v30 = vadd.f32 %v12708_v38, %v1039_v10  ;;  %v1599_v27 = vadd.f32 %v10710_v8, %v1324_v48 }
 0x3aa   :  { %v1922_v15 = vpack.c.bf16 %v1899_v31, %v1898_v60  ;;  %v1866_v5 = vadd.f32 %v10726_v52, %v1591_v9  ;;  %v1886_v0 = vadd.f32 %v12719_v47, %v1863_v50  ;;  %v1904_v36 = vmax.f32 %v1888_v40, 0.0  ;;  %v1572_v52 = vpop.f32.mrf.mxu0 }
 0x3ab   :  { %v1815_v13 = vpop.f32.mrf.mxu1  ;;  %v1596_v31 = vadd.f32 %v1569_v18, %v1321_v62  ;;  %v1598_v9 = vadd.f32 %v10709_v39, %v1323_v21  ;;  %v1597_v26 = vadd.f32 %v1572_v52, %v1322_v30  ;;  %v15760_v62 = vld [vmem:[#allocation6_spill] sm:$0xff] }
 0x3ac   :  { %v1889_v20 = vadd.f32 %v12719_v47, %v1866_v5  ;;  %v1864_v56 = vadd.f32 %v1815_v13, %v1589_v2  ;;  %10743 = vmatprep.mubr.msk.bf16.mxu0 %vm783_vm3, %v1922_v15  ;;  %v1902_v6 = vmax.f32 %v1886_v0, 0.0 }
 0x3ad   :  { %v10729_v11 = vpop.f32.mrf.mxu1  ;;  %10744 = vmatmul.mubr.msk.bf16.vlgmr.msra.gmra.mxu0 %vm783_vm3, %v1923_v7 }
 0x3ae   :  { %v1887_v57 = vadd.f32 %v12719_v47, %v1864_v56  ;;  %v1905_v24 = vmax.f32 %v1889_v20, 0.0  ;;  %v1869_v35 = vadd.f32 %v10729_v11, %v1594_v4 }
 0x3af   :  { %v1828_v28 = vpop.f32.mrf.mxu1 }
 0x3b0   :  { %v1903_v37 = vmax.f32 %v1887_v57, 0.0  ;;  %v1867_v44 = vadd.f32 %v1828_v28, %v1592_v17  ;;  %v1925_v51 = vpack.c.bf16 %v1905_v24, %v1904_v36  ;;  %v1892_v41 = vadd.f32 %v12719_v47, %v1869_v35  ;;  %v11579_v24 = vld [vmem:[%s15578_s5 + $0x40] sm:$0xff]  }
 0x3b1   :  { %v10730_v43 = vpop.f32.mrf.mxu1  ;;  %v15758_v36 = vld [vmem:[#allocation5_spill] sm:$0xff] }
 0x3b2   :  { %v1924_v32 = vpack.c.bf16 %v1903_v37, %v1902_v6  ;;  %v1870_v22 = vadd.f32 %v10730_v43, %v1595_v46  ;;  %v1890_v54 = vadd.f32 %v12719_v47, %v1867_v44  ;;  %v1908_v42 = vmax.f32 %v1892_v41, 0.0  ;;  %v9587_v6 = vld [vmem:[%s15585_s12] ss:$0 sm:$0xff] }
 0x3b3   :  { %v1831_v53 = vpop.f32.mrf.mxu1 }
 0x3b4   :  { %v1893_v58 = vadd.f32 %v12719_v47, %v1870_v22  ;;  %v1868_v33 = vadd.f32 %v1831_v53, %v1593_v34  ;;  %10747 = vmatprep.mubr.msk.bf16.mxu0 %vm783_vm3, %v1924_v32  ;;  %v1906_v55 = vmax.f32 %v1890_v54, 0.0  ;;  %v15762_v22 = vld [vmem:[#allocation7_spill] sm:$0xff] }
 0x3b5   :  { %v10733_v59 = vpop.f32.mrf.mxu1  ;;  %10748 = vmatmul.mubr.msk.bf16.gmra.mxu0 %vm783_vm3, %v1925_v51 }
 0x3b6   :  { %v1891_v60 = vadd.f32 %v12719_v47, %v1868_v33  ;;  %v1909_v50 = vmax.f32 %v1893_v58, 0.0  ;;  %v1873_v15 = vadd.f32 %v10733_v59, %v1598_v9  ;;  %v15766_v33 = vld [vmem:[#allocation9_spill] sm:$0xff]  ;;  %v15768_v59 = vld [vmem:[#allocation10_spill] sm:$0xff] }
 0x3b7   :  { %v1844_v3 = vpop.f32.mrf.mxu1 }
 0x3b8   :  { %v1907_v23 = vmax.f32 %v1891_v60, 0.0  ;;  %v1871_v1 = vadd.f32 %v1844_v3, %v1596_v31  ;;  %v1927_v7 = vpack.c.bf16 %v1909_v50, %v1908_v42  ;;  %v1896_v20 = vadd.f32 %v12719_v47, %v1873_v15  ;;  %v15770_v60 = vld [vmem:[#allocation11_spill] sm:$0xff]  ;;  %v15772_v50 = vld [vmem:[#allocation12_spill] sm:$0xff] }
 0x3b9   :  { %v10734_v5 = vpop.f32.mrf.mxu1 }
 0x3ba   :  { %v1926_v2 = vpack.c.bf16 %v1907_v23, %v1906_v55  ;;  %v1874_v61 = vadd.f32 %v10734_v5, %v1599_v27  ;;  %v1894_v38 = vadd.f32 %v12719_v47, %v1871_v1  ;;  %v1912_v63 = vmax.f32 %v1896_v20, 0.0 }
 0x3bb   :  { %v1847_v13 = vpop.f32.mrf.mxu1 }
 0x3bc   :  { %v1897_v29 = vadd.f32 %v12719_v47, %v1874_v61  ;;  %v1872_v0 = vadd.f32 %v1847_v13, %v1597_v26  ;;  %10751 = vmatprep.mubr.msk.bf16.mxu0 %vm783_vm3, %v1926_v2  ;;  %v1910_v40 = vmax.f32 %v1894_v38, 0.0  ;;  %v15774_v2 = vld [vmem:[#allocation13_spill] sm:$0xff]  ;;  %v15778_v38 = vld [vmem:[#allocation15_spill] sm:$0xff] }
 0x3bd   :  { %10752 = vmatmul.mubr.msk.bf16.gmra.mxu0 %vm783_vm3, %v1927_v7  ;;  %v15776_v7 = vld [vmem:[#allocation14_spill] sm:$0xff] }
 0x3be   :  { %v1895_v56 = vadd.f32 %v12719_v47, %v1872_v0  ;;  %v1913_v39 = vmax.f32 %v1897_v29, 0.0  ;;  %v11578_v47 = vld [vmem:[%s15578_s5 + $0x48] sm:$0xff]   ;;  %v15780_v0 = vld [vmem:[#allocation16_spill] sm:$0xff] }
 0x3bf   :  { %10771 = vmatprep.subr.bf16.mxu1 %v11578_v47 }
 0x3c0   :  { %v1911_v11 = vmax.f32 %v1895_v56, 0.0  ;;  %v1929_v17 = vpack.c.bf16 %v1913_v39, %v1912_v63  ;;  %10772 = vmatpush3.bf16.msra.mxu1 %v11578_v47 }
 0x3c1   :  { %10773 = vmatprep.subr.bf16.mxu1 %v11579_v24 }
 0x3c2   :  { %v1928_v57 = vpack.c.bf16 %v1911_v11, %v1910_v40 }
 0x3c4   :  { %10755 = vmatprep.mubr.msk.bf16.mxu0 %vm783_vm3, %v1928_v57  ;;  %10774 = vmatpush3.bf16.msra.mxu1 %v11579_v24  ;;  %v15782_v24 = vld [vmem:[#allocation17_spill] sm:$0xff] }
 0x3c5   :  { %10756 = vmatmul.mubr.msk.bf16.gmra.mxu0 %vm783_vm3, %v1929_v17 }
 0x46d   :  { %v10745_v4 = vpop.f32.mrf.mxu0 }
 0x46e   :  { %v2028_v16 = vadd.f32 %v10745_v4, %v9587_v6 }
 0x46f   :  { %v2019_v28 = vpop.f32.mrf.mxu0 }
 0x470   :  { %v2020_v44 = vadd.f32 %v9587_v6, %v2019_v28  ;;  %v12792_v25 = vadd.f32 %v2028_v16, %v15764_v14  ;;  %v15784_v28 = vld [vmem:[#allocation18_spill] sm:$0xff]  ;;  %v15788_v16 = vld [vmem:[#allocation20_spill] sm:$0xff] }
 0x471   :  { %v10746_v37 = vpop.f32.mrf.mxu0 }
 0x472   :  { %v2031_v46 = vadd.f32 %v10746_v37, %v9587_v6  ;;  %v12786_v32 = vadd.f32 %v2020_v44, %v15760_v62  ;;  %15765 = vst [vmem:[#allocation29_spill] sm:$0xff] %v12792_v25  ;;  %v15786_v44 = vld [vmem:[#allocation19_spill] sm:$0xff] }
 0x473   :  { %v2022_v45 = vpop.f32.mrf.mxu0 }
 0x474   :  { %v2023_v18 = vadd.f32 %v9587_v6, %v2022_v45  ;;  %v12783_v35 = vadd.f32 %v2031_v46, %v15758_v36  ;;  %15761 = vst [vmem:[#allocation26_spill] sm:$0xff] %v12786_v32 }
 0x475   :  { %v10749_v43 = vpop.f32.mrf.mxu0 }
 0x476   :  { %15759 = vst [vmem:[#allocation27_spill] sm:$0xff] %v12783_v35  ;;  %v12789_v34 = vadd.f32 %v2023_v18, %v15762_v22  ;;  %v2116_v21 = vpack.c.bf16 %v12783_v35, %v12792_v25  ;;  %v2044_v48 = vadd.f32 %v10749_v43, %v9587_v6 }
 0x477   :  { %v2035_v10 = vpop.f32.mrf.mxu0 }
 0x478   :  { %15763 = vst [vmem:[#allocation28_spill] sm:$0xff] %v12789_v34  ;;  %v2115_v19 = vpack.c.bf16 %v12789_v34, %v12786_v32  ;;  %v2036_v53 = vadd.f32 %v9587_v6, %v2035_v10  ;;  %v12808_v9 = vadd.f32 %v2044_v48, %v15772_v50 }
 0x479   :  { %v10750_v51 = vpop.f32.mrf.mxu0 }
 0x47a   :  { %v2047_v49 = vadd.f32 %v10750_v51, %v9587_v6  ;;  %10775 = vmatprep.mubr.bf16.mxu1 %v2115_v19  ;;  %v12802_v30 = vadd.f32 %v2036_v53, %v15768_v59  ;;  %15773 = vst [vmem:[#allocation8_spill] sm:$0xff] %v12808_v9 }
 0x47b   :  { %v2038_v54 = vpop.f32.mrf.mxu0  ;;  %10776 = vmatmul.mubr.bf16.vlgmr.msra.gmra.mxu1 %v2116_v21 }
 0x47c   :  { %v2039_v58 = vadd.f32 %v9587_v6, %v2038_v54  ;;  %v12799_v8 = vadd.f32 %v2047_v49, %v15766_v33  ;;  %15769 = vst [vmem:[#allocation6_spill] sm:$0xff] %v12802_v30 }
 0x47d   :  { %v10753_v41 = vpop.f32.mrf.mxu0 }
 0x47e   :  { %15767 = vst [vmem:[#allocation5_spill] sm:$0xff] %v12799_v8  ;;  %v12805_v31 = vadd.f32 %v2039_v58, %v15770_v60  ;;  %v2118_v1 = vpack.c.bf16 %v12799_v8, %v12808_v9  ;;  %v2060_v42 = vadd.f32 %v10753_v41, %v9587_v6 }
 0x47f   :  { %v2051_v3 = vpop.f32.mrf.mxu0 }
 0x480   :  { %15771 = vst [vmem:[#allocation7_spill] sm:$0xff] %v12805_v31  ;;  %v2117_v55 = vpack.c.bf16 %v12805_v31, %v12802_v30  ;;  %v2052_v27 = vadd.f32 %v9587_v6, %v2051_v3  ;;  %v12824_v20 = vadd.f32 %v2060_v42, %v15780_v0 }
 0x481   :  { %v10754_v23 = vpop.f32.mrf.mxu0 }
 0x482   :  { %v2063_v52 = vadd.f32 %v10754_v23, %v9587_v6  ;;  %10779 = vmatprep.mubr.bf16.mxu1 %v2117_v55  ;;  %v12818_v13 = vadd.f32 %v2052_v27, %v15776_v7  ;;  %15781 = vst [vmem:[#allocation12_spill] sm:$0xff] %v12824_v20 }
 0x483   :  { %v2054_v15 = vpop.f32.mrf.mxu0  ;;  %10780 = vmatmul.mubr.bf16.gmra.mxu1 %v2118_v1 }
 0x484   :  { %v2055_v5 = vadd.f32 %v9587_v6, %v2054_v15  ;;  %v12815_v61 = vadd.f32 %v2063_v52, %v15774_v2  ;;  %15777 = vst [vmem:[#allocation10_spill] sm:$0xff] %v12818_v13 }
 0x485   :  { %v10757_v26 = vpop.f32.mrf.mxu0 }
 0x486   :  { %15775 = vst [vmem:[#allocation9_spill] sm:$0xff] %v12815_v61  ;;  %v12821_v29 = vadd.f32 %v2055_v5, %v15778_v38  ;;  %v2120_v11 = vpack.c.bf16 %v12815_v61, %v12824_v20  ;;  %v2076_v17 = vadd.f32 %v10757_v26, %v9587_v6 }
 0x487   :  { %v2067_v56 = vpop.f32.mrf.mxu0 }
 0x488   :  { %15779 = vst [vmem:[#allocation11_spill] sm:$0xff] %v12821_v29  ;;  %v2119_v39 = vpack.c.bf16 %v12821_v29, %v12818_v13  ;;  %v2068_v63 = vadd.f32 %v9587_v6, %v2067_v56  ;;  %v12840_v45 = vadd.f32 %v2076_v17, %v15788_v16 }
 0x489   :  { %v10758_v40 = vpop.f32.mrf.mxu0 }
 0x48a   :  { %v2079_v57 = vadd.f32 %v10758_v40, %v9587_v6  ;;  %10783 = vmatprep.mubr.bf16.mxu1 %v2119_v39  ;;  %v12834_v37 = vadd.f32 %v2068_v63, %v15784_v28  ;;  %15789 = vst [vmem:[#allocation16_spill] sm:$0xff] %v12840_v45 }
 0x48b   :  { %v2070_v12 = vpop.f32.mrf.mxu0  ;;  %10784 = vmatmul.mubr.bf16.gmra.mxu1 %v2120_v11 }
 0x48c   :  { %v2071_v47 = vadd.f32 %v9587_v6, %v2070_v12  ;;  %v12831_v4 = vadd.f32 %v2079_v57, %v15782_v24  ;;  %15785 = vst [vmem:[#allocation14_spill] sm:$0xff] %v12834_v37  ;;  %v12849_v6 = vld [vmem:[%s15579_s6 + $0x1] ss:$0 sm:$0xff] }
 0x48e   :  { %15783 = vst [vmem:[#allocation13_spill] sm:$0xff] %v12831_v4  ;;  %v12837_v46 = vadd.f32 %v2071_v47, %v15786_v44  ;;  %v2122_v36 = vpack.c.bf16 %v12831_v4, %v12840_v45 }
 0x490   :  { %15787 = vst [vmem:[#allocation15_spill] sm:$0xff] %v12837_v46  ;;  %v2121_v18 = vpack.c.bf16 %v12837_v46, %v12834_v37 }
 0x492   :  { %10787 = vmatprep.mubr.bf16.mxu1 %v2121_v18 }
 0x493   :  { %10788 = vmatmul.mubr.bf16.gmra.mxu1 %v2122_v36 }
 0x53b   :  { %v10777_v43 = vpop.f32.mrf.mxu1 }
 0x53c   :  { %v2222_v62 = vadd.f32 %v10777_v43, %v12849_v6 }
 0x53d   :  { %v2213_v22 = vpop.f32.mrf.mxu1 }
 0x53e   :  { %v12852_v14 = vmax.f32 %v2222_v62, 0.0  ;;  %v2214_v10 = vadd.f32 %v12849_v6, %v2213_v22 }
 0x53f   :  { %v10778_v19 = vpop.f32.mrf.mxu1 }
 0x540   :  { %v12855_v21 = vmax.f32 %v2214_v10, 0.0  ;;  %v2225_v51 = vadd.f32 %v10778_v19, %v12849_v6  ;;  %v2298_v53 = vsel %vm783_vm3, %v12852_v14, 0.0  ;;  %v2342_v33 = vmul.f32 %v12852_v14, %v12852_v14 }
 0x541   :  { %2299 = vadd.xlane.f32.xlu1 %v2298_v53  ;;  %v2216_v49 = vpop.f32.mrf.mxu1 }
 0x542   :  { %v2217_v48 = vadd.f32 %v12849_v6, %v2216_v49  ;;  %v2292_v54 = vsel %vm783_vm3, %v12855_v21, 0.0  ;;  %v2340_v58 = vmul.f32 %v12855_v21, %v12855_v21  ;;  %v12867_v59 = vmax.f32 %v2225_v51, 0.0 }
 0x543   :  { %v10781_v41 = vpop.f32.mrf.mxu1  ;;  %2293 = vadd.xlane.f32.xlu0 %v2292_v54  ;;  %v2362_v23 = vsel %vm783_vm3, %v2342_v33, 0.0 }
 0x544   :  { %v12869_v60 = vmax.f32 %v2217_v48, 0.0  ;;  %v2356_v50 = vsel %vm783_vm3, %v2340_v58, 0.0  ;;  %v2238_v55 = vadd.f32 %v10781_v41, %v12849_v6  ;;  %v2343_v52 = vmul.f32 %v12867_v59, %v12867_v59 }
 0x545   :  { %v2229_v3 = vpop.f32.mrf.mxu1  ;;  %2357 = vadd.xlane.f32.xlu1 %v2356_v50  ;;  %v2301_v2 = vsel %vm783_vm3, %v12867_v59, 0.0 }
 0x546   :  { %v2295_v27 = vsel %vm783_vm3, %v12869_v60, 0.0  ;;  %v12878_v15 = vmax.f32 %v2238_v55, 0.0  ;;  %v2230_v5 = vadd.f32 %v12849_v6, %v2229_v3  ;;  %v2365_v38 = vsel %vm783_vm3, %v2343_v52, 0.0 }
 0x547   :  { %v10782_v1 = vpop.f32.mrf.mxu1  ;;  %2363 = vadd.xlane.f32.xlu0 %v2362_v23  ;;  %v2341_v0 = vmul.f32 %v12869_v60, %v12869_v60 }
 0x548   :  { %v2241_v7 = vadd.f32 %v10782_v1, %v12849_v6  ;;  %v12887_v39 = vmax.f32 %v2230_v5, 0.0  ;;  %v2310_v40 = vsel %vm783_vm3, %v12878_v15, 0.0  ;;  %v2346_v24 = vmul.f32 %v12878_v15, %v12878_v15 }
 0x549   :  { %v2232_v42 = vpop.f32.mrf.mxu1  ;;  %2296 = vadd.xlane.f32.xlu1 %v2295_v27  ;;  %v2359_v17 = vsel %vm783_vm3, %v2341_v0, 0.0 }
 0x54a   :  { %v12891_v63 = vmax.f32 %v2241_v7, 0.0  ;;  %v2233_v57 = vadd.f32 %v12849_v6, %v2232_v42  ;;  %v2304_v47 = vsel %vm783_vm3, %v12887_v39, 0.0  ;;  %v2374_v36 = vsel %vm783_vm3, %v2346_v24, 0.0 }
 0x54b   :  { %v10785_v26 = vpop.f32.mrf.mxu1  ;;  %2302 = vadd.xlane.f32.xlu0 %v2301_v2  ;;  %v2344_v43 = vmul.f32 %v12887_v39, %v12887_v39 }
 0x54c   :  { %v12899_v44 = vmax.f32 %v2233_v57, 0.0  ;;  %v2313_v16 = vsel %vm783_vm3, %v12891_v63, 0.0  ;;  %v2347_v19 = vmul.f32 %v12891_v63, %v12891_v63  ;;  %v2254_v23 = vadd.f32 %v10785_v26, %v12849_v6 }
 0x54d   :  { %v2245_v56 = vpop.f32.mrf.mxu1  ;;  %2366 = vadd.xlane.f32.xlu1 %v2365_v38  ;;  %v2368_v53 = vsel %vm783_vm3, %v2344_v43, 0.0 }
 0x54e   :  { %v2307_v10 = vsel %vm783_vm3, %v12899_v44, 0.0  ;;  %v2377_v48 = vsel %vm783_vm3, %v2347_v19, 0.0  ;;  %v2345_v54 = vmul.f32 %v12899_v44, %v12899_v44  ;;  %v2246_v58 = vadd.f32 %v12849_v6, %v2245_v56 }
 0x54f   :  { %v10786_v11 = vpop.f32.mrf.mxu1  ;;  %2311 = vadd.xlane.f32.xlu0 %v2310_v40  ;;  %v12935_v5 = vmax.f32 %v2254_v23, 0.0  ;;  %v11585_v23 = vld [vmem:[#allocation2 + $0xb0] sm:$0xff]  }
 0x550   :  { %v2257_v50 = vadd.f32 %v10786_v11, %v12849_v6  ;;  %v2371_v55 = vsel %vm783_vm3, %v2345_v54, 0.0  ;;  %v12928_v1 = vmax.f32 %v2246_v58, 0.0 }
 0x551   :  { %v2248_v12 = vpop.f32.mrf.mxu1  ;;  %2360 = vadd.xlane.f32.xlu1 %v2359_v17  ;;  %v2322_v0 = vsel %vm783_vm3, %v12935_v5, 0.0 }
 0x552   :  { %v2249_v49 = vadd.f32 %v12849_v6, %v2248_v12  ;;  %v12931_v52 = vmax.f32 %v2257_v50, 0.0  ;;  %v2316_v2 = vsel %vm783_vm3, %v12928_v1, 0.0  ;;  %v2348_v56 = vmul.f32 %v12928_v1, %v12928_v1  ;;  %v11583_v50 = vld [vmem:[#allocation2 + $0xe8] sm:$0xff]  }
 0x553   :  { %v10789_v28 = vpop.f32.mrf.mxu1  ;;  %2305 = vadd.xlane.f32.xlu0 %v2304_v47  ;;  %v2350_v47 = vmul.f32 %v12935_v5, %v12935_v5 }
 0x554   :  { %v12924_v3 = vmax.f32 %v2249_v49, 0.0  ;;  %v2325_v26 = vsel %vm783_vm3, %v12931_v52, 0.0  ;;  %v2351_v57 = vmul.f32 %v12931_v52, %v12931_v52  ;;  %v2380_v12 = vsel %vm783_vm3, %v2348_v56, 0.0 }
 0x555   :  { %v2261_v18 = vpop.f32.mrf.mxu1  ;;  %2314 = vadd.xlane.f32.xlu1 %v2313_v16  ;;  %v2270_v24 = vadd.f32 %v10789_v28, %v12849_v6  ;;  %v2386_v43 = vsel %vm783_vm3, %v2350_v47, 0.0 }
 0x556   :  { %v2319_v42 = vsel %vm783_vm3, %v12924_v3, 0.0  ;;  %v2262_v7 = vadd.f32 %v12849_v6, %v2261_v18  ;;  %v2349_v38 = vmul.f32 %v12924_v3, %v12924_v3  ;;  %v2389_v18 = vsel %vm783_vm3, %v2351_v57, 0.0 }
 0x557   :  { %v10790_v62 = vpop.f32.mrf.mxu1  ;;  %2375 = vadd.xlane.f32.xlu0 %v2374_v36 }
 0x558   :  { %v2273_v22 = vadd.f32 %v10790_v62, %v12849_v6  ;;  %v12948_v40 = vmax.f32 %v2262_v7, 0.0  ;;  %v2383_v11 = vsel %vm783_vm3, %v2349_v38, 0.0  ;;  %v12962_v62 = vmax.f32 %v2270_v24, 0.0  ;;  %v12981_v7 = vld [vmem:[#allocation2 + $0x118] sm:$0xff]  }
 0x559   :  { %2308 = vadd.xlane.f32.xlu1 %v2307_v10  ;;  %v2264_v17 = vpop.f32.mrf.mxu1 }
 0x55a   :  { %v12911_v51 = vmax.f32 %v2273_v22, 0.0  ;;  %v2265_v16 = vadd.f32 %v12849_v6, %v2264_v17  ;;  %v2352_v36 = vmul.f32 %v12948_v40, %v12948_v40  ;;  %v2328_v28 = vsel %vm783_vm3, %v12948_v40, 0.0 }
 0x55b   :  { %2369 = vadd.xlane.f32.xlu0 %v2368_v53  ;;  %v2354_v19 = vmul.f32 %v12962_v62, %v12962_v62  ;;  %v2334_v53 = vsel %vm783_vm3, %v12962_v62, 0.0 }
 0x55c   :  { %v2337_v33 = vsel %vm783_vm3, %v12911_v51, 0.0  ;;  %v2355_v41 = vmul.f32 %v12911_v51, %v12911_v51  ;;  %v12964_v22 = vmax.f32 %v2265_v16, 0.0  ;;  %v2392_v10 = vsel %vm783_vm3, %v2352_v36, 0.0 }
 0x55d   :  { %2378 = vadd.xlane.f32.xlu1 %v2377_v48  ;;  %v11580_v48 = vld [vmem:[#allocation2 + $0xf8] sm:$0xff]   ;;  %v2398_v54 = vsel %vm783_vm3, %v2354_v19, 0.0 }
 0x55e   :  { %v2401_v27 = vsel %vm783_vm3, %v2355_v41, 0.0  ;;  %v2331_v6 = vsel %vm783_vm3, %v12964_v22, 0.0  ;;  %v2353_v49 = vmul.f32 %v12964_v22, %v12964_v22  ;;  %10815 = vmatprep.subr.bf16.mxu1 %v11580_v48  ;;  %v11582_v41 = vld [vmem:[#allocation2 + $0xb8] sm:$0xff]  }
 0x55f   :  { %2338 = vadd.xlane.f32.xlu0 %v2337_v33  ;;  %10816 = vmatpush3.bf16.msra.mxu1 %v11580_v48  ;;  %v11581_v33 = vld [vmem:[#allocation2 + $0xf0] sm:$0xff]  }
 0x560   :  { %v2395_v58 = vsel %vm783_vm3, %v2353_v49, 0.0  ;;  %10817 = vmatprep.subr.bf16.mxu1 %v11581_v33  ;;  %10791 = vmatprep.subr.bf16.mxu0 %v11582_v41 }
 0x561   :  { %2372 = vadd.xlane.f32.xlu1 %v2371_v55  ;;  %v11584_v55 = vld [vmem:[#allocation2 + $0xe0] sm:$0xff]   ;;  %10792 = vmatpush3.bf16.msra.mxu0 %v11582_v41 }
 0x562   :  { %10793 = vmatprep.subr.bf16.mxu0 %v11585_v23 }
 0x563   :  { %2402 = vadd.xlane.f32.xlu0 %v2401_v27  ;;  %10818 = vmatpush3.bf16.msra.mxu1 %v11581_v33  ;;  %v11586_v27 = vld [vmem:[#allocation2 + $0xa8] sm:$0xff]  }
 0x564   :  { %10819 = vmatprep.subr.bf16.mxu1 %v11583_v50 }
 0x565   :  { %2320 = vadd.xlane.f32.xlu1 %v2319_v42  ;;  %10794 = vmatpush3.bf16.msra.mxu0 %v11585_v23  ;;  %v11587_v42 = vld [vmem:[#allocation2 + $0xa0] sm:$0xff]  }
 0x566   :  { %10795 = vmatprep.subr.bf16.mxu0 %v11586_v27 }
 0x567   :  { %2317 = vadd.xlane.f32.xlu0 %v2316_v2  ;;  %10820 = vmatpush3.bf16.msra.mxu1 %v11583_v50  ;;  %v12979_v2 = vld [vmem:[#allocation2 + $0xd8] sm:$0xff]  }
 0x568   :  { %10821 = vmatprep.subr.bf16.mxu1 %v11584_v55 }
 0x569   :  { %2326 = vadd.xlane.f32.xlu1 %v2325_v26  ;;  %10796 = vmatpush3.bf16.msra.mxu0 %v11586_v27 }
 0x56a   :  { %10797 = vmatprep.subr.bf16.mxu0 %v11587_v42 }
 0x56b   :  { %2323 = vadd.xlane.f32.xlu0 %v2322_v0  ;;  %10822 = vmatpush3.bf16.msra.mxu1 %v11584_v55 }
 0x56c   :  { %10863 = vmatprep.subr.bf16.mxu1 %v12981_v7 }
 0x56d   :  { %2384 = vadd.xlane.f32.xlu1 %v2383_v11  ;;  %10798 = vmatpush3.bf16.msra.mxu0 %v11587_v42 }
 0x56e   :  { %10839 = vmatprep.subr.bf16.mxu0 %v12979_v2 }
 0x56f   :  { %2381 = vadd.xlane.f32.xlu0 %v2380_v12 }
 0x571   :  { %2390 = vadd.xlane.f32.xlu1 %v2389_v18 }
 0x573   :  { %2387 = vadd.xlane.f32.xlu0 %v2386_v43 }
 0x575   :  { %2393 = vadd.xlane.f32.xlu1 %v2392_v10 }
 0x577   :  { %2329 = vadd.xlane.f32.xlu0 %v2328_v28 }
 0x579   :  { %2332 = vadd.xlane.f32.xlu1 %v2331_v6 }
 0x57b   :  { %2335 = vadd.xlane.f32.xlu0 %v2334_v53 }
 0x57d   :  { %2399 = vadd.xlane.f32.xlu1 %v2398_v54 }
 0x57f   :  { %2396 = vadd.xlane.f32.xlu0 %v2395_v58 }
 0x5ca   :  { %v2300_v26 = vpop.xlane.xlu1 %2299 }
 0x5cb   :  { %v12987_v56 = vmul.f32 0.015625, %v2300_v26 }
 0x5cc   :  { %v2294_v38 = vpop.xlane.xlu0 %2293 }
 0x5cd   :  { %v12985_v0 = vmul.f32 0.015625, %v2294_v38  ;;  %v2438_v24 = vmul.f32 %v12987_v56, %v12987_v56 }
 0x5ce   :  { %v2358_v11 = vpop.xlane.xlu1 %2357 }
 0x5cf   :  { %v2436_v57 = vmul.f32 %v12985_v0, %v12985_v0  ;;  %v2420_v17 = vmul.f32 0.015625, %v2358_v11 }
 0x5d0   :  { %v2364_v12 = vpop.xlane.xlu0 %2363 }
 0x5d1   :  { %v2422_v47 = vmul.f32 0.015625, %v2364_v12  ;;  %v2452_v18 = vsub.f32 %v2420_v17, %v2436_v57 }
 0x5d2   :  { %v2297_v16 = vpop.xlane.xlu1 %2296 }
 0x5d3   :  { %v2454_v36 = vsub.f32 %v2422_v47, %v2438_v24  ;;  %v2484_v6 = vadd.f32 1e-05, %v2452_v18  ;;  %v12995_v19 = vmul.f32 0.015625, %v2297_v16 }
 0x5d4   :  { %v2303_v43 = vpop.xlane.xlu0 %2302 }
 0x5d5   :  { %v12993_v10 = vmul.f32 0.015625, %v2303_v43  ;;  %v2486_v49 = vadd.f32 1e-05, %v2454_v36  ;;  %11710 = vrsqrt.f32 %v2484_v6  ;;  %v2437_v41 = vmul.f32 %v12995_v19, %v12995_v19 }
 0x5d6   :  { %v2367_v28 = vpop.xlane.xlu1 %2366 }
 0x5d7   :  { %v2423_v53 = vmul.f32 0.015625, %v2367_v28  ;;  %v2439_v48 = vmul.f32 %v12993_v10, %v12993_v10  ;;  %11712 = vrsqrt.f32 %v2486_v49 }
 0x5d8   :  { %v2312_v54 = vpop.xlane.xlu0 %2311 }
 0x5d9   :  { %v2455_v58 = vsub.f32 %v2423_v53, %v2439_v48  ;;  %v13001_v27 = vmul.f32 0.015625, %v2312_v54 }
 0x5da   :  { %v2361_v33 = vpop.xlane.xlu1 %2360 }
 0x5db   :  { %v2421_v50 = vmul.f32 0.015625, %v2361_v33  ;;  %v2487_v55 = vadd.f32 1e-05, %v2455_v58  ;;  %v2442_v57 = vmul.f32 %v13001_v27, %v13001_v27 }
 0x5dc   :  { %v2306_v23 = vpop.xlane.xlu0 %2305 }
 0x5dd   :  { %v2453_v42 = vsub.f32 %v2421_v50, %v2437_v41  ;;  %11714 = vrsqrt.f32 %v2487_v55  ;;  %v13005_v12 = vmul.f32 0.015625, %v2306_v23  ;;  %v13018_v50 = vld [vmem:[%s15580_s7 + $0x1] ss:$0 sm:$0xff] }
 0x5de   :  { %v2315_v26 = vpop.xlane.xlu1 %2314 }
 0x5df   :  { %v2485_v38 = vadd.f32 1e-05, %v2453_v42  ;;  %v13007_v24 = vmul.f32 0.015625, %v2315_v26  ;;  %v2440_v36 = vmul.f32 %v13005_v12, %v13005_v12  ;;  %v2471_v42 = vsub.f32 %v12867_v59, %v12993_v10 }
 0x5e0   :  { %v2376_v11 = vpop.xlane.xlu0 %2375 }
 0x5e1   :  { %11716 = vrsqrt.f32 %v2485_v38  ;;  %v2426_v17 = vmul.f32 0.015625, %v2376_v11  ;;  %v2443_v6 = vmul.f32 %v13007_v24, %v13007_v24 }
 0x5e2   :  { %v2309_v47 = vpop.xlane.xlu1 %2308  ;;  %v11711_v54 = vpop.eup %11710 }
 0x5e3   :  { %v2458_v16 = vsub.f32 %v2426_v17, %v2442_v57  ;;  %v13013_v49 = vmul.f32 0.015625, %v2309_v47 }
 0x5e4   :  { %v2370_v18 = vpop.xlane.xlu0 %2369  ;;  %v11713_v41 = vpop.eup %11712 }
 0x5e5   :  { %v2424_v43 = vmul.f32 0.015625, %v2370_v18  ;;  %v2490_v53 = vadd.f32 1e-05, %v2458_v16  ;;  %v2441_v57 = vmul.f32 %v13013_v49, %v13013_v49  ;;  %v2524_v16 = vmul.f32 %v11711_v54, %v13018_v50 }
 0x5e6   :  { %v2379_v28 = vpop.xlane.xlu1 %2378  ;;  %v2526_v18 = vmul.f32 %v11713_v41, %v13018_v50 }
 0x5e7   :  { %v2427_v48 = vmul.f32 0.015625, %v2379_v28  ;;  %v2456_v58 = vsub.f32 %v2424_v43, %v2440_v36  ;;  %11718 = vrsqrt.f32 %v2490_v53  ;;  %v2470_v53 = vsub.f32 %v12852_v14, %v12987_v56 }
 0x5e8   :  { %v2339_v33 = vpop.xlane.xlu0 %2338 }
 0x5e9   :  { %v2459_v55 = vsub.f32 %v2427_v48, %v2443_v6  ;;  %v13020_v23 = vmul.f32 0.015625, %v2339_v33  ;;  %v2488_v26 = vadd.f32 1e-05, %v2456_v58  ;;  %v2468_v48 = vsub.f32 %v12855_v21, %v12985_v0 }
 0x5ea   :  { %v2373_v38 = vpop.xlane.xlu1 %2372  ;;  %v11715_v11 = vpop.eup %11714  ;;  %v2542_v14 = vmul.f32 %v2526_v18, %v2470_v53  ;;  %v11592_v53 = vld [vmem:[#allocation2 + $0x110] sm:$0xff]  }
 0x5eb   :  { %v2491_v17 = vadd.f32 1e-05, %v2459_v55  ;;  %v2425_v47 = vmul.f32 0.015625, %v2373_v38  ;;  %v2527_v36 = vmul.f32 %v11715_v11, %v13018_v50  ;;  %11720 = vrsqrt.f32 %v2488_v26 }
 0x5ec   :  { %v2403_v43 = vpop.xlane.xlu0 %2402  ;;  %v2451_v59 = vmul.f32 %v13020_v23, %v13020_v23  ;;  %v2469_v26 = vsub.f32 %v12869_v60, %v12995_v19  ;;  %v2540_v11 = vmul.f32 %v2524_v16, %v2468_v48 }
 0x5ed   :  { %11722 = vrsqrt.f32 %v2491_v17  ;;  %v2457_v10 = vsub.f32 %v2425_v47, %v2441_v57  ;;  %v2435_v28 = vmul.f32 0.015625, %v2403_v43  ;;  %v2543_v58 = vmul.f32 %v2527_v36, %v2471_v42  ;;  %v13041_v57 = vld [vmem:[%s15581_s8 + $0x1] ss:$0 sm:$0xff] }
 0x5ee   :  { %v11717_v6 = vpop.eup %11716  ;;  %v2321_v54 = vpop.xlane.xlu1 %2320  ;;  %v13049_v60 = vadd.f32 %v13041_v57, %v2540_v11  ;;  %v13055_v16 = vadd.f32 %v13041_v57, %v2542_v14  ;;  %v2474_v14 = vsub.f32 %v12878_v15, %v13001_v27  ;;  %v2475_v15 = vsub.f32 %v12891_v63, %v13007_v24 }
 0x5ef   :  { %v2525_v33 = vmul.f32 %v11717_v6, %v13018_v50  ;;  %v2489_v41 = vadd.f32 1e-05, %v2457_v10  ;;  %v2467_v55 = vsub.f32 %v2435_v28, %v2451_v59  ;;  %v13044_v42 = vadd.f32 %v13041_v57, %v2543_v58 }
 0x5f0   :  { %v2318_v38 = vpop.xlane.xlu0 %2317  ;;  %v13046_v17 = vmul.f32 0.015625, %v2321_v54 }
 0x5f1   :  { %11724 = vrsqrt.f32 %v2489_v41  ;;  %v2499_v56 = vadd.f32 1e-05, %v2467_v55  ;;  %v2541_v0 = vmul.f32 %v2525_v33, %v2469_v26  ;;  %v13057_v18 = vmul.f32 0.015625, %v2318_v38  ;;  %v15790_v41 = vld [vmem:[#allocation21_spill] sm:$0xff] }
 0x5f2   :  { %v2327_v21 = vpop.xlane.xlu1 %2326  ;;  %v2445_v10 = vmul.f32 %v13046_v17, %v13046_v17  ;;  %v2590_v6 = vpack.c.bf16 %v13044_v42, %v13055_v16  ;;  %vm2613_vm0 = vcmp.lt.s32.totalorder %v15790_v41, 4  ;;  %v2600_v24 = vrot.slane %v13044_v42, 4 }
 0x5f3   :  { %11726 = vrsqrt.f32 %v2499_v56  ;;  %v13052_v19 = vadd.f32 %v13041_v57, %v2541_v0  ;;  %v13059_v36 = vmul.f32 0.015625, %v2327_v21  ;;  %v2444_v55 = vmul.f32 %v13057_v18, %v13057_v18 }
 0x5f4   :  { %v2324_v47 = vpop.xlane.xlu0 %2323  ;;  %v11719_v48 = vpop.eup %11718  ;;  %v2472_v56 = vsub.f32 %v12887_v39, %v13005_v12 }
 0x5f5   :  { %v2589_v59 = vpack.c.bf16 %v13052_v19, %v13049_v60  ;;  %v13067_v54 = vmul.f32 0.015625, %v2324_v47  ;;  %v2447_v0 = vmul.f32 %v13059_v36, %v13059_v36  ;;  %v2530_v39 = vmul.f32 %v11719_v48, %v13018_v50 }
 0x5f6   :  { %v2385_v43 = vpop.xlane.xlu1 %2384 }
 0x5f7   :  { %v2429_v28 = vmul.f32 0.015625, %v2385_v43  ;;  %10823 = vmatprep.mubr.msk.bf16.mxu1 %vm783_vm3, %v2589_v59  ;;  %v2446_v27 = vmul.f32 %v13067_v54, %v13067_v54 }
 0x5f8   :  { %v2382_v58 = vpop.xlane.xlu0 %2381  ;;  %v11721_v33 = vpop.eup %11720  ;;  %10824 = vmatmul.mubr.msk.bf16.vlgmr.msra.gmra.mxu1 %vm783_vm3, %v2590_v6  ;;  %v11593_v6 = vld [vmem:[#allocation2 + $0x108] sm:$0xff]  }
 0x5f9   :  { %v2461_v26 = vsub.f32 %v2429_v28, %v2445_v10  ;;  %v2428_v38 = vmul.f32 0.015625, %v2382_v58  ;;  %v2528_v21 = vmul.f32 %v11721_v33, %v13018_v50  ;;  %10864 = vmatpush3.bf16.msra.mxu1 %v12981_v7 }
 0x5fa   :  { %v11723_v11 = vpop.eup %11722  ;;  %v2391_v47 = vpop.xlane.xlu1 %2390  ;;  %10865 = vmatprep.subr.bf16.mxu1 %v11592_v53 }
 0x5fb   :  { %v2531_v43 = vmul.f32 %v11723_v11, %v13018_v50  ;;  %v2493_v59 = vadd.f32 1e-05, %v2461_v26  ;;  %v2460_v10 = vsub.f32 %v2428_v38, %v2444_v55  ;;  %v2431_v28 = vmul.f32 0.015625, %v2391_v47 }
 0x5fc   :  { %v2388_v12 = vpop.xlane.xlu0 %2387  ;;  %v2544_v58 = vmul.f32 %v2528_v21, %v2472_v56  ;;  %v2473_v55 = vsub.f32 %v12899_v44, %v13013_v49  ;;  %v2546_v49 = vmul.f32 %v2530_v39, %v2474_v14 }
 0x5fd   :  { %11728 = vrsqrt.f32 %v2493_v59  ;;  %v2492_v33 = vadd.f32 1e-05, %v2460_v10  ;;  %v2463_v7 = vsub.f32 %v2431_v28, %v2447_v0  ;;  %v2430_v45 = vmul.f32 0.015625, %v2388_v12  ;;  %10866 = vmatpush3.bf16.msra.mxu1 %v11592_v53  ;;  %v11595_v0 = vld [vmem:[#allocation2 + $0x100] sm:$0xff]  }
 0x5fe   :  { %v11725_v11 = vpop.eup %11724  ;;  %v2394_v26 = vpop.xlane.xlu1 %2393  ;;  %v13091_v38 = vadd.f32 %v13041_v57, %v2544_v58  ;;  %v2547_v63 = vmul.f32 %v2531_v43, %v2475_v15  ;;  %10867 = vmatprep.subr.bf16.mxu1 %v11593_v6  ;;  %v2483_v59 = vsub.f32 %v12911_v51, %v13020_v23  ;;  %v2599_v10 = vrot.slane %v13055_v16, 4 }
 0x5ff   :  { %v2529_v48 = vmul.f32 %v11725_v11, %v13018_v50  ;;  %11730 = vrsqrt.f32 %v2492_v33  ;;  %v2495_v56 = vadd.f32 1e-05, %v2463_v7  ;;  %v2462_v21 = vsub.f32 %v2430_v45, %v2446_v27 }
 0x600   :  { %v11727_v47 = vpop.eup %11726  ;;  %v2330_v44 = vpop.xlane.xlu0 %2329  ;;  %v2601_v43 = vrot.slane %v13091_v38, 4  ;;  %v2432_v12 = vmul.f32 0.015625, %v2394_v26  ;;  %v13104_v58 = vsel %vm2613_vm0, %v2599_v10, %v2600_v24  ;;  %v13113_v39 = vadd.f32 %v13041_v57, %v2547_v63 }
 0x601   :  { %v2539_v28 = vmul.f32 %v11727_v47, %v13018_v50  ;;  %11732 = vrsqrt.f32 %v2495_v56  ;;  %v2494_v53 = vadd.f32 1e-05, %v2462_v21  ;;  %v13100_v15 = vmul.f32 0.015625, %v2330_v44  ;;  %10868 = vmatpush3.bf16.msra.mxu1 %v11593_v6 }
 0x602   :  { %v2333_v45 = vpop.xlane.xlu1 %2332  ;;  %v2545_v27 = vmul.f32 %v2529_v48, %v2473_v55  ;;  %v13108_v51 = vsel %vm2613_vm0, %v2600_v24, %v2601_v43  ;;  %10869 = vmatprep.subr.bf16.mxu1 %v11595_v0  ;;  %v13119_v11 = vadd.f32 %v13041_v57, %v2546_v49  ;;  %v2598_v55 = vrot.slane %v13052_v19, 4 }
 0x603   :  { %v2555_v23 = vmul.f32 %v2539_v28, %v2483_v59  ;;  %11734 = vrsqrt.f32 %v2494_v53  ;;  %v2448_v14 = vmul.f32 %v13100_v15, %v13100_v15  ;;  %v13124_v24 = vmul.f32 0.015625, %v2333_v45 }
 0x604   :  { %v2336_v33 = vpop.xlane.xlu0 %2335  ;;  %v13116_v7 = vadd.f32 %v13041_v57, %v2545_v27  ;;  %v2592_v28 = vpack.c.bf16 %v13113_v39, %v13119_v11  ;;  %v13143_v27 = vsel %vm2613_vm0, %v2598_v55, %v2599_v10  ;;  %v3231_v37 = vrot.slane %v13091_v38, 2 }
 0x605   :  { %v2464_v26 = vsub.f32 %v2432_v12, %v2448_v14  ;;  %v13126_v48 = vmul.f32 0.015625, %v2336_v33  ;;  %v13129_v63 = vadd.f32 %v13041_v57, %v2555_v23  ;;  %10870 = vmatpush3.bf16.msra.mxu1 %v11595_v0  ;;  %v2597_v12 = vrot.slane %v13049_v60, 4  ;;  %v15791_v0 = vld [vmem:[#allocation22_spill] sm:$0xff] }
 0x606   :  { %v2400_v56 = vpop.xlane.xlu1 %2399  ;;  %v2591_v21 = vpack.c.bf16 %v13116_v7, %v13091_v38  ;;  %v2602_v47 = vrot.slane %v13116_v7, 4  ;;  %vm2630_vm6 = vcmp.ge.s32.totalorder %v15791_v0, 4  ;;  %v2449_v23 = vmul.f32 %v13124_v24, %v13124_v24 }
 0x607   :  { %v2496_v59 = vadd.f32 1e-05, %v2464_v26  ;;  %v2450_v44 = vmul.f32 %v13126_v48, %v13126_v48  ;;  %v2434_v49 = vmul.f32 0.015625, %v2400_v56  ;;  %v15626_v45 = vrot.slane %v13129_v63, 4 }
 0x608   :  { %10827 = vmatprep.mubr.msk.bf16.mxu1 %vm783_vm3, %v2591_v21  ;;  %v2397_v53 = vpop.xlane.xlu0 %2396  ;;  %v2477_v56 = vsub.f32 %v12924_v3, %v13046_v17  ;;  %v13153_v21 = vsel %vm2613_vm0, %v2597_v12, %v2598_v55  ;;  %v2476_v55 = vsub.f32 %v12928_v1, %v13057_v18  ;;  %v2603_v18 = vrot.slane %v13119_v11, 4 }
 0x609   :  { %11736 = vrsqrt.f32 %v2496_v59  ;;  %v2466_v14 = vsub.f32 %v2434_v49, %v2450_v44  ;;  %10828 = vmatmul.mubr.msk.bf16.gmra.mxu1 %vm783_vm3, %v2592_v28  ;;  %v2433_v33 = vmul.f32 0.015625, %v2397_v53  ;;  %v13159_v10 = vsel %vm2613_vm0, %v15626_v45, %v2597_v12 }
 0x60a   :  { %v11729_v26 = vpop.eup %11728  ;;  %v13163_v59 = vsel %vm2613_vm0, %v2601_v43, %v2602_v47  ;;  %v2678_v3 = vsel %vm2630_vm6, %v13159_v10, 0.0  ;;  %v2704_v12 = vpack.c.bf16 %v13104_v58, %v13143_v27  ;;  %v3232_v46 = vrot.slane %v13116_v7, 2 }
 0x60b   :  { %v2533_v44 = vmul.f32 %v11729_v26, %v13018_v50  ;;  %v2498_v49 = vadd.f32 1e-05, %v2466_v14  ;;  %v2465_v28 = vsub.f32 %v2433_v33, %v2449_v23  ;;  %v2703_v53 = vpack.c.bf16 %v13153_v21, %v2678_v3  ;;  %v11589_v14 = vld [vmem:[#allocation2 + $0xd0] sm:$0xff]  }
 0x60c   :  { %v11731_v17 = vpop.eup %11730  ;;  %v2479_v33 = vsub.f32 %v12931_v52, %v13059_v36  ;;  %v2705_v1 = vpack.c.bf16 %v13163_v59, %v13108_v51  ;;  %v2604_v3 = vrot.slane %v13113_v39, 4  ;;  %v2478_v52 = vsub.f32 %v12935_v5, %v13067_v54  ;;  %v15792_v5 = vld [vmem:[#allocation23_spill] sm:$0xff] }
 0x60d   :  { %v2532_v43 = vmul.f32 %v11731_v17, %v13018_v50  ;;  %11738 = vrsqrt.f32 %v2498_v49  ;;  %v2497_v6 = vadd.f32 1e-05, %v2465_v28  ;;  %v2549_v26 = vmul.f32 %v2533_v44, %v2477_v56  ;;  %10799 = vmatprep.mubr.msk.bf16.mxu0 %vm783_vm3, %v2703_v53 }
 0x60e   :  { %v11733_v23 = vpop.eup %11732  ;;  %10800 = vmatmul.mubr.msk.bf16.vlgmr.msra.gmra.mxu0 %vm783_vm3, %v2704_v12  ;;  %v13201_v53 = vsel %vm2613_vm0, %v2603_v18, %v2604_v3  ;;  %vm2638_vm8 = vcmp.ge.s32.totalorder %v15792_v5, 4  ;;  %v3006_v0 = vrot.slane %v13116_v7, 6  ;;  %v3005_v7 = vrot.slane %v13091_v38, 6 }
 0x60f   :  { %v2535_v45 = vmul.f32 %v11733_v23, %v13018_v50  ;;  %11740 = vrsqrt.f32 %v2497_v6  ;;  %v2548_v56 = vmul.f32 %v2532_v43, %v2476_v55  ;;  %v13185_v44 = vadd.f32 %v13041_v57, %v2549_v26  ;;  %10803 = vmatprep.mubr.msk.bf16.mxu0 %vm783_vm3, %v2705_v1  ;;  %10840 = vmatpush3.bf16.msra.mxu0 %v12979_v2  ;;  %v11591_v55 = vld [vmem:[#allocation2 + $0xc8] sm:$0xff]  }
 0x610   :  { %v11735_v49 = vpop.eup %11734  ;;  %v13197_v6 = vsel %vm2613_vm0, %v2602_v47, %v2603_v18  ;;  %10841 = vmatprep.subr.bf16.mxu0 %v11589_v14  ;;  %v2480_v18 = vsub.f32 %v12948_v40, %v13100_v15  ;;  %v13239_v15 = vld [vmem:[#allocation2 + $0x138] sm:$0xff]   ;;  %v3027_v29 = vsel %vm662_vm5, %v3005_v7, %v3006_v0 }
 0x611   :  { %v2534_v36 = vmul.f32 %v11735_v49, %v13018_v50  ;;  %v13193_v28 = vadd.f32 %v13041_v57, %v2548_v56  ;;  %v2551_v17 = vmul.f32 %v2535_v45, %v2479_v33  ;;  %v2606_v12 = vrot.slane %v13185_v44, 4  ;;  %v11594_v56 = vld [vmem:[#allocation2 + $0xc0] sm:$0xff]  }
 0x612   :  { %v2706_v47 = vpack.c.bf16 %v13201_v53, %v13197_v6 }
 0x613   :  { %v2593_v2 = vpack.c.bf16 %v13185_v44, %v13193_v28  ;;  %v2605_v54 = vrot.slane %v13193_v28, 4  ;;  %v2550_v43 = vmul.f32 %v2534_v36, %v2478_v52  ;;  %v13211_v45 = vadd.f32 %v13041_v57, %v2551_v17  ;;  %10842 = vmatpush3.bf16.msra.mxu0 %v11589_v14 }
 0x614   :  { %10843 = vmatprep.subr.bf16.mxu0 %v11591_v55  ;;  %v3009_v38 = vrot.slane %v13193_v28, 6 }
 0x615   :  { %10831 = vmatprep.mubr.msk.bf16.mxu1 %vm783_vm3, %v2593_v2  ;;  %v13216_v26 = vsel %vm2613_vm0, %v2605_v54, %v2606_v12  ;;  %v13220_v23 = vsel %vm2613_vm0, %v2604_v3, %v2605_v54  ;;  %v13223_v33 = vadd.f32 %v13041_v57, %v2550_v43  ;;  %v2608_v17 = vrot.slane %v13211_v45, 4 }
 0x616   :  { %v11737_v1 = vpop.eup %11736  ;;  %v2686_v14 = vsel %vm2638_vm8, %v13220_v23, 0.0  ;;  %10804 = vmatmul.mubr.msk.bf16.gmra.mxu0 %vm783_vm3, %v2706_v47 }
 0x617   :  { %v2536_v49 = vmul.f32 %v11737_v1, %v13018_v50  ;;  %v2707_v3 = vpack.c.bf16 %v13216_v26, %v2686_v14  ;;  %v2594_v52 = vpack.c.bf16 %v13211_v45, %v13223_v33  ;;  %v2607_v36 = vrot.slane %v13223_v33, 4  ;;  %10844 = vmatpush3.bf16.msra.mxu0 %v11591_v55 }
 0x618   :  { %10845 = vmatprep.subr.bf16.mxu0 %v11594_v56  ;;  %v2482_v55 = vsub.f32 %v12962_v62, %v13126_v48  ;;  %v3228_v14 = vrot.slane %v13052_v19, 2  ;;  %v3229_v62 = vrot.slane %v13055_v16, 2  ;;  %v15627_v48 = vrot.slane %v13129_v63, 6 }
 0x619   :  { %v2552_v40 = vmul.f32 %v2536_v49, %v2480_v18  ;;  %10807 = vmatprep.mubr.msk.bf16.mxu0 %vm783_vm3, %v2707_v3  ;;  %10832 = vmatmul.mubr.msk.bf16.gmra.mxu1 %vm783_vm3, %v2594_v52  ;;  %v13243_v54 = vsel %vm2613_vm0, %v2607_v36, %v2608_v17  ;;  %v13247_v43 = vsel %vm2613_vm0, %v2606_v12, %v2607_v36  ;;  %v15793_v36 = vld [vmem:[#allocation25_spill] sm:$0xff] }
 0x61a   :  { %v11739_v2 = vpop.eup %11738  ;;  %v2481_v18 = vsub.f32 %v12964_v22, %v13124_v24  ;;  %v2708_v12 = vpack.c.bf16 %v13243_v54, %v13247_v43  ;;  %vm3468_vm12 = vcmp.lt.s32.totalorder %v15793_v36, 60 }
 0x61b   :  { %v2538_v47 = vmul.f32 %v11739_v2, %v13018_v50  ;;  %10846 = vmatpush3.bf16.msra.mxu0 %v11594_v56  ;;  %v13256_v49 = vadd.f32 %v13041_v57, %v2552_v40  ;;  %v15628_v56 = vrot.slane %v13049_v60, 2  ;;  %v3001_v40 = vrot.slane %v13049_v60, 6 }
 0x61c   :  { %v11741_v1 = vpop.eup %11740  ;;  %10887 = vmatprep.subr.bf16.mxu0 %v13239_v15 }
 0x61d   :  { %v2537_v3 = vmul.f32 %v11741_v1, %v13018_v50  ;;  %v2554_v52 = vmul.f32 %v2538_v47, %v2482_v55  ;;  %v3256_v50 = vsel %vm1616_vm4, %v3228_v14, %v3229_v62  ;;  %v3257_v55 = vsel %vm1616_vm4, %v15628_v56, %v3228_v14 }
 0x61e   :  { %10808 = vmatmul.mubr.msk.bf16.gmra.mxu0 %vm783_vm3, %v2708_v12  ;;  %v2609_v47 = vrot.slane %v13256_v49, 4  ;;  %v15794_v12 = vld [vmem:[#allocation24_spill] sm:$0xff]  ;;  %v15795_v14 = vrot.slane %v13129_v63, 4  ;;  %v3284_v56 = vpack.c.bf16 %v3256_v50, %v3257_v55 }
 0x61f   :  { %v2553_v22 = vmul.f32 %v2537_v3, %v2481_v18  ;;  %v13266_v24 = vadd.f32 %v13041_v57, %v2554_v52  ;;  %v3002_v18 = vrot.slane %v13052_v19, 6  ;;  %v3032_v3 = vsel %vm662_vm5, %v15627_v48, %v3001_v40 }
 0x620   :  { %vm3460_vm13 = vcmp.lt.s32.totalorder %v15794_v12, 60  ;;  %v13300_v19 = vsel %vm3468_vm12, %v13159_v10, 0.0  ;;  %v13314_v4 = vsel %vm2613_vm0, %v2608_v17, %v2609_v47  ;;  %v3033_v50 = vsel %vm679_vm7, %v3032_v3, 0.0 }
 0x621   :  { %v13274_v2 = vadd.f32 %v13041_v57, %v2553_v22  ;;  %v2611_v1 = vrot.slane %v13266_v24, 4  ;;  %v2596_v48 = vpack.c.bf16 %v13129_v63, %v13266_v24  ;;  %v3230_v17 = vrot.slane %v13044_v42, 2 }
 0x622   :  { %v13337_v3 = vsel %vm3460_vm13, %v13220_v23, 0.0  ;;  %v3253_v23 = vsel %vm1616_vm4, %v3231_v37, %v3232_v46 }
 0x623   :  { %v2595_v57 = vpack.c.bf16 %v13274_v2, %v13256_v49  ;;  %v2610_v52 = vrot.slane %v13274_v2, 4  ;;  %v13295_v22 = vsel %vm2613_vm0, %v2611_v1, %v15795_v14 }
 0x625   :  { %10835 = vmatprep.mubr.msk.bf16.mxu1 %vm783_vm3, %v2595_v57  ;;  %v13310_v14 = vsel %vm2613_vm0, %v2609_v47, %v2610_v52  ;;  %v13318_v10 = vsel %vm2613_vm0, %v2610_v52, %v2611_v1  ;;  %v3031_v47 = vsel %vm662_vm5, %v3001_v40, %v3002_v18  ;;  %v3003_v52 = vrot.slane %v13055_v16, 6 }
 0x626   :  { %10836 = vmatmul.mubr.msk.bf16.gmra.mxu1 %vm783_vm3, %v2596_v48  ;;  %v2709_v55 = vpack.c.bf16 %v13310_v14, %v13314_v4  ;;  %v2710_v57 = vpack.c.bf16 %v13295_v22, %v13318_v10  ;;  %v3058_v1 = vpack.c.bf16 %v3031_v47, %v3033_v50  ;;  %v3233_v48 = vrot.slane %v13119_v11, 2 }
 0x627   :  { %10871 = vmatprep.mubr.msk.bf16.mxu1 %vm783_vm3, %v3284_v56  ;;  %v3254_v56 = vsel %vm1616_vm4, %v3230_v17, %v3231_v37  ;;  %v3235_v16 = vrot.slane %v13193_v28, 2  ;;  %v3030_v47 = vsel %vm662_vm5, %v3002_v18, %v3003_v52  ;;  %v3007_v28 = vrot.slane %v13119_v11, 6 }
 0x628   :  { %10811 = vmatprep.mubr.msk.bf16.mxu0 %vm783_vm3, %v2709_v55  ;;  %v3252_v50 = vsel %vm1616_vm4, %v3232_v46, %v3233_v48  ;;  %v3004_v55 = vrot.slane %v13044_v42, 6  ;;  %v3237_v42 = vrot.slane %v13223_v33, 2 }
 0x629   :  { %10812 = vmatmul.mubr.msk.bf16.gmra.mxu0 %vm783_vm3, %v2710_v57  ;;  %v3255_v57 = vsel %vm1616_vm4, %v3229_v62, %v3230_v17  ;;  %v3286_v20 = vpack.c.bf16 %v3252_v50, %v3253_v23  ;;  %v11597_v17 = vld [vmem:[#allocation2 + $0x130] sm:$0xff]   ;;  %v3008_v50 = vrot.slane %v13113_v39, 6  ;;  %v3010_v23 = vrot.slane %v13185_v44, 6 }
 0x62a   :  { %10847 = vmatprep.mubr.msk.bf16.mxu0 %vm783_vm3, %v3058_v1  ;;  %v3285_v40 = vpack.c.bf16 %v3254_v56, %v3255_v57  ;;  %v3234_v1 = vrot.slane %v13113_v39, 2  ;;  %v3029_v37 = vsel %vm662_vm5, %v3003_v52, %v3004_v55  ;;  %v3028_v18 = vsel %vm662_vm5, %v3004_v55, %v3005_v7  ;;  %v11598_v55 = vld [vmem:[#allocation2 + $0x128] sm:$0xff]  }
 0x62b   :  { %v3059_v62 = vpack.c.bf16 %v3029_v37, %v3030_v47  ;;  %v3060_v56 = vpack.c.bf16 %v3027_v29, %v3028_v18  ;;  %v3024_v29 = vsel %vm662_vm5, %v3008_v50, %v3009_v38  ;;  %v3026_v7 = vsel %vm662_vm5, %v3006_v0, %v3007_v28 }
 0x62c   :  { %v3250_v46 = vsel %vm1616_vm4, %v3234_v1, %v3235_v16  ;;  %v3251_v39 = vsel %vm1616_vm4, %v3233_v48, %v3234_v1  ;;  %v3239_v47 = vrot.slane %v13256_v49, 2  ;;  %v3023_v37 = vsel %vm662_vm5, %v3009_v38, %v3010_v23 }
 0x62d   :  { %v3266_v52 = vsel %vm1640_vm10, %v3250_v46, 0.0  ;;  %v3041_v48 = vsel %vm687_vm9, %v3024_v29, 0.0  ;;  %v3238_v1 = vrot.slane %v13211_v45, 2  ;;  %v11599_v46 = vld [vmem:[#allocation2 + $0x120] sm:$0xff]   ;;  %v3241_v38 = vrot.slane %v13266_v24, 2 }
 0x62e   :  { %10872 = vmatmul.mubr.msk.bf16.vlgmr.msra.gmra.mxu1 %vm783_vm3, %v3285_v40  ;;  %v3236_v40 = vrot.slane %v13185_v44, 2  ;;  %v3287_v57 = vpack.c.bf16 %v3266_v52, %v3251_v39  ;;  %v3025_v44 = vsel %vm662_vm5, %v3007_v28, %v3008_v50  ;;  %v3011_v18 = vrot.slane %v13223_v33, 6 }
 0x62f   :  { %10875 = vmatprep.mubr.msk.bf16.mxu1 %vm783_vm3, %v3286_v20  ;;  %v3061_v0 = vpack.c.bf16 %v3025_v44, %v3026_v7  ;;  %v3012_v52 = vrot.slane %v13211_v45, 6  ;;  %v3247_v33 = vsel %vm1616_vm4, %v3237_v42, %v3238_v1  ;;  %v3242_v39 = vrot.slane %v13129_v63, 2 }
 0x630   :  { %v3248_v20 = vsel %vm1616_vm4, %v3236_v40, %v3237_v42  ;;  %v3022_v29 = vsel %vm662_vm5, %v3010_v23, %v3011_v18 }
 0x631   :  { %10848 = vmatmul.mubr.msk.bf16.vlgmr.msra.gmra.mxu0 %vm783_vm3, %v3059_v62  ;;  %v3062_v62 = vpack.c.bf16 %v3023_v37, %v3041_v48  ;;  %v3243_v7 = vsel %vm1616_vm4, %v3241_v38, %v3242_v39 }
 0x632   :  { %10888 = vmatpush3.bf16.msra.mxu0 %v13239_v15  ;;  %10851 = vmatprep.mubr.msk.bf16.mxu0 %vm783_vm3, %v3060_v56  ;;  %v3249_v15 = vsel %vm1616_vm4, %v3235_v16, %v3236_v40  ;;  %v3240_v16 = vrot.slane %v13274_v2, 2  ;;  %v3246_v56 = vsel %vm1616_vm4, %v3238_v1, %v3239_v47  ;;  %v15798_v1 = vpack.c.bf16 %v13108_v51, %v13104_v58 }
 0x633   :  { %10889 = vmatprep.subr.bf16.mxu0 %v11597_v17  ;;  %v3288_v11 = vpack.c.bf16 %v3248_v20, %v3249_v15  ;;  %v3013_v20 = vrot.slane %v13256_v49, 6  ;;  %v3289_v28 = vpack.c.bf16 %v3246_v56, %v3247_v33  ;;  %v15796_v15 = vrot.slane %v13049_v60, 2 }
 0x634   :  { %v3244_v40 = vsel %vm1616_vm4, %v3240_v16, %v3241_v38  ;;  %v3245_v50 = vsel %vm1616_vm4, %v3239_v47, %v3240_v16  ;;  %v3015_v47 = vrot.slane %v13266_v24, 6  ;;  %v15797_v60 = vrot.slane %v13129_v63, 6 }
 0x635   :  { %v3020_v42 = vsel %vm662_vm5, %v3012_v52, %v3013_v20  ;;  %v3258_v23 = vsel %vm1616_vm4, %v3242_v39, %v15796_v15  ;;  %v3528_v24 = vpack.c.bf16 %v13197_v6, %v13163_v59  ;;  %v3530_v63 = vpack.c.bf16 %v13247_v43, %v13216_v26  ;;  %v11600_v59 = vld [vmem:[%s15584_s11 + $0x38] sm:$0xff]   ;;  %v11602_v6 = vld [vmem:[%s15584_s11 + $0x28] sm:$0xff]  }
 0x636   :  { %10876 = vmatmul.mubr.msk.bf16.gmra.mxu1 %vm783_vm3, %v3287_v57  ;;  %10890 = vmatpush3.bf16.msra.mxu0 %v11597_v17  ;;  %v3014_v17 = vrot.slane %v13274_v2, 6  ;;  %v3021_v2 = vsel %vm662_vm5, %v3011_v18, %v3012_v52  ;;  %v3290_v57 = vpack.c.bf16 %v3244_v40, %v3245_v50  ;;  %v3017_v44 = vsel %vm662_vm5, %v3015_v47, %v15797_v60  ;;  %v11604_v26 = vld [vmem:[%s15578_s5 + $0xb8] sm:$0xff]  }
 0x637   :  { %10879 = vmatprep.mubr.msk.bf16.mxu1 %vm783_vm3, %v3288_v11  ;;  %10891 = vmatprep.subr.bf16.mxu0 %v11598_v55  ;;  %v3063_v49 = vpack.c.bf16 %v3021_v2, %v3022_v29  ;;  %v3274_v11 = vsel %vm1648_vm11, %v3258_v23, 0.0  ;;  %v3532_v58 = vpack.c.bf16 %v13318_v10, %v13310_v14  ;;  %v15800_v51 = vpack.c.bf16 %v13300_v19, %v13295_v22  ;;  %v11606_v22 = vld [vmem:[%s15578_s5 + $0xa8] sm:$0xff]   ;;  %v11607_v14 = vld [vmem:[%s15578_s5 + $0xa0] sm:$0xff]  }
 0x638   :  { %v3019_v45 = vsel %vm662_vm5, %v3013_v20, %v3014_v17  ;;  %v3291_v37 = vpack.c.bf16 %v3274_v11, %v3243_v7  ;;  %v3018_v48 = vsel %vm662_vm5, %v3014_v17, %v3015_v47  ;;  %10911 = vmatprep.subr.bf16.mxu1 %v11600_v59 }
 0x639   :  { %10852 = vmatmul.mubr.msk.bf16.gmra.mxu0 %vm783_vm3, %v3061_v0  ;;  %v3065_v16 = vpack.c.bf16 %v3017_v44, %v3018_v48  ;;  %v3526_v0 = vpack.c.bf16 %v13143_v27, %v13153_v21  ;;  %v15799_v27 = vpack.c.bf16 %v13337_v3, %v13201_v53  ;;  %v3531_v21 = vpack.c.bf16 %v13314_v4, %v13243_v54  ;;  %v11601_v4 = vld [vmem:[%s15584_s11 + $0x30] sm:$0xff]   ;;  %v11603_v53 = vld [vmem:[%s15584_s11 + $0x20] sm:$0xff]   ;;  %v11608_v3 = vld [vmem:[%s15578_s5 + $0x98] sm:$0xff]  }
 0x63a   :  { %10855 = vmatprep.mubr.msk.bf16.mxu0 %vm783_vm3, %v3062_v62  ;;  %10892 = vmatpush3.bf16.msra.mxu0 %v11598_v55  ;;  %v3064_v55 = vpack.c.bf16 %v3019_v45, %v3020_v42  ;;  %v11605_v54 = vld [vmem:[%s15578_s5 + $0xb0] sm:$0xff]  }
 0x63b   :  { %10893 = vmatprep.subr.bf16.mxu0 %v11599_v46  ;;  %10912 = vmatpush3.bf16.msra.mxu1 %v11600_v59 }
 0x63c   :  { %10913 = vmatprep.subr.bf16.mxu1 %v11601_v4 }
 0x63e   :  { %10880 = vmatmul.mubr.msk.bf16.gmra.mxu1 %vm783_vm3, %v3289_v28  ;;  %10894 = vmatpush3.bf16.msra.mxu0 %v11599_v46 }
 0x63f   :  { %10883 = vmatprep.mubr.msk.bf16.mxu1 %vm783_vm3, %v3290_v57  ;;  %10914 = vmatpush3.bf16.msra.mxu1 %v11601_v4 }
 0x640   :  { %10915 = vmatprep.subr.bf16.mxu1 %v11602_v6  ;;  %10935 = vmatprep.subr.bf16.mxu0 %v11604_v26 }
 0x641   :  { %10856 = vmatmul.mubr.msk.bf16.gmra.mxu0 %vm783_vm3, %v3063_v49 }
 0x642   :  { %10859 = vmatprep.mubr.msk.bf16.mxu0 %vm783_vm3, %v3064_v55 }
 0x643   :  { %10916 = vmatpush3.bf16.msra.mxu1 %v11602_v6 }
 0x644   :  { %10917 = vmatprep.subr.bf16.mxu1 %v11603_v53 }
 0x646   :  { %10884 = vmatmul.mubr.msk.bf16.gmra.mxu1 %vm783_vm3, %v3291_v37 }
 0x647   :  { %10918 = vmatpush3.bf16.msra.mxu1 %v11603_v53 }
 0x649   :  { %10860 = vmatmul.mubr.msk.bf16.gmra.mxu0 %vm783_vm3, %v3065_v16 }
 0x64a   :  { %10895 = vmatprep.mubr.msk.bf16.mxu0 %vm783_vm3, %v3526_v0 }
 0x651   :  { %10896 = vmatmul.mubr.msk.bf16.vlgmr.msra.gmra.mxu0 %vm783_vm3, %v15798_v1 }
 0x652   :  { %10899 = vmatprep.mubr.msk.bf16.mxu0 %vm783_vm3, %v3528_v24  ;;  %10936 = vmatpush3.bf16.msra.mxu0 %v11604_v26 }
 0x653   :  { %10937 = vmatprep.subr.bf16.mxu0 %v11605_v54 }
 0x656   :  { %10938 = vmatpush3.bf16.msra.mxu0 %v11605_v54 }
 0x657   :  { %10939 = vmatprep.subr.bf16.mxu0 %v11606_v22 }
 0x659   :  { %10900 = vmatmul.mubr.msk.bf16.gmra.mxu0 %vm783_vm3, %v15799_v27 }
 0x65a   :  { %10903 = vmatprep.mubr.msk.bf16.mxu0 %vm783_vm3, %v3530_v63  ;;  %10940 = vmatpush3.bf16.msra.mxu0 %v11606_v22 }
 0x65b   :  { %10941 = vmatprep.subr.bf16.mxu0 %v11607_v14 }
 0x65e   :  { %10942 = vmatpush3.bf16.msra.mxu0 %v11607_v14 }
 0x65f   :  { %10943 = vmatprep.subr.bf16.mxu0 %v11608_v3 }
 0x661   :  { %10904 = vmatmul.mubr.msk.bf16.gmra.mxu0 %vm783_vm3, %v3531_v21 }
 0x662   :  { %10907 = vmatprep.mubr.msk.bf16.mxu0 %vm783_vm3, %v3532_v58  ;;  %10944 = vmatpush3.bf16.msra.mxu0 %v11608_v3 }
 0x669   :  { %10908 = vmatmul.mubr.msk.bf16.gmra.mxu0 %vm783_vm3, %v15800_v51 }
 0x6b8   :  { %v13491_v43 = vpop.f32.mrf.mxu1 }
 0x6ba   :  { %v2938_v19 = vpop.f32.mrf.mxu1 }
 0x6bc   :  { %v10826_v10 = vpop.f32.mrf.mxu1 }
 0x6be   :  { %v2941_v46 = vpop.f32.mrf.mxu1 }
 0x6c9   :  { %v13502_v62 = vpop.f32.mrf.mxu1 }
 0x6cb   :  { %v13504_v38 = vpop.f32.mrf.mxu1 }
 0x6cd   :  { %v13506_v17 = vpop.f32.mrf.mxu1 }
 0x6ce   :  { %v10801_v18 = vpop.f32.mrf.mxu0 }
 0x6cf   :  { %v13508_v52 = vpop.f32.mrf.mxu1  ;;  %v2947_v13 = vadd.f32 %v13491_v43, %v10801_v18 }
 0x6d0   :  { %v2793_v56 = vpop.f32.mrf.mxu0 }
 0x6d1   :  { %v2939_v41 = vadd.f32 %v2938_v19, %v2793_v56 }
 0x6d2   :  { %v10802_v40 = vpop.f32.mrf.mxu0 }
 0x6d3   :  { %v2950_v31 = vadd.f32 %v10826_v10, %v10802_v40 }
 0x6d4   :  { %v2796_v50 = vpop.f32.mrf.mxu0 }
 0x6d5   :  { %v2942_v34 = vadd.f32 %v2941_v46, %v2796_v50 }
 0x6d6   :  { %v10805_v33 = vpop.f32.mrf.mxu0 }
 0x6d7   :  { %v2963_v56 = vadd.f32 %v13502_v62, %v10805_v33 }
 0x6d8   :  { %v2809_v20 = vpop.f32.mrf.mxu0 }
 0x6d9   :  { %v13510_v28 = vpop.f32.mrf.mxu1  ;;  %v2955_v19 = vadd.f32 %v13504_v38, %v2809_v20 }
 0x6da   :  { %v10806_v2 = vpop.f32.mrf.mxu0 }
 0x6db   :  { %v13512_v29 = vpop.f32.mrf.mxu1  ;;  %v2966_v40 = vadd.f32 %v13506_v17, %v10806_v2 }
 0x6dc   :  { %v13514_v39 = vpop.f32.mrf.mxu0 }
 0x6dd   :  { %v13518_v45 = vpop.f32.mrf.mxu1 }
 0x6de   :  { %v13516_v57 = vpop.f32.mrf.mxu0 }
 0x6df   :  { %v13524_v55 = vpop.f32.mrf.mxu1 }
 0x6e0   :  { %v13520_v49 = vpop.f32.mrf.mxu0 }
 0x6e2   :  { %v13522_v42 = vpop.f32.mrf.mxu0 }
 0x6e4   :  { %v13528_v23 = vpop.f32.mrf.mxu0 }
 0x6e6   :  { %v13526_v15 = vpop.f32.mrf.mxu1 }
 0x6e8   :  { %v13530_v7 = vpop.f32.mrf.mxu1 }
 0x6e9   :  { %v13532_v47 = vpop.f32.mrf.mxu0 }
 0x6ea   :  { %v13534_v11 = vpop.f32.mrf.mxu1 }
 0x6eb   :  { %15801 = vst [vmem:[#allocation17_spill] sm:$0xff] %v13534_v11  ;;  %v13536_v37 = vpop.f32.mrf.mxu0 }
 0x6ec   :  { %v13538_v48 = vpop.f32.mrf.mxu1 }
 0x6ed   :  { %15802 = vst [vmem:[#allocation18_spill] sm:$0xff] %v13538_v48  ;;  %v13540_v60 = vpop.f32.mrf.mxu0 }
 0x6ee   :  { %v10873_v16 = vpop.f32.mrf.mxu1 }
 0x6ef   :  { %v13542_v44 = vpop.f32.mrf.mxu0 }
 0x6f0   :  { %15803 = vst [vmem:[#allocation19_spill] sm:$0xff] %v13542_v44  ;;  %v3374_v1 = vpop.f32.mrf.mxu1 }
 0x6f1   :  { %v10849_v0 = vpop.f32.mrf.mxu0 }
 0x6f2   :  { %v10874_v21 = vpop.f32.mrf.mxu1  ;;  %v3213_v8 = vadd.f32 %v10849_v0, %v2947_v13 }
 0x6f3   :  { %v3148_v24 = vpop.f32.mrf.mxu0 }
 0x6f4   :  { %v3377_v59 = vpop.f32.mrf.mxu1  ;;  %v3211_v30 = vadd.f32 %v3148_v24, %v2939_v41  ;;  %v3439_v11 = vadd.f32 %v10873_v16, %v3213_v8 }
 0x6f5   :  { %v10850_v63 = vpop.f32.mrf.mxu0 }
 0x6f6   :  { %v10877_v53 = vpop.f32.mrf.mxu1  ;;  %v3214_v32 = vadd.f32 %v10850_v63, %v2950_v31  ;;  %v13567_v31 = vld [vmem:[%s15583_s10 + $0x1] ss:$0 sm:$0xff] }
 0x6f7   :  { %v3151_v27 = vpop.f32.mrf.mxu0 }
 0x6f8   :  { %v3390_v22 = vpop.f32.mrf.mxu1  ;;  %v3212_v44 = vadd.f32 %v3151_v27, %v2942_v34  ;;  %v3440_v18 = vadd.f32 %v10874_v21, %v3214_v32  ;;  %v2979_v27 = vadd.f32 %v13510_v28, %v13516_v57  ;;  %v2982_v21 = vadd.f32 %v13518_v45, %v13522_v42 }
 0x6f9   :  { %v10853_v58 = vpop.f32.mrf.mxu0 }
 0x6fa   :  { %v10878_v36 = vpop.f32.mrf.mxu1  ;;  %v3438_v8 = vadd.f32 %v3377_v59, %v3212_v44  ;;  %v2971_v44 = vadd.f32 %v13512_v29, %v13520_v49 }
 0x6fb   :  { %v3164_v51 = vpop.f32.mrf.mxu0 }
 0x6fc   :  { %v3393_v61 = vpop.f32.mrf.mxu1  ;;  %v3215_v46 = vadd.f32 %v3164_v51, %v2955_v19 }
 0x6fd   :  { %v10854_v4 = vpop.f32.mrf.mxu0 }
 0x6fe   :  { %v13559_v35 = vpop.f32.mrf.mxu1 }
 0x6ff   :  { %v3167_v6 = vpop.f32.mrf.mxu0 }
 0x700   :  { %v3406_v10 = vpop.f32.mrf.mxu1 }
 0x701   :  { %v13544_v26 = vpop.f32.mrf.mxu0 }
 0x702   :  { %v10882_v17 = vpop.f32.mrf.mxu1  ;;  %v3221_v19 = vadd.f32 %v13544_v26, %v2979_v27 }
 0x703   :  { %v3180_v54 = vpop.f32.mrf.mxu0 }
 0x705   :  { %v13546_v14 = vpop.f32.mrf.mxu0 }
 0x706   :  { %v3222_v28 = vadd.f32 %v13546_v14, %v2982_v21  ;;  %v2987_v14 = vadd.f32 %v13530_v7, %v13536_v37 }
 0x707   :  { %v13548_v3 = vpop.f32.mrf.mxu0 }
 0x709   :  { %v13550_v12 = vpop.f32.mrf.mxu0 }
 0x70a   :  { %15804 = vst [vmem:[#allocation20_spill] sm:$0xff] %v13550_v12  ;;  %v3437_v12 = vadd.f32 %v3374_v1, %v3211_v30  ;;  %v2958_v30 = vadd.f32 %v13508_v52, %v13514_v39 }
 0x70b   :  { %v13552_v5 = vpop.f32.mrf.mxu0 }
 0x70c   :  { %15805 = vst [vmem:[#allocation30_spill] sm:$0xff] %v13552_v5  ;;  %v3216_v2 = vadd.f32 %v3167_v6, %v2958_v30  ;;  %v3219_v6 = vadd.f32 %v3180_v54, %v2971_v44  ;;  %v2995_v30 = vadd.f32 %v13526_v15, %v13532_v47 }
 0x70d   :  { %v13555_v9 = vpop.f32.mrf.mxu0 }
 0x70e   :  { %v3442_v49 = vadd.f32 %v3393_v61, %v3216_v2  ;;  %v3445_v26 = vadd.f32 %v3406_v10, %v3219_v6 }
 0x70f   :  { %v13557_v25 = vpop.f32.mrf.mxu0 }
 0x711   :  { %v10897_v48 = vpop.f32.mrf.mxu0 }
 0x712   :  { %v3681_v41 = vadd.f32 %v10897_v48, %v3439_v11  ;;  %v3441_v48 = vadd.f32 %v3390_v22, %v3215_v46 }
 0x713   :  { %v3616_v5 = vpop.f32.mrf.mxu0 }
 0x714   :  { %v3679_v43 = vadd.f32 %v3616_v5, %v3437_v12  ;;  %v3217_v5 = vadd.f32 %v10853_v58, %v2963_v56  ;;  %v3218_v12 = vadd.f32 %v10854_v4, %v2966_v40  ;;  %v3705_v33 = vadd.f32 %v13567_v31, %v3681_v41  ;;  %v3409_v58 = vpop.f32.mrf.mxu1 }
 0x715   :  { %v10898_v13 = vpop.f32.mrf.mxu0  ;;  %v3447_v41 = vadd.f32 %v13559_v35, %v3221_v19 }
 0x716   :  { %v3682_v34 = vadd.f32 %v10898_v13, %v3440_v18  ;;  %v3703_v62 = vadd.f32 %v13567_v31, %v3679_v43  ;;  %v3443_v39 = vadd.f32 %v10877_v53, %v3217_v5  ;;  %v3444_v63 = vadd.f32 %v10878_v36, %v3218_v12  ;;  %v10885_v54 = vpop.f32.mrf.mxu1  ;;  %v15806_v5 = vld [vmem:[#allocation17_spill] sm:$0xff] }
 0x717   :  { %v3619_v32 = vpop.f32.mrf.mxu0  ;;  %v3721_v51 = vmax.f32 %v3705_v33, 0.0  ;;  %v2974_v53 = vadd.f32 %v13524_v55, %v13528_v23  ;;  %v15808_v33 = vld [vmem:[#allocation19_spill] sm:$0xff] }
 0x718   :  { %v3706_v38 = vadd.f32 %v13567_v31, %v3682_v34  ;;  %v3680_v50 = vadd.f32 %v3619_v32, %v3438_v8  ;;  %v3719_v0 = vmax.f32 %v3703_v62, 0.0  ;;  %v3448_v8 = vadd.f32 %v10882_v17, %v3222_v28  ;;  %v3422_v32 = vpop.f32.mrf.mxu1 }
 0x719   :  { %v10901_v20 = vpop.f32.mrf.mxu0  ;;  %v3220_v55 = vadd.f32 %v13548_v3, %v2974_v53  ;;  %v2998_v3 = vadd.f32 %v15806_v5, %v13540_v60 }
 0x71a   :  { %v3704_v11 = vadd.f32 %v13567_v31, %v3680_v50  ;;  %v3722_v52 = vmax.f32 %v3706_v38, 0.0  ;;  %v3685_v59 = vadd.f32 %v10901_v20, %v3443_v39  ;;  %v15807_v38 = vld [vmem:[#allocation30_spill] sm:$0xff]  ;;  %v10886_v39 = vpop.f32.mrf.mxu1 }
 0x71b   :  { %v3632_v16 = vpop.f32.mrf.mxu0  ;;  %v3223_v7 = vadd.f32 %v15807_v38, %v2987_v14  ;;  %v3446_v35 = vadd.f32 %v3409_v58, %v3220_v55  ;;  %v15809_v20 = vld [vmem:[#allocation18_spill] sm:$0xff]  ;;  %v3226_v15 = vadd.f32 %v13555_v9, %v2998_v3 }
 0x71c   :  { %v3720_v24 = vmax.f32 %v3704_v11, 0.0  ;;  %v3683_v1 = vadd.f32 %v3632_v16, %v3441_v48  ;;  %v3745_v36 = vpack.c.bf16 %v3722_v52, %v3721_v51  ;;  %v3709_v18 = vadd.f32 %v13567_v31, %v3685_v59  ;;  %v15810_v11 = vld [vmem:[#allocation20_spill] sm:$0xff]  ;;  %v3425_v6 = vpop.f32.mrf.mxu1  ;;  %v15813_v38 = vld [vmem:[#allocation26_spill] sm:$0xff] }
 0x71d   :  { %v10902_v4 = vpop.f32.mrf.mxu0  ;;  %v2990_v2 = vadd.f32 %v15809_v20, %v15808_v33  ;;  %v3225_v17 = vadd.f32 %v15810_v11, %v2995_v30 }
 0x71e   :  { %v3744_v22 = vpack.c.bf16 %v3720_v24, %v3719_v0  ;;  %v3686_v29 = vadd.f32 %v10902_v4, %v3444_v63  ;;  %v3707_v57 = vadd.f32 %v13567_v31, %v3683_v1  ;;  %v3725_v12 = vmax.f32 %v3709_v18, 0.0 }
 0x71f   :  { %v3635_v43 = vpop.f32.mrf.mxu0  ;;  %v3224_v24 = vadd.f32 %v13557_v25, %v2990_v2  ;;  %v3449_v63 = vadd.f32 %v3422_v32, %v3223_v7  ;;  %v3451_v9 = vadd.f32 %v10885_v54, %v3225_v17  ;;  %v3452_v4 = vadd.f32 %v10886_v39, %v3226_v15 }
 0x720   :  { %v3710_v45 = vadd.f32 %v13567_v31, %v3686_v29  ;;  %v3684_v42 = vadd.f32 %v3635_v43, %v3442_v49  ;;  %10919 = vmatprep.mubr.msk.bf16.mxu1 %vm783_vm3, %v3744_v22  ;;  %v3723_v40 = vmax.f32 %v3707_v57, 0.0 }
 0x721   :  { %v10905_v61 = vpop.f32.mrf.mxu0  ;;  %10920 = vmatmul.mubr.msk.bf16.vlgmr.msra.gmra.mxu1 %vm783_vm3, %v3745_v36  ;;  %v3450_v36 = vadd.f32 %v3425_v6, %v3224_v24 }
 0x722   :  { %v3708_v23 = vadd.f32 %v13567_v31, %v3684_v42  ;;  %v3726_v56 = vmax.f32 %v3710_v45, 0.0  ;;  %v3689_v10 = vadd.f32 %v10905_v61, %v3447_v41  ;;  %v11611_v41 = vld [vmem:[%s15578_s5 + $0x80] sm:$0xff]  }
 0x723   :  { %v3648_v13 = vpop.f32.mrf.mxu0 }
 0x724   :  { %v3724_v46 = vmax.f32 %v3708_v23, 0.0  ;;  %v3687_v34 = vadd.f32 %v3648_v13, %v3445_v26  ;;  %v3747_v48 = vpack.c.bf16 %v3726_v56, %v3725_v12  ;;  %v3713_v16 = vadd.f32 %v13567_v31, %v3689_v10  ;;  %v11609_v56 = vld [vmem:[%s15578_s5 + $0x90] sm:$0xff]  }
 0x725   :  { %v10906_v62 = vpop.f32.mrf.mxu0  ;;  %10945 = vmatprep.subr.bf16.mxu0 %v11609_v56  ;;  %v15811_v12 = vld [vmem:[#allocation27_spill] sm:$0xff] }
 0x726   :  { %v3746_v37 = vpack.c.bf16 %v3724_v46, %v3723_v40  ;;  %v3690_v50 = vadd.f32 %v10906_v62, %v3448_v8  ;;  %v3711_v47 = vadd.f32 %v13567_v31, %v3687_v34  ;;  %v3729_v22 = vmax.f32 %v3713_v16, 0.0  ;;  %10946 = vmatpush3.bf16.msra.mxu0 %v11609_v56  ;;  %v9701_v46 = vld [vmem:[%s15585_s12 + $0x1] ss:$0 sm:$0xff] }
 0x727   :  { %v3651_v44 = vpop.f32.mrf.mxu0 }
 0x728   :  { %v3714_v60 = vadd.f32 %v13567_v31, %v3690_v50  ;;  %v3688_v52 = vadd.f32 %v3651_v44, %v3446_v35  ;;  %10923 = vmatprep.mubr.msk.bf16.mxu1 %vm783_vm3, %v3746_v37  ;;  %v3727_v58 = vmax.f32 %v3711_v47, 0.0  ;;  %v15815_v37 = vld [vmem:[#allocation28_spill] sm:$0xff]  ;;  %v15817_v35 = vld [vmem:[#allocation29_spill] sm:$0xff] }
 0x729   :  { %v10909_v0 = vpop.f32.mrf.mxu0  ;;  %10924 = vmatmul.mubr.msk.bf16.gmra.mxu1 %vm783_vm3, %v3747_v48 }
 0x72a   :  { %v3712_v1 = vadd.f32 %v13567_v31, %v3688_v52  ;;  %v3730_v27 = vmax.f32 %v3714_v60, 0.0  ;;  %v3693_v29 = vadd.f32 %v10909_v0, %v3451_v9  ;;  %v15819_v52 = vld [vmem:[#allocation5_spill] sm:$0xff]  ;;  %v15821_v0 = vld [vmem:[#allocation6_spill] sm:$0xff] }
 0x72b   :  { %v3664_v21 = vpop.f32.mrf.mxu0 }
 0x72c   :  { %v3728_v51 = vmax.f32 %v3712_v1, 0.0  ;;  %v3691_v59 = vadd.f32 %v3664_v21, %v3449_v63  ;;  %v3749_v43 = vpack.c.bf16 %v3730_v27, %v3729_v22  ;;  %v3717_v42 = vadd.f32 %v13567_v31, %v3693_v29  ;;  %v15823_v1 = vld [vmem:[#allocation7_spill] sm:$0xff]  ;;  %v15825_v27 = vld [vmem:[#allocation8_spill] sm:$0xff] }
 0x72d   :  { %v10910_v49 = vpop.f32.mrf.mxu0 }
 0x72e   :  { %v3748_v53 = vpack.c.bf16 %v3728_v51, %v3727_v58  ;;  %v3694_v19 = vadd.f32 %v10910_v49, %v3452_v4  ;;  %v3715_v25 = vadd.f32 %v13567_v31, %v3691_v59  ;;  %v3733_v23 = vmax.f32 %v3717_v42, 0.0 }
 0x72f   :  { %v3667_v28 = vpop.f32.mrf.mxu0 }
 0x730   :  { %v3718_v57 = vadd.f32 %v13567_v31, %v3694_v19  ;;  %v3692_v45 = vadd.f32 %v3667_v28, %v3450_v36  ;;  %10927 = vmatprep.mubr.msk.bf16.mxu1 %vm783_vm3, %v3748_v53  ;;  %v3731_v61 = vmax.f32 %v3715_v25, 0.0  ;;  %v15827_v53 = vld [vmem:[#allocation9_spill] sm:$0xff]  ;;  %v15831_v25 = vld [vmem:[#allocation11_spill] sm:$0xff] }
 0x731   :  { %10928 = vmatmul.mubr.msk.bf16.gmra.mxu1 %vm783_vm3, %v3749_v43  ;;  %v15829_v43 = vld [vmem:[#allocation10_spill] sm:$0xff] }
 0x732   :  { %v3716_v54 = vadd.f32 %v13567_v31, %v3692_v45  ;;  %v3734_v18 = vmax.f32 %v3718_v57, 0.0  ;;  %v11610_v31 = vld [vmem:[%s15578_s5 + $0x88] sm:$0xff]   ;;  %v15833_v45 = vld [vmem:[#allocation12_spill] sm:$0xff] }
 0x733   :  { %10947 = vmatprep.subr.bf16.mxu0 %v11610_v31 }
 0x734   :  { %v3732_v55 = vmax.f32 %v3716_v54, 0.0  ;;  %v3751_v14 = vpack.c.bf16 %v3734_v18, %v3733_v23  ;;  %10948 = vmatpush3.bf16.msra.mxu0 %v11610_v31 }
 0x735   :  { %10949 = vmatprep.subr.bf16.mxu0 %v11611_v41 }
 0x736   :  { %v3750_v26 = vpack.c.bf16 %v3732_v55, %v3731_v61 }
 0x738   :  { %10931 = vmatprep.mubr.msk.bf16.mxu1 %vm783_vm3, %v3750_v26  ;;  %10950 = vmatpush3.bf16.msra.mxu0 %v11611_v41  ;;  %v15835_v41 = vld [vmem:[#allocation13_spill] sm:$0xff] }
 0x739   :  { %10932 = vmatmul.mubr.msk.bf16.gmra.mxu1 %vm783_vm3, %v3751_v14 }
 0x7e1   :  { %v10921_v13 = vpop.f32.mrf.mxu1 }
 0x7e2   :  { %v3851_v5 = vadd.f32 %v10921_v13, %v9701_v46 }
 0x7e3   :  { %v3842_v40 = vpop.f32.mrf.mxu1 }
 0x7e4   :  { %v3843_v8 = vadd.f32 %v9701_v46, %v3842_v40  ;;  %v13641_v33 = vadd.f32 %v3851_v5, %v15817_v35  ;;  %v15837_v40 = vld [vmem:[#allocation14_spill] sm:$0xff]  ;;  %v15841_v5 = vld [vmem:[#allocation16_spill] sm:$0xff] }
 0x7e5   :  { %v10922_v34 = vpop.f32.mrf.mxu1 }
 0x7e6   :  { %v3854_v30 = vadd.f32 %v10922_v34, %v9701_v46  ;;  %v13635_v7 = vadd.f32 %v3843_v8, %v15813_v38  ;;  %15818 = vst [vmem:[#allocation18_spill] sm:$0xff] %v13641_v33  ;;  %v15839_v8 = vld [vmem:[#allocation15_spill] sm:$0xff] }
 0x7e7   :  { %v3845_v3 = vpop.f32.mrf.mxu1 }
 0x7e8   :  { %v3846_v32 = vadd.f32 %v9701_v46, %v3845_v3  ;;  %v13632_v10 = vadd.f32 %v3854_v30, %v15811_v12  ;;  %15814 = vst [vmem:[#allocation30_spill] sm:$0xff] %v13635_v7 }
 0x7e9   :  { %v10925_v62 = vpop.f32.mrf.mxu1 }
 0x7ea   :  { %15812 = vst [vmem:[#allocation17_spill] sm:$0xff] %v13632_v10  ;;  %v13638_v50 = vadd.f32 %v3846_v32, %v15815_v37  ;;  %v3939_v11 = vpack.c.bf16 %v13632_v10, %v13641_v33  ;;  %v3867_v15 = vadd.f32 %v10925_v62, %v9701_v46 }
 0x7eb   :  { %v3858_v20 = vpop.f32.mrf.mxu1 }
 0x7ec   :  { %15816 = vst [vmem:[#allocation19_spill] sm:$0xff] %v13638_v50  ;;  %v3938_v2 = vpack.c.bf16 %v13638_v50, %v13635_v7  ;;  %v3859_v48 = vadd.f32 %v9701_v46, %v3858_v20  ;;  %v13657_v9 = vadd.f32 %v3867_v15, %v15825_v27 }
 0x7ed   :  { %v10926_v17 = vpop.f32.mrf.mxu1 }
 0x7ee   :  { %v3870_v44 = vadd.f32 %v10926_v17, %v9701_v46  ;;  %10951 = vmatprep.mubr.bf16.mxu0 %v3938_v2  ;;  %v13651_v24 = vadd.f32 %v3859_v48, %v15821_v0  ;;  %15826 = vst [vmem:[#allocation28_spill] sm:$0xff] %v13657_v9 }
 0x7ef   :  { %v3861_v47 = vpop.f32.mrf.mxu1  ;;  %10952 = vmatmul.mubr.bf16.vlgmr.msra.gmra.mxu0 %v3939_v11 }
 0x7f0   :  { %v3862_v60 = vadd.f32 %v9701_v46, %v3861_v47  ;;  %v13648_v39 = vadd.f32 %v3870_v44, %v15819_v52  ;;  %15822 = vst [vmem:[#allocation27_spill] sm:$0xff] %v13651_v24 }
 0x7f1   :  { %v10929_v16 = vpop.f32.mrf.mxu1 }
 0x7f2   :  { %15820 = vst [vmem:[#allocation20_spill] sm:$0xff] %v13648_v39  ;;  %v13654_v63 = vadd.f32 %v3862_v60, %v15823_v1  ;;  %v3941_v51 = vpack.c.bf16 %v13648_v39, %v13657_v9  ;;  %v3883_v22 = vadd.f32 %v10929_v16, %v9701_v46 }
 0x7f3   :  { %v3874_v21 = vpop.f32.mrf.mxu1 }
 0x7f4   :  { %15824 = vst [vmem:[#allocation26_spill] sm:$0xff] %v13654_v63  ;;  %v3940_v58 = vpack.c.bf16 %v13654_v63, %v13651_v24  ;;  %v3875_v4 = vadd.f32 %v9701_v46, %v3874_v21  ;;  %v13673_v42 = vadd.f32 %v3883_v22, %v15833_v45 }
 0x7f5   :  { %v10930_v59 = vpop.f32.mrf.mxu1 }
 0x7f6   :  { %v3886_v6 = vadd.f32 %v10930_v59, %v9701_v46  ;;  %10955 = vmatprep.mubr.bf16.mxu0 %v3940_v58  ;;  %v13667_v28 = vadd.f32 %v3875_v4, %v15829_v43  ;;  %15834 = vst [vmem:[#allocation7_spill] sm:$0xff] %v13673_v42 }
 0x7f7   :  { %v3877_v29 = vpop.f32.mrf.mxu1  ;;  %10956 = vmatmul.mubr.bf16.gmra.mxu0 %v3941_v51 }
 0x7f8   :  { %v3878_v49 = vadd.f32 %v9701_v46, %v3877_v29  ;;  %v13664_v19 = vadd.f32 %v3886_v6, %v15827_v53  ;;  %15830 = vst [vmem:[#allocation5_spill] sm:$0xff] %v13667_v28 }
 0x7f9   :  { %v10933_v36 = vpop.f32.mrf.mxu1 }
 0x7fa   :  { %15828 = vst [vmem:[#allocation29_spill] sm:$0xff] %v13664_v19  ;;  %v13670_v57 = vadd.f32 %v3878_v49, %v15831_v25  ;;  %v3943_v61 = vpack.c.bf16 %v13664_v19, %v13673_v42  ;;  %v3899_v14 = vadd.f32 %v10933_v36, %v9701_v46 }
 0x7fb   :  { %v3890_v54 = vpop.f32.mrf.mxu1 }
 0x7fc   :  { %15832 = vst [vmem:[#allocation6_spill] sm:$0xff] %v13670_v57  ;;  %v3942_v18 = vpack.c.bf16 %v13670_v57, %v13667_v28  ;;  %v3891_v23 = vadd.f32 %v9701_v46, %v3890_v54  ;;  %v13689_v3 = vadd.f32 %v3899_v14, %v15841_v5 }
 0x7fd   :  { %v10934_v55 = vpop.f32.mrf.mxu1 }
 0x7fe   :  { %v3902_v26 = vadd.f32 %v10934_v55, %v9701_v46  ;;  %10959 = vmatprep.mubr.bf16.mxu0 %v3942_v18  ;;  %v13683_v34 = vadd.f32 %v3891_v23, %v15837_v40  ;;  %15842 = vst [vmem:[#allocation11_spill] sm:$0xff] %v13689_v3 }
 0x7ff   :  { %v3893_v56 = vpop.f32.mrf.mxu1  ;;  %10960 = vmatmul.mubr.bf16.gmra.mxu0 %v3943_v61 }
 0x800   :  { %v3894_v31 = vadd.f32 %v9701_v46, %v3893_v56  ;;  %v13680_v13 = vadd.f32 %v3902_v26, %v15835_v41  ;;  %15838 = vst [vmem:[#allocation9_spill] sm:$0xff] %v13683_v34  ;;  %v13698_v46 = vld [vmem:[%s15579_s6 + $0x2] ss:$0 sm:$0xff] }
 0x802   :  { %15836 = vst [vmem:[#allocation8_spill] sm:$0xff] %v13680_v13  ;;  %v13686_v30 = vadd.f32 %v3894_v31, %v15839_v8  ;;  %v3945_v12 = vpack.c.bf16 %v13680_v13, %v13689_v3 }
 0x804   :  { %15840 = vst [vmem:[#allocation10_spill] sm:$0xff] %v13686_v30  ;;  %v3944_v32 = vpack.c.bf16 %v13686_v30, %v13683_v34 }
 0x806   :  { %10963 = vmatprep.mubr.bf16.mxu0 %v3944_v32 }
 0x807   :  { %10964 = vmatmul.mubr.bf16.gmra.mxu0 %v3945_v12 }
 0x8af   :  { %v10953_v62 = vpop.f32.mrf.mxu0 }
 0x8b0   :  { %v4045_v38 = vadd.f32 %v10953_v62, %v13698_v46 }
 0x8b1   :  { %v4036_v37 = vpop.f32.mrf.mxu0 }
 0x8b2   :  { %v13701_v35 = vmax.f32 %v4045_v38, 0.0  ;;  %v4037_v20 = vadd.f32 %v13698_v46, %v4036_v37 }
 0x8b3   :  { %v10954_v2 = vpop.f32.mrf.mxu0 }
 0x8b4   :  { %v13704_v11 = vmax.f32 %v4037_v20, 0.0  ;;  %v4048_v17 = vadd.f32 %v10954_v2, %v13698_v46  ;;  %v4121_v48 = vsel %vm783_vm3, %v13701_v35, 0.0  ;;  %v4165_v44 = vmul.f32 %v13701_v35, %v13701_v35 }
 0x8b5   :  { %4122 = vadd.xlane.f32.xlu0 %v4121_v48  ;;  %v4039_v15 = vpop.f32.mrf.mxu0 }
 0x8b6   :  { %v4040_v47 = vadd.f32 %v13698_v46, %v4039_v15  ;;  %v4185_v60 = vsel %vm783_vm3, %v4165_v44, 0.0  ;;  %v4163_v16 = vmul.f32 %v13704_v11, %v13704_v11  ;;  %v13715_v0 = vmax.f32 %v4048_v17, 0.0 }
 0x8b7   :  { %4186 = vadd.xlane.f32.xlu1 %v4185_v60  ;;  %v10957_v52 = vpop.f32.mrf.mxu0  ;;  %v4115_v1 = vsel %vm783_vm3, %v13704_v11, 0.0 }
 0x8b8   :  { %v13719_v21 = vmax.f32 %v4040_v47, 0.0  ;;  %v4061_v58 = vadd.f32 %v10957_v52, %v13698_v46  ;;  %v4179_v51 = vsel %vm783_vm3, %v4163_v16, 0.0  ;;  %v4124_v4 = vsel %vm783_vm3, %v13715_v0, 0.0 }
 0x8b9   :  { %v4052_v27 = vpop.f32.mrf.mxu0  ;;  %4116 = vadd.xlane.f32.xlu0 %v4115_v1  ;;  %v4166_v6 = vmul.f32 %v13715_v0, %v13715_v0 }
 0x8ba   :  { %v13729_v29 = vmax.f32 %v4061_v58, 0.0  ;;  %v4053_v49 = vadd.f32 %v13698_v46, %v4052_v27  ;;  %v4118_v53 = vsel %vm783_vm3, %v13719_v21, 0.0  ;;  %v4164_v45 = vmul.f32 %v13719_v21, %v13719_v21 }
 0x8bb   :  { %v13723_v59 = vpop.f32.mrf.mxu0  ;;  %4180 = vadd.xlane.f32.xlu1 %v4179_v51  ;;  %v4188_v25 = vsel %vm783_vm3, %v4166_v6, 0.0 }
 0x8bc   :  { %v13738_v18 = vmax.f32 %v4053_v49, 0.0  ;;  %v4133_v61 = vsel %vm783_vm3, %v13729_v29, 0.0  ;;  %v4182_v23 = vsel %vm783_vm3, %v4164_v45, 0.0  ;;  %v4169_v31 = vmul.f32 %v13729_v29, %v13729_v29 }
 0x8bd   :  { %v4055_v22 = vpop.f32.mrf.mxu0  ;;  %4125 = vadd.xlane.f32.xlu0 %v4124_v4 }
 0x8be   :  { %v4056_v43 = vadd.f32 %v13698_v46, %v4055_v22  ;;  %v4127_v56 = vsel %vm783_vm3, %v13738_v18, 0.0  ;;  %v4197_v12 = vsel %vm783_vm3, %v4169_v31, 0.0  ;;  %v4167_v62 = vmul.f32 %v13738_v18, %v13738_v18 }
 0x8bf   :  { %v10961_v36 = vpop.f32.mrf.mxu0  ;;  %4119 = vadd.xlane.f32.xlu1 %v4118_v53 }
 0x8c0   :  { %v13742_v55 = vmax.f32 %v4056_v43, 0.0  ;;  %v4077_v14 = vadd.f32 %v10961_v36, %v13698_v46  ;;  %v4191_v2 = vsel %vm783_vm3, %v4167_v62, 0.0 }
 0x8c1   :  { %v4068_v54 = vpop.f32.mrf.mxu0  ;;  %4189 = vadd.xlane.f32.xlu0 %v4188_v25 }
 0x8c2   :  { %v4130_v41 = vsel %vm783_vm3, %v13742_v55, 0.0  ;;  %v4168_v40 = vmul.f32 %v13742_v55, %v13742_v55  ;;  %v13754_v5 = vmax.f32 %v4077_v14, 0.0  ;;  %v4069_v32 = vadd.f32 %v13698_v46, %v4068_v54 }
 0x8c3   :  { %4134 = vadd.xlane.f32.xlu1 %v4133_v61  ;;  %v10962_v26 = vpop.f32.mrf.mxu0 }
 0x8c4   :  { %v4194_v38 = vsel %vm783_vm3, %v4168_v40, 0.0  ;;  %v13761_v20 = vmax.f32 %v4069_v32, 0.0  ;;  %v4173_v17 = vmul.f32 %v13754_v5, %v13754_v5  ;;  %v4080_v48 = vadd.f32 %v10962_v26, %v13698_v46 }
 0x8c5   :  { %4183 = vadd.xlane.f32.xlu0 %v4182_v23  ;;  %v4071_v8 = vpop.f32.mrf.mxu0  ;;  %v4145_v44 = vsel %vm783_vm3, %v13754_v5, 0.0  ;;  %v4064_v32 = vadd.f32 %v13723_v59, %v13698_v46 }
 0x8c6   :  { %v4072_v47 = vadd.f32 %v13698_v46, %v4071_v8  ;;  %v4209_v60 = vsel %vm783_vm3, %v4173_v17, 0.0  ;;  %v4171_v52 = vmul.f32 %v13761_v20, %v13761_v20  ;;  %v13773_v16 = vmax.f32 %v4080_v48, 0.0 }
 0x8c7   :  { %4128 = vadd.xlane.f32.xlu1 %v4127_v56  ;;  %v10965_v37 = vpop.f32.mrf.mxu0  ;;  %v4139_v1 = vsel %vm783_vm3, %v13761_v20, 0.0 }
 0x8c8   :  { %v13777_v58 = vmax.f32 %v4072_v47, 0.0  ;;  %v4093_v51 = vadd.f32 %v10965_v37, %v13698_v46  ;;  %v4203_v4 = vsel %vm783_vm3, %v4171_v52, 0.0  ;;  %v4148_v6 = vsel %vm783_vm3, %v13773_v16, 0.0 }
 0x8c9   :  { %4131 = vadd.xlane.f32.xlu0 %v4130_v41  ;;  %v4084_v15 = vpop.f32.mrf.mxu0  ;;  %v4174_v22 = vmul.f32 %v13773_v16, %v13773_v16 }
 0x8ca   :  { %v13785_v53 = vmax.f32 %v4093_v51, 0.0  ;;  %v4085_v36 = vadd.f32 %v13698_v46, %v4084_v15  ;;  %v4142_v43 = vsel %vm783_vm3, %v13777_v58, 0.0  ;;  %v4172_v54 = vmul.f32 %v13777_v58, %v13777_v58  ;;  %v11616_v51 = vld [vmem:[#allocation2 + $0x148] sm:$0xff]  }
 0x8cb   :  { %4198 = vadd.xlane.f32.xlu1 %v4197_v12  ;;  %v10966_v27 = vpop.f32.mrf.mxu0  ;;  %v4212_v45 = vsel %vm783_vm3, %v4174_v22, 0.0  ;;  %v11619_v22 = vld [vmem:[#allocation2 + $0x180] sm:$0xff]  }
 0x8cc   :  { %v13794_v61 = vmax.f32 %v4085_v36, 0.0  ;;  %v4157_v23 = vsel %vm783_vm3, %v13785_v53, 0.0  ;;  %v4206_v14 = vsel %vm783_vm3, %v4172_v54, 0.0  ;;  %v4096_v56 = vadd.f32 %v10966_v27, %v13698_v46  ;;  %v11615_v27 = vld [vmem:[#allocation2 + $0x190] sm:$0xff]   ;;  %v13834_v36 = vld [vmem:[#allocation2 + $0x1b8] sm:$0xff]  }
 0x8cd   :  { %4195 = vadd.xlane.f32.xlu0 %v4194_v38  ;;  %v4087_v49 = vpop.f32.mrf.mxu0  ;;  %v4177_v41 = vmul.f32 %v13785_v53, %v13785_v53 }
 0x8ce   :  { %v4088_v25 = vadd.f32 %v13698_v46, %v4087_v49  ;;  %v4151_v31 = vsel %vm783_vm3, %v13794_v61, 0.0  ;;  %v13812_v12 = vmax.f32 %v4096_v56, 0.0  ;;  %v4175_v38 = vmul.f32 %v13794_v61, %v13794_v61  ;;  %v11613_v46 = vld [vmem:[#allocation2 + $0x198] sm:$0xff]  }
 0x8cf   :  { %4192 = vadd.xlane.f32.xlu1 %v4191_v2  ;;  %v4221_v62 = vsel %vm783_vm3, %v4177_v41, 0.0  ;;  %v13818_v2 = vmax.f32 %v4064_v32, 0.0  ;;  %10991 = vmatprep.subr.bf16.mxu0 %v11613_v46  ;;  %v13831_v49 = vld [vmem:[#allocation2 + $0x178] sm:$0xff]  }
 0x8d0   :  { %v13798_v26 = vmax.f32 %v4088_v25, 0.0  ;;  %v4215_v17 = vsel %vm783_vm3, %v4175_v38, 0.0  ;;  %v4178_v48 = vmul.f32 %v13812_v12, %v13812_v12  ;;  %v4160_v59 = vsel %vm783_vm3, %v13812_v12, 0.0  ;;  %10992 = vmatpush3.bf16.msra.mxu0 %v11613_v46 }
 0x8d1   :  { %4146 = vadd.xlane.f32.xlu0 %v4145_v44  ;;  %v11612_v44 = vld [vmem:[#allocation2 + $0x158] sm:$0xff]   ;;  %v4170_v47 = vmul.f32 %v13818_v2, %v13818_v2  ;;  %10993 = vmatprep.subr.bf16.mxu0 %v11615_v27 }
 0x8d2   :  { %v4154_v40 = vsel %vm783_vm3, %v13798_v26, 0.0  ;;  %v4176_v8 = vmul.f32 %v13798_v26, %v13798_v26  ;;  %10967 = vmatprep.subr.bf16.mxu1 %v11612_v44  ;;  %v4224_v15 = vsel %vm783_vm3, %v4178_v48, 0.0 }
 0x8d3   :  { %4210 = vadd.xlane.f32.xlu1 %v4209_v60  ;;  %10968 = vmatpush3.bf16.msra.mxu1 %v11612_v44  ;;  %v4136_v60 = vsel %vm783_vm3, %v13818_v2, 0.0  ;;  %v4200_v52 = vsel %vm783_vm3, %v4170_v47, 0.0 }
 0x8d4   :  { %v4218_v37 = vsel %vm783_vm3, %v4176_v8, 0.0  ;;  %10994 = vmatpush3.bf16.msra.mxu0 %v11615_v27 }
 0x8d5   :  { %4140 = vadd.xlane.f32.xlu0 %v4139_v1  ;;  %v11614_v1 = vld [vmem:[#allocation2 + $0x150] sm:$0xff]  }
 0x8d6   :  { %10969 = vmatprep.subr.bf16.mxu1 %v11614_v1 }
 0x8d7   :  { %4204 = vadd.xlane.f32.xlu1 %v4203_v4  ;;  %v11617_v4 = vld [vmem:[#allocation2 + $0x188] sm:$0xff]   ;;  %10970 = vmatpush3.bf16.msra.mxu1 %v11614_v1 }
 0x8d8   :  { %10971 = vmatprep.subr.bf16.mxu1 %v11616_v51  ;;  %10995 = vmatprep.subr.bf16.mxu0 %v11617_v4 }
 0x8d9   :  { %4149 = vadd.xlane.f32.xlu0 %v4148_v6  ;;  %v11618_v6 = vld [vmem:[#allocation2 + $0x140] sm:$0xff]   ;;  %10996 = vmatpush3.bf16.msra.mxu0 %v11617_v4 }
 0x8da   :  { %10997 = vmatprep.subr.bf16.mxu0 %v11619_v22 }
 0x8db   :  { %4143 = vadd.xlane.f32.xlu1 %v4142_v43  ;;  %10972 = vmatpush3.bf16.msra.mxu1 %v11616_v51 }
 0x8dc   :  { %10973 = vmatprep.subr.bf16.mxu1 %v11618_v6 }
 0x8dd   :  { %4213 = vadd.xlane.f32.xlu0 %v4212_v45  ;;  %10998 = vmatpush3.bf16.msra.mxu0 %v11619_v22 }
 0x8de   :  { %11039 = vmatprep.subr.bf16.mxu0 %v13834_v36 }
 0x8df   :  { %4158 = vadd.xlane.f32.xlu1 %v4157_v23  ;;  %10974 = vmatpush3.bf16.msra.mxu1 %v11618_v6 }
 0x8e0   :  { %11015 = vmatprep.subr.bf16.mxu1 %v13831_v49 }
 0x8e1   :  { %4207 = vadd.xlane.f32.xlu0 %v4206_v14 }
 0x8e3   :  { %4152 = vadd.xlane.f32.xlu1 %v4151_v31 }
 0x8e5   :  { %4155 = vadd.xlane.f32.xlu0 %v4154_v40 }
 0x8e7   :  { %4222 = vadd.xlane.f32.xlu1 %v4221_v62 }
 0x8e9   :  { %4219 = vadd.xlane.f32.xlu0 %v4218_v37 }
 0x8eb   :  { %4216 = vadd.xlane.f32.xlu1 %v4215_v17 }
 0x8ed   :  { %4161 = vadd.xlane.f32.xlu0 %v4160_v59 }
 0x8ef   :  { %4225 = vadd.xlane.f32.xlu1 %v4224_v15 }
 0x8f1   :  { %4137 = vadd.xlane.f32.xlu0 %v4136_v60 }
 0x8f3   :  { %4201 = vadd.xlane.f32.xlu1 %v4200_v52 }
 0x93e   :  { %v4123_v43 = vpop.xlane.xlu0 %4122 }
 0x93f   :  { %v13837_v25 = vmul.f32 0.015625, %v4123_v43 }
 0x940   :  { %v4187_v45 = vpop.xlane.xlu1 %4186 }
 0x941   :  { %v4261_v54 = vmul.f32 %v13837_v25, %v13837_v25  ;;  %v4245_v23 = vmul.f32 0.015625, %v4187_v45 }
 0x942   :  { %v4117_v14 = vpop.xlane.xlu0 %4116 }
 0x943   :  { %v4227_v56 = vmul.f32 0.015625, %v4117_v14  ;;  %v4277_v8 = vsub.f32 %v4245_v23, %v4261_v54 }
 0x944   :  { %v4181_v31 = vpop.xlane.xlu1 %4180 }
 0x945   :  { %v4259_v41 = vmul.f32 %v4227_v56, %v4227_v56  ;;  %v4243_v40 = vmul.f32 0.015625, %v4181_v31  ;;  %v4309_v48 = vadd.f32 1e-05, %v4277_v8 }
 0x946   :  { %v4126_v32 = vpop.xlane.xlu0 %4125 }
 0x947   :  { %v4275_v62 = vsub.f32 %v4243_v40, %v4259_v41  ;;  %v13841_v38 = vmul.f32 0.015625, %v4126_v32 }
 0x948   :  { %v4120_v37 = vpop.xlane.xlu1 %4119 }
 0x949   :  { %v4307_v17 = vadd.f32 1e-05, %v4275_v62  ;;  %v4262_v46 = vmul.f32 %v13841_v38, %v13841_v38  ;;  %v13845_v59 = vmul.f32 0.015625, %v4120_v37  ;;  %v13862_v37 = vld [vmem:[%s15580_s7 + $0x2] ss:$0 sm:$0xff] }
 0x94a   :  { %v4190_v44 = vpop.xlane.xlu0 %4189 }
 0x94b   :  { %11742 = vrsqrt.f32 %v4307_v17  ;;  %v4246_v15 = vmul.f32 0.015625, %v4190_v44  ;;  %v4260_v1 = vmul.f32 %v13845_v59, %v13845_v59  ;;  %v4291_v17 = vsub.f32 %v13704_v11, %v4227_v56  ;;  %v13873_v11 = vld [vmem:[%s15581_s8 + $0x2] ss:$0 sm:$0xff] }
 0x94c   :  { %v4135_v47 = vpop.xlane.xlu1 %4134  ;;  %11744 = vrsqrt.f32 %v4309_v48 }
 0x94d   :  { %v4278_v60 = vsub.f32 %v4246_v15, %v4262_v46  ;;  %v13849_v22 = vmul.f32 0.015625, %v4135_v47 }
 0x94e   :  { %v4184_v52 = vpop.xlane.xlu0 %4183 }
 0x94f   :  { %v4310_v27 = vadd.f32 1e-05, %v4278_v60  ;;  %v4244_v51 = vmul.f32 0.015625, %v4184_v52  ;;  %v4265_v31 = vmul.f32 %v13849_v22, %v13849_v22 }
 0x950   :  { %v4129_v4 = vpop.xlane.xlu1 %4128 }
 0x951   :  { %11746 = vrsqrt.f32 %v4310_v27  ;;  %v4276_v6 = vsub.f32 %v4244_v51, %v4260_v1  ;;  %v13853_v14 = vmul.f32 0.015625, %v4129_v4 }
 0x952   :  { %v4132_v43 = vpop.xlane.xlu0 %4131 }
 0x953   :  { %v4308_v45 = vadd.f32 1e-05, %v4276_v6  ;;  %v13851_v54 = vmul.f32 0.015625, %v4132_v43  ;;  %v4263_v46 = vmul.f32 %v13853_v14, %v13853_v14 }
 0x954   :  { %v4199_v23 = vpop.xlane.xlu1 %4198 }
 0x955   :  { %11748 = vrsqrt.f32 %v4308_v45  ;;  %v4249_v41 = vmul.f32 0.015625, %v4199_v23  ;;  %v4264_v8 = vmul.f32 %v13851_v54, %v13851_v54 }
 0x956   :  { %v4196_v40 = vpop.xlane.xlu0 %4195 }
 0x957   :  { %v4248_v32 = vmul.f32 0.015625, %v4196_v40  ;;  %v4281_v48 = vsub.f32 %v4249_v41, %v4265_v31 }
 0x958   :  { %v11743_v62 = vpop.eup %11742  ;;  %v4193_v44 = vpop.xlane.xlu1 %4192 }
 0x959   :  { %v4280_v15 = vsub.f32 %v4248_v32, %v4264_v8  ;;  %v4247_v47 = vmul.f32 0.015625, %v4193_v44  ;;  %v4347_v60 = vmul.f32 %v11743_v62, %v13862_v37  ;;  %v4313_v52 = vadd.f32 1e-05, %v4281_v48  ;;  %v11745_v27 = vpop.eup %11744 }
 0x95a   :  { %v4147_v1 = vpop.xlane.xlu0 %4146  ;;  %v4349_v31 = vmul.f32 %v11745_v27, %v13862_v37  ;;  %v4293_v48 = vsub.f32 %v13701_v35, %v13837_v25  ;;  %v4294_v44 = vsub.f32 %v13715_v0, %v13841_v38  ;;  %v4292_v35 = vsub.f32 %v13719_v21, %v13845_v59 }
 0x95b   :  { %v4312_v51 = vadd.f32 1e-05, %v4280_v15  ;;  %v4279_v4 = vsub.f32 %v4247_v47, %v4263_v46  ;;  %v13868_v6 = vmul.f32 0.015625, %v4147_v1  ;;  %v4363_v43 = vmul.f32 %v4347_v60, %v4291_v17 }
 0x95c   :  { %11750 = vrsqrt.f32 %v4313_v52  ;;  %v4211_v45 = vpop.xlane.xlu1 %4210  ;;  %v15649_v15 = vmov 0.0   ;;  %v4365_v27 = vmul.f32 %v4349_v31, %v4293_v48 }
 0x95d   :  { %11752 = vrsqrt.f32 %v4312_v51  ;;  %v4311_v56 = vadd.f32 1e-05, %v4279_v4  ;;  %v4269_v41 = vmul.f32 %v13868_v6, %v13868_v6  ;;  %v4253_v40 = vmul.f32 0.015625, %v4211_v45 }
 0x95e   :  { %v11747_v23 = vpop.eup %11746  ;;  %v4141_v8 = vpop.xlane.xlu0 %4140  ;;  %v13879_v32 = vadd.f32 %v13873_v11, %v4363_v43 }
 0x95f   :  { %v4350_v62 = vmul.f32 %v11747_v23, %v13862_v37  ;;  %11754 = vrsqrt.f32 %v4311_v56  ;;  %v13882_v17 = vmul.f32 0.015625, %v4141_v8  ;;  %v4285_v4 = vsub.f32 %v4253_v40, %v4269_v41 }
 0x960   :  { %v4205_v46 = vpop.xlane.xlu1 %4204  ;;  %v4493_v47 = vpack.c.bf16 %v13879_v32, %v15649_v15  ;;  %v13899_v8 = vadd.f32 %v13873_v11, %v4365_v27 }
 0x961   :  { %v4267_v60 = vmul.f32 %v13882_v17, %v13882_v17  ;;  %v4251_v52 = vmul.f32 0.015625, %v4205_v46  ;;  %v4366_v51 = vmul.f32 %v4350_v62, %v4294_v44  ;;  %v4317_v41 = vadd.f32 1e-05, %v4285_v4 }
 0x962   :  { %v11749_v1 = vpop.eup %11748  ;;  %10975 = vmatprep.mubr.msk.bf16.mxu1 %vm783_vm3, %v4493_v47  ;;  %v4150_v43 = vpop.xlane.xlu0 %4149 }
 0x963   :  { %v4348_v0 = vmul.f32 %v11749_v1, %v13862_v37  ;;  %v4283_v25 = vsub.f32 %v4251_v52, %v4267_v60  ;;  %v13896_v23 = vmul.f32 0.015625, %v4150_v43  ;;  %v13902_v31 = vadd.f32 %v13873_v11, %v4366_v51  ;;  %v11621_v52 = vld [vmem:[#allocation2 + $0x170] sm:$0xff]  }
 0x964   :  { %v4144_v38 = vpop.xlane.xlu1 %4143  ;;  %v11626_v43 = vld [vmem:[#allocation2 + $0x1b0] sm:$0xff]  }
 0x965   :  { %v4364_v45 = vmul.f32 %v4348_v0, %v4292_v35  ;;  %v4315_v56 = vadd.f32 1e-05, %v4283_v25  ;;  %v13907_v21 = vmul.f32 0.015625, %v4144_v38  ;;  %v4270_v46 = vmul.f32 %v13896_v23, %v13896_v23 }
 0x966   :  { %v4214_v40 = vpop.xlane.xlu0 %4213  ;;  %v4413_v4 = vpack.c.bf16 %v13902_v31, %v13899_v8 }
 0x967   :  { %v13905_v62 = vadd.f32 %v13873_v11, %v4364_v45  ;;  %11756 = vrsqrt.f32 %v4315_v56  ;;  %v4254_v59 = vmul.f32 0.015625, %v4214_v40  ;;  %v4268_v35 = vmul.f32 %v13907_v21, %v13907_v21 }
 0x968   :  { %v4159_v48 = vpop.xlane.xlu1 %4158  ;;  %11758 = vrsqrt.f32 %v4317_v41  ;;  %v4297_v45 = vsub.f32 %v13729_v29, %v13849_v22  ;;  %v4296_v56 = vsub.f32 %v13742_v55, %v13851_v54  ;;  %v4295_v29 = vsub.f32 %v13738_v18, %v13853_v14  ;;  %v11623_v14 = vld [vmem:[#allocation2 + $0x160] sm:$0xff]  }
 0x969   :  { %v11751_v44 = vpop.eup %11750  ;;  %v13913_v47 = vpack.c.bf16 %v13899_v8, %v13905_v62  ;;  %v4412_v60 = vpack.c.bf16 %v13905_v62, %v13879_v32  ;;  %v4286_v0 = vsub.f32 %v4254_v59, %v4270_v46  ;;  %v13932_v59 = vmul.f32 0.015625, %v4159_v48 }
 0x96a   :  { %v11753_v1 = vpop.eup %11752  ;;  %v4353_v27 = vmul.f32 %v11751_v44, %v13862_v37  ;;  %v4208_v51 = vpop.xlane.xlu0 %4207 }
 0x96b   :  { %v4252_v25 = vmul.f32 0.015625, %v4208_v51  ;;  %10976 = vmatmul.mubr.msk.bf16.vlgmr.msra.gmra.mxu1 %vm783_vm3, %v13913_v47  ;;  %10999 = vmatprep.mubr.msk.bf16.mxu0 %vm783_vm3, %v4412_v60  ;;  %v4352_v40 = vmul.f32 %v11753_v1, %v13862_v37  ;;  %v11622_v60 = vld [vmem:[#allocation2 + $0x168] sm:$0xff]   ;;  %v4318_v1 = vadd.f32 1e-05, %v4286_v0  ;;  %v4273_v18 = vmul.f32 %v13932_v59, %v13932_v59 }
 0x96c   :  { %v11755_v38 = vpop.eup %11754  ;;  %11000 = vmatmul.mubr.msk.bf16.vlgmr.msra.gmra.mxu0 %vm783_vm3, %v4413_v4  ;;  %v4153_v41 = vpop.xlane.xlu1 %4152  ;;  %11016 = vmatpush3.bf16.msra.mxu1 %v13831_v49  ;;  %v4369_v54 = vmul.f32 %v4353_v27, %v4297_v45  ;;  %v11628_v51 = vld [vmem:[#allocation2 + $0x1a8] sm:$0xff]  }
 0x96d   :  { %v4284_v44 = vsub.f32 %v4252_v25, %v4268_v35  ;;  %v4351_v46 = vmul.f32 %v11755_v38, %v13862_v37  ;;  %11017 = vmatprep.subr.bf16.mxu1 %v11621_v52  ;;  %11040 = vmatpush3.bf16.msra.mxu0 %v13834_v36  ;;  %v4368_v22 = vmul.f32 %v4352_v40, %v4296_v56  ;;  %v13940_v48 = vmul.f32 0.015625, %v4153_v41  ;;  %v11630_v40 = vld [vmem:[#allocation2 + $0x1a0] sm:$0xff]  }
 0x96e   :  { %v4156_v55 = vpop.xlane.xlu0 %4155  ;;  %11041 = vmatprep.subr.bf16.mxu0 %v11626_v43  ;;  %v13951_v45 = vadd.f32 %v13873_v11, %v4369_v54 }
 0x96f   :  { %v4316_v4 = vadd.f32 1e-05, %v4284_v44  ;;  %v13938_v49 = vmul.f32 0.015625, %v4156_v55  ;;  %v4367_v25 = vmul.f32 %v4351_v46, %v4295_v29  ;;  %v13943_v38 = vadd.f32 %v13873_v11, %v4368_v22 }
 0x970   :  { %v4223_v35 = vpop.xlane.xlu1 %4222  ;;  %11018 = vmatpush3.bf16.msra.mxu1 %v11621_v52  ;;  %v4271_v46 = vmul.f32 %v13940_v48, %v13940_v48 }
 0x971   :  { %11760 = vrsqrt.f32 %v4316_v4  ;;  %v4257_v36 = vmul.f32 0.015625, %v4223_v35  ;;  %11019 = vmatprep.subr.bf16.mxu1 %v11622_v60  ;;  %11042 = vmatpush3.bf16.msra.mxu0 %v11626_v43  ;;  %v13948_v0 = vadd.f32 %v13873_v11, %v4367_v25  ;;  %v4272_v52 = vmul.f32 %v13938_v49, %v13938_v49  ;;  %v13968_v25 = vld [vmem:[#allocation2 + $0x1d8] sm:$0xff]  }
 0x972   :  { %v4220_v27 = vpop.xlane.xlu0 %4219  ;;  %11043 = vmatprep.subr.bf16.mxu0 %v11628_v51  ;;  %11762 = vrsqrt.f32 %v4318_v1  ;;  %v13965_v22 = vpack.c.bf16 %v13951_v45, %v13943_v38 }
 0x973   :  { %v4289_v56 = vsub.f32 %v4257_v36, %v4273_v18  ;;  %v4256_v41 = vmul.f32 0.015625, %v4220_v27  ;;  %v13959_v29 = vpack.c.bf16 %v13948_v0, %v13902_v31  ;;  %v4414_v55 = vpack.c.bf16 %v13943_v38, %v13948_v0 }
 0x974   :  { %v11757_v44 = vpop.eup %11756  ;;  %v4217_v43 = vpop.xlane.xlu1 %4216  ;;  %11020 = vmatpush3.bf16.msra.mxu1 %v11622_v60  ;;  %v4299_v18 = vsub.f32 %v13761_v20, %v13882_v17 }
 0x975   :  { %v4321_v54 = vadd.f32 1e-05, %v4289_v56  ;;  %v4288_v1 = vsub.f32 %v4256_v41, %v4272_v52  ;;  %v4255_v4 = vmul.f32 0.015625, %v4217_v43  ;;  %v4355_v35 = vmul.f32 %v11757_v44, %v13862_v37  ;;  %11021 = vmatprep.subr.bf16.mxu1 %v11623_v14  ;;  %11044 = vmatpush3.bf16.msra.mxu0 %v11628_v51  ;;  %v11759_v56 = vpop.eup %11758 }
 0x976   :  { %10979 = vmatprep.mubr.msk.bf16.mxu1 %vm783_vm3, %v13959_v29  ;;  %11003 = vmatprep.mubr.msk.bf16.mxu0 %vm783_vm3, %v4414_v55  ;;  %v4162_v36 = vpop.xlane.xlu0 %4161  ;;  %v4357_v55 = vmul.f32 %v11759_v56, %v13862_v37 }
 0x977   :  { %11764 = vrsqrt.f32 %v4321_v54  ;;  %v4320_v60 = vadd.f32 1e-05, %v4288_v1  ;;  %v4287_v27 = vsub.f32 %v4255_v4, %v4271_v46  ;;  %10980 = vmatmul.mubr.msk.bf16.gmra.mxu1 %vm783_vm3, %v13965_v22  ;;  %v13977_v52 = vmul.f32 0.015625, %v4162_v36  ;;  %11045 = vmatprep.subr.bf16.mxu0 %v11630_v40 }
 0x978   :  { %v4226_v51 = vpop.xlane.xlu1 %4225  ;;  %v4371_v41 = vmul.f32 %v4355_v35, %v4299_v18  ;;  %11022 = vmatpush3.bf16.msra.mxu1 %v11623_v14  ;;  %v4301_v35 = vsub.f32 %v13754_v5, %v13868_v6 }
 0x979   :  { %11766 = vrsqrt.f32 %v4320_v60  ;;  %v4319_v20 = vadd.f32 1e-05, %v4287_v27  ;;  %v4274_v17 = vmul.f32 %v13977_v52, %v13977_v52  ;;  %11063 = vmatprep.subr.bf16.mxu1 %v13968_v25  ;;  %11046 = vmatpush3.bf16.msra.mxu0 %v11630_v40  ;;  %v4258_v44 = vmul.f32 0.015625, %v4226_v51 }
 0x97a   :  { %v4138_v46 = vpop.xlane.xlu0 %4137  ;;  %v13983_v43 = vadd.f32 %v13873_v11, %v4371_v41  ;;  %v4300_v27 = vsub.f32 %v13777_v58, %v13907_v21  ;;  %v4373_v41 = vmul.f32 %v4357_v55, %v4301_v35 }
 0x97b   :  { %11768 = vrsqrt.f32 %v4319_v20  ;;  %v4234_v54 = vmul.f32 0.015625, %v4138_v46  ;;  %v4290_v1 = vsub.f32 %v4258_v44, %v4274_v17 }
 0x97c   :  { %v4202_v4 = vpop.xlane.xlu1 %4201  ;;  %v4497_v14 = vpack.c.bf16 %v13983_v43, %v15649_v15  ;;  %v13998_v6 = vadd.f32 %v13873_v11, %v4373_v41 }
 0x97d   :  { %v4266_v18 = vmul.f32 %v4234_v54, %v4234_v54  ;;  %v4250_v36 = vmul.f32 0.015625, %v4202_v4  ;;  %v4322_v60 = vadd.f32 1e-05, %v4290_v1  ;;  %v4302_v4 = vsub.f32 %v13773_v16, %v13896_v23 }
 0x97e   :  { %v11761_v40 = vpop.eup %11760  ;;  %10983 = vmatprep.mubr.msk.bf16.mxu1 %vm783_vm3, %v4497_v14  ;;  %v4304_v14 = vsub.f32 %v13798_v26, %v13938_v49 }
 0x97f   :  { %v4356_v56 = vmul.f32 %v11761_v40, %v13862_v37  ;;  %v4282_v51 = vsub.f32 %v4250_v36, %v4266_v18  ;;  %v11763_v20 = vpop.eup %11762  ;;  %11770 = vrsqrt.f32 %v4322_v60  ;;  %v4305_v36 = vsub.f32 %v13785_v53, %v13932_v59 }
 0x980   :  { %v4358_v58 = vmul.f32 %v11763_v20, %v13862_v37  ;;  %v4303_v40 = vsub.f32 %v13794_v61, %v13940_v48  ;;  %v4306_v53 = vsub.f32 %v13812_v12, %v13977_v52  ;;  %v4792_v52 = vrot.slane %v13905_v62, 4 }
 0x981   :  { %v4314_v17 = vadd.f32 1e-05, %v4282_v51  ;;  %v4372_v44 = vmul.f32 %v4356_v56, %v4300_v27 }
 0x982   :  { %v4374_v27 = vmul.f32 %v4358_v58, %v4302_v4  ;;  %v4791_v4 = vrot.slane %v13879_v32, 4 }
 0x983   :  { %11772 = vrsqrt.f32 %v4314_v17  ;;  %v13995_v5 = vadd.f32 %v13873_v11, %v4372_v44 }
 0x984   :  { %v11765_v46 = vpop.eup %11764  ;;  %v14022_v51 = vadd.f32 %v13873_v11, %v4374_v27  ;;  %v4821_v62 = vsel %vm2613_vm0, %v4791_v4, %v4792_v52 }
 0x985   :  { %v14002_v1 = vpack.c.bf16 %v13998_v6, %v13995_v5  ;;  %v4361_v55 = vmul.f32 %v11765_v46, %v13862_v37  ;;  %v4298_v46 = vsub.f32 %v13818_v2, %v4234_v54  ;;  %v4793_v2 = vrot.slane %v13899_v8, 4 }
 0x986   :  { %v11767_v21 = vpop.eup %11766  ;;  %v4416_v27 = vpack.c.bf16 %v13995_v5, %v13983_v43 }
 0x987   :  { %v4360_v35 = vmul.f32 %v11767_v21, %v13862_v37  ;;  %10984 = vmatmul.mubr.msk.bf16.gmra.mxu1 %vm783_vm3, %v14002_v1  ;;  %v4377_v16 = vmul.f32 %v4361_v55, %v4305_v36  ;;  %v4795_v55 = vrot.slane %v13948_v0, 4  ;;  %v4820_v36 = vsel %vm2613_vm0, %v4792_v52, %v4793_v2  ;;  %v11640_v52 = vld [vmem:[%s15578_s5 + $0xd8] sm:$0xff]  }
 0x988   :  { %v11769_v18 = vpop.eup %11768 }
 0x989   :  { %v4359_v60 = vmul.f32 %v11769_v18, %v13862_v37  ;;  %v4376_v56 = vmul.f32 %v4360_v35, %v4304_v14  ;;  %v14031_v59 = vadd.f32 %v13873_v11, %v4377_v16  ;;  %v4796_v35 = vrot.slane %v13943_v38, 4 }
 0x98b   :  { %v4375_v23 = vmul.f32 %v4359_v60, %v4303_v40  ;;  %v14019_v26 = vadd.f32 %v13873_v11, %v4376_v56  ;;  %v14077_v38 = vsel %vm2613_vm0, %v4795_v55, %v4796_v35 }
 0x98c   :  { %v11771_v49 = vpop.eup %11770 }
 0x98d   :  { %v14025_v41 = vadd.f32 %v13873_v11, %v4375_v23  ;;  %v4362_v61 = vmul.f32 %v11771_v49, %v13862_v37  ;;  %v14039_v44 = vpack.c.bf16 %v14031_v59, %v14019_v26  ;;  %v11627_v23 = vld [vmem:[#allocation2 + $0x1d0] sm:$0xff]  }
 0x98f   :  { %v14035_v48 = vpack.c.bf16 %v14025_v41, %v14022_v51  ;;  %v4378_v17 = vmul.f32 %v4362_v61, %v4306_v53  ;;  %v4799_v53 = vrot.slane %v13983_v43, 4  ;;  %v4797_v61 = vrot.slane %v13951_v45, 4 }
 0x990   :  { %v11773_v20 = vpop.eup %11772  ;;  %v4417_v43 = vpack.c.bf16 %v14022_v51, %v13998_v6 }
 0x991   :  { %v4354_v58 = vmul.f32 %v11773_v20, %v13862_v37  ;;  %10987 = vmatprep.mubr.msk.bf16.mxu1 %vm783_vm3, %v14035_v48  ;;  %v14048_v12 = vadd.f32 %v13873_v11, %v4378_v17  ;;  %v4794_v37 = vrot.slane %v13902_v31, 4  ;;  %v4800_v17 = vrot.slane %v13995_v5, 4 }
 0x992   :  { %10988 = vmatmul.mubr.msk.bf16.gmra.mxu1 %vm783_vm3, %v14039_v44 }
 0x993   :  { %v4370_v21 = vmul.f32 %v4354_v58, %v4298_v46  ;;  %v4806_v54 = vrot.slane %v14048_v12, 4  ;;  %v4818_v0 = vsel %vm2613_vm0, %v4794_v37, %v4795_v55  ;;  %v4819_v40 = vsel %vm2613_vm0, %v4793_v2, %v4794_v37  ;;  %v11629_v46 = vld [vmem:[#allocation2 + $0x1c8] sm:$0xff]  }
 0x994   :  { %v4849_v16 = vpack.c.bf16 %v4819_v40, %v4820_v36  ;;  %v4850_v49 = vpack.c.bf16 %v14077_v38, %v4818_v0  ;;  %v4813_v55 = vsel %vm2613_vm0, %v4799_v53, %v4800_v17  ;;  %v4803_v37 = vrot.slane %v14025_v41, 4 }
 0x995   :  { %v14057_v14 = vadd.f32 %v13873_v11, %v4370_v21  ;;  %v14068_v32 = vsel %vm2613_vm0, %v4806_v54, %v4791_v4  ;;  %v4418_v21 = vpack.c.bf16 %v14019_v26, %v14025_v41  ;;  %v11631_v4 = vld [vmem:[#allocation2 + $0x1c0] sm:$0xff]   ;;  %v4804_v11 = vrot.slane %v14019_v26, 4 }
 0x996   :  { %v4823_v31 = vsel %vm2630_vm6, %v14068_v32, 0.0 }
 0x997   :  { %v4415_v8 = vpack.c.bf16 %v14057_v14, %v13951_v45  ;;  %v4848_v60 = vpack.c.bf16 %v4821_v62, %v4823_v31  ;;  %v4798_v56 = vrot.slane %v14057_v14, 4  ;;  %v4816_v45 = vsel %vm2613_vm0, %v4796_v35, %v4797_v61 }
 0x998   :  { %v4801_v35 = vrot.slane %v13998_v6, 4  ;;  %v5042_v6 = vpack.c.bf16 %v4820_v36, %v4821_v62  ;;  %v5044_v62 = vpack.c.bf16 %v4816_v45, %v14077_v38 }
 0x999   :  { %11004 = vmatmul.mubr.msk.bf16.gmra.mxu0 %vm783_vm3, %v4415_v8  ;;  %11023 = vmatprep.mubr.msk.bf16.mxu1 %vm783_vm3, %v4848_v60  ;;  %v4814_v20 = vsel %vm2613_vm0, %v4798_v56, %v4799_v53  ;;  %v4815_v58 = vsel %vm2613_vm0, %v4797_v61, %v4798_v56  ;;  %v4802_v8 = vrot.slane %v14022_v51, 4  ;;  %v4419_v60 = vpack.c.bf16 %v14048_v12, %v14031_v59 }
 0x99a   :  { %11007 = vmatprep.mubr.msk.bf16.mxu0 %vm783_vm3, %v4416_v27  ;;  %11024 = vmatmul.mubr.msk.bf16.vlgmr.msra.gmra.mxu1 %vm783_vm3, %v4849_v16  ;;  %v4851_v5 = vpack.c.bf16 %v4815_v58, %v4816_v45  ;;  %v4812_v31 = vsel %vm2613_vm0, %v4800_v17, %v4801_v35  ;;  %v4809_v27 = vsel %vm2613_vm0, %v4803_v37, %v4804_v11  ;;  %v4805_v16 = vrot.slane %v14031_v59, 4  ;;  %v11638_v17 = vld [vmem:[%s15578_s5 + $0xe8] sm:$0xff]  }
 0x99b   :  { %11064 = vmatpush3.bf16.msra.mxu1 %v13968_v25  ;;  %11027 = vmatprep.mubr.msk.bf16.mxu1 %vm783_vm3, %v4850_v49  ;;  %v4831_v25 = vsel %vm2638_vm8, %v4814_v20, 0.0  ;;  %v4810_v51 = vsel %vm2613_vm0, %v4802_v8, %v4803_v37  ;;  %v4811_v41 = vsel %vm2613_vm0, %v4801_v35, %v4802_v8  ;;  %v5043_v49 = vpack.c.bf16 %v4818_v0, %v4819_v40 }
 0x99c   :  { %11065 = vmatprep.subr.bf16.mxu1 %v11627_v23  ;;  %v4852_v2 = vpack.c.bf16 %v4813_v55, %v4831_v25  ;;  %v4853_v26 = vpack.c.bf16 %v4811_v41, %v4812_v31  ;;  %v4854_v56 = vpack.c.bf16 %v4809_v27, %v4810_v51  ;;  %v4808_v36 = vsel %vm2613_vm0, %v4804_v11, %v4805_v16 }
 0x99d   :  { %v5024_v61 = vsel %vm3460_vm13, %v4814_v20, 0.0  ;;  %v5046_v0 = vpack.c.bf16 %v4812_v31, %v4813_v55  ;;  %v5047_v18 = vpack.c.bf16 %v4810_v51, %v4811_v41  ;;  %v5048_v38 = vpack.c.bf16 %v4808_v36, %v4809_v27 }
 0x99e   :  { %v5287_v40 = vpack.c.bf16 %v15649_v15, %v14057_v14  ;;  %v5032_v20 = vsel %vm3468_vm12, %v14068_v32, 0.0  ;;  %v11632_v14 = vld [vmem:[%s15584_s11 + $0x58] sm:$0xff]   ;;  %v11637_v32 = vld [vmem:[%s15578_s5 + $0xf0] sm:$0xff]  }
 0x99f   :  { %11066 = vmatpush3.bf16.msra.mxu1 %v11627_v23  ;;  %v4807_v23 = vsel %vm2613_vm0, %v4805_v16, %v4806_v54  ;;  %v5045_v54 = vpack.c.bf16 %v5024_v61, %v4815_v58  ;;  %11087 = vmatprep.subr.bf16.mxu0 %v11632_v14  ;;  %v11639_v58 = vld [vmem:[%s15578_s5 + $0xe0] sm:$0xff]  }
 0x9a0   :  { %11067 = vmatprep.subr.bf16.mxu1 %v11629_v46  ;;  %v4855_v53 = vpack.c.bf16 %v4807_v23, %v4808_v36 }
 0x9a1   :  { %11008 = vmatmul.mubr.msk.bf16.gmra.mxu0 %vm783_vm3, %v4417_v43 }
 0x9a2   :  { %11011 = vmatprep.mubr.msk.bf16.mxu0 %vm783_vm3, %v4418_v21  ;;  %11028 = vmatmul.mubr.msk.bf16.gmra.mxu1 %vm783_vm3, %v4851_v5 }
 0x9a3   :  { %11031 = vmatprep.mubr.msk.bf16.mxu1 %vm783_vm3, %v4852_v2  ;;  %11068 = vmatpush3.bf16.msra.mxu1 %v11629_v46 }
 0x9a4   :  { %11069 = vmatprep.subr.bf16.mxu1 %v11631_v4 }
 0x9a7   :  { %11070 = vmatpush3.bf16.msra.mxu1 %v11631_v4 }
 0x9a9   :  { %11012 = vmatmul.mubr.msk.bf16.gmra.mxu0 %vm783_vm3, %v4419_v60 }
 0x9aa   :  { %11047 = vmatprep.mubr.msk.bf16.mxu0 %vm783_vm3, %v5042_v6  ;;  %11032 = vmatmul.mubr.msk.bf16.gmra.mxu1 %vm783_vm3, %v4853_v26 }
 0x9ab   :  { %11035 = vmatprep.mubr.msk.bf16.mxu1 %vm783_vm3, %v4854_v56 }
 0x9b1   :  { %11048 = vmatmul.mubr.msk.bf16.vlgmr.msra.gmra.mxu0 %vm783_vm3, %v5043_v49 }
 0x9b2   :  { %11051 = vmatprep.mubr.msk.bf16.mxu0 %vm783_vm3, %v5044_v62  ;;  %11036 = vmatmul.mubr.msk.bf16.gmra.mxu1 %vm783_vm3, %v4855_v53 }
 0x9b3   :  { %11071 = vmatprep.mubr.msk.bf16.mxu1 %vm783_vm3, %v13913_v47  ;;  %11088 = vmatpush3.bf16.msra.mxu0 %v11632_v14 }
 0x9b9   :  { %11052 = vmatmul.mubr.msk.bf16.gmra.mxu0 %vm783_vm3, %v5045_v54 }
 0x9ba   :  { %11055 = vmatprep.mubr.msk.bf16.mxu0 %vm783_vm3, %v5046_v0  ;;  %11072 = vmatmul.mubr.msk.bf16.vlgmr.msra.gmra.mxu1 %vm783_vm3, %v13959_v29  ;;  %v5049_v29 = vpack.c.bf16 %v5032_v20, %v4807_v23 }
 0x9bb   :  { %11075 = vmatprep.mubr.msk.bf16.mxu1 %vm783_vm3, %v13965_v22  ;;  %v5291_v22 = vpack.c.bf16 %v15649_v15, %v14048_v12  ;;  %v11636_v12 = vld [vmem:[%s15578_s5 + $0xf8] sm:$0xff]  }
 0x9bc   :  { %11111 = vmatprep.subr.bf16.mxu1 %v11636_v12 }
 0x9bd   :  { %11112 = vmatpush3.bf16.msra.mxu1 %v11636_v12 }
 0x9be   :  { %11113 = vmatprep.subr.bf16.mxu1 %v11637_v32 }
 0x9c1   :  { %11056 = vmatmul.mubr.msk.bf16.gmra.mxu0 %vm783_vm3, %v5047_v18  ;;  %11114 = vmatpush3.bf16.msra.mxu1 %v11637_v32 }
 0x9c2   :  { %11059 = vmatprep.mubr.msk.bf16.mxu0 %vm783_vm3, %v5048_v38  ;;  %11076 = vmatmul.mubr.msk.bf16.gmra.mxu1 %vm783_vm3, %v5287_v40 }
 0x9c3   :  { %11079 = vmatprep.mubr.msk.bf16.mxu1 %vm783_vm3, %v14002_v1  ;;  %v11633_v1 = vld [vmem:[%s15584_s11 + $0x50] sm:$0xff]   ;;  %11115 = vmatprep.subr.bf16.mxu1 %v11638_v17 }
 0x9c4   :  { %11089 = vmatprep.subr.bf16.mxu0 %v11633_v1 }
 0x9c5   :  { %11090 = vmatpush3.bf16.msra.mxu0 %v11633_v1  ;;  %11116 = vmatpush3.bf16.msra.mxu1 %v11638_v17 }
 0x9c6   :  { %11117 = vmatprep.subr.bf16.mxu1 %v11639_v58 }
 0x9c9   :  { %11060 = vmatmul.mubr.msk.bf16.gmra.mxu0 %vm783_vm3, %v5049_v29  ;;  %11118 = vmatpush3.bf16.msra.mxu1 %v11639_v58 }
 0x9ca   :  { %11080 = vmatmul.mubr.msk.bf16.gmra.mxu1 %vm783_vm3, %v14035_v48  ;;  %v11634_v48 = vld [vmem:[%s15584_s11 + $0x48] sm:$0xff]   ;;  %11119 = vmatprep.subr.bf16.mxu1 %v11640_v52 }
 0x9cb   :  { %11083 = vmatprep.mubr.msk.bf16.mxu1 %vm783_vm3, %v14039_v44  ;;  %11091 = vmatprep.subr.bf16.mxu0 %v11634_v48  ;;  %v11635_v44 = vld [vmem:[%s15584_s11 + $0x40] sm:$0xff]  }
 0x9cc   :  { %11092 = vmatpush3.bf16.msra.mxu0 %v11634_v48 }
 0x9cd   :  { %11093 = vmatprep.subr.bf16.mxu0 %v11635_v44  ;;  %11120 = vmatpush3.bf16.msra.mxu1 %v11640_v52 }
 0x9d0   :  { %11094 = vmatpush3.bf16.msra.mxu0 %v11635_v44 }
 0x9d2   :  { %11084 = vmatmul.mubr.msk.bf16.gmra.mxu1 %vm783_vm3, %v5291_v22 }
 0xa2b   :  { %v10977_v46 = vpop.f32.mrf.mxu1 }
 0xa2c   :  { %v11001_v8 = vpop.f32.mrf.mxu0 }
 0xa2d   :  { %v4583_v43 = vpop.f32.mrf.mxu1  ;;  %v4737_v42 = vadd.f32 %v11001_v8, %v10977_v46 }
 0xa2e   :  { %v4728_v11 = vpop.f32.mrf.mxu0 }
 0xa2f   :  { %v10978_v25 = vpop.f32.mrf.mxu1  ;;  %v4729_v13 = vadd.f32 %v4728_v11, %v4583_v43 }
 0xa30   :  { %v11002_v27 = vpop.f32.mrf.mxu0 }
 0xa31   :  { %v4586_v21 = vpop.f32.mrf.mxu1  ;;  %v4740_v19 = vadd.f32 %v11002_v27, %v10978_v25 }
 0xa32   :  { %v4731_v6 = vpop.f32.mrf.mxu0 }
 0xa33   :  { %v4732_v33 = vadd.f32 %v4731_v6, %v4586_v21 }
 0xa37   :  { %v14198_v45 = vpop.f32.mrf.mxu1 }
 0xa39   :  { %v14200_v5 = vpop.f32.mrf.mxu1 }
 0xa3b   :  { %v14202_v55 = vpop.f32.mrf.mxu1 }
 0xa3d   :  { %v14204_v4 = vpop.f32.mrf.mxu1 }
 0xa47   :  { %v14206_v2 = vpop.f32.mrf.mxu1 }
 0xa49   :  { %v14208_v37 = vpop.f32.mrf.mxu1 }
 0xa4b   :  { %v14210_v35 = vpop.f32.mrf.mxu1 }
 0xa4d   :  { %v14212_v31 = vpop.f32.mrf.mxu1 }
 0xa52   :  { %v14214_v60 = vpop.f32.mrf.mxu1 }
 0xa54   :  { %v14216_v51 = vpop.f32.mrf.mxu1 }
 0xa56   :  { %v14218_v41 = vpop.f32.mrf.mxu1 }
 0xa58   :  { %v14220_v26 = vpop.f32.mrf.mxu1 }
 0xa59   :  { %15848 = vst [vmem:[#allocation12_spill] sm:$0xff] %v14220_v26  ;;  %v11005_v56 = vpop.f32.mrf.mxu0 }
 0xa5a   :  { %v11025_v16 = vpop.f32.mrf.mxu1 }
 0xa5b   :  { %v4744_v23 = vpop.f32.mrf.mxu0  ;;  %v5003_v63 = vadd.f32 %v11025_v16, %v4737_v42  ;;  %v14258_v42 = vld [vmem:[%s15583_s10 + $0x2] ss:$0 sm:$0xff] }
 0xa5c   :  { %v4938_v49 = vpop.f32.mrf.mxu1  ;;  %v4745_v8 = vadd.f32 %v4744_v23, %v14200_v5 }
 0xa5d   :  { %v11006_v36 = vpop.f32.mrf.mxu0  ;;  %v5001_v9 = vadd.f32 %v4938_v49, %v4729_v13 }
 0xa5e   :  { %v11026_v62 = vpop.f32.mrf.mxu1 }
 0xa5f   :  { %v4747_v53 = vpop.f32.mrf.mxu0  ;;  %v5004_v50 = vadd.f32 %v11026_v62, %v4740_v19 }
 0xa60   :  { %v4941_v59 = vpop.f32.mrf.mxu1 }
 0xa61   :  { %v14222_v61 = vpop.f32.mrf.mxu0  ;;  %v5002_v26 = vadd.f32 %v4941_v59, %v4732_v33 }
 0xa62   :  { %v11029_v54 = vpop.f32.mrf.mxu1 }
 0xa63   :  { %v14224_v0 = vpop.f32.mrf.mxu0 }
 0xa64   :  { %v4954_v18 = vpop.f32.mrf.mxu1 }
 0xa65   :  { %v14226_v38 = vpop.f32.mrf.mxu0 }
 0xa66   :  { %v11030_v40 = vpop.f32.mrf.mxu1 }
 0xa67   :  { %v14228_v47 = vpop.f32.mrf.mxu0 }
 0xa68   :  { %v4957_v20 = vpop.f32.mrf.mxu1 }
 0xa69   :  { %v14230_v29 = vpop.f32.mrf.mxu0 }
 0xa6a   :  { %v14232_v22 = vpop.f32.mrf.mxu1 }
 0xa6b   :  { %v14234_v14 = vpop.f32.mrf.mxu0 }
 0xa6c   :  { %v14236_v1 = vpop.f32.mrf.mxu1 }
 0xa6d   :  { %v14238_v48 = vpop.f32.mrf.mxu0 }
 0xa6e   :  { %15849 = vst [vmem:[#allocation13_spill] sm:$0xff] %v14238_v48  ;;  %v14240_v44 = vpop.f32.mrf.mxu1 }
 0xa6f   :  { %v14242_v12 = vpop.f32.mrf.mxu0 }
 0xa70   :  { %15850 = vst [vmem:[#allocation14_spill] sm:$0xff] %v14242_v12  ;;  %v14244_v32 = vpop.f32.mrf.mxu1 }
 0xa71   :  { %v11049_v17 = vpop.f32.mrf.mxu0 }
 0xa72   :  { %v14246_v58 = vpop.f32.mrf.mxu1  ;;  %v5197_v10 = vadd.f32 %v11049_v17, %v5003_v63  ;;  %v4756_v63 = vadd.f32 %v11006_v36, %v14202_v55 }
 0xa73   :  { %15851 = vst [vmem:[#allocation15_spill] sm:$0xff] %v14246_v58  ;;  %v5132_v52 = vpop.f32.mrf.mxu0 }
 0xa74   :  { %v14248_v15 = vpop.f32.mrf.mxu1  ;;  %v5195_v7 = vadd.f32 %v5132_v52, %v5001_v9  ;;  %v4753_v9 = vadd.f32 %v11005_v56, %v14198_v45 }
 0xa75   :  { %15852 = vst [vmem:[#allocation16_spill] sm:$0xff] %v14248_v15  ;;  %v11050_v3 = vpop.f32.mrf.mxu0 }
 0xa76   :  { %v14250_v30 = vpop.f32.mrf.mxu1  ;;  %v5198_v15 = vadd.f32 %v11050_v3, %v5004_v50  ;;  %v5005_v50 = vadd.f32 %v4954_v18, %v4745_v8  ;;  %v5007_v3 = vadd.f32 %v11029_v54, %v4753_v9  ;;  %v4761_v54 = vadd.f32 %v14224_v0, %v14208_v37 }
 0xa77   :  { %15853 = vst [vmem:[#allocation21_spill] sm:$0xff] %v14250_v30  ;;  %v5135_v34 = vpop.f32.mrf.mxu0  ;;  %v4764_v37 = vadd.f32 %v14228_v47, %v14212_v31 }
 0xa78   :  { %v14252_v57 = vpop.f32.mrf.mxu1  ;;  %v5196_v11 = vadd.f32 %v5135_v34, %v5002_v26  ;;  %v4748_v34 = vadd.f32 %v4747_v53, %v14204_v4 }
 0xa79   :  { %v11053_v28 = vpop.f32.mrf.mxu0 }
 0xa7a   :  { %v11073_v24 = vpop.f32.mrf.mxu1  ;;  %v5006_v55 = vadd.f32 %v4957_v20, %v4748_v34  ;;  %v5201_v6 = vadd.f32 %v11053_v28, %v5007_v3  ;;  %v4769_v28 = vadd.f32 %v14222_v61, %v14206_v2  ;;  %v4772_v20 = vadd.f32 %v14226_v38, %v14210_v35 }
 0xa7b   :  { %v5148_v39 = vpop.f32.mrf.mxu0  ;;  %v5439_v48 = vadd.f32 %v11073_v24, %v5197_v10 }
 0xa7c   :  { %v5374_v58 = vpop.f32.mrf.mxu1  ;;  %v5199_v27 = vadd.f32 %v5148_v39, %v5005_v50  ;;  %v5011_v2 = vadd.f32 %v14232_v22, %v4769_v28  ;;  %v5012_v0 = vadd.f32 %v14240_v44, %v4772_v20 }
 0xa7d   :  { %v11054_v12 = vpop.f32.mrf.mxu0  ;;  %v5437_v30 = vadd.f32 %v5374_v58, %v5195_v7  ;;  %v5463_v25 = vadd.f32 %v14258_v42, %v5439_v48  ;;  %v5009_v58 = vadd.f32 %v14236_v1, %v4761_v54 }
 0xa7e   :  { %v11074_v43 = vpop.f32.mrf.mxu1 }
 0xa7f   :  { %v5151_v46 = vpop.f32.mrf.mxu0  ;;  %v5440_v13 = vadd.f32 %v11074_v43, %v5198_v15  ;;  %v5461_v10 = vadd.f32 %v14258_v42, %v5437_v30  ;;  %v5008_v15 = vadd.f32 %v11030_v40, %v4756_v63  ;;  %v5479_v62 = vmax.f32 %v5463_v25, 0.0 }
 0xa80   :  { %v5377_v19 = vpop.f32.mrf.mxu1  ;;  %v5200_v18 = vadd.f32 %v5151_v46, %v5006_v55  ;;  %v5010_v46 = vadd.f32 %v14244_v32, %v4764_v37  ;;  %v4785_v32 = vadd.f32 %v14230_v29, %v14214_v60 }
 0xa81   :  { %v11057_v33 = vpop.f32.mrf.mxu0  ;;  %v5464_v7 = vadd.f32 %v14258_v42, %v5440_v13  ;;  %v5438_v24 = vadd.f32 %v5377_v19, %v5196_v11  ;;  %v5477_v30 = vmax.f32 %v5461_v10, 0.0  ;;  %v5202_v23 = vadd.f32 %v11054_v12, %v5008_v15 }
 0xa82   :  { %v11077_v21 = vpop.f32.mrf.mxu1  ;;  %v5205_v11 = vadd.f32 %v11057_v33, %v5011_v2  ;;  %v15854_v33 = vld [vmem:[#allocation13_spill] sm:$0xff] }
 0xa83   :  { %v5164_v5 = vpop.f32.mrf.mxu0  ;;  %v5462_v45 = vadd.f32 %v14258_v42, %v5438_v24  ;;  %v5480_v26 = vmax.f32 %v5464_v7, 0.0  ;;  %v5443_v4 = vadd.f32 %v11077_v21, %v5201_v6  ;;  %v4777_v24 = vadd.f32 %v14234_v14, %v14216_v51  ;;  %v15856_v51 = vld [vmem:[#allocation12_spill] sm:$0xff]  ;;  %v15857_v14 = vld [vmem:[#allocation14_spill] sm:$0xff] }
 0xa84   :  { %v5390_v56 = vpop.f32.mrf.mxu1  ;;  %v5203_v38 = vadd.f32 %v5164_v5, %v5009_v58  ;;  %v4788_v25 = vadd.f32 %v15854_v33, %v14218_v41  ;;  %v15862_v33 = vld [vmem:[#allocation30_spill] sm:$0xff] }
 0xa85   :  { %v11058_v16 = vpop.f32.mrf.mxu0  ;;  %v5478_v49 = vmax.f32 %v5462_v45, 0.0  ;;  %v5441_v36 = vadd.f32 %v5390_v56, %v5199_v27  ;;  %v5503_v48 = vpack.c.bf16 %v5480_v26, %v5479_v62  ;;  %v5467_v61 = vadd.f32 %v14258_v42, %v5443_v4  ;;  %v15855_v27 = vld [vmem:[#allocation16_spill] sm:$0xff] }
 0xa86   :  { %v11078_v53 = vpop.f32.mrf.mxu1  ;;  %v5206_v31 = vadd.f32 %v11058_v16, %v5012_v0  ;;  %v5013_v45 = vadd.f32 %v15855_v27, %v4777_v24  ;;  %v4780_v56 = vadd.f32 %v15857_v14, %v15856_v51  ;;  %v15858_v16 = vld [vmem:[#allocation15_spill] sm:$0xff] }
 0xa87   :  { %v5167_v59 = vpop.f32.mrf.mxu0  ;;  %v5502_v39 = vpack.c.bf16 %v5478_v49, %v5477_v30  ;;  %v5444_v40 = vadd.f32 %v11078_v53, %v5202_v23  ;;  %v5465_v52 = vadd.f32 %v14258_v42, %v5441_v36  ;;  %v5483_v50 = vmax.f32 %v5467_v61, 0.0  ;;  %v15859_v30 = vld [vmem:[#allocation21_spill] sm:$0xff] }
 0xa88   :  { %v5393_v12 = vpop.f32.mrf.mxu1  ;;  %v5204_v44 = vadd.f32 %v5167_v59, %v5010_v46  ;;  %v5015_v60 = vadd.f32 %v15858_v16, %v4785_v32  ;;  %v5016_v23 = vadd.f32 %v15859_v30, %v4788_v25  ;;  %v5014_v62 = vadd.f32 %v14252_v57, %v4780_v56 }
 0xa89   :  { %v11061_v17 = vpop.f32.mrf.mxu0  ;;  %v5468_v43 = vadd.f32 %v14258_v42, %v5444_v40  ;;  %v5442_v8 = vadd.f32 %v5393_v12, %v5200_v18  ;;  %11095 = vmatprep.mubr.msk.bf16.mxu0 %vm783_vm3, %v5502_v39  ;;  %v5481_v19 = vmax.f32 %v5465_v52, 0.0 }
 0xa8a   :  { %v11081_v35 = vpop.f32.mrf.mxu1  ;;  %11096 = vmatmul.mubr.msk.bf16.vlgmr.msra.gmra.mxu0 %vm783_vm3, %v5503_v48  ;;  %v5209_v4 = vadd.f32 %v11061_v17, %v5015_v60 }
 0xa8b   :  { %v5466_v1 = vadd.f32 %v14258_v42, %v5442_v8  ;;  %v5484_v13 = vmax.f32 %v5468_v43, 0.0  ;;  %v5180_v9 = vpop.f32.mrf.mxu0  ;;  %v5447_v10 = vadd.f32 %v11081_v35, %v5205_v11 }
 0xa8c   :  { %v5406_v63 = vpop.f32.mrf.mxu1  ;;  %v5207_v49 = vadd.f32 %v5180_v9, %v5013_v45  ;;  %v11641_v9 = vld [vmem:[%s15578_s5 + $0xd0] sm:$0xff]  }
 0xa8d   :  { %v5482_v47 = vmax.f32 %v5466_v1, 0.0  ;;  %v5445_v22 = vadd.f32 %v5406_v63, %v5203_v38  ;;  %v5505_v21 = vpack.c.bf16 %v5484_v13, %v5483_v50  ;;  %v11062_v5 = vpop.f32.mrf.mxu0  ;;  %v5471_v29 = vadd.f32 %v14258_v42, %v5447_v10  ;;  %11121 = vmatprep.subr.bf16.mxu1 %v11641_v9  ;;  %v11643_v63 = vld [vmem:[%s15578_s5 + $0xc0] sm:$0xff]  }
 0xa8e   :  { %v11082_v7 = vpop.f32.mrf.mxu1  ;;  %v5210_v39 = vadd.f32 %v11062_v5, %v5016_v23  ;;  %11122 = vmatpush3.bf16.msra.mxu1 %v11641_v9  ;;  %v15870_v23 = vld [vmem:[#allocation27_spill] sm:$0xff] }
 0xa8f   :  { %v5504_v34 = vpack.c.bf16 %v5482_v47, %v5481_v19  ;;  %v5448_v3 = vadd.f32 %v11082_v7, %v5206_v31  ;;  %v5469_v55 = vadd.f32 %v14258_v42, %v5445_v22  ;;  %v5183_v59 = vpop.f32.mrf.mxu0  ;;  %v5487_v20 = vmax.f32 %v5471_v29, 0.0  ;;  %v9815_v47 = vld [vmem:[%s15585_s12 + $0x2] ss:$0 sm:$0xff]  ;;  %v15868_v29 = vld [vmem:[#allocation20_spill] sm:$0xff] }
 0xa90   :  { %v5409_v15 = vpop.f32.mrf.mxu1  ;;  %v5208_v58 = vadd.f32 %v5183_v59, %v5014_v62 }
 0xa91   :  { %v5472_v6 = vadd.f32 %v14258_v42, %v5448_v3  ;;  %v5446_v26 = vadd.f32 %v5409_v15, %v5204_v44  ;;  %11099 = vmatprep.mubr.msk.bf16.mxu0 %vm783_vm3, %v5504_v34  ;;  %v5485_v18 = vmax.f32 %v5469_v55, 0.0  ;;  %v15860_v34 = vld [vmem:[#allocation17_spill] sm:$0xff]  ;;  %v15866_v15 = vld [vmem:[#allocation18_spill] sm:$0xff] }
 0xa92   :  { %v11085_v41 = vpop.f32.mrf.mxu1  ;;  %11100 = vmatmul.mubr.msk.bf16.gmra.mxu0 %vm783_vm3, %v5505_v21  ;;  %v15864_v21 = vld [vmem:[#allocation19_spill] sm:$0xff] }
 0xa93   :  { %v5470_v36 = vadd.f32 %v14258_v42, %v5446_v26  ;;  %v5488_v53 = vmax.f32 %v5472_v6, 0.0  ;;  %v5451_v48 = vadd.f32 %v11085_v41, %v5209_v4  ;;  %v15874_v4 = vld [vmem:[#allocation28_spill] sm:$0xff] }
 0xa94   :  { %v5422_v54 = vpop.f32.mrf.mxu1 }
 0xa95   :  { %v5486_v40 = vmax.f32 %v5470_v36, 0.0  ;;  %v5449_v28 = vadd.f32 %v5422_v54, %v5207_v49  ;;  %v5507_v8 = vpack.c.bf16 %v5488_v53, %v5487_v20  ;;  %v5475_v61 = vadd.f32 %v14258_v42, %v5451_v48  ;;  %v15872_v36 = vld [vmem:[#allocation26_spill] sm:$0xff] }
 0xa96   :  { %v11086_v12 = vpop.f32.mrf.mxu1 }
 0xa97   :  { %v5506_v52 = vpack.c.bf16 %v5486_v40, %v5485_v18  ;;  %v5452_v43 = vadd.f32 %v11086_v12, %v5210_v39  ;;  %v5473_v2 = vadd.f32 %v14258_v42, %v5449_v28  ;;  %v5491_v46 = vmax.f32 %v5475_v61, 0.0 }
 0xa98   :  { %v5425_v37 = vpop.f32.mrf.mxu1 }
 0xa99   :  { %v5476_v57 = vadd.f32 %v14258_v42, %v5452_v43  ;;  %v5450_v17 = vadd.f32 %v5425_v37, %v5208_v58  ;;  %11103 = vmatprep.mubr.msk.bf16.mxu0 %vm783_vm3, %v5506_v52  ;;  %v5489_v38 = vmax.f32 %v5473_v2, 0.0  ;;  %v15876_v58 = vld [vmem:[#allocation29_spill] sm:$0xff]  ;;  %v15880_v2 = vld [vmem:[#allocation6_spill] sm:$0xff] }
 0xa9a   :  { %11104 = vmatmul.mubr.msk.bf16.gmra.mxu0 %vm783_vm3, %v5507_v8  ;;  %v15878_v8 = vld [vmem:[#allocation5_spill] sm:$0xff] }
 0xa9b   :  { %v5474_v35 = vadd.f32 %v14258_v42, %v5450_v17  ;;  %v5492_v0 = vmax.f32 %v5476_v57, 0.0  ;;  %v11642_v42 = vld [vmem:[%s15578_s5 + $0xc8] sm:$0xff]   ;;  %v15882_v17 = vld [vmem:[#allocation7_spill] sm:$0xff] }
 0xa9c   :  { %11123 = vmatprep.subr.bf16.mxu1 %v11642_v42 }
 0xa9d   :  { %v5490_v1 = vmax.f32 %v5474_v35, 0.0  ;;  %v5509_v13 = vpack.c.bf16 %v5492_v0, %v5491_v46  ;;  %11124 = vmatpush3.bf16.msra.mxu1 %v11642_v42 }
 0xa9e   :  { %11125 = vmatprep.subr.bf16.mxu1 %v11643_v63 }
 0xa9f   :  { %v5508_v11 = vpack.c.bf16 %v5490_v1, %v5489_v38 }
 0xaa1   :  { %11107 = vmatprep.mubr.msk.bf16.mxu0 %vm783_vm3, %v5508_v11  ;;  %11126 = vmatpush3.bf16.msra.mxu1 %v11643_v63  ;;  %v15884_v63 = vld [vmem:[#allocation8_spill] sm:$0xff] }
 0xaa2   :  { %11108 = vmatmul.mubr.msk.bf16.gmra.mxu0 %vm783_vm3, %v5509_v13 }
 0xb4a   :  { %v11097_v19 = vpop.f32.mrf.mxu0 }
 0xb4b   :  { %v5609_v7 = vadd.f32 %v11097_v19, %v9815_v47 }
 0xb4c   :  { %v5600_v31 = vpop.f32.mrf.mxu0 }
 0xb4d   :  { %v5601_v50 = vadd.f32 %v9815_v47, %v5600_v31  ;;  %v14333_v27 = vadd.f32 %v5609_v7, %v15866_v15  ;;  %v15886_v31 = vld [vmem:[#allocation9_spill] sm:$0xff]  ;;  %v15890_v7 = vld [vmem:[#allocation11_spill] sm:$0xff] }
 0xb4e   :  { %v11098_v22 = vpop.f32.mrf.mxu0 }
 0xb4f   :  { %v5612_v10 = vadd.f32 %v11098_v22, %v9815_v47  ;;  %v14327_v25 = vadd.f32 %v5601_v50, %v15862_v33  ;;  %15867 = vst [vmem:[#allocation25_spill] sm:$0xff] %v14333_v27  ;;  %v15888_v50 = vld [vmem:[#allocation10_spill] sm:$0xff] }
 0xb50   :  { %v5603_v24 = vpop.f32.mrf.mxu0 }
 0xb51   :  { %v5604_v44 = vadd.f32 %v9815_v47, %v5603_v24  ;;  %v14324_v3 = vadd.f32 %v5612_v10, %v15860_v34  ;;  %15863 = vst [vmem:[#allocation23_spill] sm:$0xff] %v14327_v25 }
 0xb52   :  { %v11101_v32 = vpop.f32.mrf.mxu0 }
 0xb53   :  { %15861 = vst [vmem:[#allocation22_spill] sm:$0xff] %v14324_v3  ;;  %v14330_v5 = vadd.f32 %v5604_v44, %v15864_v21  ;;  %v5697_v6 = vpack.c.bf16 %v14324_v3, %v14333_v27  ;;  %v5625_v56 = vadd.f32 %v11101_v32, %v9815_v47 }
 0xb54   :  { %v5616_v45 = vpop.f32.mrf.mxu0 }
 0xb55   :  { %15865 = vst [vmem:[#allocation24_spill] sm:$0xff] %v14330_v5  ;;  %v5696_v55 = vpack.c.bf16 %v14330_v5, %v14327_v25  ;;  %v5617_v51 = vadd.f32 %v9815_v47, %v5616_v45  ;;  %v14349_v53 = vadd.f32 %v5625_v56, %v15874_v4 }
 0xb56   :  { %v11102_v26 = vpop.f32.mrf.mxu0 }
 0xb57   :  { %v5628_v14 = vadd.f32 %v11102_v26, %v9815_v47  ;;  %11127 = vmatprep.mubr.bf16.mxu1 %v5696_v55  ;;  %v14343_v49 = vadd.f32 %v5617_v51, %v15870_v23  ;;  %15875 = vst [vmem:[#allocation14_spill] sm:$0xff] %v14349_v53 }
 0xb58   :  { %v5619_v16 = vpop.f32.mrf.mxu0  ;;  %11128 = vmatmul.mubr.bf16.vlgmr.msra.gmra.mxu1 %v5697_v6 }
 0xb59   :  { %v5620_v60 = vadd.f32 %v9815_v47, %v5619_v16  ;;  %v14340_v41 = vadd.f32 %v5628_v14, %v15868_v29  ;;  %15871 = vst [vmem:[#allocation16_spill] sm:$0xff] %v14343_v49 }
 0xb5a   :  { %v11105_v30 = vpop.f32.mrf.mxu0 }
 0xb5b   :  { %15869 = vst [vmem:[#allocation13_spill] sm:$0xff] %v14340_v41  ;;  %v14346_v62 = vadd.f32 %v5620_v60, %v15872_v36  ;;  %v5699_v18 = vpack.c.bf16 %v14340_v41, %v14349_v53  ;;  %v5641_v20 = vadd.f32 %v11105_v30, %v9815_v47 }
 0xb5c   :  { %v5632_v59 = vpop.f32.mrf.mxu0 }
 0xb5d   :  { %15873 = vst [vmem:[#allocation12_spill] sm:$0xff] %v14346_v62  ;;  %v5698_v54 = vpack.c.bf16 %v14346_v62, %v14343_v49  ;;  %v5633_v40 = vadd.f32 %v9815_v47, %v5632_v59  ;;  %v14365_v61 = vadd.f32 %v5641_v20, %v15882_v17 }
 0xb5e   :  { %v11106_v39 = vpop.f32.mrf.mxu0 }
 0xb5f   :  { %v5644_v28 = vadd.f32 %v11106_v39, %v9815_v47  ;;  %11131 = vmatprep.mubr.bf16.mxu1 %v5698_v54  ;;  %v14359_v37 = vadd.f32 %v5633_v40, %v15878_v8  ;;  %15883 = vst [vmem:[#allocation30_spill] sm:$0xff] %v14365_v61 }
 0xb60   :  { %v5635_v48 = vpop.f32.mrf.mxu0  ;;  %11132 = vmatmul.mubr.bf16.gmra.mxu1 %v5699_v18 }
 0xb61   :  { %v5636_v12 = vadd.f32 %v9815_v47, %v5635_v48  ;;  %v14356_v52 = vadd.f32 %v5644_v28, %v15876_v58  ;;  %15879 = vst [vmem:[#allocation21_spill] sm:$0xff] %v14359_v37 }
 0xb62   :  { %v11109_v43 = vpop.f32.mrf.mxu0 }
 0xb63   :  { %15877 = vst [vmem:[#allocation15_spill] sm:$0xff] %v14356_v52  ;;  %v14362_v57 = vadd.f32 %v5636_v12, %v15880_v2  ;;  %v5701_v38 = vpack.c.bf16 %v14356_v52, %v14365_v61  ;;  %v5657_v13 = vadd.f32 %v11109_v43, %v9815_v47 }
 0xb64   :  { %v5648_v35 = vpop.f32.mrf.mxu0 }
 0xb65   :  { %15881 = vst [vmem:[#allocation17_spill] sm:$0xff] %v14362_v57  ;;  %v5700_v0 = vpack.c.bf16 %v14362_v57, %v14359_v37  ;;  %v5649_v46 = vadd.f32 %v9815_v47, %v5648_v35  ;;  %v14381_v24 = vadd.f32 %v5657_v13, %v15890_v7 }
 0xb66   :  { %v11110_v1 = vpop.f32.mrf.mxu0 }
 0xb67   :  { %v5660_v11 = vadd.f32 %v11110_v1, %v9815_v47  ;;  %11135 = vmatprep.mubr.bf16.mxu1 %v5700_v0  ;;  %v14375_v22 = vadd.f32 %v5649_v46, %v15886_v31  ;;  %15891 = vst [vmem:[#allocation27_spill] sm:$0xff] %v14381_v24 }
 0xb68   :  { %v5651_v9 = vpop.f32.mrf.mxu0  ;;  %11136 = vmatmul.mubr.bf16.gmra.mxu1 %v5701_v38 }
 0xb69   :  { %v5652_v42 = vadd.f32 %v9815_v47, %v5651_v9  ;;  %v14372_v19 = vadd.f32 %v5660_v11, %v15884_v63  ;;  %15887 = vst [vmem:[#allocation18_spill] sm:$0xff] %v14375_v22  ;;  %v14390_v47 = vld [vmem:[%s15579_s6 + $0x3] ss:$0 sm:$0xff] }
 0xb6b   :  { %15885 = vst [vmem:[#allocation19_spill] sm:$0xff] %v14372_v19  ;;  %v14378_v10 = vadd.f32 %v5652_v42, %v15888_v50  ;;  %v5703_v34 = vpack.c.bf16 %v14372_v19, %v14381_v24 }
 0xb6d   :  { %15889 = vst [vmem:[#allocation20_spill] sm:$0xff] %v14378_v10  ;;  %v5702_v44 = vpack.c.bf16 %v14378_v10, %v14375_v22 }
 0xb6f   :  { %11139 = vmatprep.mubr.bf16.mxu1 %v5702_v44 }
 0xb70   :  { %11140 = vmatmul.mubr.bf16.gmra.mxu1 %v5703_v34 }
 0xc18   :  { %v11129_v32 = vpop.f32.mrf.mxu1 }
 0xc19   :  { %v5803_v33 = vadd.f32 %v11129_v32, %v14390_v47 }
 0xc1a   :  { %v5794_v21 = vpop.f32.mrf.mxu1 }
 0xc1b   :  { %v14393_v15 = vmax.f32 %v5803_v33, 0.0  ;;  %v5795_v45 = vadd.f32 %v14390_v47, %v5794_v21 }
 0xc1c   :  { %v11130_v55 = vpop.f32.mrf.mxu1 }
 0xc1d   :  { %v14396_v6 = vmax.f32 %v5795_v45, 0.0  ;;  %v5806_v26 = vadd.f32 %v11130_v55, %v14390_v47  ;;  %v5879_v51 = vsel %vm783_vm3, %v14393_v15, 0.0  ;;  %v5923_v36 = vmul.f32 %v14393_v15, %v14393_v15 }
 0xc1e   :  { %5880 = vadd.xlane.f32.xlu0 %v5879_v51  ;;  %v5797_v14 = vpop.f32.mrf.mxu1 }
 0xc1f   :  { %v14401_v56 = vmax.f32 %v5806_v26, 0.0  ;;  %v5798_v16 = vadd.f32 %v14390_v47, %v5797_v14  ;;  %v5873_v23 = vsel %vm783_vm3, %v14396_v6, 0.0  ;;  %v5943_v39 = vsel %vm783_vm3, %v5923_v36, 0.0 }
 0xc20   :  { %v14404_v60 = vpop.f32.mrf.mxu1  ;;  %v5921_v28 = vmul.f32 %v14396_v6, %v14396_v6 }
 0xc21   :  { %v14406_v29 = vmax.f32 %v5798_v16, 0.0  ;;  %v5882_v30 = vsel %vm783_vm3, %v14401_v56, 0.0  ;;  %v5924_v40 = vmul.f32 %v14401_v56, %v14401_v56 }
 0xc22   :  { %5883 = vadd.xlane.f32.xlu1 %v5882_v30  ;;  %5874 = vadd.xlane.f32.xlu0 %v5873_v23  ;;  %v5810_v4 = vpop.f32.mrf.mxu1  ;;  %v5937_v8 = vsel %vm783_vm3, %v5921_v28, 0.0 }
 0xc23   :  { %v5811_v59 = vadd.f32 %v14390_v47, %v5810_v4  ;;  %v5876_v18 = vsel %vm783_vm3, %v14406_v29, 0.0  ;;  %v5946_v43 = vsel %vm783_vm3, %v5924_v40, 0.0  ;;  %v5922_v2 = vmul.f32 %v14406_v29, %v14406_v29 }
 0xc24   :  { %v14415_v54 = vpop.f32.mrf.mxu1 }
 0xc25   :  { %v14424_v48 = vmax.f32 %v5811_v59, 0.0  ;;  %v5940_v46 = vsel %vm783_vm3, %v5922_v2, 0.0 }
 0xc26   :  { %5877 = vadd.xlane.f32.xlu1 %v5876_v18  ;;  %5944 = vadd.xlane.f32.xlu0 %v5943_v39  ;;  %v5813_v20 = vpop.f32.mrf.mxu1 }
 0xc27   :  { %v5814_v58 = vadd.f32 %v14390_v47, %v5813_v20  ;;  %v5925_v0 = vmul.f32 %v14424_v48, %v14424_v48  ;;  %v5885_v11 = vsel %vm783_vm3, %v14424_v48, 0.0 }
 0xc28   :  { %v11137_v12 = vpop.f32.mrf.mxu1 }
 0xc29   :  { %v14433_v38 = vmax.f32 %v5814_v58, 0.0  ;;  %v5835_v1 = vadd.f32 %v11137_v12, %v14390_v47  ;;  %v5949_v42 = vsel %vm783_vm3, %v5925_v0, 0.0 }
 0xc2a   :  { %5947 = vadd.xlane.f32.xlu1 %v5946_v43  ;;  %5938 = vadd.xlane.f32.xlu0 %v5937_v8  ;;  %v5826_v17 = vpop.f32.mrf.mxu1  ;;  %v5819_v43 = vadd.f32 %v14404_v60, %v14390_v47 }
 0xc2b   :  { %v5827_v9 = vadd.f32 %v14390_v47, %v5826_v17  ;;  %v14441_v63 = vmax.f32 %v5835_v1, 0.0  ;;  %v5888_v50 = vsel %vm783_vm3, %v14433_v38, 0.0  ;;  %v5926_v7 = vmul.f32 %v14433_v38, %v14433_v38 }
 0xc2c   :  { %v11138_v35 = vpop.f32.mrf.mxu1  ;;  %v14488_v0 = vmax.f32 %v5819_v43, 0.0  ;;  %v5822_v1 = vadd.f32 %v14415_v54, %v14390_v47  ;;  %v14527_v43 = vld [vmem:[#allocation2 + $0x218] sm:$0xff]  }
 0xc2d   :  { %v5838_v31 = vadd.f32 %v11138_v35, %v14390_v47  ;;  %v14448_v34 = vmax.f32 %v5827_v9, 0.0  ;;  %v5952_v21 = vsel %vm783_vm3, %v5926_v7, 0.0  ;;  %v5903_v45 = vsel %vm783_vm3, %v14441_v63, 0.0 }
 0xc2e   :  { %5941 = vadd.xlane.f32.xlu1 %v5940_v46  ;;  %v5829_v13 = vpop.f32.mrf.mxu1  ;;  %5886 = vadd.xlane.f32.xlu0 %v5885_v11  ;;  %v5931_v16 = vmul.f32 %v14441_v63, %v14441_v63  ;;  %v14499_v9 = vmax.f32 %v5822_v1, 0.0  ;;  %v5891_v54 = vsel %vm783_vm3, %v14488_v0, 0.0 }
 0xc2f   :  { %v14450_v32 = vmax.f32 %v5838_v31, 0.0  ;;  %v5830_v33 = vadd.f32 %v14390_v47, %v5829_v13  ;;  %v5897_v14 = vsel %vm783_vm3, %v14448_v34, 0.0  ;;  %v5929_v23 = vmul.f32 %v14448_v34, %v14448_v34 }
 0xc30   :  { %v11141_v44 = vpop.f32.mrf.mxu1  ;;  %v5967_v59 = vsel %vm783_vm3, %v5931_v16, 0.0  ;;  %v5927_v13 = vmul.f32 %v14488_v0, %v14488_v0 }
 0xc31   :  { %v14456_v26 = vmax.f32 %v5830_v33, 0.0  ;;  %v5906_v51 = vsel %vm783_vm3, %v14450_v32, 0.0  ;;  %v5932_v18 = vmul.f32 %v14450_v32, %v14450_v32  ;;  %v5961_v40 = vsel %vm783_vm3, %v5929_v23, 0.0 }
 0xc32   :  { %5889 = vadd.xlane.f32.xlu1 %v5888_v50  ;;  %5950 = vadd.xlane.f32.xlu0 %v5949_v42  ;;  %v5842_v55 = vpop.f32.mrf.mxu1  ;;  %v5851_v42 = vadd.f32 %v11141_v44, %v14390_v47  ;;  %v5955_v50 = vsel %vm783_vm3, %v5927_v13, 0.0  ;;  %v11644_v44 = vld [vmem:[#allocation2 + $0x1f8] sm:$0xff]  }
 0xc33   :  { %v5843_v36 = vadd.f32 %v14390_v47, %v5842_v55  ;;  %v5900_v4 = vsel %vm783_vm3, %v14456_v26, 0.0  ;;  %v5970_v12 = vsel %vm783_vm3, %v5932_v18, 0.0  ;;  %v5930_v58 = vmul.f32 %v14456_v26, %v14456_v26  ;;  %11143 = vmatprep.subr.bf16.mxu0 %v11644_v44  ;;  %v11645_v55 = vld [vmem:[#allocation2 + $0x1f0] sm:$0xff]  }
 0xc34   :  { %v11142_v30 = vpop.f32.mrf.mxu1  ;;  %v14506_v7 = vmax.f32 %v5851_v42, 0.0  ;;  %11144 = vmatpush3.bf16.msra.mxu0 %v11644_v44 }
 0xc35   :  { %v14473_v28 = vmax.f32 %v5843_v36, 0.0  ;;  %v5964_v2 = vsel %vm783_vm3, %v5930_v58, 0.0  ;;  %v5854_v33 = vadd.f32 %v11142_v30, %v14390_v47  ;;  %v11647_v30 = vld [vmem:[#allocation2 + $0x230] sm:$0xff]   ;;  %11145 = vmatprep.subr.bf16.mxu0 %v11645_v55  ;;  %v11648_v36 = vld [vmem:[#allocation2 + $0x1e8] sm:$0xff]   ;;  %v15667_v58 = vmov 0.0|0.0  }
 0xc36   :  { %5953 = vadd.xlane.f32.xlu1 %v5952_v21  ;;  %5904 = vadd.xlane.f32.xlu0 %v5903_v45  ;;  %v5845_v39 = vpop.f32.mrf.mxu1  ;;  %v5894_v21 = vsel %vm783_vm3, %v14499_v9, 0.0  ;;  %v5928_v45 = vmul.f32 %v14499_v9, %v14499_v9  ;;  %v5915_v23 = vsel %vm783_vm3, %v14506_v7, 0.0 }
 0xc37   :  { %v5846_v20 = vadd.f32 %v14390_v47, %v5845_v39  ;;  %v5909_v17 = vsel %vm783_vm3, %v14473_v28, 0.0  ;;  %v5933_v35 = vmul.f32 %v14473_v28, %v14473_v28  ;;  %v5935_v47 = vmul.f32 %v14506_v7, %v14506_v7  ;;  %11151 = vmatprep.mubr.bf16.mxu0 %v15667_v58 }
 0xc38   :  { %v5958_v16 = vsel %vm783_vm3, %v5928_v45, 0.0  ;;  %11146 = vmatpush3.bf16.msra.mxu0 %v11645_v55 }
 0xc39   :  { %v14481_v8 = vmax.f32 %v5846_v20, 0.0  ;;  %v5973_v46 = vsel %vm783_vm3, %v5933_v35, 0.0  ;;  %11147 = vmatprep.subr.bf16.mxu0 %v11648_v36  ;;  %v11650_v20 = vld [vmem:[#allocation2 + $0x1e0] sm:$0xff]  }
 0xc3a   :  { %5907 = vadd.xlane.f32.xlu1 %v5906_v51  ;;  %5898 = vadd.xlane.f32.xlu0 %v5897_v14  ;;  %v11646_v51 = vld [vmem:[#allocation2 + $0x238] sm:$0xff]   ;;  %v14513_v14 = vmax.f32 %v5854_v33, 0.0 }
 0xc3b   :  { %v5912_v60 = vsel %vm783_vm3, %v14481_v8, 0.0  ;;  %v5934_v11 = vmul.f32 %v14481_v8, %v14481_v8  ;;  %11167 = vmatprep.subr.bf16.mxu1 %v11646_v51 }
 0xc3c   :  { %11168 = vmatpush3.bf16.msra.mxu1 %v11646_v51  ;;  %v5936_v18 = vmul.f32 %v14513_v14, %v14513_v14  ;;  %11148 = vmatpush3.bf16.msra.mxu0 %v11648_v36 }
 0xc3d   :  { %v5976_v31 = vsel %vm783_vm3, %v5934_v11, 0.0  ;;  %11169 = vmatprep.subr.bf16.mxu1 %v11647_v30  ;;  %11149 = vmatprep.subr.bf16.mxu0 %v11650_v20 }
 0xc3e   :  { %5901 = vadd.xlane.f32.xlu1 %v5900_v4  ;;  %5968 = vadd.xlane.f32.xlu0 %v5967_v59  ;;  %v5918_v4 = vsel %vm783_vm3, %v14513_v14, 0.0  ;;  %v5979_v59 = vsel %vm783_vm3, %v5935_v47, 0.0  ;;  %v5982_v39 = vsel %vm783_vm3, %v5936_v18, 0.0 }
 0xc40   :  { %11170 = vmatpush3.bf16.msra.mxu1 %v11647_v30  ;;  %11150 = vmatpush3.bf16.msra.mxu0 %v11650_v20 }
 0xc41   :  { %11191 = vmatprep.subr.bf16.mxu0 %v14527_v43 }
 0xc42   :  { %5971 = vadd.xlane.f32.xlu1 %v5970_v12  ;;  %5962 = vadd.xlane.f32.xlu0 %v5961_v40  ;;  %v11649_v40 = vld [vmem:[#allocation2 + $0x228] sm:$0xff]   ;;  %v11651_v12 = vld [vmem:[#allocation2 + $0x220] sm:$0xff]  }
 0xc43   :  { %11171 = vmatprep.subr.bf16.mxu1 %v11649_v40 }
 0xc44   :  { %11172 = vmatpush3.bf16.msra.mxu1 %v11649_v40 }
 0xc45   :  { %11173 = vmatprep.subr.bf16.mxu1 %v11651_v12 }
 0xc46   :  { %5965 = vadd.xlane.f32.xlu1 %v5964_v2  ;;  %5910 = vadd.xlane.f32.xlu0 %v5909_v17  ;;  %v14530_v2 = vld [vmem:[#allocation2 + $0x258] sm:$0xff]  }
 0xc48   :  { %11174 = vmatpush3.bf16.msra.mxu1 %v11651_v12 }
 0xc49   :  { %11215 = vmatprep.subr.bf16.mxu1 %v14530_v2 }
 0xc4a   :  { %5913 = vadd.xlane.f32.xlu1 %v5912_v60  ;;  %5974 = vadd.xlane.f32.xlu0 %v5973_v46 }
 0xc4e   :  { %5977 = vadd.xlane.f32.xlu1 %v5976_v31  ;;  %5892 = vadd.xlane.f32.xlu0 %v5891_v54 }
 0xc52   :  { %5895 = vadd.xlane.f32.xlu1 %v5894_v21  ;;  %5956 = vadd.xlane.f32.xlu0 %v5955_v50 }
 0xc56   :  { %5959 = vadd.xlane.f32.xlu1 %v5958_v16  ;;  %5916 = vadd.xlane.f32.xlu0 %v5915_v23 }
 0xc5a   :  { %5919 = vadd.xlane.f32.xlu1 %v5918_v4  ;;  %5980 = vadd.xlane.f32.xlu0 %v5979_v59 }
 0xc5e   :  { %5983 = vadd.xlane.f32.xlu1 %v5982_v39 }
 0xca7   :  { %v5881_v17 = vpop.xlane.xlu0 %5880 }
 0xca8   :  { %v14533_v60 = vmul.f32 0.015625, %v5881_v17 }
 0xcaa   :  { %v6019_v42 = vmul.f32 %v14533_v60, %v14533_v60 }
 0xcab   :  { %v5884_v35 = vpop.xlane.xlu1 %5883  ;;  %v5875_v1 = vpop.xlane.xlu0 %5874 }
 0xcac   :  { %v14535_v46 = vmul.f32 0.015625, %v5884_v35  ;;  %v14539_v31 = vmul.f32 0.015625, %v5875_v1 }
 0xcae   :  { %v6020_v33 = vmul.f32 %v14535_v46, %v14535_v46  ;;  %v6017_v55 = vmul.f32 %v14539_v31, %v14539_v31 }
 0xcaf   :  { %v5878_v11 = vpop.xlane.xlu1 %5877  ;;  %v5945_v13 = vpop.xlane.xlu0 %5944 }
 0xcb0   :  { %v6003_v54 = vmul.f32 0.015625, %v5945_v13  ;;  %v14543_v21 = vmul.f32 0.015625, %v5878_v11 }
 0xcb2   :  { %v6035_v50 = vsub.f32 %v6003_v54, %v6019_v42  ;;  %v6018_v36 = vmul.f32 %v14543_v21, %v14543_v21 }
 0xcb3   :  { %v5948_v45 = vpop.xlane.xlu1 %5947  ;;  %v5939_v44 = vpop.xlane.xlu0 %5938 }
 0xcb4   :  { %v6067_v51 = vadd.f32 1e-05, %v6035_v50  ;;  %v6004_v16 = vmul.f32 0.015625, %v5948_v45  ;;  %v6001_v23 = vmul.f32 0.015625, %v5939_v44 }
 0xcb6   :  { %v6036_v47 = vsub.f32 %v6004_v16, %v6020_v33  ;;  %v6033_v30 = vsub.f32 %v6001_v23, %v6017_v55  ;;  %11774 = vrsqrt.f32 %v6067_v51 }
 0xcb7   :  { %v5942_v4 = vpop.xlane.xlu1 %5941  ;;  %v5887_v59 = vpop.xlane.xlu0 %5886 }
 0xcb8   :  { %v6068_v18 = vadd.f32 1e-05, %v6036_v47  ;;  %v6065_v39 = vadd.f32 1e-05, %v6033_v30  ;;  %v6002_v40 = vmul.f32 0.015625, %v5942_v4  ;;  %v14549_v20 = vmul.f32 0.015625, %v5887_v59 }
 0xcb9   :  { %v14560_v30 = vld [vmem:[%s15580_s7 + $0x3] ss:$0 sm:$0xff] }
 0xcba   :  { %11776 = vrsqrt.f32 %v6068_v18  ;;  %v6034_v12 = vsub.f32 %v6002_v40, %v6018_v36  ;;  %v6021_v11 = vmul.f32 %v14549_v20, %v14549_v20 }
 0xcbb   :  { %11778 = vrsqrt.f32 %v6065_v39  ;;  %v5890_v17 = vpop.xlane.xlu1 %5889  ;;  %v5951_v35 = vpop.xlane.xlu0 %5950 }
 0xcbc   :  { %v6066_v1 = vadd.f32 1e-05, %v6034_v12  ;;  %v14553_v13 = vmul.f32 0.015625, %v5890_v17  ;;  %v6005_v42 = vmul.f32 0.015625, %v5951_v35 }
 0xcbe   :  { %11780 = vrsqrt.f32 %v6066_v1  ;;  %v6037_v54 = vsub.f32 %v6005_v42, %v6021_v11  ;;  %v6022_v45 = vmul.f32 %v14553_v13, %v14553_v13 }
 0xcbf   :  { %v5954_v50 = vpop.xlane.xlu1 %5953  ;;  %v5905_v33 = vpop.xlane.xlu0 %5904 }
 0xcc0   :  { %v6069_v44 = vadd.f32 1e-05, %v6037_v54  ;;  %v6006_v55 = vmul.f32 0.015625, %v5954_v50  ;;  %v14562_v4 = vmul.f32 0.015625, %v5905_v33  ;;  %v6051_v54 = vsub.f32 %v14393_v15, %v14533_v60 }
 0xcc1   :  { %v6052_v50 = vsub.f32 %v14401_v56, %v14535_v46 }
 0xcc2   :  { %11782 = vrsqrt.f32 %v6069_v44  ;;  %v6038_v51 = vsub.f32 %v6006_v55, %v6022_v45  ;;  %v6027_v1 = vmul.f32 %v14562_v4, %v14562_v4  ;;  %v6049_v45 = vsub.f32 %v14396_v6, %v14539_v31  ;;  %v14590_v6 = vld [vmem:[%s15581_s8 + $0x3] ss:$0 sm:$0xff] }
 0xcc3   :  { %v5908_v16 = vpop.xlane.xlu1 %5907  ;;  %v5899_v23 = vpop.xlane.xlu0 %5898  ;;  %v6050_v44 = vsub.f32 %v14406_v29, %v14543_v21 }
 0xcc4   :  { %v11775_v47 = vpop.eup %11774  ;;  %v6070_v36 = vadd.f32 1e-05, %v6038_v51  ;;  %v14564_v59 = vmul.f32 0.015625, %v5908_v16  ;;  %v14566_v39 = vmul.f32 0.015625, %v5899_v23 }
 0xcc5   :  { %v6107_v17 = vmul.f32 %v11775_v47, %v14560_v30 }
 0xcc6   :  { %11784 = vrsqrt.f32 %v6070_v36  ;;  %v6028_v55 = vmul.f32 %v14564_v59, %v14564_v59  ;;  %v6025_v23 = vmul.f32 %v14566_v39, %v14566_v39 }
 0xcc7   :  { %v11777_v18 = vpop.eup %11776  ;;  %v5902_v40 = vpop.xlane.xlu1 %5901  ;;  %v6123_v46 = vmul.f32 %v6107_v17, %v6051_v54 }
 0xcc8   :  { %v5969_v12 = vpop.xlane.xlu0 %5968  ;;  %v11779_v35 = vpop.eup %11778  ;;  %v6108_v42 = vmul.f32 %v11777_v18, %v14560_v30  ;;  %v14585_v15 = vmul.f32 0.015625, %v5902_v40 }
 0xcc9   :  { %v6011_v11 = vmul.f32 0.015625, %v5969_v12  ;;  %v6105_v33 = vmul.f32 %v11779_v35, %v14560_v30  ;;  %v14596_v54 = vadd.f32 %v14590_v6, %v6123_v46 }
 0xcca   :  { %v6124_v47 = vmul.f32 %v6108_v42, %v6052_v50 }
 0xccb   :  { %v6043_v51 = vsub.f32 %v6011_v11, %v6027_v1  ;;  %v11781_v16 = vpop.eup %11780  ;;  %v5972_v60 = vpop.xlane.xlu1 %5971  ;;  %v6121_v29 = vmul.f32 %v6105_v33, %v6049_v45  ;;  %v6026_v11 = vmul.f32 %v14585_v15, %v14585_v15 }
 0xccc   :  { %v5963_v56 = vpop.xlane.xlu0 %5962  ;;  %v6106_v31 = vmul.f32 %v11781_v16, %v14560_v30  ;;  %v6012_v21 = vmul.f32 0.015625, %v5972_v60  ;;  %v14599_v50 = vadd.f32 %v14590_v6, %v6124_v47  ;;  %v6054_v47 = vsub.f32 %v14433_v38, %v14553_v13  ;;  %v11658_v38 = vld [vmem:[#allocation2 + $0x250] sm:$0xff]  }
 0xccd   :  { %v6009_v36 = vmul.f32 0.015625, %v5963_v56  ;;  %v6075_v18 = vadd.f32 1e-05, %v6043_v51  ;;  %v14602_v33 = vadd.f32 %v14590_v6, %v6121_v29  ;;  %v6053_v56 = vsub.f32 %v14424_v48, %v14549_v20 }
 0xcce   :  { %v6122_v12 = vmul.f32 %v6106_v31, %v6050_v44  ;;  %v6044_v35 = vsub.f32 %v6012_v21, %v6028_v55 }
 0xccf   :  { %v6041_v1 = vsub.f32 %v6009_v36, %v6025_v23  ;;  %v11783_v40 = vpop.eup %11782  ;;  %v5966_v17 = vpop.xlane.xlu1 %5965  ;;  %11786 = vrsqrt.f32 %v6075_v18  ;;  %v14618_v36 = vpack.c.bf16 %v14599_v50, %v14596_v54  ;;  %v11653_v18 = vld [vmem:[#allocation2 + $0x210] sm:$0xff]  }
 0xcd0   :  { %v5911_v42 = vpop.xlane.xlu0 %5910  ;;  %v14605_v45 = vadd.f32 %v14590_v6, %v6122_v12  ;;  %v6076_v44 = vadd.f32 1e-05, %v6044_v35  ;;  %v6109_v51 = vmul.f32 %v11783_v40, %v14560_v30  ;;  %v6010_v16 = vmul.f32 0.015625, %v5966_v17 }
 0xcd1   :  { %v6073_v55 = vadd.f32 1e-05, %v6041_v1  ;;  %v14608_v23 = vmul.f32 0.015625, %v5911_v42 }
 0xcd2   :  { %v6170_v60 = vpack.c.bf16 %v14605_v45, %v14602_v33  ;;  %11788 = vrsqrt.f32 %v6076_v44  ;;  %v6042_v29 = vsub.f32 %v6010_v16, %v6026_v11  ;;  %v6125_v1 = vmul.f32 %v6109_v51, %v6053_v56  ;;  %v11660_v56 = vld [vmem:[#allocation2 + $0x248] sm:$0xff]  }
 0xcd3   :  { %v11785_v46 = vpop.eup %11784  ;;  %11790 = vrsqrt.f32 %v6073_v55  ;;  %v5914_v31 = vpop.xlane.xlu1 %5913  ;;  %v6029_v35 = vmul.f32 %v14608_v23, %v14608_v23  ;;  %v11654_v55 = vld [vmem:[#allocation2 + $0x208] sm:$0xff]  }
 0xcd4   :  { %v5975_v21 = vpop.xlane.xlu0 %5974  ;;  %v6110_v12 = vmul.f32 %v11785_v46, %v14560_v30  ;;  %v14623_v48 = vmul.f32 0.015625, %v5914_v31  ;;  %11152 = vmatmul.mubr.msk.bf16.vlgmr.msra.gmra.mxu0 %vm783_vm3, %v6170_v60  ;;  %11175 = vmatprep.mubr.msk.bf16.mxu1 %vm783_vm3, %v6170_v60  ;;  %v6074_v13 = vadd.f32 1e-05, %v6042_v29 }
 0xcd5   :  { %v6013_v20 = vmul.f32 0.015625, %v5975_v21  ;;  %11155 = vmatprep.mubr.msk.bf16.mxu0 %vm783_vm3, %v14618_v36  ;;  %11176 = vmatmul.mubr.msk.bf16.vlgmr.msra.gmra.mxu1 %vm783_vm3, %v14618_v36  ;;  %v11655_v21 = vld [vmem:[#allocation2 + $0x200] sm:$0xff]  }
 0xcd6   :  { %v6126_v11 = vmul.f32 %v6110_v12, %v6054_v47  ;;  %11192 = vmatpush3.bf16.msra.mxu0 %v14527_v43  ;;  %11792 = vrsqrt.f32 %v6074_v13  ;;  %v6030_v17 = vmul.f32 %v14623_v48, %v14623_v48  ;;  %11216 = vmatpush3.bf16.msra.mxu1 %v14530_v2  ;;  %v14641_v43 = vadd.f32 %v14590_v6, %v6125_v1  ;;  %v11662_v1 = vld [vmem:[#allocation2 + $0x240] sm:$0xff]  }
 0xcd7   :  { %v6045_v40 = vsub.f32 %v6013_v20, %v6029_v35  ;;  %v5978_v42 = vpop.xlane.xlu1 %5977  ;;  %11193 = vmatprep.subr.bf16.mxu0 %v11653_v18  ;;  %11217 = vmatprep.subr.bf16.mxu1 %v11658_v38 }
 0xcd8   :  { %v5893_v44 = vpop.xlane.xlu0 %5892  ;;  %v6014_v60 = vmul.f32 0.015625, %v5978_v42  ;;  %v14638_v51 = vadd.f32 %v14590_v6, %v6126_v11  ;;  %v14656_v42 = vld [vmem:[#allocation2 + $0x278] sm:$0xff]  }
 0xcd9   :  { %v6077_v16 = vadd.f32 1e-05, %v6045_v40  ;;  %v14635_v46 = vmul.f32 0.015625, %v5893_v44 }
 0xcda   :  { %v6046_v47 = vsub.f32 %v6014_v60, %v6030_v17  ;;  %11194 = vmatpush3.bf16.msra.mxu0 %v11653_v18  ;;  %v14645_v2 = vpack.c.bf16 %v14638_v51, %v14641_v43  ;;  %11218 = vmatpush3.bf16.msra.mxu1 %v11658_v38 }
 0xcdb   :  { %11794 = vrsqrt.f32 %v6077_v16  ;;  %v5896_v29 = vpop.xlane.xlu1 %5895  ;;  %11195 = vmatprep.subr.bf16.mxu0 %v11654_v55  ;;  %v6023_v35 = vmul.f32 %v14635_v46, %v14635_v46  ;;  %11219 = vmatprep.subr.bf16.mxu1 %v11660_v56 }
 0xcdc   :  { %v5957_v31 = vpop.xlane.xlu0 %5956  ;;  %v6078_v12 = vadd.f32 1e-05, %v6046_v47  ;;  %v14649_v20 = vmul.f32 0.015625, %v5896_v29  ;;  %11156 = vmatmul.mubr.msk.bf16.gmra.mxu0 %vm783_vm3, %v14645_v2  ;;  %11179 = vmatprep.mubr.msk.bf16.mxu1 %vm783_vm3, %v14645_v2  ;;  %v11787_v18 = vpop.eup %11786 }
 0xcdd   :  { %v6007_v13 = vmul.f32 0.015625, %v5957_v31  ;;  %11159 = vmatprep.mubr.bf16.mxu0 %v15667_v58  ;;  %v6060_v31 = vsub.f32 %v14450_v32, %v14564_v59 }
 0xcde   :  { %11796 = vrsqrt.f32 %v6078_v12  ;;  %11196 = vmatpush3.bf16.msra.mxu0 %v11654_v55  ;;  %11220 = vmatpush3.bf16.msra.mxu1 %v11660_v56  ;;  %v6024_v16 = vmul.f32 %v14649_v20, %v14649_v20  ;;  %v6115_v12 = vmul.f32 %v11787_v18, %v14560_v30  ;;  %v6059_v56 = vsub.f32 %v14441_v63, %v14562_v4 }
 0xcdf   :  { %v6039_v40 = vsub.f32 %v6007_v13, %v6023_v35  ;;  %v11789_v38 = vpop.eup %11788  ;;  %v5960_v11 = vpop.xlane.xlu1 %5959  ;;  %11197 = vmatprep.subr.bf16.mxu0 %v11655_v21  ;;  %11221 = vmatprep.subr.bf16.mxu1 %v11662_v1 }
 0xce0   :  { %v5917_v17 = vpop.xlane.xlu0 %5916  ;;  %v11791_v44 = vpop.eup %11790  ;;  %v6008_v47 = vmul.f32 0.015625, %v5960_v11  ;;  %v6116_v29 = vmul.f32 %v11789_v38, %v14560_v30  ;;  %v6131_v4 = vmul.f32 %v6115_v12, %v6059_v56 }
 0xce1   :  { %v6071_v60 = vadd.f32 1e-05, %v6039_v40  ;;  %v6113_v55 = vmul.f32 %v11791_v44, %v14560_v30  ;;  %v14665_v13 = vmul.f32 0.015625, %v5917_v17  ;;  %v6057_v40 = vsub.f32 %v14448_v34, %v14566_v39 }
 0xce2   :  { %v6040_v35 = vsub.f32 %v6008_v47, %v6024_v16  ;;  %11198 = vmatpush3.bf16.msra.mxu0 %v11655_v21  ;;  %v6132_v58 = vmul.f32 %v6116_v29, %v6060_v31  ;;  %11222 = vmatpush3.bf16.msra.mxu1 %v11662_v1  ;;  %v6058_v21 = vsub.f32 %v14456_v26, %v14585_v15 }
 0xce3   :  { %11798 = vrsqrt.f32 %v6071_v60  ;;  %v5920_v38 = vpop.xlane.xlu1 %5919  ;;  %11239 = vmatprep.subr.bf16.mxu0 %v14656_v42  ;;  %v11793_v32 = vpop.eup %11792  ;;  %v6129_v63 = vmul.f32 %v6113_v55, %v6057_v40  ;;  %v6031_v34 = vmul.f32 %v14665_v13, %v14665_v13  ;;  %v14690_v12 = vadd.f32 %v14590_v6, %v6131_v4 }
 0xce4   :  { %v5981_v11 = vpop.xlane.xlu0 %5980  ;;  %v6072_v59 = vadd.f32 1e-05, %v6040_v35  ;;  %v14672_v18 = vmul.f32 0.015625, %v5920_v38  ;;  %v6114_v17 = vmul.f32 %v11793_v32, %v14560_v30  ;;  %v14680_v1 = vadd.f32 %v14590_v6, %v6132_v58 }
 0xce5   :  { %v6015_v44 = vmul.f32 0.015625, %v5981_v11  ;;  %v6153_v31 = vadd.f32 %v14590_v6, %v6129_v63  ;;  %v6061_v35 = vsub.f32 %v14473_v28, %v14608_v23  ;;  %v6062_v40 = vsub.f32 %v14481_v8, %v14623_v48 }
 0xce6   :  { %11800 = vrsqrt.f32 %v6072_v59  ;;  %v6130_v60 = vmul.f32 %v6114_v17, %v6058_v21  ;;  %v6032_v29 = vmul.f32 %v14672_v18, %v14672_v18  ;;  %v14699_v11 = vpack.c.bf16 %v14680_v1, %v14690_v12 }
 0xce7   :  { %v5984_v16 = vpop.xlane.xlu1 %5983  ;;  %v6047_v26 = vsub.f32 %v6015_v44, %v6031_v34  ;;  %v6055_v63 = vsub.f32 %v14488_v0, %v14635_v46 }
 0xce8   :  { %v11795_v39 = vpop.eup %11794  ;;  %v6016_v15 = vmul.f32 0.015625, %v5984_v16  ;;  %v14687_v55 = vadd.f32 %v14590_v6, %v6130_v60  ;;  %v15892_v60 = vmov 0.0  }
 0xce9   :  { %v6117_v47 = vmul.f32 %v11795_v39, %v14560_v30  ;;  %v6079_v59 = vadd.f32 1e-05, %v6047_v26  ;;  %v6056_v39 = vsub.f32 %v14499_v9, %v14649_v20  ;;  %v6575_v9 = vpack.c.bf16 %v14596_v54, %v14605_v45  ;;  %v11659_v20 = vld [vmem:[#allocation2 + $0x270] sm:$0xff]  }
 0xcea   :  { %v6048_v58 = vsub.f32 %v6016_v15, %v6032_v29  ;;  %v6174_v38 = vpack.c.bf16 %v14687_v55, %v6153_v31  ;;  %v6064_v54 = vsub.f32 %v14513_v14, %v14672_v18 }
 0xceb   :  { %v11797_v56 = vpop.eup %11796  ;;  %v6133_v21 = vmul.f32 %v6117_v47, %v6061_v35  ;;  %v6574_v47 = vpack.c.bf16 %v14602_v33, %v15892_v60  ;;  %v6576_v33 = vpack.c.bf16 %v14641_v43, %v14599_v50  ;;  %v6063_v50 = vsub.f32 %v14506_v7, %v14665_v13 }
 0xcec   :  { %v6118_v32 = vmul.f32 %v11797_v56, %v14560_v30  ;;  %v6080_v44 = vadd.f32 1e-05, %v6048_v58  ;;  %11160 = vmatmul.mubr.msk.bf16.gmra.mxu0 %vm783_vm3, %v6174_v38 }
 0xced   :  { %11163 = vmatprep.mubr.msk.bf16.mxu0 %vm783_vm3, %v14699_v11  ;;  %v6157_v48 = vadd.f32 %v14590_v6, %v6133_v21  ;;  %v11670_v21 = vld [vmem:[%s15578_s5 + $0x128] sm:$0xff]  }
 0xcee   :  { %11802 = vrsqrt.f32 %v6080_v44  ;;  %v6134_v28 = vmul.f32 %v6118_v32, %v6062_v40  ;;  %v11661_v40 = vld [vmem:[#allocation2 + $0x268] sm:$0xff]   ;;  %v11663_v32 = vld [vmem:[#allocation2 + $0x260] sm:$0xff]   ;;  %v11669_v44 = vld [vmem:[%s15578_s5 + $0x130] sm:$0xff]  }
 0xcef   :  { %11804 = vrsqrt.f32 %v6079_v59  ;;  %v6580_v13 = vpack.c.bf16 %v6157_v48, %v14680_v1  ;;  %v15893_v1 = vmov 0.0|0.0  }
 0xcf0   :  { %v11799_v23 = vpop.eup %11798  ;;  %v6158_v17 = vadd.f32 %v14590_v6, %v6134_v28  ;;  %v11671_v28 = vld [vmem:[%s15578_s5 + $0x120] sm:$0xff]  }
 0xcf1   :  { %v6111_v8 = vmul.f32 %v11799_v23, %v14560_v30  ;;  %v11672_v23 = vld [vmem:[%s15578_s5 + $0x118] sm:$0xff]  }
 0xcf2   :  { %v14710_v4 = vpack.c.bf16 %v6158_v17, %v6157_v48 }
 0xcf3   :  { %v11801_v34 = vpop.eup %11800  ;;  %v6127_v29 = vmul.f32 %v6111_v8, %v6055_v63 }
 0xcf4   :  { %v6112_v16 = vmul.f32 %v11801_v34, %v14560_v30  ;;  %11164 = vmatmul.mubr.msk.bf16.gmra.mxu0 %vm783_vm3, %v14710_v4 }
 0xcf5   :  { %11199 = vmatprep.mubr.msk.bf16.mxu0 %vm783_vm3, %v6574_v47  ;;  %v6151_v0 = vadd.f32 %v14590_v6, %v6127_v29 }
 0xcf6   :  { %v6128_v26 = vmul.f32 %v6112_v16, %v6056_v39 }
 0xcf8   :  { %v6152_v46 = vadd.f32 %v14590_v6, %v6128_v26 }
 0xcfa   :  { %v6173_v15 = vpack.c.bf16 %v6152_v46, %v6151_v0 }
 0xcfb   :  { %v11803_v35 = vpop.eup %11802 }
 0xcfc   :  { %11180 = vmatmul.mubr.msk.bf16.gmra.mxu1 %vm783_vm3, %v6173_v15  ;;  %v11805_v58 = vpop.eup %11804  ;;  %11200 = vmatmul.mubr.msk.bf16.vlgmr.msra.gmra.mxu0 %vm783_vm3, %v6575_v9  ;;  %v6120_v56 = vmul.f32 %v11803_v35, %v14560_v30 }
 0xcfd   :  { %11183 = vmatprep.mubr.msk.bf16.mxu1 %vm783_vm3, %v6174_v38  ;;  %11240 = vmatpush3.bf16.msra.mxu0 %v14656_v42  ;;  %v6119_v45 = vmul.f32 %v11805_v58, %v14560_v30  ;;  %v6577_v38 = vpack.c.bf16 %v6151_v0, %v14638_v51  ;;  %v6578_v42 = vpack.c.bf16 %v6153_v31, %v15892_v60  ;;  %v11665_v31 = vld [vmem:[%s15584_s11 + $0x70] sm:$0xff]  }
 0xcfe   :  { %11203 = vmatprep.mubr.msk.bf16.mxu0 %vm783_vm3, %v6576_v33  ;;  %11241 = vmatprep.subr.bf16.mxu0 %v11659_v20  ;;  %v6136_v43 = vmul.f32 %v6120_v56, %v6064_v54  ;;  %v6579_v51 = vpack.c.bf16 %v14690_v12, %v14687_v55  ;;  %v11666_v55 = vld [vmem:[%s15584_s11 + $0x68] sm:$0xff]   ;;  %v11667_v12 = vld [vmem:[%s15584_s11 + $0x60] sm:$0xff]  }
 0xcff   :  { %v6135_v59 = vmul.f32 %v6119_v45, %v6063_v50 }
 0xd00   :  { %v6160_v7 = vadd.f32 %v14590_v6, %v6136_v43 }
 0xd01   :  { %11242 = vmatpush3.bf16.msra.mxu0 %v11659_v20  ;;  %v6159_v14 = vadd.f32 %v14590_v6, %v6135_v59  ;;  %v6771_v6 = vpack.c.bf16 %v15892_v60, %v6152_v46 }
 0xd02   :  { %11243 = vmatprep.subr.bf16.mxu0 %v11661_v40 }
 0xd03   :  { %v6177_v30 = vpack.c.bf16 %v6160_v7, %v6159_v14  ;;  %v6581_v18 = vpack.c.bf16 %v6159_v14, %v6158_v17 }
 0xd04   :  { %11184 = vmatmul.mubr.msk.bf16.gmra.mxu1 %vm783_vm3, %v14699_v11  ;;  %11204 = vmatmul.mubr.msk.bf16.gmra.mxu0 %vm783_vm3, %v6577_v38 }
 0xd05   :  { %11187 = vmatprep.mubr.msk.bf16.mxu1 %vm783_vm3, %v14710_v4  ;;  %11207 = vmatprep.mubr.msk.bf16.mxu0 %vm783_vm3, %v6578_v42 }
 0xd06   :  { %11244 = vmatpush3.bf16.msra.mxu0 %v11661_v40 }
 0xd07   :  { %11245 = vmatprep.subr.bf16.mxu0 %v11663_v32 }
 0xd0a   :  { %11246 = vmatpush3.bf16.msra.mxu0 %v11663_v32 }
 0xd0c   :  { %11188 = vmatmul.mubr.msk.bf16.gmra.mxu1 %vm783_vm3, %v6177_v30  ;;  %11208 = vmatmul.mubr.msk.bf16.gmra.mxu0 %vm783_vm3, %v6579_v51 }
 0xd0d   :  { %11223 = vmatprep.mubr.msk.bf16.mxu1 %vm783_vm3, %v6575_v9  ;;  %11211 = vmatprep.mubr.msk.bf16.mxu0 %vm783_vm3, %v6580_v13 }
 0xd14   :  { %11224 = vmatmul.mubr.msk.bf16.vlgmr.msra.gmra.mxu1 %vm783_vm3, %v6576_v33  ;;  %11212 = vmatmul.mubr.msk.bf16.gmra.mxu0 %vm783_vm3, %v6581_v18 }
 0xd15   :  { %11227 = vmatprep.mubr.msk.bf16.mxu1 %vm783_vm3, %v6577_v38  ;;  %11247 = vmatprep.mubr.msk.bf16.mxu0 %vm783_vm3, %v14618_v36  ;;  %v6775_v36 = vpack.c.bf16 %v15892_v60, %v6160_v7 }
 0xd1c   :  { %11228 = vmatmul.mubr.msk.bf16.gmra.mxu1 %vm783_vm3, %v6771_v6  ;;  %11248 = vmatmul.mubr.msk.bf16.vlgmr.msra.gmra.mxu0 %vm783_vm3, %v14645_v2  ;;  %v11664_v2 = vld [vmem:[%s15584_s11 + $0x78] sm:$0xff]  }
 0xd1d   :  { %11231 = vmatprep.mubr.msk.bf16.mxu1 %vm783_vm3, %v6579_v51  ;;  %11251 = vmatprep.mubr.msk.bf16.mxu0 %vm783_vm3, %v6173_v15 }
 0xd1e   :  { %11263 = vmatprep.subr.bf16.mxu1 %v11664_v2 }
 0xd1f   :  { %11264 = vmatpush3.bf16.msra.mxu1 %v11664_v2 }
 0xd20   :  { %11265 = vmatprep.subr.bf16.mxu1 %v11665_v31 }
 0xd23   :  { %11266 = vmatpush3.bf16.msra.mxu1 %v11665_v31 }
 0xd24   :  { %11232 = vmatmul.mubr.msk.bf16.gmra.mxu1 %vm783_vm3, %v6580_v13  ;;  %11252 = vmatmul.mubr.bf16.gmra.mxu0 %v15893_v1 }
 0xd25   :  { %11235 = vmatprep.mubr.msk.bf16.mxu1 %vm783_vm3, %v6581_v18  ;;  %11255 = vmatprep.mubr.msk.bf16.mxu0 %vm783_vm3, %v14699_v11  ;;  %v11668_v11 = vld [vmem:[%s15578_s5 + $0x138] sm:$0xff]  }
 0xd26   :  { %11267 = vmatprep.subr.bf16.mxu1 %v11666_v55  ;;  %11287 = vmatprep.subr.bf16.mxu0 %v11668_v11 }
 0xd27   :  { %11268 = vmatpush3.bf16.msra.mxu1 %v11666_v55  ;;  %11288 = vmatpush3.bf16.msra.mxu0 %v11668_v11 }
 0xd28   :  { %11269 = vmatprep.subr.bf16.mxu1 %v11667_v12  ;;  %11289 = vmatprep.subr.bf16.mxu0 %v11669_v44 }
 0xd2b   :  { %11270 = vmatpush3.bf16.msra.mxu1 %v11667_v12  ;;  %11290 = vmatpush3.bf16.msra.mxu0 %v11669_v44 }
 0xd2c   :  { %11236 = vmatmul.mubr.msk.bf16.gmra.mxu1 %vm783_vm3, %v6775_v36  ;;  %11256 = vmatmul.mubr.msk.bf16.gmra.mxu0 %vm783_vm3, %v14710_v4 }
 0xd2d   :  { %11259 = vmatprep.mubr.msk.bf16.mxu0 %vm783_vm3, %v6177_v30  ;;  %11291 = vmatprep.subr.bf16.mxu0 %v11670_v21 }
 0xd2f   :  { %11292 = vmatpush3.bf16.msra.mxu0 %v11670_v21 }
 0xd30   :  { %11293 = vmatprep.subr.bf16.mxu0 %v11671_v28 }
 0xd33   :  { %11294 = vmatpush3.bf16.msra.mxu0 %v11671_v28 }
 0xd34   :  { %11260 = vmatmul.mubr.bf16.gmra.mxu0 %v15893_v1  ;;  %11295 = vmatprep.subr.bf16.mxu0 %v11672_v23 }
 0xd37   :  { %11296 = vmatpush3.bf16.msra.mxu0 %v11672_v23 }
 0xd94   :  { %v11153_v8 = vpop.f32.mrf.mxu0 }
 0xd95   :  { %v11177_v47 = vpop.f32.mrf.mxu1 }
 0xd96   :  { %v6341_v48 = vpop.f32.mrf.mxu0  ;;  %v6495_v57 = vadd.f32 %v11177_v47, %v11153_v8 }
 0xd97   :  { %v6486_v0 = vpop.f32.mrf.mxu1 }
 0xd98   :  { %v11154_v17 = vpop.f32.mrf.mxu0  ;;  %v6487_v19 = vadd.f32 %v6486_v0, %v6341_v48 }
 0xd99   :  { %v11178_v35 = vpop.f32.mrf.mxu1 }
 0xd9a   :  { %v6344_v63 = vpop.f32.mrf.mxu0  ;;  %v6498_v52 = vadd.f32 %v11178_v35, %v11154_v17 }
 0xd9b   :  { %v6489_v33 = vpop.f32.mrf.mxu1 }
 0xd9c   :  { %v14803_v4 = vpop.f32.mrf.mxu0  ;;  %v6490_v27 = vadd.f32 %v6489_v33, %v6344_v63 }
 0xd9e   :  { %v14805_v34 = vpop.f32.mrf.mxu0 }
 0xda0   :  { %v14807_v39 = vpop.f32.mrf.mxu0 }
 0xda2   :  { %v14809_v16 = vpop.f32.mrf.mxu0 }
 0xdac   :  { %v14811_v60 = vpop.f32.mrf.mxu0 }
 0xdae   :  { %v14813_v29 = vpop.f32.mrf.mxu0 }
 0xdb0   :  { %v14815_v26 = vpop.f32.mrf.mxu0 }
 0xdb2   :  { %v14817_v46 = vpop.f32.mrf.mxu0 }
 0xdb4   :  { %v14819_v15 = vpop.f32.mrf.mxu0 }
 0xdb6   :  { %v14821_v9 = vpop.f32.mrf.mxu0 }
 0xdb8   :  { %v14823_v20 = vpop.f32.mrf.mxu0 }
 0xdba   :  { %v14825_v58 = vpop.f32.mrf.mxu0 }
 0xdbb   :  { %15894 = vst [vmem:[#allocation26_spill] sm:$0xff] %v14825_v58 }
 0xdbc   :  { %v11181_v56 = vpop.f32.mrf.mxu1  ;;  %v11201_v40 = vpop.f32.mrf.mxu0 }
 0xdbd   :  { %v6729_v49 = vadd.f32 %v11201_v40, %v6495_v57  ;;  %v14863_v57 = vld [vmem:[%s15583_s10 + $0x3] ss:$0 sm:$0xff] }
 0xdbe   :  { %v6502_v54 = vpop.f32.mrf.mxu1  ;;  %v6664_v45 = vpop.f32.mrf.mxu0 }
 0xdbf   :  { %v6727_v53 = vadd.f32 %v6664_v45, %v6487_v19  ;;  %v6503_v8 = vadd.f32 %v6502_v54, %v14805_v34 }
 0xdc0   :  { %v11182_v50 = vpop.f32.mrf.mxu1  ;;  %v11202_v43 = vpop.f32.mrf.mxu0 }
 0xdc1   :  { %v6730_v5 = vadd.f32 %v11202_v43, %v6498_v52 }
 0xdc2   :  { %v6505_v38 = vpop.f32.mrf.mxu1  ;;  %v6667_v32 = vpop.f32.mrf.mxu0 }
 0xdc4   :  { %v14827_v42 = vpop.f32.mrf.mxu1  ;;  %v11205_v59 = vpop.f32.mrf.mxu0 }
 0xdc6   :  { %v14829_v7 = vpop.f32.mrf.mxu1  ;;  %v6680_v14 = vpop.f32.mrf.mxu0 }
 0xdc8   :  { %v14831_v30 = vpop.f32.mrf.mxu1  ;;  %v11206_v51 = vpop.f32.mrf.mxu0 }
 0xdca   :  { %v14833_v13 = vpop.f32.mrf.mxu1  ;;  %v6683_v18 = vpop.f32.mrf.mxu0 }
 0xdcc   :  { %v14835_v6 = vpop.f32.mrf.mxu1  ;;  %v14837_v36 = vpop.f32.mrf.mxu0 }
 0xdce   :  { %v14839_v2 = vpop.f32.mrf.mxu1  ;;  %v14841_v31 = vpop.f32.mrf.mxu0 }
 0xdd0   :  { %v14843_v55 = vpop.f32.mrf.mxu1  ;;  %v14845_v12 = vpop.f32.mrf.mxu0 }
 0xdd2   :  { %v14847_v11 = vpop.f32.mrf.mxu1  ;;  %v14849_v44 = vpop.f32.mrf.mxu0 }
 0xdd3   :  { %15895 = vst [vmem:[#allocation28_spill] sm:$0xff] %v14847_v11  ;;  %v6728_v11 = vadd.f32 %v6667_v32, %v6490_v27 }
 0xdd4   :  { %v11225_v21 = vpop.f32.mrf.mxu1  ;;  %v14851_v28 = vpop.f32.mrf.mxu0 }
 0xdd5   :  { %15896 = vst [vmem:[#allocation29_spill] sm:$0xff] %v14851_v28  ;;  %v6923_v1 = vadd.f32 %v11225_v21, %v6729_v49  ;;  %v6514_v49 = vadd.f32 %v11182_v50, %v14807_v39 }
 0xdd6   :  { %v6858_v23 = vpop.f32.mrf.mxu1  ;;  %v14853_v24 = vpop.f32.mrf.mxu0 }
 0xdd7   :  { %15897 = vst [vmem:[#allocation5_spill] sm:$0xff] %v14853_v24  ;;  %v6921_v25 = vadd.f32 %v6858_v23, %v6727_v53  ;;  %v6511_v53 = vadd.f32 %v11181_v56, %v14803_v4  ;;  %v6734_v35 = vadd.f32 %v11206_v51, %v6514_v49 }
 0xdd8   :  { %v11226_v10 = vpop.f32.mrf.mxu1  ;;  %v14855_v22 = vpop.f32.mrf.mxu0 }
 0xdd9   :  { %15898 = vst [vmem:[#allocation6_spill] sm:$0xff] %v14855_v22  ;;  %v6924_v58 = vadd.f32 %v11226_v10, %v6730_v5  ;;  %v6731_v5 = vadd.f32 %v6680_v14, %v6503_v8  ;;  %v6733_v17 = vadd.f32 %v11205_v59, %v6511_v53  ;;  %v6519_v59 = vadd.f32 %v14829_v7, %v14813_v29 }
 0xdda   :  { %v6861_v61 = vpop.f32.mrf.mxu1  ;;  %v14857_v37 = vpop.f32.mrf.mxu0  ;;  %v6522_v7 = vadd.f32 %v14833_v13, %v14817_v46 }
 0xddb   :  { %v6922_v47 = vadd.f32 %v6861_v61, %v6728_v11  ;;  %v6506_v61 = vadd.f32 %v6505_v38, %v14809_v16  ;;  %v6735_v23 = vadd.f32 %v14841_v31, %v6519_v59 }
 0xddc   :  { %v11229_v62 = vpop.f32.mrf.mxu1  ;;  %v11249_v41 = vpop.f32.mrf.mxu0 }
 0xddd   :  { %v7165_v48 = vadd.f32 %v11249_v41, %v6923_v1  ;;  %v6732_v39 = vadd.f32 %v6683_v18, %v6506_v61  ;;  %v6927_v56 = vadd.f32 %v11229_v62, %v6733_v17  ;;  %v6527_v62 = vadd.f32 %v14827_v42, %v14811_v60 }
 0xdde   :  { %v6874_v3 = vpop.f32.mrf.mxu1  ;;  %v7100_v28 = vpop.f32.mrf.mxu0  ;;  %v6530_v18 = vadd.f32 %v14831_v30, %v14815_v26  ;;  %v6535_v61 = vadd.f32 %v14839_v2, %v14821_v9  ;;  %v15900_v9 = vld [vmem:[#allocation26_spill] sm:$0xff]  ;;  %v15901_v2 = vld [vmem:[#allocation28_spill] sm:$0xff] }
 0xddf   :  { %v7163_v24 = vadd.f32 %v7100_v28, %v6921_v25  ;;  %v7189_v63 = vadd.f32 %v14863_v57, %v7165_v48  ;;  %v6925_v33 = vadd.f32 %v6874_v3, %v6731_v5  ;;  %v6737_v60 = vadd.f32 %v14837_v36, %v6527_v62 }
 0xde0   :  { %v11230_v22 = vpop.f32.mrf.mxu1  ;;  %v11250_v0 = vpop.f32.mrf.mxu0  ;;  %v6738_v30 = vadd.f32 %v14845_v12, %v6530_v18 }
 0xde1   :  { %v7166_v19 = vadd.f32 %v11250_v0, %v6924_v58  ;;  %v7187_v25 = vadd.f32 %v14863_v57, %v7163_v24  ;;  %v6928_v45 = vadd.f32 %v11230_v22, %v6734_v35  ;;  %v7205_v14 = vmax.f32 %v7189_v63, 0.0 }
 0xde2   :  { %v6877_v52 = vpop.f32.mrf.mxu1  ;;  %v7103_v27 = vpop.f32.mrf.mxu0 }
 0xde3   :  { %v7190_v41 = vadd.f32 %v14863_v57, %v7166_v19  ;;  %v7164_v10 = vadd.f32 %v7103_v27, %v6922_v47  ;;  %v7203_v24 = vmax.f32 %v7187_v25, 0.0  ;;  %v6926_v51 = vadd.f32 %v6877_v52, %v6732_v39 }
 0xde4   :  { %v11233_v1 = vpop.f32.mrf.mxu1  ;;  %v11253_v34 = vpop.f32.mrf.mxu0  ;;  %v6736_v19 = vadd.f32 %v14849_v44, %v6522_v7  ;;  %v6543_v44 = vadd.f32 %v14835_v6, %v14819_v15 }
 0xde5   :  { %v7188_v4 = vadd.f32 %v14863_v57, %v7164_v10  ;;  %v7206_v40 = vmax.f32 %v7190_v41, 0.0  ;;  %v7169_v16 = vadd.f32 %v11253_v34, %v6927_v56  ;;  %v6931_v52 = vadd.f32 %v11233_v1, %v6737_v60 }
 0xde6   :  { %v6890_v58 = vpop.f32.mrf.mxu1  ;;  %v7116_v54 = vpop.f32.mrf.mxu0  ;;  %v6546_v1 = vadd.f32 %v14843_v55, %v14823_v20  ;;  %v15903_v55 = vld [vmem:[#allocation6_spill] sm:$0xff] }
 0xde7   :  { %v7204_v50 = vmax.f32 %v7188_v4, 0.0  ;;  %v7167_v43 = vadd.f32 %v7116_v54, %v6925_v33  ;;  %v7229_v22 = vpack.c.bf16 %v7206_v40, %v7205_v14  ;;  %v7193_v42 = vadd.f32 %v14863_v57, %v7169_v16  ;;  %v15899_v4 = vld [vmem:[#allocation5_spill] sm:$0xff] }
 0xde8   :  { %v11234_v32 = vpop.f32.mrf.mxu1  ;;  %v11254_v38 = vpop.f32.mrf.mxu0  ;;  %v6929_v31 = vadd.f32 %v6890_v58, %v6735_v23  ;;  %v6739_v58 = vadd.f32 %v15899_v4, %v6535_v61  ;;  %v6538_v54 = vadd.f32 %v15901_v2, %v15900_v9  ;;  %v15911_v4 = vld [vmem:[#allocation25_spill] sm:$0xff] }
 0xde9   :  { %v7228_v3 = vpack.c.bf16 %v7204_v50, %v7203_v24  ;;  %v7170_v11 = vadd.f32 %v11254_v38, %v6928_v45  ;;  %v7191_v48 = vadd.f32 %v14863_v57, %v7167_v43  ;;  %v6932_v46 = vadd.f32 %v11234_v32, %v6738_v30  ;;  %v15902_v24 = vld [vmem:[#allocation29_spill] sm:$0xff] }
 0xdea   :  { %v6893_v21 = vpop.f32.mrf.mxu1  ;;  %v7119_v28 = vpop.f32.mrf.mxu0  ;;  %v7209_v25 = vmax.f32 %v7193_v42, 0.0  ;;  %v6741_v15 = vadd.f32 %v15902_v24, %v6543_v44  ;;  %v6742_v45 = vadd.f32 %v15903_v55, %v6546_v1  ;;  %v6740_v32 = vadd.f32 %v14857_v37, %v6538_v54  ;;  %v15907_v1 = vld [vmem:[#allocation23_spill] sm:$0xff] }
 0xdeb   :  { %v7194_v0 = vadd.f32 %v14863_v57, %v7170_v11  ;;  %v7168_v8 = vadd.f32 %v7119_v28, %v6926_v51  ;;  %11271 = vmatprep.mubr.msk.bf16.mxu1 %vm783_vm3, %v7228_v3  ;;  %v7207_v5 = vmax.f32 %v7191_v48, 0.0  ;;  %v6930_v12 = vadd.f32 %v6893_v21, %v6736_v19 }
 0xdec   :  { %v11237_v29 = vpop.f32.mrf.mxu1  ;;  %v11257_v26 = vpop.f32.mrf.mxu0  ;;  %11272 = vmatmul.mubr.msk.bf16.vlgmr.msra.gmra.mxu1 %vm783_vm3, %v7229_v22 }
 0xded   :  { %v7192_v47 = vadd.f32 %v14863_v57, %v7168_v8  ;;  %v7210_v53 = vmax.f32 %v7194_v0, 0.0  ;;  %v7173_v41 = vadd.f32 %v11257_v26, %v6931_v52  ;;  %v6935_v14 = vadd.f32 %v11237_v29, %v6741_v15 }
 0xdee   :  { %v6906_v49 = vpop.f32.mrf.mxu1  ;;  %v7132_v27 = vpop.f32.mrf.mxu0 }
 0xdef   :  { %v7208_v13 = vmax.f32 %v7192_v47, 0.0  ;;  %v7171_v36 = vadd.f32 %v7132_v27, %v6929_v31  ;;  %v7231_v34 = vpack.c.bf16 %v7210_v53, %v7209_v25  ;;  %v7197_v6 = vadd.f32 %v14863_v57, %v7173_v41  ;;  %v11675_v27 = vld [vmem:[%s15578_s5 + $0x100] sm:$0xff]  }
 0xdf0   :  { %v11258_v10 = vpop.f32.mrf.mxu0  ;;  %v11238_v35 = vpop.f32.mrf.mxu1  ;;  %v6933_v50 = vadd.f32 %v6906_v49, %v6739_v58  ;;  %v15904_v53 = vmov 0.0|0.0   ;;  %v11673_v49 = vld [vmem:[%s15578_s5 + $0x110] sm:$0xff]  }
 0xdf1   :  { %v7230_v17 = vpack.c.bf16 %v7208_v13, %v7207_v5  ;;  %v7174_v63 = vadd.f32 %v11258_v10, %v6932_v46  ;;  %v7195_v39 = vadd.f32 %v14863_v57, %v7171_v36  ;;  %v6936_v3 = vadd.f32 %v11238_v35, %v6742_v45  ;;  %11297 = vmatprep.subr.bf16.mxu0 %v11673_v49  ;;  %v9925_v13 = vld [vmem:[%s15585_s12 + $0x3] ss:$0 sm:$0xff]  ;;  %v15909_v35 = vld [vmem:[#allocation24_spill] sm:$0xff] }
 0xdf2   :  { %v7135_v33 = vpop.f32.mrf.mxu0  ;;  %v6909_v38 = vpop.f32.mrf.mxu1  ;;  %v7213_v62 = vmax.f32 %v7197_v6, 0.0  ;;  %11298 = vmatpush3.bf16.msra.mxu0 %v11673_v49 }
 0xdf3   :  { %v7198_v56 = vadd.f32 %v14863_v57, %v7174_v63  ;;  %v7172_v40 = vadd.f32 %v7135_v33, %v6930_v12  ;;  %11275 = vmatprep.mubr.msk.bf16.mxu1 %vm783_vm3, %v7230_v17  ;;  %v7211_v51 = vmax.f32 %v7195_v39, 0.0  ;;  %v6934_v28 = vadd.f32 %v6909_v38, %v6740_v32  ;;  %v15905_v17 = vld [vmem:[#allocation22_spill] sm:$0xff]  ;;  %v15917_v32 = vld [vmem:[#allocation12_spill] sm:$0xff] }
 0xdf4   :  { %v11261_v20 = vpop.f32.mrf.mxu0  ;;  %11276 = vmatmul.mubr.msk.bf16.gmra.mxu1 %vm783_vm3, %v7231_v34 }
 0xdf5   :  { %v7196_v43 = vadd.f32 %v14863_v57, %v7172_v40  ;;  %v7214_v16 = vmax.f32 %v7198_v56, 0.0  ;;  %v7177_v18 = vadd.f32 %v11261_v20, %v6935_v14  ;;  %v15913_v20 = vld [vmem:[#allocation13_spill] sm:$0xff] }
 0xdf6   :  { %v7148_v59 = vpop.f32.mrf.mxu0 }
 0xdf7   :  { %v7212_v11 = vmax.f32 %v7196_v43, 0.0  ;;  %v7175_v21 = vadd.f32 %v7148_v59, %v6933_v50  ;;  %v7233_v0 = vpack.c.bf16 %v7214_v16, %v7213_v62  ;;  %v7201_v60 = vadd.f32 %v14863_v57, %v7177_v18  ;;  %v15915_v50 = vld [vmem:[#allocation16_spill] sm:$0xff]  ;;  %v15919_v16 = vld [vmem:[#allocation14_spill] sm:$0xff] }
 0xdf8   :  { %v11262_v22 = vpop.f32.mrf.mxu0 }
 0xdf9   :  { %v7232_v23 = vpack.c.bf16 %v7212_v11, %v7211_v51  ;;  %v7178_v48 = vadd.f32 %v11262_v22, %v6936_v3  ;;  %v7199_v7 = vadd.f32 %v14863_v57, %v7175_v21  ;;  %v7217_v47 = vmax.f32 %v7201_v60, 0.0  ;;  %v15927_v60 = vld [vmem:[#allocation30_spill] sm:$0xff] }
 0xdfa   :  { %v7151_v8 = vpop.f32.mrf.mxu0 }
 0xdfb   :  { %v7202_v37 = vadd.f32 %v14863_v57, %v7178_v48  ;;  %v7176_v29 = vadd.f32 %v7151_v8, %v6934_v28  ;;  %11279 = vmatprep.mubr.msk.bf16.mxu1 %vm783_vm3, %v7232_v23  ;;  %v7215_v30 = vmax.f32 %v7199_v7, 0.0  ;;  %v15921_v23 = vld [vmem:[#allocation15_spill] sm:$0xff]  ;;  %v15923_v8 = vld [vmem:[#allocation21_spill] sm:$0xff] }
 0xdfc   :  { %11280 = vmatmul.mubr.msk.bf16.gmra.mxu1 %vm783_vm3, %v7233_v0 }
 0xdfd   :  { %v7200_v42 = vadd.f32 %v14863_v57, %v7176_v29  ;;  %v7218_v26 = vmax.f32 %v7202_v37, 0.0  ;;  %v11674_v57 = vld [vmem:[%s15578_s5 + $0x108] sm:$0xff]   ;;  %v15925_v37 = vld [vmem:[#allocation17_spill] sm:$0xff] }
 0xdfe   :  { %11299 = vmatprep.subr.bf16.mxu0 %v11674_v57 }
 0xdff   :  { %v7216_v31 = vmax.f32 %v7200_v42, 0.0  ;;  %v7235_v52 = vpack.c.bf16 %v7218_v26, %v7217_v47  ;;  %11300 = vmatpush3.bf16.msra.mxu0 %v11674_v57 }
 0xe00   :  { %11301 = vmatprep.subr.bf16.mxu0 %v11675_v27 }
 0xe01   :  { %v7234_v19 = vpack.c.bf16 %v7216_v31, %v7215_v30 }
 0xe03   :  { %11283 = vmatprep.mubr.msk.bf16.mxu1 %vm783_vm3, %v7234_v19  ;;  %11302 = vmatpush3.bf16.msra.mxu0 %v11675_v27 }
 0xe04   :  { %11284 = vmatmul.mubr.msk.bf16.gmra.mxu1 %vm783_vm3, %v7235_v52 }
 0xe05   :  { %11327 = vmatprep.mubr.bf16.mxu1 %v15904_v53 }
 0xeac   :  { %v11273_v5 = vpop.f32.mrf.mxu1 }
 0xead   :  { %v7335_v10 = vadd.f32 %v11273_v5, %v9925_v13  ;;  %v15929_v5 = vld [vmem:[#allocation19_spill] sm:$0xff] }
 0xeae   :  { %v7326_v46 = vpop.f32.mrf.mxu1 }
 0xeaf   :  { %v7327_v25 = vadd.f32 %v9925_v13, %v7326_v46  ;;  %v14939_v58 = vadd.f32 %v7335_v10, %v15911_v4 }
 0xeb0   :  { %v11274_v36 = vpop.f32.mrf.mxu1 }
 0xeb1   :  { %v7338_v41 = vadd.f32 %v11274_v36, %v9925_v13  ;;  %v14933_v34 = vadd.f32 %v7327_v25, %v15907_v1  ;;  %15912 = vst [vmem:[#allocation10_spill] sm:$0xff] %v14939_v58  ;;  %v15931_v36 = vld [vmem:[#allocation18_spill] sm:$0xff] }
 0xeb2   :  { %v7329_v61 = vpop.f32.mrf.mxu1 }
 0xeb3   :  { %v7330_v12 = vadd.f32 %v9925_v13, %v7329_v61  ;;  %v14930_v63 = vadd.f32 %v7338_v41, %v15905_v17  ;;  %15908 = vst [vmem:[#allocation8_spill] sm:$0xff] %v14933_v34  ;;  %v15933_v41 = vld [vmem:[#allocation20_spill] sm:$0xff]  ;;  %v15935_v61 = vld [vmem:[#allocation27_spill] sm:$0xff] }
 0xeb4   :  { %v11277_v44 = vpop.f32.mrf.mxu1 }
 0xeb5   :  { %15906 = vst [vmem:[#allocation7_spill] sm:$0xff] %v14930_v63  ;;  %v14936_v33 = vadd.f32 %v7330_v12, %v15909_v35  ;;  %v7423_v40 = vpack.c.bf16 %v14930_v63, %v14939_v58  ;;  %v7351_v24 = vadd.f32 %v11277_v44, %v9925_v13 }
 0xeb6   :  { %v7342_v39 = vpop.f32.mrf.mxu1 }
 0xeb7   :  { %15910 = vst [vmem:[#allocation9_spill] sm:$0xff] %v14936_v33  ;;  %v7422_v56 = vpack.c.bf16 %v14936_v33, %v14933_v34  ;;  %v7343_v2 = vadd.f32 %v9925_v13, %v7342_v39  ;;  %v14955_v38 = vadd.f32 %v7351_v24, %v15919_v16 }
 0xeb8   :  { %v11278_v9 = vpop.f32.mrf.mxu1 }
 0xeb9   :  { %v7354_v54 = vadd.f32 %v11278_v9, %v9925_v13  ;;  %11303 = vmatprep.mubr.bf16.mxu0 %v7422_v56  ;;  %v14949_v43 = vadd.f32 %v7343_v2, %v15915_v50  ;;  %15920 = vst [vmem:[#allocation28_spill] sm:$0xff] %v14955_v38 }
 0xeba   :  { %v7345_v15 = vpop.f32.mrf.mxu1  ;;  %11304 = vmatmul.mubr.bf16.vlgmr.msra.gmra.mxu0 %v7423_v40 }
 0xebb   :  { %v7346_v6 = vadd.f32 %v9925_v13, %v7345_v15  ;;  %v14946_v55 = vadd.f32 %v7354_v54, %v15913_v20  ;;  %15916 = vst [vmem:[#allocation5_spill] sm:$0xff] %v14949_v43 }
 0xebc   :  { %v11281_v45 = vpop.f32.mrf.mxu1 }
 0xebd   :  { %15914 = vst [vmem:[#allocation11_spill] sm:$0xff] %v14946_v55  ;;  %v14952_v14 = vadd.f32 %v7346_v6, %v15917_v32  ;;  %v7425_v3 = vpack.c.bf16 %v14946_v55, %v14955_v38  ;;  %v7367_v18 = vadd.f32 %v11281_v45, %v9925_v13 }
 0xebe   :  { %v7358_v59 = vpop.f32.mrf.mxu1 }
 0xebf   :  { %15918 = vst [vmem:[#allocation26_spill] sm:$0xff] %v14952_v14  ;;  %v7424_v51 = vpack.c.bf16 %v14952_v14, %v14949_v43  ;;  %v7359_v21 = vadd.f32 %v9925_v13, %v7358_v59  ;;  %v14971_v42 = vadd.f32 %v7367_v18, %v15927_v60 }
 0xec0   :  { %v11282_v11 = vpop.f32.mrf.mxu1 }
 0xec1   :  { %v7370_v62 = vadd.f32 %v11282_v11, %v9925_v13  ;;  %11307 = vmatprep.mubr.bf16.mxu0 %v7424_v51  ;;  %v14965_v7 = vadd.f32 %v7359_v21, %v15923_v8  ;;  %15928 = vst [vmem:[#allocation23_spill] sm:$0xff] %v14971_v42 }
 0xec2   :  { %v7361_v22 = vpop.f32.mrf.mxu1  ;;  %11308 = vmatmul.mubr.bf16.gmra.mxu0 %v7425_v3 }
 0xec3   :  { %v7362_v28 = vadd.f32 %v9925_v13, %v7361_v22  ;;  %v14962_v48 = vadd.f32 %v7370_v62, %v15921_v23  ;;  %15924 = vst [vmem:[#allocation6_spill] sm:$0xff] %v14965_v7 }
 0xec4   :  { %v11285_v0 = vpop.f32.mrf.mxu1 }
 0xec5   :  { %15922 = vst [vmem:[#allocation29_spill] sm:$0xff] %v14962_v48  ;;  %v14968_v29 = vadd.f32 %v7362_v28, %v15925_v37  ;;  %v7427_v31 = vpack.c.bf16 %v14962_v48, %v14971_v42  ;;  %v7383_v49 = vadd.f32 %v11285_v0, %v9925_v13 }
 0xec6   :  { %v7374_v26 = vpop.f32.mrf.mxu1 }
 0xec7   :  { %15926 = vst [vmem:[#allocation22_spill] sm:$0xff] %v14968_v29  ;;  %v7426_v30 = vpack.c.bf16 %v14968_v29, %v14965_v7  ;;  %v7375_v19 = vadd.f32 %v9925_v13, %v7374_v26  ;;  %v14987_v12 = vadd.f32 %v7383_v49, %v15935_v61 }
 0xec8   :  { %v11286_v47 = vpop.f32.mrf.mxu1 }
 0xec9   :  { %v7386_v52 = vadd.f32 %v11286_v47, %v9925_v13  ;;  %11311 = vmatprep.mubr.bf16.mxu0 %v7426_v30  ;;  %v14981_v25 = vadd.f32 %v7375_v19, %v15931_v36  ;;  %15936 = vst [vmem:[#allocation16_spill] sm:$0xff] %v14987_v12 }
 0xeca   :  { %v7377_v57 = vpop.f32.mrf.mxu1  ;;  %11312 = vmatmul.mubr.bf16.gmra.mxu0 %v7427_v31 }
 0xecb   :  { %v7378_v27 = vadd.f32 %v9925_v13, %v7377_v57  ;;  %v14978_v46 = vadd.f32 %v7386_v52, %v15929_v5  ;;  %15932 = vst [vmem:[#allocation25_spill] sm:$0xff] %v14981_v25  ;;  %v14996_v13 = vld [vmem:[%s15579_s6 + $0x4] ss:$0 sm:$0xff]  ;;  %v11676_v57 = vld [vmem:[#allocation2 + $0x298] sm:$0xff]  }
 0xecc   :  { %11319 = vmatprep.subr.bf16.mxu1 %v11676_v57 }
 0xecd   :  { %15930 = vst [vmem:[#allocation24_spill] sm:$0xff] %v14978_v46  ;;  %v14984_v10 = vadd.f32 %v7378_v27, %v15933_v41  ;;  %v7429_v44 = vpack.c.bf16 %v14978_v46, %v14987_v12  ;;  %11320 = vmatpush3.bf16.msra.mxu1 %v11676_v57 }
 0xecf   :  { %15934 = vst [vmem:[#allocation13_spill] sm:$0xff] %v14984_v10  ;;  %v7428_v17 = vpack.c.bf16 %v14984_v10, %v14981_v25 }
 0xed1   :  { %11315 = vmatprep.mubr.bf16.mxu0 %v7428_v17 }
 0xed2   :  { %11316 = vmatmul.mubr.bf16.gmra.mxu0 %v7429_v44 }
 0xf7a   :  { %v11305_v1 = vpop.f32.mrf.mxu0 }
 0xf7b   :  { %v7529_v35 = vadd.f32 %v11305_v1, %v14996_v13 }
 0xf7c   :  { %v7520_v4 = vpop.f32.mrf.mxu0 }
 0xf7d   :  { %v14999_v39 = vmax.f32 %v7529_v35, 0.0  ;;  %v7521_v56 = vadd.f32 %v14996_v13, %v7520_v4 }
 0xf7e   :  { %v11306_v40 = vpop.f32.mrf.mxu0 }
 0xf7f   :  { %v15002_v9 = vmax.f32 %v7521_v56, 0.0  ;;  %v7532_v2 = vadd.f32 %v11306_v40, %v14996_v13  ;;  %v7605_v54 = vsel %vm783_vm3, %v14999_v39, 0.0  ;;  %v7649_v16 = vmul.f32 %v14999_v39, %v14999_v39 }
 0xf80   :  { %7606 = vadd.xlane.f32.xlu0 %v7605_v54  ;;  %v7523_v24 = vpop.f32.mrf.mxu0 }
 0xf81   :  { %v15007_v15 = vmax.f32 %v7532_v2, 0.0  ;;  %v7524_v6 = vadd.f32 %v14996_v13, %v7523_v24  ;;  %v7599_v32 = vsel %vm783_vm3, %v15002_v9, 0.0  ;;  %v7669_v11 = vsel %vm783_vm3, %v7649_v16, 0.0 }
 0xf82   :  { %v11309_v20 = vpop.f32.mrf.mxu0  ;;  %v7647_v62 = vmul.f32 %v15002_v9, %v15002_v9 }
 0xf83   :  { %v15010_v45 = vmax.f32 %v7524_v6, 0.0  ;;  %v7608_v50 = vsel %vm783_vm3, %v15007_v15, 0.0  ;;  %v7650_v21 = vmul.f32 %v15007_v15, %v15007_v15  ;;  %v7545_v40 = vadd.f32 %v11309_v20, %v14996_v13 }
 0xf84   :  { %7609 = vadd.xlane.f32.xlu1 %v7608_v50  ;;  %v7536_v59 = vpop.f32.mrf.mxu0  ;;  %7600 = vadd.xlane.f32.xlu0 %v7599_v32  ;;  %v7663_v0 = vsel %vm783_vm3, %v7647_v62, 0.0 }
 0xf85   :  { %v7602_v3 = vsel %vm783_vm3, %v15010_v45, 0.0  ;;  %v7672_v23 = vsel %vm783_vm3, %v7650_v21, 0.0  ;;  %v7648_v8 = vmul.f32 %v15010_v45, %v15010_v45  ;;  %v7537_v44 = vadd.f32 %v14996_v13, %v7536_v59 }
 0xf86   :  { %v11310_v51 = vpop.f32.mrf.mxu0  ;;  %v15066_v32 = vmax.f32 %v7545_v40, 0.0 }
 0xf87   :  { %v7666_v19 = vsel %vm783_vm3, %v7648_v8, 0.0  ;;  %v15059_v2 = vmax.f32 %v7537_v44, 0.0  ;;  %v7548_v16 = vadd.f32 %v11310_v51, %v14996_v13 }
 0xf88   :  { %v7539_v18 = vpop.f32.mrf.mxu0  ;;  %7603 = vadd.xlane.f32.xlu1 %v7602_v3  ;;  %7670 = vadd.xlane.f32.xlu0 %v7669_v11 }
 0xf89   :  { %v7540_v54 = vadd.f32 %v14996_v13, %v7539_v18  ;;  %v7611_v3 = vsel %vm783_vm3, %v15059_v2, 0.0  ;;  %v15074_v21 = vmax.f32 %v7548_v16, 0.0  ;;  %v7617_v18 = vsel %vm783_vm3, %v15066_v32, 0.0 }
 0xf8a   :  { %v11313_v22 = vpop.f32.mrf.mxu0  ;;  %v7651_v51 = vmul.f32 %v15059_v2, %v15059_v2 }
 0xf8b   :  { %v7561_v28 = vadd.f32 %v11313_v22, %v14996_v13  ;;  %v15069_v59 = vmax.f32 %v7540_v54, 0.0 }
 0xf8c   :  { %v7552_v37 = vpop.f32.mrf.mxu0  ;;  %7673 = vadd.xlane.f32.xlu1 %v7672_v23  ;;  %7664 = vadd.xlane.f32.xlu0 %v7663_v0  ;;  %v7620_v0 = vsel %vm783_vm3, %v15074_v21, 0.0  ;;  %v7675_v8 = vsel %vm783_vm3, %v7651_v51, 0.0  ;;  %v11681_v51 = vld [vmem:[#allocation2 + $0x2d0] sm:$0xff]  }
 0xf8d   :  { %v15030_v60 = vmax.f32 %v7561_v28, 0.0  ;;  %v7553_v26 = vadd.f32 %v14996_v13, %v7552_v37  ;;  %v7614_v62 = vsel %vm783_vm3, %v15069_v59, 0.0  ;;  %v7653_v28 = vmul.f32 %v15066_v32, %v15066_v32 }
 0xf8e   :  { %v11314_v30 = vpop.f32.mrf.mxu0  ;;  %v7652_v37 = vmul.f32 %v15069_v59, %v15069_v59 }
 0xf8f   :  { %v15033_v31 = vmax.f32 %v7553_v26, 0.0  ;;  %v7564_v47 = vadd.f32 %v11314_v30, %v14996_v13  ;;  %v7629_v52 = vsel %vm783_vm3, %v15030_v60, 0.0  ;;  %v7657_v17 = vmul.f32 %v15030_v60, %v15030_v60 }
 0xf90   :  { %v7555_v49 = vpop.f32.mrf.mxu0  ;;  %7667 = vadd.xlane.f32.xlu1 %v7666_v19  ;;  %7630 = vadd.xlane.f32.xlu0 %v7629_v52  ;;  %v7681_v30 = vsel %vm783_vm3, %v7653_v28, 0.0  ;;  %v11677_v19 = vld [vmem:[#allocation2 + $0x290] sm:$0xff]  }
 0xf91   :  { %v15039_v27 = vmax.f32 %v7564_v47, 0.0  ;;  %v7556_v5 = vadd.f32 %v14996_v13, %v7555_v49  ;;  %v7623_v61 = vsel %vm783_vm3, %v15033_v31, 0.0  ;;  %v7693_v35 = vsel %vm783_vm3, %v7657_v17, 0.0  ;;  %11321 = vmatprep.subr.bf16.mxu1 %v11677_v19 }
 0xf92   :  { %v7655_v56 = vmul.f32 %v15033_v31, %v15033_v31  ;;  %v11317_v11 = vpop.f32.mrf.mxu0  ;;  %v7654_v47 = vmul.f32 %v15074_v21, %v15074_v21  ;;  %11322 = vmatpush3.bf16.msra.mxu1 %v11677_v19 }
 0xf93   :  { %v15042_v36 = vmax.f32 %v7556_v5, 0.0  ;;  %v7632_v41 = vsel %vm783_vm3, %v15039_v27, 0.0  ;;  %v7658_v4 = vmul.f32 %v15039_v27, %v15039_v27  ;;  %v7577_v23 = vadd.f32 %v11317_v11, %v14996_v13 }
 0xf94   :  { %7633 = vadd.xlane.f32.xlu1 %v7632_v41  ;;  %7624 = vadd.xlane.f32.xlu0 %v7623_v61  ;;  %v7687_v6 = vsel %vm783_vm3, %v7655_v56, 0.0  ;;  %v7568_v22 = vpop.f32.mrf.mxu0  ;;  %v7678_v5 = vsel %vm783_vm3, %v7652_v37, 0.0  ;;  %v11678_v41 = vld [vmem:[#allocation2 + $0x288] sm:$0xff]   ;;  %v7684_v17 = vsel %vm783_vm3, %v7654_v47, 0.0  ;;  %v15129_v47 = vld [vmem:[#allocation2 + $0x318] sm:$0xff]  }
 0xf95   :  { %v7626_v1 = vsel %vm783_vm3, %v15042_v36, 0.0  ;;  %v7696_v24 = vsel %vm783_vm3, %v7658_v4, 0.0  ;;  %v7656_v50 = vmul.f32 %v15042_v36, %v15042_v36  ;;  %v15093_v52 = vmax.f32 %v7577_v23, 0.0  ;;  %11323 = vmatprep.subr.bf16.mxu1 %v11678_v41  ;;  %v11682_v23 = vld [vmem:[#allocation2 + $0x2c8] sm:$0xff]  }
 0xf96   :  { %v11318_v26 = vpop.f32.mrf.mxu0  ;;  %v7569_v49 = vadd.f32 %v14996_v13, %v7568_v22  ;;  %11324 = vmatpush3.bf16.msra.mxu1 %v11678_v41  ;;  %v11683_v22 = vld [vmem:[#allocation2 + $0x2b8] sm:$0xff]   ;;  %v11686_v37 = vld [vmem:[#allocation2 + $0x2a8] sm:$0xff]  }
 0xf97   :  { %v7690_v20 = vsel %vm783_vm3, %v7656_v50, 0.0  ;;  %v7580_v57 = vadd.f32 %v11318_v26, %v14996_v13  ;;  %v7641_v4 = vsel %vm783_vm3, %v15093_v52, 0.0  ;;  %v7661_v16 = vmul.f32 %v15093_v52, %v15093_v52  ;;  %v11687_v26 = vld [vmem:[#allocation2 + $0x2a0] sm:$0xff]  }
 0xf98   :  { %7627 = vadd.xlane.f32.xlu1 %v7626_v1  ;;  %7694 = vadd.xlane.f32.xlu0 %v7693_v35  ;;  %v7571_v61 = vpop.f32.mrf.mxu0  ;;  %v15099_v44 = vmax.f32 %v7569_v49, 0.0 }
 0xf99   :  { %v15101_v1 = vmax.f32 %v7580_v57, 0.0  ;;  %v7572_v35 = vadd.f32 %v14996_v13, %v7571_v61 }
 0xf9a   :  { %v7635_v54 = vsel %vm783_vm3, %v15099_v44, 0.0 }
 0xf9b   :  { %v15106_v56 = vmax.f32 %v7572_v35, 0.0  ;;  %v7644_v40 = vsel %vm783_vm3, %v15101_v1, 0.0 }
 0xf9c   :  { %7697 = vadd.xlane.f32.xlu1 %v7696_v24  ;;  %7688 = vadd.xlane.f32.xlu0 %v7687_v6  ;;  %v7659_v24 = vmul.f32 %v15099_v44, %v15099_v44 }
 0xf9d   :  { %v7638_v13 = vsel %vm783_vm3, %v15106_v56, 0.0  ;;  %v7660_v50 = vmul.f32 %v15106_v56, %v15106_v56 }
 0xf9e   :  { %v7699_v6 = vsel %vm783_vm3, %v7659_v24, 0.0 }
 0xf9f   :  { %v7702_v11 = vsel %vm783_vm3, %v7660_v50, 0.0 }
 0xfa0   :  { %7691 = vadd.xlane.f32.xlu1 %v7690_v20  ;;  %7612 = vadd.xlane.f32.xlu0 %v7611_v3  ;;  %v11679_v20 = vld [vmem:[#allocation2 + $0x280] sm:$0xff]   ;;  %v11680_v3 = vld [vmem:[#allocation2 + $0x2d8] sm:$0xff]  }
 0xfa1   :  { %11325 = vmatprep.subr.bf16.mxu1 %v11679_v20  ;;  %11343 = vmatprep.subr.bf16.mxu0 %v11680_v3 }
 0xfa2   :  { %11326 = vmatpush3.bf16.msra.mxu1 %v11679_v20  ;;  %11344 = vmatpush3.bf16.msra.mxu0 %v11680_v3 }
 0xfa3   :  { %11345 = vmatprep.subr.bf16.mxu0 %v11681_v51  ;;  %11367 = vmatprep.subr.bf16.mxu1 %v11683_v22 }
 0xfa4   :  { %7615 = vadd.xlane.f32.xlu1 %v7614_v62  ;;  %7618 = vadd.xlane.f32.xlu0 %v7617_v18  ;;  %v7705_v62 = vsel %vm783_vm3, %v7661_v16, 0.0  ;;  %v7662_v18 = vmul.f32 %v15101_v1, %v15101_v1 }
 0xfa5   :  { %11328 = vmatmul.mubr.bf16.vlgmr.msra.gmra.mxu1 %v15904_v53 }
 0xfa6   :  { %v7708_v28 = vsel %vm783_vm3, %v7662_v18, 0.0  ;;  %11346 = vmatpush3.bf16.msra.mxu0 %v11681_v51  ;;  %11368 = vmatpush3.bf16.msra.mxu1 %v11683_v22 }
 0xfa7   :  { %11347 = vmatprep.subr.bf16.mxu0 %v11682_v23 }
 0xfa8   :  { %7621 = vadd.xlane.f32.xlu1 %v7620_v0  ;;  %7676 = vadd.xlane.f32.xlu0 %v7675_v8  ;;  %v11684_v0 = vld [vmem:[#allocation2 + $0x2c0] sm:$0xff]   ;;  %v11685_v8 = vld [vmem:[#allocation2 + $0x2b0] sm:$0xff]  }
 0xfa9   :  { %11369 = vmatprep.subr.bf16.mxu1 %v11685_v8 }
 0xfaa   :  { %11348 = vmatpush3.bf16.msra.mxu0 %v11682_v23  ;;  %11370 = vmatpush3.bf16.msra.mxu1 %v11685_v8 }
 0xfab   :  { %11349 = vmatprep.subr.bf16.mxu0 %v11684_v0  ;;  %11371 = vmatprep.subr.bf16.mxu1 %v11686_v37 }
 0xfac   :  { %7679 = vadd.xlane.f32.xlu1 %v7678_v5  ;;  %7682 = vadd.xlane.f32.xlu0 %v7681_v30  ;;  %v15127_v30 = vld [vmem:[#allocation2 + $0x2f8] sm:$0xff]  }
 0xfae   :  { %11350 = vmatpush3.bf16.msra.mxu0 %v11684_v0  ;;  %11372 = vmatpush3.bf16.msra.mxu1 %v11686_v37 }
 0xfaf   :  { %11373 = vmatprep.subr.bf16.mxu1 %v11687_v26  ;;  %11391 = vmatprep.subr.bf16.mxu0 %v15127_v30 }
 0xfb0   :  { %7685 = vadd.xlane.f32.xlu1 %v7684_v17  ;;  %7642 = vadd.xlane.f32.xlu0 %v7641_v4 }
 0xfb2   :  { %11374 = vmatpush3.bf16.msra.mxu1 %v11687_v26 }
 0xfb3   :  { %11415 = vmatprep.subr.bf16.mxu1 %v15129_v47 }
 0xfb4   :  { %7645 = vadd.xlane.f32.xlu1 %v7644_v40  ;;  %7636 = vadd.xlane.f32.xlu0 %v7635_v54 }
 0xfb8   :  { %7639 = vadd.xlane.f32.xlu1 %v7638_v13  ;;  %7700 = vadd.xlane.f32.xlu0 %v7699_v6 }
 0xfbc   :  { %7703 = vadd.xlane.f32.xlu1 %v7702_v11  ;;  %7706 = vadd.xlane.f32.xlu0 %v7705_v62 }
 0xfc0   :  { %7709 = vadd.xlane.f32.xlu1 %v7708_v28 }
0x1009   :  { %v7607_v19 = vpop.xlane.xlu0 %7606 }
0x100a   :  { %v15133_v5 = vmul.f32 0.015625, %v7607_v19 }
0x100c   :  { %v7745_v35 = vmul.f32 %v15133_v5, %v15133_v5 }
0x100d   :  { %v7610_v49 = vpop.xlane.xlu1 %7609  ;;  %v7601_v57 = vpop.xlane.xlu0 %7600 }
0x100e   :  { %v15135_v41 = vmul.f32 0.015625, %v7610_v49  ;;  %v15139_v4 = vmul.f32 0.015625, %v7601_v57 }
0x1010   :  { %v7746_v24 = vmul.f32 %v15135_v41, %v15135_v41  ;;  %v7743_v50 = vmul.f32 %v15139_v4, %v15139_v4 }
0x1011   :  { %v7604_v61 = vpop.xlane.xlu1 %7603  ;;  %v7671_v17 = vpop.xlane.xlu0 %7670 }
0x1012   :  { %v7729_v40 = vmul.f32 0.015625, %v7671_v17  ;;  %v15145_v16 = vmul.f32 0.015625, %v7604_v61 }
0x1014   :  { %v7761_v54 = vsub.f32 %v7729_v40, %v7745_v35  ;;  %v7744_v28 = vmul.f32 %v15145_v16, %v15145_v16 }
0x1015   :  { %v7674_v13 = vpop.xlane.xlu1 %7673  ;;  %v7665_v6 = vpop.xlane.xlu0 %7664 }
0x1016   :  { %v7730_v20 = vmul.f32 0.015625, %v7674_v13  ;;  %v7727_v3 = vmul.f32 0.015625, %v7665_v6  ;;  %v7793_v11 = vadd.f32 1e-05, %v7761_v54 }
0x1018   :  { %v7762_v62 = vsub.f32 %v7730_v20, %v7746_v24  ;;  %v7759_v18 = vsub.f32 %v7727_v3, %v7743_v50  ;;  %11806 = vrsqrt.f32 %v7793_v11 }
0x1019   :  { %v7668_v51 = vpop.xlane.xlu1 %7667  ;;  %v7631_v22 = vpop.xlane.xlu0 %7630 }
0x101a   :  { %v7794_v23 = vadd.f32 1e-05, %v7762_v62  ;;  %v7791_v0 = vadd.f32 1e-05, %v7759_v18  ;;  %v7728_v8 = vmul.f32 0.015625, %v7668_v51  ;;  %v15149_v57 = vmul.f32 0.015625, %v7631_v22 }
0x101c   :  { %11808 = vrsqrt.f32 %v7794_v23  ;;  %v7760_v37 = vsub.f32 %v7728_v8, %v7744_v28  ;;  %v7753_v35 = vmul.f32 %v15149_v57, %v15149_v57  ;;  %v15166_v8 = vld [vmem:[%s15580_s7 + $0x4] ss:$0 sm:$0xff] }
0x101d   :  { %11810 = vrsqrt.f32 %v7791_v0  ;;  %v7634_v26 = vpop.xlane.xlu1 %7633  ;;  %v7625_v19 = vpop.xlane.xlu0 %7624 }
0x101e   :  { %v7792_v49 = vadd.f32 1e-05, %v7760_v37  ;;  %v15153_v40 = vmul.f32 0.015625, %v7634_v26  ;;  %v15155_v54 = vmul.f32 0.015625, %v7625_v19 }
0x1020   :  { %11812 = vrsqrt.f32 %v7792_v49  ;;  %v7754_v3 = vmul.f32 %v15153_v40, %v15153_v40  ;;  %v7751_v11 = vmul.f32 %v15155_v54, %v15155_v54 }
0x1021   :  { %v7628_v61 = vpop.xlane.xlu1 %7627  ;;  %v7695_v17 = vpop.xlane.xlu0 %7694 }
0x1022   :  { %v7737_v24 = vmul.f32 0.015625, %v7695_v17  ;;  %v15157_v6 = vmul.f32 0.015625, %v7628_v61 }
0x1024   :  { %v7769_v13 = vsub.f32 %v7737_v24, %v7753_v35  ;;  %v7752_v37 = vmul.f32 %v15157_v6, %v15157_v6 }
0x1025   :  { %v7698_v50 = vpop.xlane.xlu1 %7697  ;;  %v7689_v20 = vpop.xlane.xlu0 %7688 }
0x1026   :  { %v7738_v62 = vmul.f32 0.015625, %v7698_v50  ;;  %v7735_v18 = vmul.f32 0.015625, %v7689_v20  ;;  %v7801_v51 = vadd.f32 1e-05, %v7769_v13  ;;  %v11807_v22 = vpop.eup %11806  ;;  %v7778_v50 = vsub.f32 %v15007_v15, %v15135_v41 }
0x1027   :  { %v7833_v20 = vmul.f32 %v11807_v22, %v15166_v8  ;;  %v7776_v41 = vsub.f32 %v15010_v45, %v15145_v16 }
0x1028   :  { %v7770_v28 = vsub.f32 %v7738_v62, %v7754_v3  ;;  %v7767_v23 = vsub.f32 %v7735_v18, %v7751_v11  ;;  %11814 = vrsqrt.f32 %v7801_v51  ;;  %v7777_v62 = vsub.f32 %v14999_v39, %v15133_v5 }
0x1029   :  { %v11809_v0 = vpop.eup %11808  ;;  %v7692_v26 = vpop.xlane.xlu1 %7691  ;;  %v7775_v18 = vsub.f32 %v15002_v9, %v15139_v4 }
0x102a   :  { %v7613_v19 = vpop.xlane.xlu0 %7612  ;;  %v11811_v49 = vpop.eup %11810  ;;  %v7834_v61 = vmul.f32 %v11809_v0, %v15166_v8  ;;  %v7802_v17 = vadd.f32 1e-05, %v7770_v28  ;;  %v7799_v35 = vadd.f32 1e-05, %v7767_v23  ;;  %v7736_v24 = vmul.f32 0.015625, %v7692_v26 }
0x102b   :  { %v7831_v13 = vmul.f32 %v11811_v49, %v15166_v8  ;;  %v15179_v0 = vmul.f32 0.015625, %v7613_v19  ;;  %v15191_v19 = vld [vmem:[%s15581_s8 + $0x4] ss:$0 sm:$0xff] }
0x102c   :  { %11816 = vrsqrt.f32 %v7802_v17  ;;  %v7768_v3 = vsub.f32 %v7736_v24, %v7752_v37  ;;  %v7850_v15 = vmul.f32 %v7834_v61, %v7778_v50  ;;  %v7849_v37 = vmul.f32 %v7833_v20, %v7777_v62 }
0x102d   :  { %v11813_v11 = vpop.eup %11812  ;;  %11818 = vrsqrt.f32 %v7799_v35  ;;  %v7616_v28 = vpop.xlane.xlu1 %7615  ;;  %v7847_v22 = vmul.f32 %v7831_v13, %v7775_v18  ;;  %v7747_v61 = vmul.f32 %v15179_v0, %v15179_v0 }
0x102e   :  { %v7619_v23 = vpop.xlane.xlu0 %7618  ;;  %v7800_v51 = vadd.f32 1e-05, %v7768_v3  ;;  %v7832_v26 = vmul.f32 %v11813_v11, %v15166_v8  ;;  %v15184_v49 = vmul.f32 0.015625, %v7616_v28  ;;  %v7874_v45 = vadd.f32 %v15191_v19, %v7850_v15  ;;  %v11690_v15 = vld [vmem:[#allocation2 + $0x2f0] sm:$0xff]  }
0x102f   :  { %v15186_v39 = vmul.f32 0.015625, %v7619_v23  ;;  %v7871_v16 = vadd.f32 %v15191_v19, %v7847_v22  ;;  %v7873_v13 = vadd.f32 %v15191_v19, %v7849_v37 }
0x1030   :  { %11820 = vrsqrt.f32 %v7800_v51  ;;  %v7848_v4 = vmul.f32 %v7832_v26, %v7776_v41  ;;  %v7748_v50 = vmul.f32 %v15184_v49, %v15184_v49 }
0x1031   :  { %v7622_v9 = vpop.xlane.xlu1 %7621  ;;  %v7749_v20 = vmul.f32 %v15186_v39, %v15186_v39  ;;  %v15207_v26 = vpack.c.bf16 %v7874_v45, %v7873_v13  ;;  %v11692_v13 = vld [vmem:[#allocation2 + $0x2e8] sm:$0xff]  }
0x1032   :  { %v7677_v5 = vpop.xlane.xlu0 %7676  ;;  %v7872_v35 = vadd.f32 %v15191_v19, %v7848_v4  ;;  %v15203_v3 = vmul.f32 0.015625, %v7622_v9 }
0x1033   :  { %v7731_v17 = vmul.f32 0.015625, %v7677_v5 }
0x1034   :  { %v15205_v18 = vpack.c.bf16 %v7872_v35, %v7871_v16  ;;  %v7750_v5 = vmul.f32 %v15203_v3, %v15203_v3 }
0x1035   :  { %v7763_v24 = vsub.f32 %v7731_v17, %v7747_v61  ;;  %v7680_v11 = vpop.xlane.xlu1 %7679  ;;  %v11815_v41 = vpop.eup %11814 }
0x1036   :  { %v7683_v62 = vpop.xlane.xlu0 %7682  ;;  %v7732_v23 = vmul.f32 0.015625, %v7680_v11  ;;  %11331 = vmatprep.mubr.msk.bf16.mxu1 %vm783_vm3, %v15205_v18  ;;  %11351 = vmatprep.mubr.msk.bf16.mxu0 %vm783_vm3, %v15205_v18 }
0x1037   :  { %v7795_v28 = vadd.f32 1e-05, %v7763_v24  ;;  %v7733_v51 = vmul.f32 0.015625, %v7683_v62  ;;  %11332 = vmatmul.mubr.msk.bf16.gmra.mxu1 %vm783_vm3, %v15207_v26  ;;  %11352 = vmatmul.mubr.msk.bf16.vlgmr.msra.gmra.mxu0 %vm783_vm3, %v15207_v26 }
0x1038   :  { %v7764_v22 = vsub.f32 %v7732_v23, %v7748_v50  ;;  %11335 = vmatprep.mubr.bf16.mxu1 %v15904_v53  ;;  %11392 = vmatpush3.bf16.msra.mxu0 %v15127_v30  ;;  %v7786_v50 = vsub.f32 %v15039_v27, %v15153_v40  ;;  %v7785_v30 = vsub.f32 %v15030_v60, %v15149_v57 }
0x1039   :  { %11822 = vrsqrt.f32 %v7795_v28  ;;  %v7765_v37 = vsub.f32 %v7733_v51, %v7749_v20  ;;  %v11817_v9 = vpop.eup %11816  ;;  %v7686_v4 = vpop.xlane.xlu1 %7685  ;;  %11393 = vmatprep.subr.bf16.mxu0 %v11690_v15  ;;  %v7841_v20 = vmul.f32 %v11815_v41, %v15166_v8  ;;  %v7783_v23 = vsub.f32 %v15033_v31, %v15155_v54  ;;  %v11694_v41 = vld [vmem:[#allocation2 + $0x2e0] sm:$0xff]  }
0x103a   :  { %v7643_v61 = vpop.xlane.xlu0 %7642  ;;  %v11819_v17 = vpop.eup %11818  ;;  %v7842_v45 = vmul.f32 %v11817_v9, %v15166_v8  ;;  %v7796_v16 = vadd.f32 1e-05, %v7764_v22  ;;  %v7734_v24 = vmul.f32 0.015625, %v7686_v4 }
0x103b   :  { %v7797_v35 = vadd.f32 1e-05, %v7765_v37  ;;  %v7839_v11 = vmul.f32 %v11819_v17, %v15166_v8  ;;  %v7857_v60 = vmul.f32 %v7841_v20, %v7785_v30  ;;  %v15235_v57 = vmul.f32 0.015625, %v7643_v61 }
0x103c   :  { %11824 = vrsqrt.f32 %v7796_v16  ;;  %v7766_v62 = vsub.f32 %v7734_v24, %v7750_v5  ;;  %v7858_v37 = vmul.f32 %v7842_v45, %v7786_v50  ;;  %11394 = vmatpush3.bf16.msra.mxu0 %v11690_v15  ;;  %v7784_v5 = vsub.f32 %v15042_v36, %v15157_v6 }
0x103d   :  { %v11821_v28 = vpop.eup %11820  ;;  %11826 = vrsqrt.f32 %v7797_v35  ;;  %v7646_v51 = vpop.xlane.xlu1 %7645  ;;  %11395 = vmatprep.subr.bf16.mxu0 %v11692_v13  ;;  %v7855_v4 = vmul.f32 %v7839_v11, %v7783_v23  ;;  %v7881_v61 = vadd.f32 %v15191_v19, %v7857_v60  ;;  %v7757_v24 = vmul.f32 %v15235_v57, %v15235_v57 }
0x103e   :  { %v7637_v22 = vpop.xlane.xlu0 %7636  ;;  %v7798_v9 = vadd.f32 1e-05, %v7766_v62  ;;  %v7840_v40 = vmul.f32 %v11821_v28, %v15166_v8  ;;  %v7882_v17 = vadd.f32 %v15191_v19, %v7858_v37  ;;  %v15248_v11 = vmul.f32 0.015625, %v7646_v51 }
0x103f   :  { %v15230_v27 = vmul.f32 0.015625, %v7637_v22  ;;  %11336 = vmatmul.mubr.bf16.gmra.mxu1 %v15904_v53  ;;  %v7879_v36 = vadd.f32 %v15191_v19, %v7855_v4 }
0x1040   :  { %11828 = vrsqrt.f32 %v7798_v9  ;;  %v7856_v15 = vmul.f32 %v7840_v40, %v7784_v5  ;;  %11396 = vmatpush3.bf16.msra.mxu0 %v11692_v13  ;;  %v15254_v23 = vpack.c.bf16 %v7882_v17, %v7881_v61  ;;  %v7779_v5 = vsub.f32 %v15059_v2, %v15179_v0 }
0x1041   :  { %v7640_v31 = vpop.xlane.xlu1 %7639  ;;  %v7755_v45 = vmul.f32 %v15230_v27, %v15230_v27  ;;  %11397 = vmatprep.subr.bf16.mxu0 %v11694_v41 }
0x1042   :  { %v7701_v54 = vpop.xlane.xlu0 %7700  ;;  %v15241_v16 = vmul.f32 0.015625, %v7640_v31  ;;  %v7880_v6 = vadd.f32 %v15191_v19, %v7856_v15  ;;  %v7758_v31 = vmul.f32 %v15248_v11, %v15248_v11 }
0x1043   :  { %v7739_v35 = vmul.f32 0.015625, %v7701_v54 }
0x1044   :  { %v7756_v13 = vmul.f32 %v15241_v16, %v15241_v16  ;;  %v15252_v30 = vpack.c.bf16 %v7880_v6, %v7879_v36  ;;  %11398 = vmatpush3.bf16.msra.mxu0 %v11694_v41  ;;  %v7780_v41 = vsub.f32 %v15069_v59, %v15184_v49  ;;  %v7781_v6 = vsub.f32 %v15066_v32, %v15186_v39 }
0x1045   :  { %v7771_v50 = vsub.f32 %v7739_v35, %v7755_v45  ;;  %v7704_v62 = vpop.xlane.xlu1 %7703 }
0x1046   :  { %v11823_v20 = vpop.eup %11822  ;;  %v7707_v28 = vpop.xlane.xlu0 %7706  ;;  %v7740_v37 = vmul.f32 0.015625, %v7704_v62  ;;  %11339 = vmatprep.mubr.msk.bf16.mxu1 %vm783_vm3, %v15252_v30 }
0x1047   :  { %v7803_v22 = vadd.f32 1e-05, %v7771_v50  ;;  %v7741_v9 = vmul.f32 0.015625, %v7707_v28  ;;  %v7835_v40 = vmul.f32 %v11823_v20, %v15166_v8  ;;  %11340 = vmatmul.mubr.msk.bf16.gmra.mxu1 %vm783_vm3, %v15254_v23 }
0x1048   :  { %v7772_v51 = vsub.f32 %v7740_v37, %v7756_v13  ;;  %11375 = vmatprep.mubr.bf16.mxu1 %v15904_v53  ;;  %v11693_v37 = vld [vmem:[#allocation2 + $0x308] sm:$0xff]  }
0x1049   :  { %11830 = vrsqrt.f32 %v7803_v22  ;;  %v7773_v4 = vsub.f32 %v7741_v9, %v7757_v24  ;;  %v11825_v60 = vpop.eup %11824  ;;  %v7710_v54 = vpop.xlane.xlu1 %7709  ;;  %v7851_v2 = vmul.f32 %v7835_v40, %v7779_v5  ;;  %v7782_v24 = vsub.f32 %v15074_v21, %v15203_v3  ;;  %v11691_v22 = vld [vmem:[#allocation2 + $0x310] sm:$0xff]   ;;  %v11695_v5 = vld [vmem:[#allocation2 + $0x300] sm:$0xff]  }
0x104a   :  { %v11827_v0 = vpop.eup %11826  ;;  %v7804_v15 = vadd.f32 1e-05, %v7772_v51  ;;  %v7742_v45 = vmul.f32 0.015625, %v7710_v54  ;;  %v7836_v35 = vmul.f32 %v11825_v60, %v15166_v8  ;;  %v7788_v60 = vsub.f32 %v15106_v56, %v15241_v16 }
0x104b   :  { %v7805_v17 = vadd.f32 1e-05, %v7773_v4  ;;  %v7837_v36 = vmul.f32 %v11827_v0, %v15166_v8  ;;  %v7875_v50 = vadd.f32 %v15191_v19, %v7851_v2  ;;  %v7789_v2 = vsub.f32 %v15093_v52, %v15235_v57 }
0x104c   :  { %11832 = vrsqrt.f32 %v7804_v15  ;;  %v7774_v59 = vsub.f32 %v7742_v45, %v7758_v31  ;;  %v7852_v49 = vmul.f32 %v7836_v35, %v7780_v41  ;;  %v7790_v0 = vsub.f32 %v15101_v1, %v15248_v11  ;;  %v11701_v45 = vld [vmem:[%s15586_s13 + $0x30] sm:$0xff]   ;;  %v11702_v35 = vld [vmem:[%s15586_s13 + $0x28] sm:$0xff]  }
0x104d   :  { %v11829_v61 = vpop.eup %11828  ;;  %11834 = vrsqrt.f32 %v7805_v17  ;;  %v7853_v28 = vmul.f32 %v7837_v36, %v7781_v6  ;;  %v11703_v36 = vld [vmem:[%s15586_s13 + $0x20] sm:$0xff]   ;;  %v11704_v6 = vld [vmem:[%s15586_s13 + $0x18] sm:$0xff]  }
0x104e   :  { %v7838_v20 = vmul.f32 %v11829_v61, %v15166_v8  ;;  %v7806_v13 = vadd.f32 1e-05, %v7774_v59  ;;  %v7876_v62 = vadd.f32 %v15191_v19, %v7852_v49 }
0x104f   :  { %11376 = vmatmul.mubr.msk.bf16.vlgmr.msra.gmra.mxu1 %vm783_vm3, %v15205_v18  ;;  %v7877_v21 = vadd.f32 %v15191_v19, %v7853_v28 }
0x1050   :  { %11836 = vrsqrt.f32 %v7806_v13  ;;  %v7898_v32 = vpack.c.bf16 %v7876_v62, %v7875_v50  ;;  %v7854_v39 = vmul.f32 %v7838_v20, %v7782_v24  ;;  %11379 = vmatprep.mubr.msk.bf16.mxu1 %vm783_vm3, %v15207_v26  ;;  %11416 = vmatpush3.bf16.msra.mxu1 %v15129_v47  ;;  %v7787_v47 = vsub.f32 %v15099_v44, %v15230_v27 }
0x1051   :  { %11417 = vmatprep.subr.bf16.mxu1 %v11691_v22 }
0x1052   :  { %11355 = vmatprep.mubr.msk.bf16.mxu0 %vm783_vm3, %v7898_v32  ;;  %v7878_v3 = vadd.f32 %v15191_v19, %v7854_v39 }
0x1054   :  { %v7899_v9 = vpack.c.bf16 %v7878_v3, %v7877_v21  ;;  %11418 = vmatpush3.bf16.msra.mxu1 %v11691_v22 }
0x1055   :  { %11419 = vmatprep.subr.bf16.mxu1 %v11693_v37 }
0x1056   :  { %v11831_v40 = vpop.eup %11830  ;;  %11356 = vmatmul.mubr.msk.bf16.gmra.mxu0 %vm783_vm3, %v7899_v9 }
0x1057   :  { %v7843_v18 = vmul.f32 %v11831_v40, %v15166_v8  ;;  %11359 = vmatprep.mubr.msk.bf16.mxu0 %vm783_vm3, %v15252_v30  ;;  %11380 = vmatmul.mubr.msk.bf16.gmra.mxu1 %vm783_vm3, %v7898_v32 }
0x1058   :  { %11383 = vmatprep.mubr.bf16.mxu1 %v15904_v53  ;;  %11420 = vmatpush3.bf16.msra.mxu1 %v11693_v37 }
0x1059   :  { %v11833_v51 = vpop.eup %11832  ;;  %v7859_v31 = vmul.f32 %v7843_v18, %v7787_v47  ;;  %11421 = vmatprep.subr.bf16.mxu1 %v11695_v5 }
0x105a   :  { %v11835_v4 = vpop.eup %11834  ;;  %v7844_v41 = vmul.f32 %v11833_v51, %v15166_v8 }
0x105b   :  { %v7845_v54 = vmul.f32 %v11835_v4, %v15166_v8  ;;  %v7883_v56 = vadd.f32 %v15191_v19, %v7859_v31 }
0x105c   :  { %v7860_v44 = vmul.f32 %v7844_v41, %v7788_v60  ;;  %11422 = vmatpush3.bf16.msra.mxu1 %v11695_v5 }
0x105d   :  { %v11837_v27 = vpop.eup %11836  ;;  %v7861_v17 = vmul.f32 %v7845_v54, %v7789_v2 }
0x105e   :  { %v7846_v15 = vmul.f32 %v11837_v27, %v15166_v8  ;;  %11360 = vmatmul.mubr.msk.bf16.gmra.mxu0 %vm783_vm3, %v15254_v23  ;;  %v7884_v16 = vadd.f32 %v15191_v19, %v7860_v44 }
0x105f   :  { %11384 = vmatmul.mubr.msk.bf16.gmra.mxu1 %vm783_vm3, %v15252_v30  ;;  %v7885_v1 = vadd.f32 %v15191_v19, %v7861_v17  ;;  %v11698_v30 = vld [vmem:[%s15584_s11 + $0x88] sm:$0xff]  }
0x1060   :  { %v7902_v52 = vpack.c.bf16 %v7884_v16, %v7883_v56  ;;  %v7862_v57 = vmul.f32 %v7846_v15, %v7790_v0  ;;  %11387 = vmatprep.mubr.msk.bf16.mxu1 %vm783_vm3, %v15254_v23 }
0x1062   :  { %11363 = vmatprep.mubr.msk.bf16.mxu0 %vm783_vm3, %v7902_v52  ;;  %v7886_v8 = vadd.f32 %v15191_v19, %v7862_v57  ;;  %v11696_v19 = vld [vmem:[%s15584_s11 + $0x98] sm:$0xff]  }
0x1063   :  { %11439 = vmatprep.subr.bf16.mxu0 %v11696_v19 }
0x1064   :  { %v7903_v11 = vpack.c.bf16 %v7886_v8, %v7885_v1 }
0x1065   :  { %v11329_v59 = vpop.f32.mrf.mxu1 }
0x1066   :  { %11364 = vmatmul.mubr.msk.bf16.gmra.mxu0 %vm783_vm3, %v7903_v11 }
0x1067   :  { %11399 = vmatprep.mubr.msk.bf16.mxu0 %vm783_vm3, %v15207_v26  ;;  %11388 = vmatmul.mubr.msk.bf16.gmra.mxu1 %vm783_vm3, %v7902_v52  ;;  %v11697_v26 = vld [vmem:[%s15584_s11 + $0x90] sm:$0xff]   ;;  %v8067_v49 = vpop.f32.mrf.mxu1 }
0x1068   :  { %11423 = vmatprep.mubr.msk.bf16.mxu1 %vm783_vm3, %v7898_v32 }
0x1069   :  { %v11330_v61 = vpop.f32.mrf.mxu1 }
0x106b   :  { %v8070_v24 = vpop.f32.mrf.mxu1 }
0x106e   :  { %11400 = vmatmul.mubr.msk.bf16.vlgmr.msra.gmra.mxu0 %vm783_vm3, %v7898_v32 }
0x106f   :  { %11403 = vmatprep.mubr.msk.bf16.mxu0 %vm783_vm3, %v7899_v9  ;;  %11424 = vmatmul.mubr.msk.bf16.vlgmr.msra.gmra.mxu1 %vm783_vm3, %v7899_v9 }
0x1070   :  { %11427 = vmatprep.mubr.bf16.mxu1 %v15904_v53  ;;  %11440 = vmatpush3.bf16.msra.mxu0 %v11696_v19 }
0x1071   :  { %11441 = vmatprep.subr.bf16.mxu0 %v11697_v26 }
0x1074   :  { %11442 = vmatpush3.bf16.msra.mxu0 %v11697_v26 }
0x1075   :  { %11443 = vmatprep.subr.bf16.mxu0 %v11698_v30 }
0x1076   :  { %11404 = vmatmul.mubr.bf16.gmra.mxu0 %v15904_v53 }
0x1077   :  { %11407 = vmatprep.mubr.msk.bf16.mxu0 %vm783_vm3, %v15254_v23  ;;  %11428 = vmatmul.mubr.bf16.gmra.mxu1 %v15904_v53  ;;  %v11700_v23 = vld [vmem:[%s15586_s13 + $0x38] sm:$0xff]  }
0x1078   :  { %11431 = vmatprep.mubr.msk.bf16.mxu1 %vm783_vm3, %v7902_v52  ;;  %11444 = vmatpush3.bf16.msra.mxu0 %v11698_v30 }
0x1079   :  { %11463 = vmatprep.subr.bf16.mxu1 %v11700_v23 }
0x107a   :  { %11464 = vmatpush3.bf16.msra.mxu1 %v11700_v23 }
0x107b   :  { %11465 = vmatprep.subr.bf16.mxu1 %v11701_v45 }
0x107e   :  { %11408 = vmatmul.mubr.msk.bf16.gmra.mxu0 %vm783_vm3, %v7902_v52  ;;  %11466 = vmatpush3.bf16.msra.mxu1 %v11701_v45 }
0x107f   :  { %11411 = vmatprep.mubr.msk.bf16.mxu0 %vm783_vm3, %v7903_v11  ;;  %11432 = vmatmul.mubr.msk.bf16.gmra.mxu1 %vm783_vm3, %v7903_v11 }
0x1080   :  { %11435 = vmatprep.mubr.bf16.mxu1 %v15904_v53  ;;  %11467 = vmatprep.subr.bf16.mxu1 %v11702_v35 }
0x1082   :  { %11468 = vmatpush3.bf16.msra.mxu1 %v11702_v35 }
0x1083   :  { %11469 = vmatprep.subr.bf16.mxu1 %v11703_v36 }
0x1086   :  { %11412 = vmatmul.mubr.bf16.gmra.mxu0 %v15904_v53  ;;  %11470 = vmatpush3.bf16.msra.mxu1 %v11703_v36 }
0x1087   :  { %11436 = vmatmul.mubr.bf16.gmra.mxu1 %v15904_v53  ;;  %v11699_v53 = vld [vmem:[%s15584_s11 + $0x80] sm:$0xff]   ;;  %11471 = vmatprep.subr.bf16.mxu1 %v11704_v6 }
0x1088   :  { %11445 = vmatprep.subr.bf16.mxu0 %v11699_v53 }
0x1089   :  { %11446 = vmatpush3.bf16.msra.mxu0 %v11699_v53 }
0x108a   :  { %11472 = vmatpush3.bf16.msra.mxu1 %v11704_v6 }
0x10f7   :  { %v11333_v50 = vpop.f32.mrf.mxu1  ;;  %v11353_v21 = vpop.f32.mrf.mxu0 }
0x10f8   :  { %v8221_v35 = vadd.f32 %v11353_v21, %v11329_v59 }
0x10f9   :  { %v8083_v20 = vpop.f32.mrf.mxu1  ;;  %v8212_v9 = vpop.f32.mrf.mxu0 }
0x10fa   :  { %v8213_v12 = vadd.f32 %v8212_v9, %v8067_v49 }
0x10fb   :  { %v15360_v13 = vpop.f32.mrf.mxu1  ;;  %v11354_v5 = vpop.f32.mrf.mxu0 }
0x10fc   :  { %v8224_v42 = vadd.f32 %v11354_v5, %v11330_v61 }
0x10fd   :  { %v15362_v62 = vpop.f32.mrf.mxu1  ;;  %v8215_v4 = vpop.f32.mrf.mxu0 }
0x10fe   :  { %v8216_v14 = vadd.f32 %v8215_v4, %v8070_v24 }
0x10ff   :  { %v15364_v28 = vpop.f32.mrf.mxu1 }
0x1101   :  { %v15366_v22 = vpop.f32.mrf.mxu1 }
0x1103   :  { %v15368_v32 = vpop.f32.mrf.mxu1 }
0x1105   :  { %v15370_v39 = vpop.f32.mrf.mxu1 }
0x1107   :  { %v15372_v3 = vpop.f32.mrf.mxu1 }
0x1109   :  { %v15374_v37 = vpop.f32.mrf.mxu1 }
0x110b   :  { %v15376_v40 = vpop.f32.mrf.mxu1 }
0x110d   :  { %v15378_v18 = vpop.f32.mrf.mxu1 }
0x110f   :  { %v11377_v47 = vpop.f32.mrf.mxu1 }
0x1110   :  { %v8455_v10 = vadd.f32 %v11377_v47, %v8221_v35 }
0x1111   :  { %v8390_v51 = vpop.f32.mrf.mxu1 }
0x1112   :  { %v8453_v29 = vadd.f32 %v8390_v51, %v8213_v12  ;;  %v15411_v12 = vld [vmem:[%s15583_s10 + $0x4] ss:$0 sm:$0xff] }
0x1113   :  { %v11378_v60 = vpop.f32.mrf.mxu1 }
0x1114   :  { %v8456_v43 = vadd.f32 %v11378_v60, %v8224_v42 }
0x1115   :  { %v8393_v41 = vpop.f32.mrf.mxu1 }
0x1116   :  { %v11357_v31 = vpop.f32.mrf.mxu0  ;;  %v8454_v21 = vadd.f32 %v8393_v41, %v8216_v14 }
0x1117   :  { %v11381_v54 = vpop.f32.mrf.mxu1  ;;  %v8237_v58 = vadd.f32 %v11357_v31, %v11333_v50 }
0x1118   :  { %v8228_v2 = vpop.f32.mrf.mxu0 }
0x1119   :  { %v8406_v44 = vpop.f32.mrf.mxu1  ;;  %v8229_v34 = vadd.f32 %v8228_v2, %v8083_v20  ;;  %v8459_v61 = vadd.f32 %v11381_v54, %v8237_v58 }
0x111a   :  { %v11358_v27 = vpop.f32.mrf.mxu0 }
0x111b   :  { %v11382_v0 = vpop.f32.mrf.mxu1  ;;  %v8457_v24 = vadd.f32 %v8406_v44, %v8229_v34 }
0x111c   :  { %v8231_v15 = vpop.f32.mrf.mxu0 }
0x111d   :  { %v8409_v56 = vpop.f32.mrf.mxu1 }
0x111e   :  { %v11361_v16 = vpop.f32.mrf.mxu0 }
0x111f   :  { %v15380_v17 = vpop.f32.mrf.mxu1 }
0x1120   :  { %v8244_v52 = vpop.f32.mrf.mxu0 }
0x1121   :  { %v15382_v57 = vpop.f32.mrf.mxu1 }
0x1122   :  { %v15384_v1 = vpop.f32.mrf.mxu0 }
0x1123   :  { %v15386_v8 = vpop.f32.mrf.mxu1 }
0x1124   :  { %v15388_v11 = vpop.f32.mrf.mxu0 }
0x1125   :  { %v15390_v19 = vpop.f32.mrf.mxu1 }
0x1126   :  { %v15392_v26 = vpop.f32.mrf.mxu0 }
0x1127   :  { %v15394_v30 = vpop.f32.mrf.mxu1 }
0x1128   :  { %v15396_v53 = vpop.f32.mrf.mxu0 }
0x1129   :  { %v15398_v23 = vpop.f32.mrf.mxu1 }
0x112a   :  { %v15400_v45 = vpop.f32.mrf.mxu0 }
0x112b   :  { %v15402_v36 = vpop.f32.mrf.mxu1 }
0x112c   :  { %15937 = vst [vmem:[#allocation12_spill] sm:$0xff] %v15402_v36  ;;  %v15404_v6 = vpop.f32.mrf.mxu0 }
0x112d   :  { %v15406_v25 = vpop.f32.mrf.mxu1 }
0x112e   :  { %v11401_v46 = vpop.f32.mrf.mxu0 }
0x112f   :  { %v8649_v7 = vadd.f32 %v11401_v46, %v8455_v10  ;;  %v11425_v48 = vpop.f32.mrf.mxu1 }
0x1130   :  { %v8584_v38 = vpop.f32.mrf.mxu0 }
0x1131   :  { %v8647_v55 = vadd.f32 %v8584_v38, %v8453_v29  ;;  %v8826_v33 = vpop.f32.mrf.mxu1  ;;  %v8891_v49 = vadd.f32 %v11425_v48, %v8649_v7  ;;  %v8240_v38 = vadd.f32 %v11358_v27, %v15360_v13  ;;  %v8232_v29 = vadd.f32 %v8231_v15, %v15362_v62 }
0x1132   :  { %v11402_v59 = vpop.f32.mrf.mxu0  ;;  %v8253_v62 = vadd.f32 %v11361_v16, %v15364_v28 }
0x1133   :  { %v8889_v63 = vadd.f32 %v8826_v33, %v8647_v55  ;;  %v8650_v36 = vadd.f32 %v11402_v59, %v8456_v43  ;;  %v11426_v9 = vpop.f32.mrf.mxu1  ;;  %v8915_v48 = vadd.f32 %v15411_v12, %v8891_v49  ;;  %v8460_v51 = vadd.f32 %v11382_v0, %v8240_v38 }
0x1134   :  { %v8587_v47 = vpop.f32.mrf.mxu0  ;;  %v8458_v13 = vadd.f32 %v8409_v56, %v8232_v29  ;;  %v8463_v49 = vadd.f32 %v15380_v17, %v8253_v62  ;;  %v8269_v29 = vadd.f32 %v15392_v26, %v15372_v3 }
0x1135   :  { %v8892_v46 = vadd.f32 %v11426_v9, %v8650_v36  ;;  %v8648_v10 = vadd.f32 %v8587_v47, %v8454_v21  ;;  %v8829_v42 = vpop.f32.mrf.mxu1  ;;  %v8913_v33 = vadd.f32 %v15411_v12, %v8889_v63  ;;  %v8245_v63 = vadd.f32 %v8244_v52, %v15366_v22 }
0x1136   :  { %v11405_v14 = vpop.f32.mrf.mxu0  ;;  %v8931_v2 = vmax.f32 %v8915_v48, 0.0  ;;  %v8256_v36 = vadd.f32 %v15384_v1, %v15368_v32  ;;  %v8248_v47 = vadd.f32 %v15388_v11, %v15370_v39  ;;  %v8261_v11 = vadd.f32 %v15396_v53, %v15374_v37 }
0x1137   :  { %v8916_v55 = vadd.f32 %v15411_v12, %v8892_v46  ;;  %v8890_v43 = vadd.f32 %v8829_v42, %v8648_v10  ;;  %v8653_v7 = vadd.f32 %v11405_v14, %v8459_v61  ;;  %v11429_v50 = vpop.f32.mrf.mxu1  ;;  %v8929_v41 = vmax.f32 %v8913_v33, 0.0 }
0x1138   :  { %v8600_v20 = vpop.f32.mrf.mxu0  ;;  %v8461_v22 = vadd.f32 %v15382_v57, %v8245_v63  ;;  %v8464_v17 = vadd.f32 %v15386_v8, %v8256_v36  ;;  %v8467_v37 = vadd.f32 %v15394_v30, %v8269_v29  ;;  %v8465_v53 = vadd.f32 %v15398_v23, %v8261_v11  ;;  %v15938_v63 = vld [vmem:[#allocation12_spill] sm:$0xff]  ;;  %v11705_v29 = vld [vmem:[%s15586_s13 + $0x10] sm:$0xff]  }
0x1139   :  { %v8914_v5 = vadd.f32 %v15411_v12, %v8890_v43  ;;  %v8651_v58 = vadd.f32 %v8600_v20, %v8457_v24  ;;  %v8932_v4 = vmax.f32 %v8916_v55, 0.0  ;;  %v8842_v60 = vpop.f32.mrf.mxu1  ;;  %v8895_v44 = vadd.f32 %v11429_v50, %v8653_v7  ;;  %11473 = vmatprep.subr.bf16.mxu1 %v11705_v29 }
0x113a   :  { %v11406_v34 = vpop.f32.mrf.mxu0  ;;  %v8462_v43 = vadd.f32 %v15390_v19, %v8248_v47  ;;  %v8272_v20 = vadd.f32 %v15400_v45, %v15376_v40  ;;  %v8264_v19 = vadd.f32 %v15404_v6, %v15378_v18  ;;  %11474 = vmatpush3.bf16.msra.mxu1 %v11705_v29 }
0x113b   :  { %v8930_v31 = vmax.f32 %v8914_v5, 0.0  ;;  %v8893_v54 = vadd.f32 %v8842_v60, %v8651_v58  ;;  %v8654_v27 = vadd.f32 %v11406_v34, %v8460_v51  ;;  %v11430_v15 = vpop.f32.mrf.mxu1  ;;  %v8955_v59 = vpack.c.bf16 %v8932_v4, %v8931_v2 }
0x113c   :  { %v8603_v35 = vpop.f32.mrf.mxu0  ;;  %v8919_v32 = vadd.f32 %v15411_v12, %v8895_v44  ;;  %v8466_v2 = vadd.f32 %v15406_v25, %v8264_v19 }
0x113d   :  { %v8954_v0 = vpack.c.bf16 %v8930_v31, %v8929_v41  ;;  %v8652_v56 = vadd.f32 %v8603_v35, %v8458_v13  ;;  %v8896_v28 = vadd.f32 %v11430_v15, %v8654_v27  ;;  %v8845_v16 = vpop.f32.mrf.mxu1  ;;  %v8917_v52 = vadd.f32 %v15411_v12, %v8893_v54 }
0x113e   :  { %v11409_v21 = vpop.f32.mrf.mxu0  ;;  %v8935_v48 = vmax.f32 %v8919_v32, 0.0  ;;  %v8468_v41 = vadd.f32 %v15938_v63, %v8272_v20  ;;  %v15939_v20 = vld [vmem:[#allocation7_spill] sm:$0xff] }
0x113f   :  { %v8894_v9 = vadd.f32 %v8845_v16, %v8652_v56  ;;  %11447 = vmatprep.mubr.msk.bf16.mxu0 %vm783_vm3, %v8954_v0  ;;  %v8920_v1 = vadd.f32 %v15411_v12, %v8896_v28  ;;  %v11433_v46 = vpop.f32.mrf.mxu1  ;;  %v8657_v61 = vadd.f32 %v11409_v21, %v8463_v49  ;;  %v8933_v24 = vmax.f32 %v8917_v52, 0.0 }
0x1140   :  { %v8616_v10 = vpop.f32.mrf.mxu0  ;;  %11448 = vmatmul.mubr.msk.bf16.vlgmr.msra.gmra.mxu0 %vm783_vm3, %v8955_v59 }
0x1141   :  { %v8918_v57 = vadd.f32 %v15411_v12, %v8894_v9  ;;  %v8655_v38 = vadd.f32 %v8616_v10, %v8461_v22  ;;  %v8936_v42 = vmax.f32 %v8920_v1, 0.0  ;;  %v8858_v14 = vpop.f32.mrf.mxu1  ;;  %v8899_v3 = vadd.f32 %v11433_v46, %v8657_v61 }
0x1142   :  { %v11410_v39 = vpop.f32.mrf.mxu0 }
0x1143   :  { %v8934_v33 = vmax.f32 %v8918_v57, 0.0  ;;  %v8658_v55 = vadd.f32 %v11410_v39, %v8464_v17  ;;  %v8897_v8 = vadd.f32 %v8858_v14, %v8655_v38  ;;  %v11434_v7 = vpop.f32.mrf.mxu1  ;;  %v8957_v58 = vpack.c.bf16 %v8936_v42, %v8935_v48  ;;  %v11707_v42 = vld [vmem:[%s15586_s13] sm:$0xff]   ;;  %v11708_v14 = vld [vmem:[%s15588_s15 + $0x8] sm:$0xff]  }
0x1144   :  { %v8619_v50 = vpop.f32.mrf.mxu0  ;;  %v8923_v30 = vadd.f32 %v15411_v12, %v8899_v3  ;;  %v11709_v39 = vld [vmem:[%s15588_s15] sm:$0xff]   ;;  %11495 = vmatprep.subr.bf16.mxu0 %v11708_v14 }
0x1145   :  { %v8956_v5 = vpack.c.bf16 %v8934_v33, %v8933_v24  ;;  %v8900_v26 = vadd.f32 %v11434_v7, %v8658_v55  ;;  %v8656_v51 = vadd.f32 %v8619_v50, %v8462_v43  ;;  %v8861_v13 = vpop.f32.mrf.mxu1  ;;  %v8921_v40 = vadd.f32 %v15411_v12, %v8897_v8  ;;  %11496 = vmatpush3.bf16.msra.mxu0 %v11708_v14  ;;  %v10027_v33 = vld [vmem:[%s15585_s12 + $0x4] ss:$0 sm:$0xff] }
0x1146   :  { %v11413_v62 = vpop.f32.mrf.mxu0  ;;  %v8939_v59 = vmax.f32 %v8923_v30, 0.0  ;;  %11497 = vmatprep.subr.bf16.mxu0 %v11709_v39  ;;  %v15943_v30 = vld [vmem:[#allocation11_spill] sm:$0xff] }
0x1147   :  { %v8924_v4 = vadd.f32 %v15411_v12, %v8900_v26  ;;  %11451 = vmatprep.mubr.msk.bf16.mxu0 %vm783_vm3, %v8956_v5  ;;  %v8898_v45 = vadd.f32 %v8861_v13, %v8656_v51  ;;  %v11437_v60 = vpop.f32.mrf.mxu1  ;;  %v8661_v31 = vadd.f32 %v11413_v62, %v8467_v37  ;;  %v8937_v35 = vmax.f32 %v8921_v40, 0.0  ;;  %v15940_v26 = vld [vmem:[#allocation8_spill] sm:$0xff]  ;;  %v15941_v51 = vld [vmem:[#allocation9_spill] sm:$0xff]  ;;  %v15942_v62 = vld [vmem:[#allocation10_spill] sm:$0xff] }
0x1148   :  { %v8632_v34 = vpop.f32.mrf.mxu0  ;;  %11452 = vmatmul.mubr.msk.bf16.gmra.mxu0 %vm783_vm3, %v8957_v58 }
0x1149   :  { %v8659_v23 = vadd.f32 %v8632_v34, %v8465_v53  ;;  %v8922_v54 = vadd.f32 %v15411_v12, %v8898_v45  ;;  %v8874_v18 = vpop.f32.mrf.mxu1  ;;  %v8940_v44 = vmax.f32 %v8924_v4, 0.0  ;;  %v8903_v28 = vadd.f32 %v11437_v60, %v8661_v31  ;;  %11498 = vmatpush3.bf16.msra.mxu0 %v11709_v39  ;;  %v15951_v39 = vld [vmem:[#allocation24_spill] sm:$0xff] }
0x114a   :  { %v11414_v6 = vpop.f32.mrf.mxu0 }
0x114b   :  { %v8901_v27 = vadd.f32 %v8874_v18, %v8659_v23  ;;  %v8662_v15 = vadd.f32 %v11414_v6, %v8468_v41  ;;  %v8938_v36 = vmax.f32 %v8922_v54, 0.0  ;;  %v11438_v0 = vpop.f32.mrf.mxu1  ;;  %v8959_v52 = vpack.c.bf16 %v8940_v44, %v8939_v59  ;;  %v15944_v23 = vld [vmem:[#allocation5_spill] sm:$0xff]  ;;  %v15945_v18 = vld [vmem:[#allocation26_spill] sm:$0xff]  ;;  %v15946_v44 = vld [vmem:[#allocation28_spill] sm:$0xff] }
0x114c   :  { %v8635_v56 = vpop.f32.mrf.mxu0  ;;  %v8927_v25 = vadd.f32 %v15411_v12, %v8903_v28 }
0x114d   :  { %v8904_v16 = vadd.f32 %v11438_v0, %v8662_v15  ;;  %v8660_v21 = vadd.f32 %v8635_v56, %v8466_v2  ;;  %v8958_v49 = vpack.c.bf16 %v8938_v36, %v8937_v35  ;;  %v8877_v22 = vpop.f32.mrf.mxu1  ;;  %v8925_v9 = vadd.f32 %v15411_v12, %v8901_v27 }
0x114e   :  { %v8943_v57 = vmax.f32 %v8927_v25, 0.0 }
0x114f   :  { %v8928_v47 = vadd.f32 %v15411_v12, %v8904_v16  ;;  %v8902_v32 = vadd.f32 %v8877_v22, %v8660_v21  ;;  %11455 = vmatprep.mubr.msk.bf16.mxu0 %vm783_vm3, %v8958_v49  ;;  %v8941_v46 = vmax.f32 %v8925_v9, 0.0  ;;  %v15947_v49 = vld [vmem:[#allocation29_spill] sm:$0xff]  ;;  %v15948_v9 = vld [vmem:[#allocation6_spill] sm:$0xff] }
0x1150   :  { %11456 = vmatmul.mubr.msk.bf16.gmra.mxu0 %vm783_vm3, %v8959_v52 }
0x1151   :  { %v8926_v1 = vadd.f32 %v15411_v12, %v8902_v32  ;;  %v8944_v10 = vmax.f32 %v8928_v47, 0.0  ;;  %v11706_v12 = vld [vmem:[%s15586_s13 + $0x8] sm:$0xff]  }
0x1152   :  { %11475 = vmatprep.subr.bf16.mxu1 %v11706_v12  ;;  %v15949_v32 = vld [vmem:[#allocation22_spill] sm:$0xff] }
0x1153   :  { %v8942_v17 = vmax.f32 %v8926_v1, 0.0  ;;  %v8961_v38 = vpack.c.bf16 %v8944_v10, %v8943_v57  ;;  %11476 = vmatpush3.bf16.msra.mxu1 %v11706_v12  ;;  %v15950_v1 = vld [vmem:[#allocation23_spill] sm:$0xff] }
0x1154   :  { %11477 = vmatprep.subr.bf16.mxu1 %v11707_v42 }
0x1155   :  { %v8960_v61 = vpack.c.bf16 %v8942_v17, %v8941_v46 }
0x1157   :  { %11459 = vmatprep.mubr.msk.bf16.mxu0 %vm783_vm3, %v8960_v61  ;;  %11478 = vmatpush3.bf16.msra.mxu1 %v11707_v42 }
0x1158   :  { %11460 = vmatmul.mubr.msk.bf16.gmra.mxu0 %vm783_vm3, %v8961_v38 }
0x1200   :  { %v11449_v11 = vpop.f32.mrf.mxu0 }
0x1201   :  { %v9061_v8 = vadd.f32 %v11449_v11, %v10027_v33 }
0x1202   :  { %v9052_v24 = vpop.f32.mrf.mxu0 }
0x1203   :  { %v9053_v43 = vadd.f32 %v10027_v33, %v9052_v24  ;;  %v9117_v37 = vadd.f32 %v9061_v8, %v15942_v62  ;;  %v15952_v24 = vld [vmem:[#allocation25_spill] sm:$0xff]  ;;  %v15954_v8 = vld [vmem:[#allocation16_spill] sm:$0xff] }
0x1204   :  { %v11450_v55 = vpop.f32.mrf.mxu0 }
0x1205   :  { %v9064_v48 = vadd.f32 %v11450_v55, %v10027_v33  ;;  %v9115_v58 = vadd.f32 %v9053_v43, %v15940_v26  ;;  %v15953_v43 = vld [vmem:[#allocation13_spill] sm:$0xff] }
0x1206   :  { %v9055_v7 = vpop.f32.mrf.mxu0  ;;  %v10040_v26 = vld [vmem:[%s15587_s14] ss:$0 sm:$0xff] }
0x1207   :  { %v9056_v50 = vadd.f32 %v10027_v33, %v9055_v7  ;;  %v9118_v5 = vadd.f32 %v9064_v48, %v15939_v20 }
0x1208   :  { %v11453_v3 = vpop.f32.mrf.mxu0 }
0x1209   :  { %v9116_v13 = vadd.f32 %v9056_v50, %v15941_v51  ;;  %v9148_v4 = vpack.c.bf16 %v9118_v5, %v9117_v37  ;;  %v9077_v34 = vadd.f32 %v11453_v3, %v10027_v33 }
0x120a   :  { %v9068_v53 = vpop.f32.mrf.mxu0 }
0x120b   :  { %v9147_v19 = vpack.c.bf16 %v9116_v13, %v9115_v58  ;;  %v9069_v45 = vadd.f32 %v10027_v33, %v9068_v53  ;;  %v9121_v27 = vadd.f32 %v9077_v34, %v15946_v44 }
0x120c   :  { %v11454_v40 = vpop.f32.mrf.mxu0 }
0x120d   :  { %v9080_v60 = vadd.f32 %v11454_v40, %v10027_v33  ;;  %11479 = vmatprep.mubr.bf16.mxu1 %v9147_v19  ;;  %v9119_v54 = vadd.f32 %v9069_v45, %v15944_v23 }
0x120e   :  { %v9071_v63 = vpop.f32.mrf.mxu0  ;;  %11480 = vmatmul.mubr.bf16.vlgmr.msra.gmra.mxu1 %v9148_v4 }
0x120f   :  { %v9072_v41 = vadd.f32 %v10027_v33, %v9071_v63  ;;  %v9122_v31 = vadd.f32 %v9080_v60, %v15943_v30 }
0x1210   :  { %v11457_v2 = vpop.f32.mrf.mxu0 }
0x1211   :  { %v9120_v6 = vadd.f32 %v9072_v41, %v15945_v18  ;;  %v9150_v36 = vpack.c.bf16 %v9122_v31, %v9121_v27  ;;  %v9093_v28 = vadd.f32 %v11457_v2, %v10027_v33 }
0x1212   :  { %v9084_v15 = vpop.f32.mrf.mxu0 }
0x1213   :  { %v9149_v35 = vpack.c.bf16 %v9120_v6, %v9119_v54  ;;  %v9085_v56 = vadd.f32 %v10027_v33, %v9084_v15  ;;  %v9125_v46 = vadd.f32 %v9093_v28, %v15950_v1 }
0x1214   :  { %v11458_v0 = vpop.f32.mrf.mxu0 }
0x1215   :  { %11483 = vmatprep.mubr.bf16.mxu1 %v9149_v35  ;;  %v9096_v59 = vadd.f32 %v11458_v0, %v10027_v33  ;;  %v9123_v47 = vadd.f32 %v9085_v56, %v15948_v9 }
0x1216   :  { %11484 = vmatmul.mubr.bf16.gmra.mxu1 %v9150_v36  ;;  %v9087_v16 = vpop.f32.mrf.mxu0 }
0x1217   :  { %v9088_v21 = vadd.f32 %v10027_v33, %v9087_v16  ;;  %v9126_v22 = vadd.f32 %v9096_v59, %v15947_v49 }
0x1218   :  { %v11461_v52 = vpop.f32.mrf.mxu0 }
0x1219   :  { %v9124_v25 = vadd.f32 %v9088_v21, %v15949_v32  ;;  %v9152_v57 = vpack.c.bf16 %v9126_v22, %v9125_v46  ;;  %v9109_v12 = vadd.f32 %v11461_v52, %v10027_v33 }
0x121a   :  { %v9100_v10 = vpop.f32.mrf.mxu0 }
0x121b   :  { %v9151_v17 = vpack.c.bf16 %v9124_v25, %v9123_v47  ;;  %v9101_v38 = vadd.f32 %v10027_v33, %v9100_v10  ;;  %v9129_v7 = vadd.f32 %v9109_v12, %v15954_v8 }
0x121c   :  { %v11462_v61 = vpop.f32.mrf.mxu0 }
0x121d   :  { %v9112_v29 = vadd.f32 %v11462_v61, %v10027_v33  ;;  %11487 = vmatprep.mubr.bf16.mxu1 %v9151_v17  ;;  %v9127_v55 = vadd.f32 %v9101_v38, %v15952_v24 }
0x121e   :  { %v9103_v42 = vpop.f32.mrf.mxu0  ;;  %11488 = vmatmul.mubr.bf16.gmra.mxu1 %v9152_v57 }
0x121f   :  { %v9104_v14 = vadd.f32 %v10027_v33, %v9103_v42  ;;  %v9130_v11 = vadd.f32 %v9112_v29, %v15951_v39 }
0x1221   :  { %v9128_v48 = vadd.f32 %v9104_v14, %v15953_v43  ;;  %v9154_v20 = vpack.c.bf16 %v9130_v11, %v9129_v7 }
0x1223   :  { %v9153_v50 = vpack.c.bf16 %v9128_v48, %v9127_v55  ;;  %v10049_v55 = vld [vmem:[%s15589_s16] ss:$0 sm:$0xff] }
0x1225   :  { %11491 = vmatprep.mubr.bf16.mxu1 %v9153_v50 }
0x1226   :  { %11492 = vmatmul.mubr.bf16.gmra.mxu1 %v9154_v20 }
0x12ce   :  { %v11481_v5 = vpop.f32.mrf.mxu1 }
0x12cf   :  { %v9253_v13 = vadd.f32 %v11481_v5, %v10040_v26 }
0x12d0   :  { %v9244_v3 = vpop.f32.mrf.mxu1 }
0x12d1   :  { %v9245_v33 = vadd.f32 %v10040_v26, %v9244_v3  ;;  %v9309_v45 = vmax.f32 %v9253_v13, 0.0 }
0x12d2   :  { %v11482_v58 = vpop.f32.mrf.mxu1 }
0x12d3   :  { %v9256_v51 = vadd.f32 %v11482_v58, %v10040_v26  ;;  %v9307_v4 = vmax.f32 %v9245_v33, 0.0 }
0x12d4   :  { %v9247_v62 = vpop.f32.mrf.mxu1 }
0x12d5   :  { %v9248_v37 = vadd.f32 %v10040_v26, %v9247_v62  ;;  %v9310_v53 = vmax.f32 %v9256_v51, 0.0 }
0x12d6   :  { %v11485_v19 = vpop.f32.mrf.mxu1 }
0x12d7   :  { %v9308_v40 = vmax.f32 %v9248_v37, 0.0  ;;  %v9328_v63 = vpack.c.bf16 %v9310_v53, %v9309_v45  ;;  %v9269_v23 = vadd.f32 %v11485_v19, %v10040_v26 }
0x12d8   :  { %v9260_v60 = vpop.f32.mrf.mxu1 }
0x12d9   :  { %v9327_v34 = vpack.c.bf16 %v9308_v40, %v9307_v4  ;;  %v9261_v30 = vadd.f32 %v10040_v26, %v9260_v60  ;;  %v9313_v15 = vmax.f32 %v9269_v23, 0.0 }
0x12da   :  { %v11486_v41 = vpop.f32.mrf.mxu1 }
0x12db   :  { %v9272_v31 = vadd.f32 %v11486_v41, %v10040_v26  ;;  %11499 = vmatprep.mubr.msk.bf16.mxu0 %vm282_vm2, %v9327_v34  ;;  %v9311_v2 = vmax.f32 %v9261_v30, 0.0 }
0x12dc   :  { %v9263_v54 = vpop.f32.mrf.mxu1  ;;  %11500 = vmatmul.mubr.msk.bf16.vlgmr.msra.gmra.mxu0 %vm282_vm2, %v9328_v63 }
0x12dd   :  { %v9264_v18 = vadd.f32 %v10040_v26, %v9263_v54  ;;  %v9314_v6 = vmax.f32 %v9272_v31, 0.0 }
0x12de   :  { %v11489_v27 = vpop.f32.mrf.mxu1 }
0x12df   :  { %v9312_v44 = vmax.f32 %v9264_v18, 0.0  ;;  %v9330_v0 = vpack.c.bf16 %v9314_v6, %v9313_v15  ;;  %v9285_v16 = vadd.f32 %v11489_v27, %v10040_v26 }
0x12e0   :  { %v9276_v36 = vpop.f32.mrf.mxu1 }
0x12e1   :  { %v9329_v35 = vpack.c.bf16 %v9312_v44, %v9311_v2  ;;  %v9277_v59 = vadd.f32 %v10040_v26, %v9276_v36  ;;  %v9317_v32 = vmax.f32 %v9285_v16, 0.0 }
0x12e2   :  { %v11490_v56 = vpop.f32.mrf.mxu1 }
0x12e3   :  { %11503 = vmatprep.mubr.msk.bf16.mxu0 %vm282_vm2, %v9329_v35  ;;  %v9288_v28 = vadd.f32 %v11490_v56, %v10040_v26  ;;  %v9315_v9 = vmax.f32 %v9277_v59, 0.0 }
0x12e4   :  { %11504 = vmatmul.mubr.msk.bf16.gmra.mxu0 %vm282_vm2, %v9330_v0  ;;  %v9279_v21 = vpop.f32.mrf.mxu1 }
0x12e5   :  { %v9280_v49 = vadd.f32 %v10040_v26, %v9279_v21  ;;  %v9318_v22 = vmax.f32 %v9288_v28, 0.0 }
0x12e6   :  { %v11493_v52 = vpop.f32.mrf.mxu1 }
0x12e7   :  { %v9316_v47 = vmax.f32 %v9280_v49, 0.0  ;;  %v9332_v46 = vpack.c.bf16 %v9318_v22, %v9317_v32  ;;  %v9301_v61 = vadd.f32 %v11493_v52, %v10040_v26 }
0x12e8   :  { %v9292_v25 = vpop.f32.mrf.mxu1 }
0x12e9   :  { %v9331_v1 = vpack.c.bf16 %v9316_v47, %v9315_v9  ;;  %v9293_v17 = vadd.f32 %v10040_v26, %v9292_v25  ;;  %v9321_v39 = vmax.f32 %v9301_v61, 0.0 }
0x12ea   :  { %v11494_v10 = vpop.f32.mrf.mxu1 }
0x12eb   :  { %v9304_v57 = vadd.f32 %v11494_v10, %v10040_v26  ;;  %11507 = vmatprep.mubr.msk.bf16.mxu0 %vm282_vm2, %v9331_v1  ;;  %v9319_v42 = vmax.f32 %v9293_v17, 0.0 }
0x12ec   :  { %v9295_v38 = vpop.f32.mrf.mxu1  ;;  %11508 = vmatmul.mubr.msk.bf16.gmra.mxu0 %vm282_vm2, %v9332_v46 }
0x12ed   :  { %v9296_v29 = vadd.f32 %v10040_v26, %v9295_v38  ;;  %v9322_v12 = vmax.f32 %v9304_v57, 0.0 }
0x12ef   :  { %v9320_v14 = vmax.f32 %v9296_v29, 0.0  ;;  %v9334_v24 = vpack.c.bf16 %v9322_v12, %v9321_v39 }
0x12f1   :  { %v9333_v11 = vpack.c.bf16 %v9320_v14, %v9319_v42 }
0x12f3   :  { %11511 = vmatprep.mubr.msk.bf16.mxu0 %vm282_vm2, %v9333_v11 }
0x12f4   :  { %11512 = vmatmul.mubr.msk.bf16.gmra.mxu0 %vm282_vm2, %v9334_v24 }
0x139c   :  { %v11501_v43 = vpop.f32.mrf.mxu0 }
0x139d   :  { %v9421_v48 = vadd.f32 %v11501_v43, %v10049_v55 }
0x139e   :  { %v9412_v8 = vpop.f32.mrf.mxu0 }
0x139f   :  { %9477 = vst.msk [vmem:[%s15590_s17 + $0x10] sm:$0xff] %vm109_vm1, %v9421_v48  ;;  %v9413_v7 = vadd.f32 %v10049_v55, %v9412_v8 }
0x13a0   :  { %v11502_v50 = vpop.f32.mrf.mxu0 }
0x13a1   :  { %9475 = vst.msk [vmem:[%s15590_s17] sm:$0xff] %vm109_vm1, %v9413_v7  ;;  %v9424_v20 = vadd.f32 %v11502_v50, %v10049_v55 }
0x13a2   :  { %v9415_v5 = vpop.f32.mrf.mxu0 }
0x13a3   :  { %9478 = vst.msk [vmem:[%s15590_s17 + $0x18] sm:$0xff] %vm109_vm1, %v9424_v20  ;;  %v9416_v3 = vadd.f32 %v10049_v55, %v9415_v5 }
0x13a4   :  { %v11505_v26 = vpop.f32.mrf.mxu0 }
0x13a5   :  { %9476 = vst.msk [vmem:[%s15590_s17 + $0x8] sm:$0xff] %vm109_vm1, %v9416_v3  ;;  %v9437_v58 = vadd.f32 %v11505_v26, %v10049_v55 }
0x13a6   :  { %v9428_v33 = vpop.f32.mrf.mxu0 }
0x13a7   :  { %9481 = vst.msk [vmem:[%s15590_s17 + $0x30] sm:$0xff] %vm109_vm1, %v9437_v58  ;;  %v9429_v51 = vadd.f32 %v10049_v55, %v9428_v33 }
0x13a8   :  { %v11506_v13 = vpop.f32.mrf.mxu0 }
0x13a9   :  { %9479 = vst.msk [vmem:[%s15590_s17 + $0x20] sm:$0xff] %vm109_vm1, %v9429_v51  ;;  %v9440_v62 = vadd.f32 %v11506_v13, %v10049_v55 }
0x13aa   :  { %v9431_v37 = vpop.f32.mrf.mxu0 }
0x13ab   :  { %9482 = vst.msk [vmem:[%s15590_s17 + $0x38] sm:$0xff] %vm109_vm1, %v9440_v62  ;;  %v9432_v53 = vadd.f32 %v10049_v55, %v9431_v37 }
0x13ac   :  { %v11509_v19 = vpop.f32.mrf.mxu0 }
0x13ad   :  { %9480 = vst.msk [vmem:[%s15590_s17 + $0x28] sm:$0xff] %vm109_vm1, %v9432_v53  ;;  %v9453_v4 = vadd.f32 %v11509_v19, %v10049_v55 }
0x13ae   :  { %v9444_v40 = vpop.f32.mrf.mxu0 }
0x13af   :  { %9485 = vst.msk [vmem:[%s15590_s17 + $0x50] sm:$0xff] %vm109_vm1, %v9453_v4  ;;  %v9445_v45 = vadd.f32 %v10049_v55, %v9444_v40 }
0x13b0   :  { %v11510_v60 = vpop.f32.mrf.mxu0 }
0x13b1   :  { %9483 = vst.msk [vmem:[%s15590_s17 + $0x40] sm:$0xff] %vm109_vm1, %v9445_v45  ;;  %v9456_v34 = vadd.f32 %v11510_v60, %v10049_v55 }
0x13b2   :  { %v9447_v63 = vpop.f32.mrf.mxu0 }
0x13b3   :  { %9486 = vst.msk [vmem:[%s15590_s17 + $0x58] sm:$0xff] %vm109_vm1, %v9456_v34  ;;  %v9448_v41 = vadd.f32 %v10049_v55, %v9447_v63 }
0x13b4   :  { %v11513_v30 = vpop.f32.mrf.mxu0 }
0x13b5   :  { %9484 = vst.msk [vmem:[%s15590_s17 + $0x48] sm:$0xff] %vm109_vm1, %v9448_v41  ;;  %v9469_v31 = vadd.f32 %v11513_v30, %v10049_v55 }
0x13b6   :  { %v9460_v23 = vpop.f32.mrf.mxu0 }
0x13b7   :  { %9489 = vst.msk [vmem:[%s15590_s17 + $0x70] sm:$0xff] %vm109_vm1, %v9469_v31  ;;  %v9461_v54 = vadd.f32 %v10049_v55, %v9460_v23 }
0x13b8   :  { %v11514_v18 = vpop.f32.mrf.mxu0 }
0x13b9   :  { %9487 = vst.msk [vmem:[%s15590_s17 + $0x60] sm:$0xff] %vm109_vm1, %v9461_v54  ;;  %v9472_v6 = vadd.f32 %v11514_v18, %v10049_v55 }
0x13ba   :  { %v9463_v2 = vpop.f32.mrf.mxu0 }
0x13bb   :  { %9490 = vst.msk [vmem:[%s15590_s17 + $0x78] sm:$0xff] %vm109_vm1, %v9472_v6  ;;  %v9464_v44 = vadd.f32 %v10049_v55, %v9463_v2 }
0x13bd   :  { %9488 = vst.msk [vmem:[%s15590_s17 + $0x68] sm:$0xff] %vm109_vm1, %v9464_v44 }
0x13be   :  { %9495 = vsyncpa [#allocation3], 1 }

</bundles_post_ra>
